<compile_context>
chip_gen: v6e
topology: v6e:2x2x1
jax: 0.10.0
libtpu: 0.0.40
codegen_flags: <defaults>
</compile_context>

<pallas_src>
import numpy as np

import jax
import jax.numpy as jnp
from jax.experimental import pallas as pl
from jax.experimental.pallas import tpu as pltpu

_EPS = 1e-5

# --------------------------------------------------------------------------
# geometry
# --------------------------------------------------------------------------
_N = 2
_H1, _W1, _HP1, _WP1 = 16, 16, 18, 18     # stage-1 image / padded frame
_H2, _W2, _HP2, _WP2 = 8, 8, 10, 10       # stage-2
_H3, _W3, _HP3, _WP3 = 4, 4, 6, 6         # stage-3
_R1 = _N * _HP1            # 36  stage-1 rows (lane-dense layout, lanes = Wp)
_R2 = _N * _HP2 * _WP2     # 200 stage-2 flattened padded-frame rows
_R3 = _N * _HP3 * _WP3     # 72  stage-3 flattened padded-frame rows

# Scratch-slab margins (16 rows each side) must cover conv shifts (wp+1) and
# the maxpool over-read (wp+1).
assert 16 >= _WP2 + 1 and 16 >= _WP3 + 1

# --------------------------------------------------------------------------
# packed weight/geometry slab layout: (name, rows, cols<=128), row offsets
# aligned to 8 sublanes.  Everything is read with static slices in-kernel.
# --------------------------------------------------------------------------
_W_LAYOUT = (
    ("k2a", 288, 32), ("k2b", 288, 32),          # stage-2 conv3x3 (im2col form)
    ("k3a", 576, 64), ("k3b", 576, 64),          # stage-3 conv3x3 (im2col form)
    ("wc2", 32, 64), ("wc3", 64, 128),           # 1x1 convs 32->64, 64->128
    ("a1", _R2, _R1),                            # stage-1 pool row selection
    ("s23a", _R3, 128), ("s23b", _R3, _R2 - 128),  # pool2 -> frame3 selection
    ("pavg", _N, _R3),                           # pool3 rows -> adaptive avg
    ("mask1", _R1, _WP1), ("mask2", _R2, 32), ("mask3", _R3, 64),
    ("bselA", _WP1, _W2), ("bselB", _WP1, _W2),  # stage-1 pool column selects
    ("msel", _R2, _W2),                          # per-row column pick
    ("w1a", 54, _WP1), ("w1b", 54, _WP1),        # stage-1 banded conv weights
    ("p1", 1, 6),                                # [b1,g1,bt1,b2,g2,bt2] (C=1)
    ("wc1", 1, 32), ("bc1", 1, 32),              # 1x1 conv 1->32
    ("p2", 6, 32), ("bc2", 1, 64),
    ("p3", 6, 64), ("bc3", 1, 128),
)


def _round8(x):
    return -(-x // 8) * 8


def _build_offsets():
    off, r = {}, 0
    for name, rows, _ in _W_LAYOUT:
        off[name] = r
        r += _round8(rows)
    return off, r


_W_OFF, _W_ROWS = _build_offsets()
_W_SHAPES = {name: (rows, cols) for name, rows, cols in _W_LAYOUT}


def _w(ref, name):
    """Static slice of the packed slab for entry `name`."""
    rows, cols = _W_SHAPES[name]
    o = _W_OFF[name]
    return ref[o:o + rows, 0:cols]


# --------------------------------------------------------------------------
# the fused kernel (whole forward pass)
# --------------------------------------------------------------------------

def _mean_all(v, count):
    """Mean over all elements of a 2-D value, kept as a (1,1) array."""
    return jnp.sum(jnp.sum(v, axis=1, keepdims=True), axis=0, keepdims=True) / count


def resnet_kernel(xin_ref, w_ref, fc_ref, out_ref, sc1_ref, sa_ref, sb_ref):
    f32 = jnp.float32

    # Zero only the rows used as conv zero-padding / pool over-read margins.
    sc1_ref[...] = jnp.zeros(sc1_ref.shape, f32)            # tiny (48, 18)
    sa_ref[0:16, :] = jnp.zeros((16, 64), f32)
    sa_ref[216:232, :] = jnp.zeros((16, 64), f32)
    sb_ref[0:16, :] = jnp.zeros((16, 128), f32)
    sb_ref[88:104, :] = jnp.zeros((16, 128), f32)

    # ---------------- stage 1: ResBlock(C=1), lane-dense (36,18) layout ----
    v0 = xin_ref[...]                        # zero-padded input frame
    m1 = _w(w_ref, "mask1")
    p1 = _w(w_ref, "p1")
    b1, g1, bt1 = p1[:, 0:1], p1[:, 1:2], p1[:, 2:3]
    b2, g2, bt2 = p1[:, 3:4], p1[:, 4:5], p1[:, 5:6]
    w1a = _w(w_ref, "w1a")
    w1b = _w(w_ref, "w1b")

    def conv1ch(field, band):
        # One (36,54)@(54,18) matmul; row shifts via zero-margined scratch.
        sc1_ref[8:44, 0:18] = field
        m = jnp.concatenate(
            [sc1_ref[7:43, 0:18], field, sc1_ref[9:45, 0:18]], axis=1)
        return jnp.dot(m, band, preferred_element_type=f32)

    t1 = jnp.maximum(conv1ch(v0, w1a) + b1, 0.0) * m1
    mu1 = _mean_all(t1, 512.0)
    var1 = _mean_all(t1 * t1, 512.0) - mu1 * mu1
    bn1 = ((t1 - mu1) * jax.lax.rsqrt(var1 + _EPS) * g1 + bt1) * m1

    t2 = jnp.maximum(conv1ch(bn1, w1b) + b2 + v0, 0.0) * m1
    mu2 = _mean_all(t2, 512.0)
    var2 = _mean_all(t2 * t2, 512.0) - mu2 * mu2
    o1 = (t2 - mu2) * jax.lax.rsqrt(var2 + _EPS) * g2 + bt2   # borders: junk

    # ---- conv1x1(1->32) + maxpool2x2 via per-window max/min of the field --
    sc1_ref[8:44, 0:18] = o1
    o1_dn = sc1_ref[9:45, 0:18]                               # row + 1
    rmax = jnp.maximum(o1, o1_dn)
    rmin = jnp.minimum(o1, o1_dn)
    a1 = _w(w_ref, "a1")
    bA = _w(w_ref, "bselA")
    bB = _w(w_ref, "bselB")
    msel = _w(w_ref, "msel")
    gmax = jnp.dot(a1, rmax, preferred_element_type=f32)      # (200, 18)
    gmin = jnp.dot(a1, rmin, preferred_element_type=f32)
    pmax = jnp.maximum(jnp.dot(gmax, bA, preferred_element_type=f32),
                       jnp.dot(gmax, bB, preferred_element_type=f32))
    pmin = jnp.minimum(jnp.dot(gmin, bA, preferred_element_type=f32),
                       jnp.dot(gmin, bB, preferred_element_type=f32))
    vmax = jnp.sum(pmax * msel, axis=1, keepdims=True)        # (200, 1)
    vmin = jnp.sum(pmin * msel, axis=1, keepdims=True)

    wc1 = _w(w_ref, "wc1")
    bc1 = _w(w_ref, "bc1")
    mask2 = _w(w_ref, "mask2")                                # (200, 32)
    # max_p(w*v_p + b) == max(w*max_p v, w*min_p v) + b per output channel
    f2 = (jnp.maximum(vmax * wc1, vmin * wc1) + bc1) * mask2

    # ---------------- stages 2/3: flat padded-frame ResBlocks --------------
    def conv_flat(slab_ref, p, rows, c, wp, kbig):
        # im2col: 9 statically shifted slices -> (rows, 9c), one MXU matmul.
        slab_ref[16:16 + rows, 0:c] = p
        cols = []
        for dy in (-1, 0, 1):
            for dx in (-1, 0, 1):
                s = dy * wp + dx
                cols.append(p if s == 0 else slab_ref[16 + s:16 + s + rows, 0:c])
        m = jnp.concatenate(cols, axis=1)
        return jnp.dot(m, kbig, preferred_element_type=f32)

    def res_block(slab_ref, p, rows, c, wp, count, mask, ka, kb, prm):
        rb1, rg1, rbt1 = prm[0:1, :], prm[1:2, :], prm[2:3, :]
        rb2, rg2, rbt2 = prm[3:4, :], prm[4:5, :], prm[5:6, :]
        t = jnp.maximum(conv_flat(slab_ref, p, rows, c, wp, ka) + rb1,
                        0.0) * mask
        mean = jnp.sum(t, axis=0, keepdims=True) / count
        var = jnp.sum(t * t, axis=0, keepdims=True) / count - mean * mean
        bn = ((t - mean) * jax.lax.rsqrt(var + _EPS) * rg1 + rbt1) * mask
        u = jnp.maximum(conv_flat(slab_ref, bn, rows, c, wp, kb) + rb2 + p,
                        0.0) * mask
        mean2 = jnp.sum(u, axis=0, keepdims=True) / count
        var2 = jnp.sum(u * u, axis=0, keepdims=True) / count - mean2 * mean2
        return (u - mean2) * jax.lax.rsqrt(var2 + _EPS) * rg2 + rbt2

    # stage 2: ResBlock(32) + conv1x1(32->64) + maxpool ----------------------
    o2 = res_block(sa_ref, f2, 200, 32, 10, 128.0, mask2,
                   _w(w_ref, "k2a"), _w(w_ref, "k2b"), _w(w_ref, "p2"))
    y2 = jnp.dot(o2, _w(w_ref, "wc2"), preferred_element_type=f32) \
        + _w(w_ref, "bc2")
    sa_ref[16:216, 0:64] = y2
    q2 = jnp.maximum(
        jnp.maximum(sa_ref[16:216, 0:64], sa_ref[17:217, 0:64]),
        jnp.maximum(sa_ref[26:226, 0:64], sa_ref[27:227, 0:64]))
    f3 = jnp.dot(_w(w_ref, "s23a"), q2[0:128, :],
                 preferred_element_type=f32) \
        + jnp.dot(_w(w_ref, "s23b"), q2[128:200, :],
                  preferred_element_type=f32)                  # (72, 64)

    # stage 3: ResBlock(64) + conv1x1(64->128) + maxpool ---------------------
    mask3 = _w(w_ref, "mask3")
    o3 = res_block(sb_ref, f3, 72, 64, 6, 32.0, mask3,
                   _w(w_ref, "k3a"), _w(w_ref, "k3b"), _w(w_ref, "p3"))
    y3 = jnp.dot(o3, _w(w_ref, "wc3"), preferred_element_type=f32) \
        + _w(w_ref, "bc3")
    sb_ref[16:88, 0:128] = y3
    q3 = jnp.maximum(
        jnp.maximum(sb_ref[16:88, 0:128], sb_ref[17:89, 0:128]),
        jnp.maximum(sb_ref[22:94, 0:128], sb_ref[23:95, 0:128]))

    # head: adaptive avg pool -> FC -> softmax -------------------------------
    pooled = jnp.dot(_w(w_ref, "pavg"), q3, preferred_element_type=f32)  # (2,128)
    fcw = fc_ref[0:128, :]
    fcb = fc_ref[128:129, :]
    logits = jnp.dot(pooled, fcw, preferred_element_type=f32) + fcb
    mx = jnp.max(logits, axis=1, keepdims=True)
    e = jnp.exp(logits - mx)
    out_ref[...] = e / jnp.sum(e, axis=1, keepdims=True)


# --------------------------------------------------------------------------
# host-side (one-time) parameter + geometry packing
# --------------------------------------------------------------------------

def _band_matrix(w9):
    """(54,18) banded weights so conv3x3 == [v_up | v | v_down] @ band."""
    B = np.zeros((54, _WP1), np.float32)
    for b in range(3):           # dy + 1
        for dxi in range(3):     # dx + 1
            k = float(w9[3 * b + dxi])
            dx = dxi - 1
            for c in range(_WP1):
                cp = c + dx
                if 0 <= cp < _WP1:
                    B[b * _WP1 + cp, c] = k
    return B


def pack_params(params):
    """Pack all weights + geometry constants into 2 DMA slabs (done once)."""
    ent = {
        "k2a": np.asarray(params["rb2_k1"]).reshape(288, 32),
        "k2b": np.asarray(params["rb2_k2"]).reshape(288, 32),
        "k3a": np.asarray(params["rb3_k1"]).reshape(576, 64),
        "k3b": np.asarray(params["rb3_k2"]).reshape(576, 64),
        "wc2": np.asarray(params["c2_w"]),
        "wc3": np.asarray(params["c3_w"]),
        "w1a": _band_matrix(np.asarray(params["rb1_w1"]).reshape(-1)),
        "w1b": _band_matrix(np.asarray(params["rb1_w2"]).reshape(-1)),
        "p1": np.asarray(params["rb1_p"]),
        "wc1": np.asarray(params["c1_w"]), "bc1": np.asarray(params["c1_b"]),
        "p2": np.asarray(params["rb2_p"]), "bc2": np.asarray(params["c2_b"]),
        "p3": np.asarray(params["rb3_p"]), "bc3": np.asarray(params["c3_b"]),
    }

    # geometry (exact 0/1 or 0.25 constants)
    mask1 = np.zeros((_R1, _WP1), np.float32)
    for n in range(_N):
        mask1[n * _HP1 + 1:n * _HP1 + 1 + _H1, 1:1 + _W1] = 1.0

    a1 = np.zeros((_R2, _R1), np.float32)
    msel = np.zeros((_R2, _W2), np.float32)
    mask2 = np.zeros((_R2, 32), np.float32)       # pre-broadcast to (rows, C)
    for n in range(_N):
        for h in range(1, _H2 + 1):
            for w in range(1, _W2 + 1):
                r2 = n * _HP2 * _WP2 + h * _WP2 + w
                mask2[r2, :] = 1.0
                a1[r2, n * _HP1 + 2 * h - 1] = 1.0
                msel[r2, w - 1] = 1.0

    bselA = np.zeros((_WP1, _W2), np.float32)
    bselB = np.zeros((_WP1, _W2), np.float32)
    for wo in range(_W2):
        bselA[2 * wo + 1, wo] = 1.0
        bselB[2 * wo + 2, wo] = 1.0

    s23 = np.zeros((_R3, _R2), np.float32)
    mask3 = np.zeros((_R3, 64), np.float32)
    for n in range(_N):
        for h in range(1, _H3 + 1):
            for w in range(1, _W3 + 1):
                r3 = n * _HP3 * _WP3 + h * _WP3 + w
                mask3[r3, :] = 1.0
                s23[r3, n * _HP2 * _WP2 + (2 * h - 1) * _WP2 + (2 * w - 1)] = 1.0

    pavg = np.zeros((_N, _R3), np.float32)
    for n in range(_N):
        for ho in range(2):
            for wo in range(2):
                pavg[n, n * _HP3 * _WP3 + (2 * ho + 1) * _WP3 + (2 * wo + 1)] = 0.25

    ent.update(mask1=mask1, mask2=mask2, mask3=mask3, a1=a1, msel=msel,
               bselA=bselA, bselB=bselB,
               s23a=s23[:, :128], s23b=s23[:, 128:], pavg=pavg)

    slab = np.zeros((_W_ROWS, 128), np.float32)
    for name, rows, cols in _W_LAYOUT:
        v = ent[name]
        assert v.shape == (rows, cols), (name, v.shape, (rows, cols))
        slab[_W_OFF[name]:_W_OFF[name] + rows, 0:cols] = v

    fc = np.zeros((136, 158), np.float32)
    fc[0:128, :] = np.asarray(params["fc_w"])
    fc[128, :] = np.asarray(params["fc_b"]).reshape(-1)
    return jnp.asarray(slab), jnp.asarray(fc)


# --------------------------------------------------------------------------
# parameters (deterministic synthetic init) and the jitted forward
# --------------------------------------------------------------------------

def init_params(key):
    keys = jax.random.split(key, 20)
    kit = iter(keys)

    def nrm(shape, scale=0.1):
        return (scale * jax.random.normal(next(kit), shape)).astype(jnp.float32)

    def rb_vec(c):
        # rows: [b1, gamma1, beta1, b2, gamma2, beta2]
        b1 = nrm((1, c), 0.01)
        b2 = nrm((1, c), 0.01)
        one = jnp.ones((1, c), jnp.float32)
        zero = jnp.zeros((1, c), jnp.float32)
        return jnp.concatenate([b1, one, zero, b2, one, zero], axis=0)

    return {
        "rb1_w1": nrm((1, 9)),
        "rb1_w2": nrm((1, 9)),
        "rb1_p": rb_vec(1).reshape(1, 6),
        "c1_w": nrm((1, 32)), "c1_b": nrm((1, 32), 0.01),
        "rb2_k1": nrm((9, 32, 32)),
        "rb2_k2": nrm((9, 32, 32)),
        "rb2_p": rb_vec(32),
        "c2_w": nrm((32, 64)), "c2_b": nrm((1, 64), 0.01),
        "rb3_k1": nrm((9, 64, 64)),
        "rb3_k2": nrm((9, 64, 64)),
        "rb3_p": rb_vec(64),
        "c3_w": nrm((64, 128)), "c3_b": nrm((1, 128), 0.01),
        "fc_w": nrm((128, 158)), "fc_b": nrm((1, 158), 0.01),
    }


@jax.jit
def resnet_forward(x_nchw, slab_w, slab_fc):
    # NCHW, C=1  ->  zero-padded (N*(H+2), W+2) frame for the C=1 res block.
    x = x_nchw[:, 0, :, :].astype(jnp.float32)               # (2, 16, 16)
    xp = jnp.pad(x, ((0, 0), (1, 1), (1, 1)))                # (2, 18, 18)
    xin = xp.reshape(_R1, _WP1)                              # (36, 18)

    return pl.pallas_call(
        resnet_kernel,
        out_shape=jax.ShapeDtypeStruct((2, 158), jnp.float32),
        in_specs=[pl.BlockSpec(memory_space=pltpu.MemorySpace.VMEM)] * 3,
        out_specs=pl.BlockSpec(memory_space=pltpu.MemorySpace.VMEM),
        scratch_shapes=[
            pltpu.VMEM((48, 18), jnp.float32),     # stage-1 row-shift slab
            pltpu.VMEM((232, 64), jnp.float32),    # stage-2 shift/pool slab
            pltpu.VMEM((104, 128), jnp.float32),   # stage-3 shift/pool slab
        ],
    )(xin, slab_w, slab_fc)


if __name__ == "__main__":
    key = jax.random.PRNGKey(0)
    kx, kp = jax.random.split(key)
    x = jax.random.normal(kx, (2, 1, 16, 16), dtype=jnp.float32)  # NCHW, C=1
    params = init_params(kp)
    slab_w, slab_fc = pack_params(params)     # one-time host-side packing

    y = resnet_forward(x, slab_w, slab_fc)
    y = jax.block_until_ready(y)

    assert y.shape == (2, 158), y.shape
    assert bool(jnp.all(jnp.isfinite(y)))
    assert bool(jnp.allclose(jnp.sum(y, axis=1), 1.0, atol=1e-4))
    print("KERNEL_OK")
</pallas_src>

<mosaic_0001>
module attributes {stable_mosaic.version = 11 : i64} {
  func.func @resnet_kernel(%arg0: memref<36x18xf32, #tpu.memory_space<vmem>>, %arg1: memref<2904x128xf32, #tpu.memory_space<vmem>>, %arg2: memref<136x158xf32, #tpu.memory_space<vmem>>, %arg3: memref<2x158xf32, #tpu.memory_space<vmem>>, %arg4: memref<48x18xf32, #tpu.memory_space<vmem>>, %arg5: memref<232x64xf32, #tpu.memory_space<vmem>>, %arg6: memref<104x128xf32, #tpu.memory_space<vmem>>) attributes {dimension_semantics = [], scalar_prefetch = 0 : i64, scratch_operands = 3 : i64, tpu.core_type = #tpu.core_type<tc>} {
    %cst = arith.constant 0.000000e+00 : f32
    %0 = vector.broadcast %cst : f32 to vector<48x18xf32>
    %c0 = arith.constant 0 : index
    %c0_0 = arith.constant 0 : index
    %1 = vector.load %arg4[%c0, %c0_0] : memref<48x18xf32, #tpu.memory_space<vmem>>, vector<48x18xf32>
    tpu.vector_store %arg4[%c0, %c0_0], %0 {strides = array<i32>} : memref<48x18xf32, #tpu.memory_space<vmem>>, vector<48x18xf32>,
    %cst_1 = arith.constant 0.000000e+00 : f32
    %2 = vector.broadcast %cst_1 : f32 to vector<16x64xf32>
    %c0_2 = arith.constant 0 : index
    %c0_3 = arith.constant 0 : index
    %3 = vector.load %arg5[%c0_2, %c0_3] : memref<232x64xf32, #tpu.memory_space<vmem>>, vector<16x64xf32>
    tpu.vector_store %arg5[%c0_2, %c0_3], %2 {strides = array<i32>} : memref<232x64xf32, #tpu.memory_space<vmem>>, vector<16x64xf32>,
    %cst_4 = arith.constant 0.000000e+00 : f32
    %4 = vector.broadcast %cst_4 : f32 to vector<16x64xf32>
    %c216 = arith.constant 216 : index
    %c0_5 = arith.constant 0 : index
    %5 = vector.load %arg5[%c216, %c0_5] : memref<232x64xf32, #tpu.memory_space<vmem>>, vector<16x64xf32>
    tpu.vector_store %arg5[%c216, %c0_5], %4 {strides = array<i32>} : memref<232x64xf32, #tpu.memory_space<vmem>>, vector<16x64xf32>,
    %cst_6 = arith.constant 0.000000e+00 : f32
    %6 = vector.broadcast %cst_6 : f32 to vector<16x128xf32>
    %c0_7 = arith.constant 0 : index
    %c0_8 = arith.constant 0 : index
    %7 = vector.load %arg6[%c0_7, %c0_8] : memref<104x128xf32, #tpu.memory_space<vmem>>, vector<16x128xf32>
    tpu.vector_store %arg6[%c0_7, %c0_8], %6 {strides = array<i32>} : memref<104x128xf32, #tpu.memory_space<vmem>>, vector<16x128xf32>,
    %cst_9 = arith.constant 0.000000e+00 : f32
    %8 = vector.broadcast %cst_9 : f32 to vector<16x128xf32>
    %c88 = arith.constant 88 : index
    %c0_10 = arith.constant 0 : index
    %9 = vector.load %arg6[%c88, %c0_10] : memref<104x128xf32, #tpu.memory_space<vmem>>, vector<16x128xf32>
    tpu.vector_store %arg6[%c88, %c0_10], %8 {strides = array<i32>} : memref<104x128xf32, #tpu.memory_space<vmem>>, vector<16x128xf32>,
    %c0_11 = arith.constant 0 : index
    %c0_12 = arith.constant 0 : index
    %10 = vector.load %arg0[%c0_11, %c0_12] : memref<36x18xf32, #tpu.memory_space<vmem>>, vector<36x18xf32>
    %c2176 = arith.constant 2176 : index
    %c0_13 = arith.constant 0 : index
    %11 = vector.load %arg1[%c2176, %c0_13] : memref<2904x128xf32, #tpu.memory_space<vmem>>, vector<36x18xf32>
    %c2848 = arith.constant 2848 : index
    %c0_14 = arith.constant 0 : index
    %12 = vector.load %arg1[%c2848, %c0_14] : memref<2904x128xf32, #tpu.memory_space<vmem>>, vector<1x6xf32>
    %13 = vector.extract_strided_slice %12 {offsets = [0, 0], sizes = [1, 1], strides = [1, 1]} : vector<1x6xf32> to vector<1x1xf32>
    %14 = vector.extract_strided_slice %12 {offsets = [0, 1], sizes = [1, 1], strides = [1, 1]} : vector<1x6xf32> to vector<1x1xf32>
    %15 = vector.extract_strided_slice %12 {offsets = [0, 2], sizes = [1, 1], strides = [1, 1]} : vector<1x6xf32> to vector<1x1xf32>
    %16 = vector.extract_strided_slice %12 {offsets = [0, 3], sizes = [1, 1], strides = [1, 1]} : vector<1x6xf32> to vector<1x1xf32>
    %17 = vector.extract_strided_slice %12 {offsets = [0, 4], sizes = [1, 1], strides = [1, 1]} : vector<1x6xf32> to vector<1x1xf32>
    %18 = vector.extract_strided_slice %12 {offsets = [0, 5], sizes = [1, 1], strides = [1, 1]} : vector<1x6xf32> to vector<1x1xf32>
    %c2736 = arith.constant 2736 : index
    %c0_15 = arith.constant 0 : index
    %19 = vector.load %arg1[%c2736, %c0_15] : memref<2904x128xf32, #tpu.memory_space<vmem>>, vector<54x18xf32>
    %c2792 = arith.constant 2792 : index
    %c0_16 = arith.constant 0 : index
    %20 = vector.load %arg1[%c2792, %c0_16] : memref<2904x128xf32, #tpu.memory_space<vmem>>, vector<54x18xf32>
    %c8 = arith.constant 8 : index
    %c0_17 = arith.constant 0 : index
    %21 = vector.load %arg4[%c8, %c0_17] : memref<48x18xf32, #tpu.memory_space<vmem>>, vector<36x18xf32>
    tpu.vector_store %arg4[%c8, %c0_17], %10 {strides = array<i32>} : memref<48x18xf32, #tpu.memory_space<vmem>>, vector<36x18xf32>,
    %c7 = arith.constant 7 : index
    %c0_18 = arith.constant 0 : index
    %22 = vector.load %arg4[%c7, %c0_18] : memref<48x18xf32, #tpu.memory_space<vmem>>, vector<36x18xf32>
    %c9 = arith.constant 9 : index
    %c0_19 = arith.constant 0 : index
    %23 = vector.load %arg4[%c9, %c0_19] : memref<48x18xf32, #tpu.memory_space<vmem>>, vector<36x18xf32>
    %24 = tpu.concatenate %22, %10, %23 in 1 : vector<36x18xf32>, vector<36x18xf32>, vector<36x18xf32> -> vector<36x54xf32>
    %cst_20 = arith.constant dense<0.000000e+00> : vector<36x18xf32>
    %25 = tpu.matmul %24, %19, %cst_20 {dimension_numbers = #tpu.dot_dimension_numbers<[1], [0], [0], [1], [0, 0, 1, 1], [], []>} : vector<36x54xf32>, vector<54x18xf32>, vector<36x18xf32> -> vector<36x18xf32>
    %26 = vector.broadcast %13 : vector<1x1xf32> to vector<36x18xf32>
    %27 = arith.addf %25, %26 : vector<36x18xf32>
    %cst_21 = arith.constant 0.000000e+00 : f32
    %28 = vector.broadcast %cst_21 : f32 to vector<36x18xf32>
    %29 = arith.maximumf %27, %28 : vector<36x18xf32>
    %30 = arith.mulf %29, %11 : vector<36x18xf32>
    %cst_22 = arith.constant dense<0.000000e+00> : vector<36xf32>
    %31 = vector.multi_reduction <add>, %30, %cst_22 [1] : vector<36x18xf32> to vector<36xf32>
    %32 = vector.shape_cast %31 : vector<36xf32> to vector<36x1xf32>
    %cst_23 = arith.constant dense<0.000000e+00> : vector<1xf32>
    %33 = vector.multi_reduction <add>, %32, %cst_23 [0] : vector<36x1xf32> to vector<1xf32>
    %34 = vector.shape_cast %33 : vector<1xf32> to vector<1x1xf32>
    %cst_24 = arith.constant 5.120000e+02 : f32
    %35 = vector.broadcast %cst_24 : f32 to vector<1x1xf32>
    %36 = arith.divf %34, %35 : vector<1x1xf32>
    %37 = arith.mulf %30, %30 : vector<36x18xf32>
    %cst_25 = arith.constant dense<0.000000e+00> : vector<36xf32>
    %38 = vector.multi_reduction <add>, %37, %cst_25 [1] : vector<36x18xf32> to vector<36xf32>
    %39 = vector.shape_cast %38 : vector<36xf32> to vector<36x1xf32>
    %cst_26 = arith.constant dense<0.000000e+00> : vector<1xf32>
    %40 = vector.multi_reduction <add>, %39, %cst_26 [0] : vector<36x1xf32> to vector<1xf32>
    %41 = vector.shape_cast %40 : vector<1xf32> to vector<1x1xf32>
    %cst_27 = arith.constant 5.120000e+02 : f32
    %42 = vector.broadcast %cst_27 : f32 to vector<1x1xf32>
    %43 = arith.divf %41, %42 : vector<1x1xf32>
    %44 = arith.mulf %36, %36 : vector<1x1xf32>
    %45 = arith.subf %43, %44 : vector<1x1xf32>
    %46 = vector.broadcast %36 : vector<1x1xf32> to vector<36x18xf32>
    %47 = arith.subf %30, %46 : vector<36x18xf32>
    %cst_28 = arith.constant 9.99999974E-6 : f32
    %48 = vector.broadcast %cst_28 : f32 to vector<1x1xf32>
    %49 = arith.addf %45, %48 : vector<1x1xf32>
    %50 = math.rsqrt %49 : vector<1x1xf32>
    %51 = vector.broadcast %50 : vector<1x1xf32> to vector<36x18xf32>
    %52 = arith.mulf %47, %51 : vector<36x18xf32>
    %53 = vector.broadcast %14 : vector<1x1xf32> to vector<36x18xf32>
    %54 = arith.mulf %52, %53 : vector<36x18xf32>
    %55 = vector.broadcast %15 : vector<1x1xf32> to vector<36x18xf32>
    %56 = arith.addf %54, %55 : vector<36x18xf32>
    %57 = arith.mulf %56, %11 : vector<36x18xf32>
    %c8_29 = arith.constant 8 : index
    %c0_30 = arith.constant 0 : index
    %58 = vector.load %arg4[%c8_29, %c0_30] : memref<48x18xf32, #tpu.memory_space<vmem>>, vector<36x18xf32>
    tpu.vector_store %arg4[%c8_29, %c0_30], %57 {strides = array<i32>} : memref<48x18xf32, #tpu.memory_space<vmem>>, vector<36x18xf32>,
    %c7_31 = arith.constant 7 : index
    %c0_32 = arith.constant 0 : index
    %59 = vector.load %arg4[%c7_31, %c0_32] : memref<48x18xf32, #tpu.memory_space<vmem>>, vector<36x18xf32>
    %c9_33 = arith.constant 9 : index
    %c0_34 = arith.constant 0 : index
    %60 = vector.load %arg4[%c9_33, %c0_34] : memref<48x18xf32, #tpu.memory_space<vmem>>, vector<36x18xf32>
    %61 = tpu.concatenate %59, %57, %60 in 1 : vector<36x18xf32>, vector<36x18xf32>, vector<36x18xf32> -> vector<36x54xf32>
    %cst_35 = arith.constant dense<0.000000e+00> : vector<36x18xf32>
    %62 = tpu.matmul %61, %20, %cst_35 {dimension_numbers = #tpu.dot_dimension_numbers<[1], [0], [0], [1], [0, 0, 1, 1], [], []>} : vector<36x54xf32>, vector<54x18xf32>, vector<36x18xf32> -> vector<36x18xf32>
    %63 = vector.broadcast %16 : vector<1x1xf32> to vector<36x18xf32>
    %64 = arith.addf %62, %63 : vector<36x18xf32>
    %65 = arith.addf %64, %10 : vector<36x18xf32>
    %cst_36 = arith.constant 0.000000e+00 : f32
    %66 = vector.broadcast %cst_36 : f32 to vector<36x18xf32>
    %67 = arith.maximumf %65, %66 : vector<36x18xf32>
    %68 = arith.mulf %67, %11 : vector<36x18xf32>
    %cst_37 = arith.constant dense<0.000000e+00> : vector<36xf32>
    %69 = vector.multi_reduction <add>, %68, %cst_37 [1] : vector<36x18xf32> to vector<36xf32>
    %70 = vector.shape_cast %69 : vector<36xf32> to vector<36x1xf32>
    %cst_38 = arith.constant dense<0.000000e+00> : vector<1xf32>
    %71 = vector.multi_reduction <add>, %70, %cst_38 [0] : vector<36x1xf32> to vector<1xf32>
    %72 = vector.shape_cast %71 : vector<1xf32> to vector<1x1xf32>
    %cst_39 = arith.constant 5.120000e+02 : f32
    %73 = vector.broadcast %cst_39 : f32 to vector<1x1xf32>
    %74 = arith.divf %72, %73 : vector<1x1xf32>
    %75 = arith.mulf %68, %68 : vector<36x18xf32>
    %cst_40 = arith.constant dense<0.000000e+00> : vector<36xf32>
    %76 = vector.multi_reduction <add>, %75, %cst_40 [1] : vector<36x18xf32> to vector<36xf32>
    %77 = vector.shape_cast %76 : vector<36xf32> to vector<36x1xf32>
    %cst_41 = arith.constant dense<0.000000e+00> : vector<1xf32>
    %78 = vector.multi_reduction <add>, %77, %cst_41 [0] : vector<36x1xf32> to vector<1xf32>
    %79 = vector.shape_cast %78 : vector<1xf32> to vector<1x1xf32>
    %cst_42 = arith.constant 5.120000e+02 : f32
    %80 = vector.broadcast %cst_42 : f32 to vector<1x1xf32>
    %81 = arith.divf %79, %80 : vector<1x1xf32>
    %82 = arith.mulf %74, %74 : vector<1x1xf32>
    %83 = arith.subf %81, %82 : vector<1x1xf32>
    %84 = vector.broadcast %74 : vector<1x1xf32> to vector<36x18xf32>
    %85 = arith.subf %68, %84 : vector<36x18xf32>
    %cst_43 = arith.constant 9.99999974E-6 : f32
    %86 = vector.broadcast %cst_43 : f32 to vector<1x1xf32>
    %87 = arith.addf %83, %86 : vector<1x1xf32>
    %88 = math.rsqrt %87 : vector<1x1xf32>
    %89 = vector.broadcast %88 : vector<1x1xf32> to vector<36x18xf32>
    %90 = arith.mulf %85, %89 : vector<36x18xf32>
    %91 = vector.broadcast %17 : vector<1x1xf32> to vector<36x18xf32>
    %92 = arith.mulf %90, %91 : vector<36x18xf32>
    %93 = vector.broadcast %18 : vector<1x1xf32> to vector<36x18xf32>
    %94 = arith.addf %92, %93 : vector<36x18xf32>
    %c8_44 = arith.constant 8 : index
    %c0_45 = arith.constant 0 : index
    %95 = vector.load %arg4[%c8_44, %c0_45] : memref<48x18xf32, #tpu.memory_space<vmem>>, vector<36x18xf32>
    tpu.vector_store %arg4[%c8_44, %c0_45], %94 {strides = array<i32>} : memref<48x18xf32, #tpu.memory_space<vmem>>, vector<36x18xf32>,
    %c9_46 = arith.constant 9 : index
    %c0_47 = arith.constant 0 : index
    %96 = vector.load %arg4[%c9_46, %c0_47] : memref<48x18xf32, #tpu.memory_space<vmem>>, vector<36x18xf32>
    %97 = arith.maximumf %94, %96 : vector<36x18xf32>
    %98 = arith.minimumf %94, %96 : vector<36x18xf32>
    %c1824 = arith.constant 1824 : index
    %c0_48 = arith.constant 0 : index
    %99 = vector.load %arg1[%c1824, %c0_48] : memref<2904x128xf32, #tpu.memory_space<vmem>>, vector<200x36xf32>
    %c2488 = arith.constant 2488 : index
    %c0_49 = arith.constant 0 : index
    %100 = vector.load %arg1[%c2488, %c0_49] : memref<2904x128xf32, #tpu.memory_space<vmem>>, vector<18x8xf32>
    %c2512 = arith.constant 2512 : index
    %c0_50 = arith.constant 0 : index
    %101 = vector.load %arg1[%c2512, %c0_50] : memref<2904x128xf32, #tpu.memory_space<vmem>>, vector<18x8xf32>
    %c2536 = arith.constant 2536 : index
    %c0_51 = arith.constant 0 : index
    %102 = vector.load %arg1[%c2536, %c0_51] : memref<2904x128xf32, #tpu.memory_space<vmem>>, vector<200x8xf32>
    %cst_52 = arith.constant dense<0.000000e+00> : vector<200x18xf32>
    %103 = tpu.matmul %99, %97, %cst_52 {dimension_numbers = #tpu.dot_dimension_numbers<[1], [0], [0], [1], [0, 0, 1, 1], [], []>} : vector<200x36xf32>, vector<36x18xf32>, vector<200x18xf32> -> vector<200x18xf32>
    %cst_53 = arith.constant dense<0.000000e+00> : vector<200x18xf32>
    %104 = tpu.matmul %99, %98, %cst_53 {dimension_numbers = #tpu.dot_dimension_numbers<[1], [0], [0], [1], [0, 0, 1, 1], [], []>} : vector<200x36xf32>, vector<36x18xf32>, vector<200x18xf32> -> vector<200x18xf32>
    %cst_54 = arith.constant dense<0.000000e+00> : vector<200x8xf32>
    %105 = tpu.matmul %103, %100, %cst_54 {dimension_numbers = #tpu.dot_dimension_numbers<[1], [0], [0], [1], [0, 0, 1, 1], [], []>} : vector<200x18xf32>, vector<18x8xf32>, vector<200x8xf32> -> vector<200x8xf32>
    %cst_55 = arith.constant dense<0.000000e+00> : vector<200x8xf32>
    %106 = tpu.matmul %103, %101, %cst_55 {dimension_numbers = #tpu.dot_dimension_numbers<[1], [0], [0], [1], [0, 0, 1, 1], [], []>} : vector<200x18xf32>, vector<18x8xf32>, vector<200x8xf32> -> vector<200x8xf32>
    %107 = arith.maximumf %105, %106 : vector<200x8xf32>
    %cst_56 = arith.constant dense<0.000000e+00> : vector<200x8xf32>
    %108 = tpu.matmul %104, %100, %cst_56 {dimension_numbers = #tpu.dot_dimension_numbers<[1], [0], [0], [1], [0, 0, 1, 1], [], []>} : vector<200x18xf32>, vector<18x8xf32>, vector<200x8xf32> -> vector<200x8xf32>
    %cst_57 = arith.constant dense<0.000000e+00> : vector<200x8xf32>
    %109 = tpu.matmul %104, %101, %cst_57 {dimension_numbers = #tpu.dot_dimension_numbers<[1], [0], [0], [1], [0, 0, 1, 1], [], []>} : vector<200x18xf32>, vector<18x8xf32>, vector<200x8xf32> -> vector<200x8xf32>
    %110 = arith.minimumf %108, %109 : vector<200x8xf32>
    %111 = arith.mulf %107, %102 : vector<200x8xf32>
    %cst_58 = arith.constant dense<0.000000e+00> : vector<200xf32>
    %112 = vector.multi_reduction <add>, %111, %cst_58 [1] : vector<200x8xf32> to vector<200xf32>
    %113 = vector.shape_cast %112 : vector<200xf32> to vector<200x1xf32>
    %114 = arith.mulf %110, %102 : vector<200x8xf32>
    %cst_59 = arith.constant dense<0.000000e+00> : vector<200xf32>
    %115 = vector.multi_reduction <add>, %114, %cst_59 [1] : vector<200x8xf32> to vector<200xf32>
    %116 = vector.shape_cast %115 : vector<200xf32> to vector<200x1xf32>
    %c2856 = arith.constant 2856 : index
    %c0_60 = arith.constant 0 : index
    %117 = vector.load %arg1[%c2856, %c0_60] : memref<2904x128xf32, #tpu.memory_space<vmem>>, vector<1x32xf32>
    %c2864 = arith.constant 2864 : index
    %c0_61 = arith.constant 0 : index
    %118 = vector.load %arg1[%c2864, %c0_61] : memref<2904x128xf32, #tpu.memory_space<vmem>>, vector<1x32xf32>
    %c2216 = arith.constant 2216 : index
    %c0_62 = arith.constant 0 : index
    %119 = vector.load %arg1[%c2216, %c0_62] : memref<2904x128xf32, #tpu.memory_space<vmem>>, vector<200x32xf32>
    %120 = vector.broadcast %113 : vector<200x1xf32> to vector<200x32xf32>
    %121 = vector.broadcast %117 : vector<1x32xf32> to vector<200x32xf32>
    %122 = arith.mulf %120, %121 : vector<200x32xf32>
    %123 = vector.broadcast %116 : vector<200x1xf32> to vector<200x32xf32>
    %124 = vector.broadcast %117 : vector<1x32xf32> to vector<200x32xf32>
    %125 = arith.mulf %123, %124 : vector<200x32xf32>
    %126 = arith.maximumf %122, %125 : vector<200x32xf32>
    %127 = vector.broadcast %118 : vector<1x32xf32> to vector<200x32xf32>
    %128 = arith.addf %126, %127 : vector<200x32xf32>
    %129 = arith.mulf %128, %119 : vector<200x32xf32>
    %c0_63 = arith.constant 0 : index
    %c0_64 = arith.constant 0 : index
    %130 = vector.load %arg1[%c0_63, %c0_64] : memref<2904x128xf32, #tpu.memory_space<vmem>>, vector<288x32xf32>
    %c288 = arith.constant 288 : index
    %c0_65 = arith.constant 0 : index
    %131 = vector.load %arg1[%c288, %c0_65] : memref<2904x128xf32, #tpu.memory_space<vmem>>, vector<288x32xf32>
    %c2872 = arith.constant 2872 : index
    %c0_66 = arith.constant 0 : index
    %132 = vector.load %arg1[%c2872, %c0_66] : memref<2904x128xf32, #tpu.memory_space<vmem>>, vector<6x32xf32>
    %133 = vector.extract_strided_slice %132 {offsets = [0, 0], sizes = [1, 32], strides = [1, 1]} : vector<6x32xf32> to vector<1x32xf32>
    %134 = vector.extract_strided_slice %132 {offsets = [1, 0], sizes = [1, 32], strides = [1, 1]} : vector<6x32xf32> to vector<1x32xf32>
    %135 = vector.extract_strided_slice %132 {offsets = [2, 0], sizes = [1, 32], strides = [1, 1]} : vector<6x32xf32> to vector<1x32xf32>
    %136 = vector.extract_strided_slice %132 {offsets = [3, 0], sizes = [1, 32], strides = [1, 1]} : vector<6x32xf32> to vector<1x32xf32>
    %137 = vector.extract_strided_slice %132 {offsets = [4, 0], sizes = [1, 32], strides = [1, 1]} : vector<6x32xf32> to vector<1x32xf32>
    %138 = vector.extract_strided_slice %132 {offsets = [5, 0], sizes = [1, 32], strides = [1, 1]} : vector<6x32xf32> to vector<1x32xf32>
    %c16 = arith.constant 16 : index
    %c0_67 = arith.constant 0 : index
    %139 = vector.load %arg5[%c16, %c0_67] : memref<232x64xf32, #tpu.memory_space<vmem>>, vector<200x32xf32>
    tpu.vector_store %arg5[%c16, %c0_67], %129 {strides = array<i32>} : memref<232x64xf32, #tpu.memory_space<vmem>>, vector<200x32xf32>,
    %c5 = arith.constant 5 : index
    %c0_68 = arith.constant 0 : index
    %140 = vector.load %arg5[%c5, %c0_68] : memref<232x64xf32, #tpu.memory_space<vmem>>, vector<200x32xf32>
    %c6 = arith.constant 6 : index
    %c0_69 = arith.constant 0 : index
    %141 = vector.load %arg5[%c6, %c0_69] : memref<232x64xf32, #tpu.memory_space<vmem>>, vector<200x32xf32>
    %c7_70 = arith.constant 7 : index
    %c0_71 = arith.constant 0 : index
    %142 = vector.load %arg5[%c7_70, %c0_71] : memref<232x64xf32, #tpu.memory_space<vmem>>, vector<200x32xf32>
    %c15 = arith.constant 15 : index
    %c0_72 = arith.constant 0 : index
    %143 = vector.load %arg5[%c15, %c0_72] : memref<232x64xf32, #tpu.memory_space<vmem>>, vector<200x32xf32>
    %c17 = arith.constant 17 : index
    %c0_73 = arith.constant 0 : index
    %144 = vector.load %arg5[%c17, %c0_73] : memref<232x64xf32, #tpu.memory_space<vmem>>, vector<200x32xf32>
    %c25 = arith.constant 25 : index
    %c0_74 = arith.constant 0 : index
    %145 = vector.load %arg5[%c25, %c0_74] : memref<232x64xf32, #tpu.memory_space<vmem>>, vector<200x32xf32>
    %c26 = arith.constant 26 : index
    %c0_75 = arith.constant 0 : index
    %146 = vector.load %arg5[%c26, %c0_75] : memref<232x64xf32, #tpu.memory_space<vmem>>, vector<200x32xf32>
    %c27 = arith.constant 27 : index
    %c0_76 = arith.constant 0 : index
    %147 = vector.load %arg5[%c27, %c0_76] : memref<232x64xf32, #tpu.memory_space<vmem>>, vector<200x32xf32>
    %148 = tpu.concatenate %140, %141, %142, %143, %129, %144, %145, %146, %147 in 1 : vector<200x32xf32>, vector<200x32xf32>, vector<200x32xf32>, vector<200x32xf32>, vector<200x32xf32>, vector<200x32xf32>, vector<200x32xf32>, vector<200x32xf32>, vector<200x32xf32> -> vector<200x288xf32>
    %cst_77 = arith.constant dense<0.000000e+00> : vector<200x32xf32>
    %149 = tpu.matmul %148, %130, %cst_77 {dimension_numbers = #tpu.dot_dimension_numbers<[1], [0], [0], [1], [0, 0, 1, 1], [], []>} : vector<200x288xf32>, vector<288x32xf32>, vector<200x32xf32> -> vector<200x32xf32>
    %150 = vector.broadcast %133 : vector<1x32xf32> to vector<200x32xf32>
    %151 = arith.addf %149, %150 : vector<200x32xf32>
    %cst_78 = arith.constant 0.000000e+00 : f32
    %152 = vector.broadcast %cst_78 : f32 to vector<200x32xf32>
    %153 = arith.maximumf %151, %152 : vector<200x32xf32>
    %154 = arith.mulf %153, %119 : vector<200x32xf32>
    %cst_79 = arith.constant dense<0.000000e+00> : vector<32xf32>
    %155 = vector.multi_reduction <add>, %154, %cst_79 [0] : vector<200x32xf32> to vector<32xf32>
    %156 = vector.shape_cast %155 : vector<32xf32> to vector<1x32xf32>
    %cst_80 = arith.constant 1.280000e+02 : f32
    %157 = vector.broadcast %cst_80 : f32 to vector<1x32xf32>
    %158 = arith.divf %156, %157 : vector<1x32xf32>
    %159 = arith.mulf %154, %154 : vector<200x32xf32>
    %cst_81 = arith.constant dense<0.000000e+00> : vector<32xf32>
    %160 = vector.multi_reduction <add>, %159, %cst_81 [0] : vector<200x32xf32> to vector<32xf32>
    %161 = vector.shape_cast %160 : vector<32xf32> to vector<1x32xf32>
    %cst_82 = arith.constant 1.280000e+02 : f32
    %162 = vector.broadcast %cst_82 : f32 to vector<1x32xf32>
    %163 = arith.divf %161, %162 : vector<1x32xf32>
    %164 = arith.mulf %158, %158 : vector<1x32xf32>
    %165 = arith.subf %163, %164 : vector<1x32xf32>
    %166 = vector.broadcast %158 : vector<1x32xf32> to vector<200x32xf32>
    %167 = arith.subf %154, %166 : vector<200x32xf32>
    %cst_83 = arith.constant 9.99999974E-6 : f32
    %168 = vector.broadcast %cst_83 : f32 to vector<1x32xf32>
    %169 = arith.addf %165, %168 : vector<1x32xf32>
    %170 = math.rsqrt %169 : vector<1x32xf32>
    %171 = vector.broadcast %170 : vector<1x32xf32> to vector<200x32xf32>
    %172 = arith.mulf %167, %171 : vector<200x32xf32>
    %173 = vector.broadcast %134 : vector<1x32xf32> to vector<200x32xf32>
    %174 = arith.mulf %172, %173 : vector<200x32xf32>
    %175 = vector.broadcast %135 : vector<1x32xf32> to vector<200x32xf32>
    %176 = arith.addf %174, %175 : vector<200x32xf32>
    %177 = arith.mulf %176, %119 : vector<200x32xf32>
    %c16_84 = arith.constant 16 : index
    %c0_85 = arith.constant 0 : index
    %178 = vector.load %arg5[%c16_84, %c0_85] : memref<232x64xf32, #tpu.memory_space<vmem>>, vector<200x32xf32>
    tpu.vector_store %arg5[%c16_84, %c0_85], %177 {strides = array<i32>} : memref<232x64xf32, #tpu.memory_space<vmem>>, vector<200x32xf32>,
    %c5_86 = arith.constant 5 : index
    %c0_87 = arith.constant 0 : index
    %179 = vector.load %arg5[%c5_86, %c0_87] : memref<232x64xf32, #tpu.memory_space<vmem>>, vector<200x32xf32>
    %c6_88 = arith.constant 6 : index
    %c0_89 = arith.constant 0 : index
    %180 = vector.load %arg5[%c6_88, %c0_89] : memref<232x64xf32, #tpu.memory_space<vmem>>, vector<200x32xf32>
    %c7_90 = arith.constant 7 : index
    %c0_91 = arith.constant 0 : index
    %181 = vector.load %arg5[%c7_90, %c0_91] : memref<232x64xf32, #tpu.memory_space<vmem>>, vector<200x32xf32>
    %c15_92 = arith.constant 15 : index
    %c0_93 = arith.constant 0 : index
    %182 = vector.load %arg5[%c15_92, %c0_93] : memref<232x64xf32, #tpu.memory_space<vmem>>, vector<200x32xf32>
    %c17_94 = arith.constant 17 : index
    %c0_95 = arith.constant 0 : index
    %183 = vector.load %arg5[%c17_94, %c0_95] : memref<232x64xf32, #tpu.memory_space<vmem>>, vector<200x32xf32>
    %c25_96 = arith.constant 25 : index
    %c0_97 = arith.constant 0 : index
    %184 = vector.load %arg5[%c25_96, %c0_97] : memref<232x64xf32, #tpu.memory_space<vmem>>, vector<200x32xf32>
    %c26_98 = arith.constant 26 : index
    %c0_99 = arith.constant 0 : index
    %185 = vector.load %arg5[%c26_98, %c0_99] : memref<232x64xf32, #tpu.memory_space<vmem>>, vector<200x32xf32>
    %c27_100 = arith.constant 27 : index
    %c0_101 = arith.constant 0 : index
    %186 = vector.load %arg5[%c27_100, %c0_101] : memref<232x64xf32, #tpu.memory_space<vmem>>, vector<200x32xf32>
    %187 = tpu.concatenate %179, %180, %181, %182, %177, %183, %184, %185, %186 in 1 : vector<200x32xf32>, vector<200x32xf32>, vector<200x32xf32>, vector<200x32xf32>, vector<200x32xf32>, vector<200x32xf32>, vector<200x32xf32>, vector<200x32xf32>, vector<200x32xf32> -> vector<200x288xf32>
    %cst_102 = arith.constant dense<0.000000e+00> : vector<200x32xf32>
    %188 = tpu.matmul %187, %131, %cst_102 {dimension_numbers = #tpu.dot_dimension_numbers<[1], [0], [0], [1], [0, 0, 1, 1], [], []>} : vector<200x288xf32>, vector<288x32xf32>, vector<200x32xf32> -> vector<200x32xf32>
    %189 = vector.broadcast %136 : vector<1x32xf32> to vector<200x32xf32>
    %190 = arith.addf %188, %189 : vector<200x32xf32>
    %191 = arith.addf %190, %129 : vector<200x32xf32>
    %cst_103 = arith.constant 0.000000e+00 : f32
    %192 = vector.broadcast %cst_103 : f32 to vector<200x32xf32>
    %193 = arith.maximumf %191, %192 : vector<200x32xf32>
    %194 = arith.mulf %193, %119 : vector<200x32xf32>
    %cst_104 = arith.constant dense<0.000000e+00> : vector<32xf32>
    %195 = vector.multi_reduction <add>, %194, %cst_104 [0] : vector<200x32xf32> to vector<32xf32>
    %196 = vector.shape_cast %195 : vector<32xf32> to vector<1x32xf32>
    %cst_105 = arith.constant 1.280000e+02 : f32
    %197 = vector.broadcast %cst_105 : f32 to vector<1x32xf32>
    %198 = arith.divf %196, %197 : vector<1x32xf32>
    %199 = arith.mulf %194, %194 : vector<200x32xf32>
    %cst_106 = arith.constant dense<0.000000e+00> : vector<32xf32>
    %200 = vector.multi_reduction <add>, %199, %cst_106 [0] : vector<200x32xf32> to vector<32xf32>
    %201 = vector.shape_cast %200 : vector<32xf32> to vector<1x32xf32>
    %cst_107 = arith.constant 1.280000e+02 : f32
    %202 = vector.broadcast %cst_107 : f32 to vector<1x32xf32>
    %203 = arith.divf %201, %202 : vector<1x32xf32>
    %204 = arith.mulf %198, %198 : vector<1x32xf32>
    %205 = arith.subf %203, %204 : vector<1x32xf32>
    %206 = vector.broadcast %198 : vector<1x32xf32> to vector<200x32xf32>
    %207 = arith.subf %194, %206 : vector<200x32xf32>
    %cst_108 = arith.constant 9.99999974E-6 : f32
    %208 = vector.broadcast %cst_108 : f32 to vector<1x32xf32>
    %209 = arith.addf %205, %208 : vector<1x32xf32>
    %210 = math.rsqrt %209 : vector<1x32xf32>
    %211 = vector.broadcast %210 : vector<1x32xf32> to vector<200x32xf32>
    %212 = arith.mulf %207, %211 : vector<200x32xf32>
    %213 = vector.broadcast %137 : vector<1x32xf32> to vector<200x32xf32>
    %214 = arith.mulf %212, %213 : vector<200x32xf32>
    %215 = vector.broadcast %138 : vector<1x32xf32> to vector<200x32xf32>
    %216 = arith.addf %214, %215 : vector<200x32xf32>
    %c1728 = arith.constant 1728 : index
    %c0_109 = arith.constant 0 : index
    %217 = vector.load %arg1[%c1728, %c0_109] : memref<2904x128xf32, #tpu.memory_space<vmem>>, vector<32x64xf32>
    %cst_110 = arith.constant dense<0.000000e+00> : vector<200x64xf32>
    %218 = tpu.matmul %216, %217, %cst_110 {dimension_numbers = #tpu.dot_dimension_numbers<[1], [0], [0], [1], [0, 0, 1, 1], [], []>} : vector<200x32xf32>, vector<32x64xf32>, vector<200x64xf32> -> vector<200x64xf32>
    %c2880 = arith.constant 2880 : index
    %c0_111 = arith.constant 0 : index
    %219 = vector.load %arg1[%c2880, %c0_111] : memref<2904x128xf32, #tpu.memory_space<vmem>>, vector<1x64xf32>
    %220 = vector.broadcast %219 : vector<1x64xf32> to vector<200x64xf32>
    %221 = arith.addf %218, %220 : vector<200x64xf32>
    %c16_112 = arith.constant 16 : index
    %c0_113 = arith.constant 0 : index
    %222 = vector.load %arg5[%c16_112, %c0_113] : memref<232x64xf32, #tpu.memory_space<vmem>>, vector<200x64xf32>
    tpu.vector_store %arg5[%c16_112, %c0_113], %221 {strides = array<i32>} : memref<232x64xf32, #tpu.memory_space<vmem>>, vector<200x64xf32>,
    %c16_114 = arith.constant 16 : index
    %c0_115 = arith.constant 0 : index
    %223 = vector.load %arg5[%c16_114, %c0_115] : memref<232x64xf32, #tpu.memory_space<vmem>>, vector<200x64xf32>
    %c17_116 = arith.constant 17 : index
    %c0_117 = arith.constant 0 : index
    %224 = vector.load %arg5[%c17_116, %c0_117] : memref<232x64xf32, #tpu.memory_space<vmem>>, vector<200x64xf32>
    %225 = arith.maximumf %223, %224 : vector<200x64xf32>
    %c26_118 = arith.constant 26 : index
    %c0_119 = arith.constant 0 : index
    %226 = vector.load %arg5[%c26_118, %c0_119] : memref<232x64xf32, #tpu.memory_space<vmem>>, vector<200x64xf32>
    %c27_120 = arith.constant 27 : index
    %c0_121 = arith.constant 0 : index
    %227 = vector.load %arg5[%c27_120, %c0_121] : memref<232x64xf32, #tpu.memory_space<vmem>>, vector<200x64xf32>
    %228 = arith.maximumf %226, %227 : vector<200x64xf32>
    %229 = arith.maximumf %225, %228 : vector<200x64xf32>
    %c2024 = arith.constant 2024 : index
    %c0_122 = arith.constant 0 : index
    %230 = vector.load %arg1[%c2024, %c0_122] : memref<2904x128xf32, #tpu.memory_space<vmem>>, vector<72x128xf32>
    %231 = vector.extract_strided_slice %229 {offsets = [0, 0], sizes = [128, 64], strides = [1, 1]} : vector<200x64xf32> to vector<128x64xf32>
    %cst_123 = arith.constant dense<0.000000e+00> : vector<72x64xf32>
    %232 = tpu.matmul %230, %231, %cst_123 {dimension_numbers = #tpu.dot_dimension_numbers<[1], [0], [0], [1], [0, 0, 1, 1], [], []>} : vector<72x128xf32>, vector<128x64xf32>, vector<72x64xf32> -> vector<72x64xf32>
    %c2096 = arith.constant 2096 : index
    %c0_124 = arith.constant 0 : index
    %233 = vector.load %arg1[%c2096, %c0_124] : memref<2904x128xf32, #tpu.memory_space<vmem>>, vector<72x72xf32>
    %234 = vector.extract_strided_slice %229 {offsets = [128, 0], sizes = [72, 64], strides = [1, 1]} : vector<200x64xf32> to vector<72x64xf32>
    %cst_125 = arith.constant dense<0.000000e+00> : vector<72x64xf32>
    %235 = tpu.matmul %233, %234, %cst_125 {dimension_numbers = #tpu.dot_dimension_numbers<[1], [0], [0], [1], [0, 0, 1, 1], [], []>} : vector<72x72xf32>, vector<72x64xf32>, vector<72x64xf32> -> vector<72x64xf32>
    %236 = arith.addf %232, %235 : vector<72x64xf32>
    %c2416 = arith.constant 2416 : index
    %c0_126 = arith.constant 0 : index
    %237 = vector.load %arg1[%c2416, %c0_126] : memref<2904x128xf32, #tpu.memory_space<vmem>>, vector<72x64xf32>
    %c576 = arith.constant 576 : index
    %c0_127 = arith.constant 0 : index
    %238 = vector.load %arg1[%c576, %c0_127] : memref<2904x128xf32, #tpu.memory_space<vmem>>, vector<576x64xf32>
    %c1152 = arith.constant 1152 : index
    %c0_128 = arith.constant 0 : index
    %239 = vector.load %arg1[%c1152, %c0_128] : memref<2904x128xf32, #tpu.memory_space<vmem>>, vector<576x64xf32>
    %c2888 = arith.constant 2888 : index
    %c0_129 = arith.constant 0 : index
    %240 = vector.load %arg1[%c2888, %c0_129] : memref<2904x128xf32, #tpu.memory_space<vmem>>, vector<6x64xf32>
    %241 = vector.extract_strided_slice %240 {offsets = [0, 0], sizes = [1, 64], strides = [1, 1]} : vector<6x64xf32> to vector<1x64xf32>
    %242 = vector.extract_strided_slice %240 {offsets = [1, 0], sizes = [1, 64], strides = [1, 1]} : vector<6x64xf32> to vector<1x64xf32>
    %243 = vector.extract_strided_slice %240 {offsets = [2, 0], sizes = [1, 64], strides = [1, 1]} : vector<6x64xf32> to vector<1x64xf32>
    %244 = vector.extract_strided_slice %240 {offsets = [3, 0], sizes = [1, 64], strides = [1, 1]} : vector<6x64xf32> to vector<1x64xf32>
    %245 = vector.extract_strided_slice %240 {offsets = [4, 0], sizes = [1, 64], strides = [1, 1]} : vector<6x64xf32> to vector<1x64xf32>
    %246 = vector.extract_strided_slice %240 {offsets = [5, 0], sizes = [1, 64], strides = [1, 1]} : vector<6x64xf32> to vector<1x64xf32>
    %c16_130 = arith.constant 16 : index
    %c0_131 = arith.constant 0 : index
    %247 = vector.load %arg6[%c16_130, %c0_131] : memref<104x128xf32, #tpu.memory_space<vmem>>, vector<72x64xf32>
    tpu.vector_store %arg6[%c16_130, %c0_131], %236 {strides = array<i32>} : memref<104x128xf32, #tpu.memory_space<vmem>>, vector<72x64xf32>,
    %c9_132 = arith.constant 9 : index
    %c0_133 = arith.constant 0 : index
    %248 = vector.load %arg6[%c9_132, %c0_133] : memref<104x128xf32, #tpu.memory_space<vmem>>, vector<72x64xf32>
    %c10 = arith.constant 10 : index
    %c0_134 = arith.constant 0 : index
    %249 = vector.load %arg6[%c10, %c0_134] : memref<104x128xf32, #tpu.memory_space<vmem>>, vector<72x64xf32>
    %c11 = arith.constant 11 : index
    %c0_135 = arith.constant 0 : index
    %250 = vector.load %arg6[%c11, %c0_135] : memref<104x128xf32, #tpu.memory_space<vmem>>, vector<72x64xf32>
    %c15_136 = arith.constant 15 : index
    %c0_137 = arith.constant 0 : index
    %251 = vector.load %arg6[%c15_136, %c0_137] : memref<104x128xf32, #tpu.memory_space<vmem>>, vector<72x64xf32>
    %c17_138 = arith.constant 17 : index
    %c0_139 = arith.constant 0 : index
    %252 = vector.load %arg6[%c17_138, %c0_139] : memref<104x128xf32, #tpu.memory_space<vmem>>, vector<72x64xf32>
    %c21 = arith.constant 21 : index
    %c0_140 = arith.constant 0 : index
    %253 = vector.load %arg6[%c21, %c0_140] : memref<104x128xf32, #tpu.memory_space<vmem>>, vector<72x64xf32>
    %c22 = arith.constant 22 : index
    %c0_141 = arith.constant 0 : index
    %254 = vector.load %arg6[%c22, %c0_141] : memref<104x128xf32, #tpu.memory_space<vmem>>, vector<72x64xf32>
    %c23 = arith.constant 23 : index
    %c0_142 = arith.constant 0 : index
    %255 = vector.load %arg6[%c23, %c0_142] : memref<104x128xf32, #tpu.memory_space<vmem>>, vector<72x64xf32>
    %256 = tpu.concatenate %248, %249, %250, %251, %236, %252, %253, %254, %255 in 1 : vector<72x64xf32>, vector<72x64xf32>, vector<72x64xf32>, vector<72x64xf32>, vector<72x64xf32>, vector<72x64xf32>, vector<72x64xf32>, vector<72x64xf32>, vector<72x64xf32> -> vector<72x576xf32>
    %cst_143 = arith.constant dense<0.000000e+00> : vector<72x64xf32>
    %257 = tpu.matmul %256, %238, %cst_143 {dimension_numbers = #tpu.dot_dimension_numbers<[1], [0], [0], [1], [0, 0, 1, 1], [], []>} : vector<72x576xf32>, vector<576x64xf32>, vector<72x64xf32> -> vector<72x64xf32>
    %258 = vector.broadcast %241 : vector<1x64xf32> to vector<72x64xf32>
    %259 = arith.addf %257, %258 : vector<72x64xf32>
    %cst_144 = arith.constant 0.000000e+00 : f32
    %260 = vector.broadcast %cst_144 : f32 to vector<72x64xf32>
    %261 = arith.maximumf %259, %260 : vector<72x64xf32>
    %262 = arith.mulf %261, %237 : vector<72x64xf32>
    %cst_145 = arith.constant dense<0.000000e+00> : vector<64xf32>
    %263 = vector.multi_reduction <add>, %262, %cst_145 [0] : vector<72x64xf32> to vector<64xf32>
    %264 = vector.shape_cast %263 : vector<64xf32> to vector<1x64xf32>
    %cst_146 = arith.constant 3.200000e+01 : f32
    %265 = vector.broadcast %cst_146 : f32 to vector<1x64xf32>
    %266 = arith.divf %264, %265 : vector<1x64xf32>
    %267 = arith.mulf %262, %262 : vector<72x64xf32>
    %cst_147 = arith.constant dense<0.000000e+00> : vector<64xf32>
    %268 = vector.multi_reduction <add>, %267, %cst_147 [0] : vector<72x64xf32> to vector<64xf32>
    %269 = vector.shape_cast %268 : vector<64xf32> to vector<1x64xf32>
    %cst_148 = arith.constant 3.200000e+01 : f32
    %270 = vector.broadcast %cst_148 : f32 to vector<1x64xf32>
    %271 = arith.divf %269, %270 : vector<1x64xf32>
    %272 = arith.mulf %266, %266 : vector<1x64xf32>
    %273 = arith.subf %271, %272 : vector<1x64xf32>
    %274 = vector.broadcast %266 : vector<1x64xf32> to vector<72x64xf32>
    %275 = arith.subf %262, %274 : vector<72x64xf32>
    %cst_149 = arith.constant 9.99999974E-6 : f32
    %276 = vector.broadcast %cst_149 : f32 to vector<1x64xf32>
    %277 = arith.addf %273, %276 : vector<1x64xf32>
    %278 = math.rsqrt %277 : vector<1x64xf32>
    %279 = vector.broadcast %278 : vector<1x64xf32> to vector<72x64xf32>
    %280 = arith.mulf %275, %279 : vector<72x64xf32>
    %281 = vector.broadcast %242 : vector<1x64xf32> to vector<72x64xf32>
    %282 = arith.mulf %280, %281 : vector<72x64xf32>
    %283 = vector.broadcast %243 : vector<1x64xf32> to vector<72x64xf32>
    %284 = arith.addf %282, %283 : vector<72x64xf32>
    %285 = arith.mulf %284, %237 : vector<72x64xf32>
    %c16_150 = arith.constant 16 : index
    %c0_151 = arith.constant 0 : index
    %286 = vector.load %arg6[%c16_150, %c0_151] : memref<104x128xf32, #tpu.memory_space<vmem>>, vector<72x64xf32>
    tpu.vector_store %arg6[%c16_150, %c0_151], %285 {strides = array<i32>} : memref<104x128xf32, #tpu.memory_space<vmem>>, vector<72x64xf32>,
    %c9_152 = arith.constant 9 : index
    %c0_153 = arith.constant 0 : index
    %287 = vector.load %arg6[%c9_152, %c0_153] : memref<104x128xf32, #tpu.memory_space<vmem>>, vector<72x64xf32>
    %c10_154 = arith.constant 10 : index
    %c0_155 = arith.constant 0 : index
    %288 = vector.load %arg6[%c10_154, %c0_155] : memref<104x128xf32, #tpu.memory_space<vmem>>, vector<72x64xf32>
    %c11_156 = arith.constant 11 : index
    %c0_157 = arith.constant 0 : index
    %289 = vector.load %arg6[%c11_156, %c0_157] : memref<104x128xf32, #tpu.memory_space<vmem>>, vector<72x64xf32>
    %c15_158 = arith.constant 15 : index
    %c0_159 = arith.constant 0 : index
    %290 = vector.load %arg6[%c15_158, %c0_159] : memref<104x128xf32, #tpu.memory_space<vmem>>, vector<72x64xf32>
    %c17_160 = arith.constant 17 : index
    %c0_161 = arith.constant 0 : index
    %291 = vector.load %arg6[%c17_160, %c0_161] : memref<104x128xf32, #tpu.memory_space<vmem>>, vector<72x64xf32>
    %c21_162 = arith.constant 21 : index
    %c0_163 = arith.constant 0 : index
    %292 = vector.load %arg6[%c21_162, %c0_163] : memref<104x128xf32, #tpu.memory_space<vmem>>, vector<72x64xf32>
    %c22_164 = arith.constant 22 : index
    %c0_165 = arith.constant 0 : index
    %293 = vector.load %arg6[%c22_164, %c0_165] : memref<104x128xf32, #tpu.memory_space<vmem>>, vector<72x64xf32>
    %c23_166 = arith.constant 23 : index
    %c0_167 = arith.constant 0 : index
    %294 = vector.load %arg6[%c23_166, %c0_167] : memref<104x128xf32, #tpu.memory_space<vmem>>, vector<72x64xf32>
    %295 = tpu.concatenate %287, %288, %289, %290, %285, %291, %292, %293, %294 in 1 : vector<72x64xf32>, vector<72x64xf32>, vector<72x64xf32>, vector<72x64xf32>, vector<72x64xf32>, vector<72x64xf32>, vector<72x64xf32>, vector<72x64xf32>, vector<72x64xf32> -> vector<72x576xf32>
    %cst_168 = arith.constant dense<0.000000e+00> : vector<72x64xf32>
    %296 = tpu.matmul %295, %239, %cst_168 {dimension_numbers = #tpu.dot_dimension_numbers<[1], [0], [0], [1], [0, 0, 1, 1], [], []>} : vector<72x576xf32>, vector<576x64xf32>, vector<72x64xf32> -> vector<72x64xf32>
    %297 = vector.broadcast %244 : vector<1x64xf32> to vector<72x64xf32>
    %298 = arith.addf %296, %297 : vector<72x64xf32>
    %299 = arith.addf %298, %236 : vector<72x64xf32>
    %cst_169 = arith.constant 0.000000e+00 : f32
    %300 = vector.broadcast %cst_169 : f32 to vector<72x64xf32>
    %301 = arith.maximumf %299, %300 : vector<72x64xf32>
    %302 = arith.mulf %301, %237 : vector<72x64xf32>
    %cst_170 = arith.constant dense<0.000000e+00> : vector<64xf32>
    %303 = vector.multi_reduction <add>, %302, %cst_170 [0] : vector<72x64xf32> to vector<64xf32>
    %304 = vector.shape_cast %303 : vector<64xf32> to vector<1x64xf32>
    %cst_171 = arith.constant 3.200000e+01 : f32
    %305 = vector.broadcast %cst_171 : f32 to vector<1x64xf32>
    %306 = arith.divf %304, %305 : vector<1x64xf32>
    %307 = arith.mulf %302, %302 : vector<72x64xf32>
    %cst_172 = arith.constant dense<0.000000e+00> : vector<64xf32>
    %308 = vector.multi_reduction <add>, %307, %cst_172 [0] : vector<72x64xf32> to vector<64xf32>
    %309 = vector.shape_cast %308 : vector<64xf32> to vector<1x64xf32>
    %cst_173 = arith.constant 3.200000e+01 : f32
    %310 = vector.broadcast %cst_173 : f32 to vector<1x64xf32>
    %311 = arith.divf %309, %310 : vector<1x64xf32>
    %312 = arith.mulf %306, %306 : vector<1x64xf32>
    %313 = arith.subf %311, %312 : vector<1x64xf32>
    %314 = vector.broadcast %306 : vector<1x64xf32> to vector<72x64xf32>
    %315 = arith.subf %302, %314 : vector<72x64xf32>
    %cst_174 = arith.constant 9.99999974E-6 : f32
    %316 = vector.broadcast %cst_174 : f32 to vector<1x64xf32>
    %317 = arith.addf %313, %316 : vector<1x64xf32>
    %318 = math.rsqrt %317 : vector<1x64xf32>
    %319 = vector.broadcast %318 : vector<1x64xf32> to vector<72x64xf32>
    %320 = arith.mulf %315, %319 : vector<72x64xf32>
    %321 = vector.broadcast %245 : vector<1x64xf32> to vector<72x64xf32>
    %322 = arith.mulf %320, %321 : vector<72x64xf32>
    %323 = vector.broadcast %246 : vector<1x64xf32> to vector<72x64xf32>
    %324 = arith.addf %322, %323 : vector<72x64xf32>
    %c1760 = arith.constant 1760 : index
    %c0_175 = arith.constant 0 : index
    %325 = vector.load %arg1[%c1760, %c0_175] : memref<2904x128xf32, #tpu.memory_space<vmem>>, vector<64x128xf32>
    %cst_176 = arith.constant dense<0.000000e+00> : vector<72x128xf32>
    %326 = tpu.matmul %324, %325, %cst_176 {dimension_numbers = #tpu.dot_dimension_numbers<[1], [0], [0], [1], [0, 0, 1, 1], [], []>} : vector<72x64xf32>, vector<64x128xf32>, vector<72x128xf32> -> vector<72x128xf32>
    %c2896 = arith.constant 2896 : index
    %c0_177 = arith.constant 0 : index
    %327 = vector.load %arg1[%c2896, %c0_177] : memref<2904x128xf32, #tpu.memory_space<vmem>>, vector<1x128xf32>
    %328 = vector.broadcast %327 : vector<1x128xf32> to vector<72x128xf32>
    %329 = arith.addf %326, %328 : vector<72x128xf32>
    %c16_178 = arith.constant 16 : index
    %c0_179 = arith.constant 0 : index
    %330 = vector.load %arg6[%c16_178, %c0_179] : memref<104x128xf32, #tpu.memory_space<vmem>>, vector<72x128xf32>
    tpu.vector_store %arg6[%c16_178, %c0_179], %329 {strides = array<i32>} : memref<104x128xf32, #tpu.memory_space<vmem>>, vector<72x128xf32>,
    %c16_180 = arith.constant 16 : index
    %c0_181 = arith.constant 0 : index
    %331 = vector.load %arg6[%c16_180, %c0_181] : memref<104x128xf32, #tpu.memory_space<vmem>>, vector<72x128xf32>
    %c17_182 = arith.constant 17 : index
    %c0_183 = arith.constant 0 : index
    %332 = vector.load %arg6[%c17_182, %c0_183] : memref<104x128xf32, #tpu.memory_space<vmem>>, vector<72x128xf32>
    %333 = arith.maximumf %331, %332 : vector<72x128xf32>
    %c22_184 = arith.constant 22 : index
    %c0_185 = arith.constant 0 : index
    %334 = vector.load %arg6[%c22_184, %c0_185] : memref<104x128xf32, #tpu.memory_space<vmem>>, vector<72x128xf32>
    %c23_186 = arith.constant 23 : index
    %c0_187 = arith.constant 0 : index
    %335 = vector.load %arg6[%c23_186, %c0_187] : memref<104x128xf32, #tpu.memory_space<vmem>>, vector<72x128xf32>
    %336 = arith.maximumf %334, %335 : vector<72x128xf32>
    %337 = arith.maximumf %333, %336 : vector<72x128xf32>
    %c2168 = arith.constant 2168 : index
    %c0_188 = arith.constant 0 : index
    %338 = vector.load %arg1[%c2168, %c0_188] : memref<2904x128xf32, #tpu.memory_space<vmem>>, vector<2x72xf32>
    %cst_189 = arith.constant dense<0.000000e+00> : vector<2x128xf32>
    %339 = tpu.matmul %338, %337, %cst_189 {dimension_numbers = #tpu.dot_dimension_numbers<[1], [0], [0], [1], [0, 0, 1, 1], [], []>} : vector<2x72xf32>, vector<72x128xf32>, vector<2x128xf32> -> vector<2x128xf32>
    %c0_190 = arith.constant 0 : index
    %c0_191 = arith.constant 0 : index
    %340 = vector.load %arg2[%c0_190, %c0_191] : memref<136x158xf32, #tpu.memory_space<vmem>>, vector<128x158xf32>
    %c128 = arith.constant 128 : index
    %c0_192 = arith.constant 0 : index
    %341 = vector.load %arg2[%c128, %c0_192] : memref<136x158xf32, #tpu.memory_space<vmem>>, vector<1x158xf32>
    %cst_193 = arith.constant dense<0.000000e+00> : vector<2x158xf32>
    %342 = tpu.matmul %339, %340, %cst_193 {dimension_numbers = #tpu.dot_dimension_numbers<[1], [0], [0], [1], [0, 0, 1, 1], [], []>} : vector<2x128xf32>, vector<128x158xf32>, vector<2x158xf32> -> vector<2x158xf32>
    %343 = vector.broadcast %341 : vector<1x158xf32> to vector<2x158xf32>
    %344 = arith.addf %342, %343 : vector<2x158xf32>
    %cst_194 = arith.constant dense<0xFF800000> : vector<2xf32>
    %345 = vector.multi_reduction <maximumf>, %344, %cst_194 [1] : vector<2x158xf32> to vector<2xf32>
    %346 = vector.shape_cast %345 : vector<2xf32> to vector<2x1xf32>
    %347 = vector.broadcast %346 : vector<2x1xf32> to vector<2x158xf32>
    %348 = arith.subf %344, %347 : vector<2x158xf32>
    %349 = math.exp %348 : vector<2x158xf32>
    %cst_195 = arith.constant dense<0.000000e+00> : vector<2xf32>
    %350 = vector.multi_reduction <add>, %349, %cst_195 [1] : vector<2x158xf32> to vector<2xf32>
    %351 = vector.shape_cast %350 : vector<2xf32> to vector<2x1xf32>
    %352 = vector.broadcast %351 : vector<2x1xf32> to vector<2x158xf32>
    %353 = arith.divf %349, %352 : vector<2x158xf32>
    %c0_196 = arith.constant 0 : index
    %c0_197 = arith.constant 0 : index
    %354 = vector.load %arg3[%c0_196, %c0_197] : memref<2x158xf32, #tpu.memory_space<vmem>>, vector<2x158xf32>
    tpu.vector_store %arg3[%c0_196, %c0_197], %353 {strides = array<i32>} : memref<2x158xf32, #tpu.memory_space<vmem>>, vector<2x158xf32>,
    return
  }
}

</mosaic_0001>

<bundles_post_ra>
// kernel: resnet_forward.1
= control target key start
LH: loop header
LB: loop body
LE: loop exit
PB: predicated region body
PF: predicated region fallthrough
CT: control target
= control target key end

     0   :  { %8 = vsyncpa [#allocation6], 0  ;;  %s16063_s0 = inlined_call_operand.vmem [shape: f32[36,18], index: 0, kind: input, shape index: {}]   ;;  %s16064_s1 = inlined_call_operand.hbm [shape: f32[2904,128], index: 1, kind: input, shape index: {}]   ;;  %s16065_s2 = inlined_call_operand.hbm [shape: f32[136,158], index: 2, kind: input, shape index: {}]   ;;  %s16066_s3 = inlined_call_operand.hbm [shape: f32[2,158], index: 3, kind: output, shape index: {}]  }
   0x1   :  { %9 = vsyncpa [#allocation9], 0 }
   0x2   :  { %10 = vsyncpa [#allocation7], 0  ;;  %s11822_s12 = smov [#allocation5]  }
   0x3   :  { %s18_s13 = sshll.u32 %s11822_s12, 4  ;;  %s19_s13 = int_to_ptr.vmem [resolvable:$true] %s18_s13 }
   0x4   :  { %s11764_s14 = scalar_lea.vmem %s19_s13, 46464  ;;  %p11769_p1 = scmp.lt.s32.totalorder %s19_s13, %s19_s13 }
   0x5   :  { %p11765_p0 = scmp.ne.s32.totalorder %s19_s13, %s11764_s14  ;;  %p11770_p2 = scmp.lt.s32.totalorder %s11764_s14, %s11764_s14 }
   0x7   :  { %p11771_p3 = por %p11770_p2, %p11769_p1 }
   0x9   :  { %p11772_p4 = pnand %p11771_p3, %p11765_p0 }
   0xb   :  { %11775 = shalt.err (!%p11772_p4)
}
   0xc   :  { %s11823_s15 = smov 128   ;;  %s11824_s16 = smov 8  }
   0xd   :  { %24 = dma.hbm_to_vmem [thread:$0]  %s16064_s1, 46464, %s19_s13, [#allocation6], %s11823_s15, %s11823_s15, %s11824_s16  }
   0xe   :  { %s11825_s19 = smov [#allocation8]  }
   0xf   :  { %s30_s20 = sshll.u32 %s11825_s19, 4  ;;  %s31_s20 = int_to_ptr.vmem [resolvable:$true] %s30_s20 }
  0x10   :  { %s11784_s21 = scalar_lea.vmem %s31_s20, 4352  ;;  %p11789_p6 = scmp.lt.s32.totalorder %s31_s20, %s31_s20 }
  0x11   :  { %p11785_p5 = scmp.ne.s32.totalorder %s31_s20, %s11784_s21  ;;  %p11790_p7 = scmp.lt.s32.totalorder %s11784_s21, %s11784_s21 }
  0x13   :  { %p11791_p8 = por %p11790_p7, %p11789_p6 }
  0x15   :  { %p11792_p9 = pnand %p11791_p8, %p11785_p5 }
  0x17   :  { %11795 = shalt.err (!%p11792_p9)
}
  0x18   :  { %s11826_s22 = smov 256   ;;  %s11827_s23 = smov 16  }
  0x19   :  { %36 = dma.hbm_to_vmem [thread:$0]  %s16065_s2, 4352, %s31_s20, [#allocation9], %s11826_s22, %s11826_s22, %s11827_s23  }
  0x1a   :  { %11816 = dma.done.wait [#allocation6], 46464  }
  0x1b   :  { %11817 = vsyncadd [#allocation6], 4294920832 }
  0x1c   :  { %11818 = dma.done.wait [#allocation9], 4352  }
  0x1d   :  { %11819 = vsyncadd [#allocation9], 4294962944  ;;  %vm43_vm0 = vcmask 146432   ;;  %v11828_v0 = vmov 0.0   ;;  %vm11829_vm1 = vmmov 0   ;;  %vm88_vm2 = vcmask 142336  }
  0x1e   :  { %55 = vst [vmem:[#allocation4] sm:$0xff] %v11828_v0  ;;  %56 = vst [vmem:[#allocation4 + $0x8] sm:$0xff] %v11828_v0  ;;  %9650 = vmatprep.subr.mxu0 %v11828_v0  ;;  %9679 = vmatprep.subr.mxu1 %v11828_v0  ;;  %vm171_vm3 = vcmask 1045504   ;;  %v11892_v1 = vld [vmem:[%s16063_s0] sm:$0xff]  ;;  %v11897_v2 = vld [vmem:[%s16063_s0 + $0x8] sm:$0xff]  ;;  %s11830_s30 = smov 18  }
  0x1f   :  { %57 = vst [vmem:[#allocation4 + $0x58] sm:$0xff] %v11828_v0  ;;  %45 = vst.msk [vmem:[#allocation2 + $0x8] sm:$0xff] %vm43_vm0, %v11828_v0  ;;  %9664 = vmatprep.mubr.msk.f32.mxu0 %vm11829_vm1, %v11828_v0  ;;  %9693 = vmatprep.mubr.msk.f32.mxu1 %vm11829_vm1, %v11828_v0  ;;  %v11902_v3 = vld [vmem:[%s16063_s0 + $0x10] sm:$0xff]  ;;  %v11917_v4 = vld [vmem:[%s16063_s0 + $0x18] sm:$0xff]  ;;  %vm145_vm4 = vcmask 293888   ;;  %vm155_vm5 = vcmask 441344  }
  0x20   :  { %44 = vst.msk [vmem:[#allocation2] sm:$0xff] %vm43_vm0, %v11828_v0  ;;  %46 = vst.msk [vmem:[#allocation2 + $0x10] sm:$0xff] %vm43_vm0, %v11828_v0  ;;  %105 = vrot.lane.b32.xlu0 %v11892_v1, %s11830_s30  ;;  %107 = vrot.lane.b32.xlu1 %v11897_v2, %s11830_s30  ;;  %v11922_v5 = vld [vmem:[%s16063_s0 + $0x20] sm:$0xf]  ;;  %v75_v7 = vld [vmem:[#allocation5 + $0xad8] sm:$0xff]  ;;  %s11831_s0 = smov 36  }
  0x21   :  { %47 = vst.msk [vmem:[#allocation2 + $0x18] sm:$0xff] %vm43_vm0, %v11828_v0  ;;  %48 = vst.msk [vmem:[#allocation2 + $0x20] sm:$0xff] %vm43_vm0, %v11828_v0  ;;  %v76_v6 = vld [vmem:[#allocation5 + $0xae0] sm:$0x3f]  ;;  %v74_v8 = vld [vmem:[#allocation5 + $0xad0] sm:$0xff]  ;;  %s11832_s9 = smov 127  }
  0x22   :  { %49 = vst.msk [vmem:[#allocation2 + $0x28] sm:$0xff] %vm43_vm0, %v11828_v0  ;;  %84 = vst.msk [vmem:[#allocation2 + $0x8] sm:$0xff] %vm43_vm0, %v11892_v1  ;;  %9651 = vmatpush3.msk.msra.mxu0 %vm171_vm3, %v76_v6  ;;  %v73_v9 = vld [vmem:[#allocation5 + $0xac8] sm:$0xff]  ;;  %v72_v12 = vld [vmem:[#allocation5 + $0xac0] sm:$0xff]  ;;  %s11833_s10 = smov 126   ;;  %vm293_vm6 = vcmask 1043456  }
  0x23   :  { %85 = vst.msk [vmem:[#allocation2 + $0x10] sm:$0xff] %vm43_vm0, %v11897_v2  ;;  %86 = vst.msk [vmem:[#allocation2 + $0x18] sm:$0xff] %vm43_vm0, %v11902_v3  ;;  %9652 = vmatprep.subr.mxu0 %v11828_v0  ;;  %v71_v14 = vld [vmem:[#allocation5 + $0xab8] sm:$0xff]  ;;  %v70_v15 = vld [vmem:[#allocation5 + $0xab0] sm:$0xff]  ;;  %s11834_s13 = smov 125   ;;  %s11835_s15 = smov 124  }
  0x24   :  { %87 = vst.msk [vmem:[#allocation2 + $0x20] sm:$0xff] %vm43_vm0, %v11917_v4  ;;  %9653 = vmatpush3.msra.mxu0 %v75_v7  ;;  %v11939_v16 = vld [vmem:[#allocation5 + $0xb20] sm:$0x1]  ;;  %v11980_v53 = vld [vmem:[#allocation5 + $0x888] sm:$0xff]  ;;  %v11989_v61 = vld [vmem:[#allocation5 + $0x890] sm:$0xff]  ;;  %s11836_s16 = smov 123  }
  0x25   :  { %89 = vst.msk [vmem:[#allocation2 + $0x28] sm:$0xf] %vm88_vm2, %v11922_v5  ;;  %9654 = vmatprep.subr.mxu0 %v11828_v0  ;;  %v11975_v47 = vld [vmem:[#allocation5 + $0x880] sm:$0xff]  ;;  %vm1273_vm7 = vcmask 1041408   ;;  %vm2190_vm8 = vcmask 64512   ;;  %vm50_vm9 = vcmask 523264  }
  0x26   :  { %9655 = vmatpush3.msra.mxu0 %v74_v8  ;;  %10705 = vpush %v11939_v16  ;;  %vm2599_vm10 = vcmask 261120   ;;  %s11837_s19 = smov 32   ;;  %s11838_s20 = smov 64   ;;  %vm3379_vm11 = vcmask 785408   ;;  %vm6418_vm12 = vcmask 588800   ;;  %vm8694_vm13 = vcmask 238592  }
  0x27   :  { %9656 = vmatprep.subr.mxu0 %v11828_v0  ;;  %s11839_s21 = smov 96   ;;  %vm8724_vm14 = vcmask 240642   ;;  %s11841_s22 = smov [#allocation10]  }
  0x28   :  { %9657 = vmatpush3.msra.mxu0 %v73_v9  ;;  %s8733_s23 = sshll.u32 %s11841_s22, 4  ;;  %vm8725_vm15 = vmor %vm8724_vm14, %vm1273_vm7  ;;  %s8734_s23 = int_to_ptr.vmem [resolvable:$true] %s8733_s23 }
  0x29   :  { %9658 = vmatprep.subr.mxu0 %v11828_v0  ;;  %v90_v21 = vld [vmem:[#allocation2 + $0x7] sm:$0xff]  ;;  %s11796_s24 = scalar_lea.vmem %s8734_s23, 64  ;;  %p11801_p11 = scmp.lt.s32.totalorder %s8734_s23, %s8734_s23 }
  0x2a   :  { %v95_v10 = vld [vmem:[#allocation2 + $0x9] sm:$0xff]  ;;  %v96_v11 = vld [vmem:[#allocation2 + $0x11] sm:$0xff]  ;;  %9659 = vmatpush3.msra.mxu0 %v72_v12  ;;  %p11797_p10 = scmp.ne.s32.totalorder %s8734_s23, %s11796_s24  ;;  %p11802_p12 = scmp.lt.s32.totalorder %s11796_s24, %s11796_s24 }
  0x2b   :  { %125 = vrot.lane.b32.xlu0 %v95_v10, %s11831_s0  ;;  %127 = vrot.lane.b32.xlu1 %v96_v11, %s11831_s0  ;;  %v97_v13 = vld [vmem:[#allocation2 + $0x19] sm:$0xff]  ;;  %v91_v22 = vld [vmem:[#allocation2 + $0xf] sm:$0xff] }
  0x2c   :  { %9660 = vmatprep.subr.mxu0 %v11828_v0  ;;  %v98_v17 = vld [vmem:[#allocation2 + $0x21] sm:$0xff]  ;;  %v99_v18 = vld [vmem:[#allocation2 + $0x29] sm:$0xf]  ;;  %v92_v28 = vld [vmem:[#allocation2 + $0x17] sm:$0xff]  ;;  %p11803_p13 = por %p11802_p12, %p11801_p11 }
  0x2d   :  { %9661 = vmatpush3.msra.mxu0 %v71_v14  ;;  %v93_v33 = vld [vmem:[#allocation2 + $0x1f] sm:$0xff]  ;;  %v94_v38 = vld [vmem:[#allocation2 + $0x27] sm:$0xf] }
  0x2e   :  { %9662 = vmatprep.subr.mxu0 %v11828_v0  ;;  %v11999_v12 = vld [vmem:[#allocation5 + $0x898] sm:$0xff]  ;;  %p11804_p0 = pnand %p11803_p13, %p11797_p10 }
  0x2f   :  { %109 = vrot.lane.b32.xlu0 %v11902_v3, %s11830_s30  ;;  %129 = vrot.lane.b32.xlu1 %v97_v13, %s11831_s0 }
  0x30   :  { %9663 = vmatpush3.msra.mxu0 %v70_v15 }
  0x31   :  { %9708 = vmatprep.subr.mxu0 %v11828_v0 }
  0x33   :  { %111 = vrot.lane.b32.xlu0 %v11917_v4, %s11830_s30  ;;  %131 = vrot.lane.b32.xlu1 %v98_v17, %s11831_s0 }
  0x37   :  { %113 = vrot.lane.b32.xlu0 %v11922_v5, %s11830_s30  ;;  %133 = vrot.lane.b32.xlu1 %v99_v18, %s11831_s0 }
  0x57   :  { %s10706_s8 = spop %10705 }
  0x58   :  { %v153_v44 = vstv %s10706_s8 }
  0x92   :  { %v106_v19 = vpop.permute.xlu0 %105  ;;  %v108_v20 = vpop.permute.xlu1 %107 }
  0x93   :  { %v140_v23 = vsel %vm43_vm0, %v90_v21, %v106_v19  ;;  %v141_v27 = vsel %vm43_vm0, %v91_v22, %v108_v20 }
  0x9d   :  { %v126_v24 = vpop.permute.xlu0 %125  ;;  %v128_v25 = vpop.permute.xlu1 %127 }
  0x9e   :  { %v146_v26 = vsel %vm145_vm4, %v140_v23, %v126_v24  ;;  %v147_v31 = vsel %vm145_vm4, %v141_v27, %v128_v25  ;;  %v12014_v27 = vld [vmem:[#allocation5 + $0x8a0] sm:$0xf] }
  0x9f   :  { %9665 = vmatmul.mubr.msk.f32.vlgmr.msra.gmra.mxu0 %vm155_vm5, %v146_v26 }
  0xa0   :  { %9667 = vmatprep.mubr.msk.f32.mxu0 %vm11829_vm1, %v11828_v0 }
  0xa1   :  { %v110_v29 = vpop.permute.xlu0 %109  ;;  %v130_v30 = vpop.permute.xlu1 %129 }
  0xa2   :  { %v142_v32 = vsel %vm43_vm0, %v92_v28, %v110_v29 }
  0xa3   :  { %9668 = vmatmul.mubr.msk.f32.gmra.mxu0 %vm155_vm5, %v147_v31  ;;  %v148_v34 = vsel %vm145_vm4, %v142_v32, %v130_v30 }
  0xa4   :  { %9670 = vmatprep.mubr.msk.f32.mxu0 %vm11829_vm1, %v11828_v0 }
  0xa5   :  { %v112_v35 = vpop.permute.xlu0 %111  ;;  %v132_v36 = vpop.permute.xlu1 %131 }
  0xa6   :  { %v143_v37 = vsel %vm43_vm0, %v93_v33, %v112_v35  ;;  %v83_v33 = vld [vmem:[#allocation5 + $0xb18] sm:$0x3f] }
  0xa7   :  { %9671 = vmatmul.mubr.msk.f32.gmra.mxu0 %vm155_vm5, %v148_v34  ;;  %v149_v39 = vsel %vm145_vm4, %v143_v37, %v132_v36  ;;  %v82_v34 = vld [vmem:[#allocation5 + $0xb10] sm:$0xff]  ;;  %9680 = vmatpush3.msk.msra.mxu1 %vm171_vm3, %v83_v33 }
  0xa8   :  { %9673 = vmatprep.mubr.msk.f32.mxu0 %vm11829_vm1, %v11828_v0  ;;  %9681 = vmatprep.subr.mxu1 %v11828_v0 }
  0xa9   :  { %v114_v40 = vpop.permute.xlu0 %113  ;;  %v134_v41 = vpop.permute.xlu1 %133  ;;  %9682 = vmatpush3.msra.mxu1 %v82_v34 }
  0xaa   :  { %v144_v42 = vsel %vm43_vm0, %v94_v38, %v114_v40  ;;  %9683 = vmatprep.subr.mxu1 %v11828_v0 }
  0xab   :  { %9674 = vmatmul.mubr.msk.f32.gmra.mxu0 %vm155_vm5, %v149_v39  ;;  %v150_v43 = vsel %vm145_vm4, %v144_v42, %v134_v41 }
  0xac   :  { %9676 = vmatprep.mubr.msk.f32.mxu0 %vm11829_vm1, %v11828_v0 }
  0xaf   :  { %9677 = vmatmul.mubr.msk.f32.gmra.mxu0 %vm155_vm5, %v150_v43 }
  0xb0   :  { %9718 = vmatprep.mubr.msk.f32.mxu0 %vm11829_vm1, %v11828_v0 }
 0x15f   :  { %v241_v45 = vpop.f32.mrf.mxu0 }
 0x160   :  { %v242_v46 = vadd.f32 %v241_v45, %v153_v44 }
 0x161   :  { %v9666_v48 = vpop.f32.mrf.mxu0 }
 0x162   :  { %v265_v49 = vmax.f32 %v242_v46, 0.0 }
 0x163   :  { %v246_v50 = vpop.f32.mrf.mxu0 }
 0x164   :  { %v11978_v51 = vmul.f32 %v265_v49, %v11975_v47  ;;  %v247_v52 = vadd.f32 %v246_v50, %v153_v44 }
 0x165   :  { %v9669_v54 = vpop.f32.mrf.mxu0 }
 0x166   :  { %v266_v55 = vmax.f32 %v247_v52, 0.0  ;;  %v275_v56 = vsel %vm43_vm0, %v11978_v51, 0.0  ;;  %v304_v57 = vmul.f32 %v11978_v51, %v11978_v51 }
 0x167   :  { %276 = vadd.xlane.f32.xlu0 %v275_v56  ;;  %v251_v58 = vpop.f32.mrf.mxu0 }
 0x168   :  { %v11987_v59 = vmul.f32 %v266_v55, %v11980_v53  ;;  %v252_v60 = vadd.f32 %v251_v58, %v153_v44  ;;  %v309_v6 = vsel %vm43_vm0, %v304_v57, 0.0 }
 0x169   :  { %v9672_v62 = vpop.f32.mrf.mxu0 }
 0x16a   :  { %v267_v63 = vmax.f32 %v252_v60, 0.0  ;;  %v278_v7 = vsel %vm43_vm0, %v11987_v59, 0.0  ;;  %v305_v8 = vmul.f32 %v11987_v59, %v11987_v59 }
 0x16b   :  { %310 = vadd.xlane.f32.xlu0 %v309_v6  ;;  %279 = vadd.xlane.f32.xlu1 %v278_v7  ;;  %v256_v9 = vpop.f32.mrf.mxu0 }
 0x16c   :  { %v11997_v10 = vmul.f32 %v267_v63, %v11989_v61  ;;  %v257_v11 = vadd.f32 %v256_v9, %v153_v44  ;;  %v312_v15 = vsel %vm43_vm0, %v305_v8, 0.0 }
 0x16d   :  { %v9675_v13 = vpop.f32.mrf.mxu0 }
 0x16e   :  { %v268_v14 = vmax.f32 %v257_v11, 0.0  ;;  %v281_v17 = vsel %vm43_vm0, %v11997_v10, 0.0  ;;  %v306_v18 = vmul.f32 %v11997_v10, %v11997_v10 }
 0x16f   :  { %313 = vadd.xlane.f32.xlu1 %v312_v15  ;;  %282 = vadd.xlane.f32.xlu0 %v281_v17  ;;  %v261_v19 = vpop.f32.mrf.mxu0 }
 0x170   :  { %v12007_v20 = vmul.f32 %v268_v14, %v11999_v12  ;;  %v262_v21 = vadd.f32 %v261_v19, %v153_v44  ;;  %v315_v24 = vsel %vm43_vm0, %v306_v18, 0.0 }
 0x171   :  { %v9678_v22 = vpop.f32.mrf.mxu0 }
 0x172   :  { %v269_v23 = vmax.f32 %v262_v21, 0.0  ;;  %v284_v25 = vsel %vm43_vm0, %v12007_v20, 0.0  ;;  %v307_v26 = vmul.f32 %v12007_v20, %v12007_v20 }
 0x173   :  { %316 = vadd.xlane.f32.xlu1 %v315_v24  ;;  %285 = vadd.xlane.f32.xlu0 %v284_v25  ;;  %v81_v25 = vld [vmem:[#allocation5 + $0xb08] sm:$0xff] }
 0x174   :  { %v12017_v28 = vmul.f32 %v269_v23, %v12014_v27  ;;  %v318_v29 = vsel %vm43_vm0, %v307_v26, 0.0  ;;  %v80_v26 = vld [vmem:[#allocation5 + $0xb00] sm:$0xff]  ;;  %9684 = vmatpush3.msra.mxu1 %v81_v25 }
 0x175   :  { %9685 = vmatprep.subr.mxu1 %v11828_v0 }
 0x176   :  { %v287_v30 = vsel %vm88_vm2, %v12017_v28, 0.0  ;;  %v308_v31 = vmul.f32 %v12017_v28, %v12017_v28  ;;  %9686 = vmatpush3.msra.mxu1 %v80_v26 }
 0x177   :  { %319 = vadd.xlane.f32.xlu0 %v318_v29  ;;  %9687 = vmatprep.subr.mxu1 %v11828_v0 }
 0x178   :  { %v321_v32 = vsel %vm88_vm2, %v308_v31, 0.0 }
 0x17b   :  { %288 = vadd.xlane.f32.xlu0 %v287_v30 }
 0x17f   :  { %322 = vadd.xlane.f32.xlu0 %v321_v32 }
 0x184   :  { %350 = vrot.lane.b32.xlu1 %v11939_v16, %s11832_s9 }
 0x195   :  { %360 = vrot.lane.b32.xlu0 %v11939_v16, %s11833_s10 }
 0x1f0   :  { %v277_v35 = vpop.xlane.xlu0 %276 }
 0x1f4   :  { %v311_v36 = vpop.xlane.xlu0 %310  ;;  %v280_v37 = vpop.xlane.xlu1 %279 }
 0x1f5   :  { %v290_v42 = vadd.f32 %v280_v37, %v277_v35  ;;  %v78_v37 = vld [vmem:[#allocation5 + $0xaf0] sm:$0xff] }
 0x1f8   :  { %v314_v38 = vpop.xlane.xlu1 %313  ;;  %v283_v39 = vpop.xlane.xlu0 %282 }
 0x1f9   :  { %v291_v45 = vadd.f32 %v290_v42, %v283_v39  ;;  %v324_v46 = vadd.f32 %v314_v38, %v311_v36  ;;  %v79_v36 = vld [vmem:[#allocation5 + $0xaf8] sm:$0xff] }
 0x1fa   :  { %9688 = vmatpush3.msra.mxu1 %v79_v36 }
 0x1fb   :  { %9689 = vmatprep.subr.mxu1 %v11828_v0 }
 0x1fc   :  { %v317_v40 = vpop.xlane.xlu1 %316  ;;  %v286_v41 = vpop.xlane.xlu0 %285  ;;  %9690 = vmatpush3.msra.mxu1 %v78_v37 }
 0x1fd   :  { %v292_v48 = vadd.f32 %v291_v45, %v286_v41  ;;  %v325_v52 = vadd.f32 %v324_v46, %v317_v40  ;;  %9691 = vmatprep.subr.mxu1 %v11828_v0 }
 0x200   :  { %v351_v43 = vpop.permute.xlu1 %350  ;;  %v320_v44 = vpop.xlane.xlu0 %319 }
 0x201   :  { %10707 = vpush %v351_v43  ;;  %v326_v55 = vadd.f32 %v325_v52, %v320_v44  ;;  %v77_v44 = vld [vmem:[#allocation5 + $0xae8] sm:$0xff] }
 0x202   :  { %9692 = vmatpush3.msra.mxu1 %v77_v44 }
 0x203   :  { %9793 = vmatprep.subr.mxu1 %v11828_v0 }
 0x204   :  { %v289_v49 = vpop.xlane.xlu0 %288 }
 0x205   :  { %v294_v50 = vsel %vm293_vm6, %v289_v49, 0.0 }
 0x206   :  { %v295_v54 = vadd.f32 %v294_v50, %v292_v48 }
 0x208   :  { %v296_v56 = vrot.slane %v295_v54, 4  ;;  %v323_v57 = vpop.xlane.xlu0 %322 }
 0x209   :  { %v327_v58 = vsel %vm293_vm6, %v323_v57, 0.0 }
 0x20a   :  { %v297_v60 = vadd.f32 %v296_v56, %v295_v54  ;;  %v328_v62 = vadd.f32 %v327_v58, %v326_v55 }
 0x20c   :  { %v329_v63 = vrot.slane %v328_v62, 4  ;;  %v361_v6 = vpop.permute.xlu0 %360  ;;  %v298_v7 = vrot.slane %v297_v60, 2 }
 0x20d   :  { %10709 = vpush %v361_v6 }
 0x20e   :  { %v330_v8 = vadd.f32 %v329_v63, %v328_v62  ;;  %v299_v11 = vadd.f32 %v298_v7, %v297_v60 }
 0x210   :  { %v331_v9 = vrot.slane %v330_v8, 2  ;;  %v300_v14 = vrot.slane %v299_v11, 1 }
 0x212   :  { %v332_v13 = vadd.f32 %v331_v9, %v330_v8  ;;  %v301_v17 = vadd.f32 %v300_v14, %v299_v11 }
 0x214   :  { %v333_v15 = vrot.slane %v332_v13, 1  ;;  %v303_v19 = vmul.f32 0.001953125, %v301_v17 }
 0x216   :  { %v334_v18 = vadd.f32 %v333_v15, %v332_v13  ;;  %v336_v22 = vmul.f32 %v303_v19, %v303_v19  ;;  %v338_v30 = vsub.f32 %v11978_v51, %v303_v19  ;;  %v339_v31 = vsub.f32 %v11987_v59, %v303_v19 }
 0x217   :  { %v340_v32 = vsub.f32 %v11997_v10, %v303_v19  ;;  %v341_v33 = vsub.f32 %v12007_v20, %v303_v19  ;;  %v342_v34 = vsub.f32 %v12017_v28, %v303_v19 }
 0x218   :  { %v335_v21 = vmul.f32 0.001953125, %v334_v18 }
 0x21a   :  { %v337_v23 = vsub.f32 %v335_v21, %v336_v22 }
 0x21c   :  { %v343_v24 = vadd.f32 1e-05, %v337_v23 }
 0x21e   :  { %11667 = vrsqrt.f32 %v343_v24 }
 0x22b   :  { %v11668_v29 = vpop.eup %11667 }
 0x22c   :  { %v345_v38 = vmul.f32 %v11668_v29, %v338_v30  ;;  %v346_v39 = vmul.f32 %v11668_v29, %v339_v31  ;;  %v347_v40 = vmul.f32 %v11668_v29, %v340_v32  ;;  %v348_v41 = vmul.f32 %v11668_v29, %v341_v33 }
 0x22d   :  { %v349_v51 = vmul.f32 %v11668_v29, %v342_v34 }
 0x232   :  { %s10708_s11 = spop %10707 }
 0x233   :  { %v353_v35 = vstv %s10708_s11 }
 0x234   :  { %v355_v59 = vmul.f32 %v353_v35, %v345_v38  ;;  %v356_v10 = vmul.f32 %v353_v35, %v346_v39  ;;  %v357_v42 = vmul.f32 %v353_v35, %v347_v40  ;;  %v358_v20 = vmul.f32 %v353_v35, %v348_v41 }
 0x235   :  { %v359_v28 = vmul.f32 %v353_v35, %v349_v51 }
 0x23e   :  { %s10710_s12 = spop %10709 }
 0x23f   :  { %v363_v43 = vstv %s10710_s12 }
 0x240   :  { %v367_v45 = vadd.f32 %v363_v43, %v357_v42  ;;  %v365_v46 = vadd.f32 %v363_v43, %v355_v59  ;;  %v368_v48 = vadd.f32 %v363_v43, %v358_v20  ;;  %v366_v49 = vadd.f32 %v363_v43, %v356_v10 }
 0x241   :  { %v369_v50 = vadd.f32 %v363_v43, %v359_v28 }
 0x242   :  { %v372_v52 = vmul.f32 %v367_v45, %v11989_v61  ;;  %v370_v54 = vmul.f32 %v365_v46, %v11975_v47  ;;  %v373_v55 = vmul.f32 %v368_v48, %v11999_v12  ;;  %v371_v56 = vmul.f32 %v366_v49, %v11980_v53 }
 0x243   :  { %v374_v57 = vmul.f32 %v369_v50, %v12014_v27 }
 0x244   :  { %399 = vrot.lane.b32.xlu0 %v372_v52, %s11830_s30  ;;  %377 = vst.msk [vmem:[#allocation2 + $0x18] sm:$0xff] %vm43_vm0, %v372_v52  ;;  %395 = vrot.lane.b32.xlu1 %v370_v54, %s11830_s30  ;;  %375 = vst.msk [vmem:[#allocation2 + $0x8] sm:$0xff] %vm43_vm0, %v370_v54 }
 0x245   :  { %378 = vst.msk [vmem:[#allocation2 + $0x20] sm:$0xff] %vm43_vm0, %v373_v55  ;;  %376 = vst.msk [vmem:[#allocation2 + $0x10] sm:$0xff] %vm43_vm0, %v371_v56 }
 0x246   :  { %379 = vst.msk [vmem:[#allocation2 + $0x28] sm:$0xf] %vm88_vm2, %v374_v57 }
 0x248   :  { %401 = vrot.lane.b32.xlu0 %v373_v55, %s11830_s30  ;;  %397 = vrot.lane.b32.xlu1 %v371_v56, %s11830_s30 }
 0x24b   :  { %v380_v13 = vld [vmem:[#allocation2 + $0x7] sm:$0xff] }
 0x24c   :  { %v385_v58 = vld [vmem:[#allocation2 + $0x9] sm:$0xff]  ;;  %403 = vrot.lane.b32.xlu0 %v374_v57, %s11830_s30  ;;  %v386_v60 = vld [vmem:[#allocation2 + $0x11] sm:$0xff]  ;;  %v387_v62 = vld [vmem:[#allocation2 + $0x19] sm:$0xff] }
 0x24d   :  { %415 = vrot.lane.b32.xlu1 %v385_v58, %s11831_s0  ;;  %v388_v63 = vld [vmem:[#allocation2 + $0x21] sm:$0xff]  ;;  %v389_v6 = vld [vmem:[#allocation2 + $0x29] sm:$0xf]  ;;  %v381_v19 = vld [vmem:[#allocation2 + $0xf] sm:$0xff] }
 0x24e   :  { %v382_v25 = vld [vmem:[#allocation2 + $0x17] sm:$0xff]  ;;  %v383_v31 = vld [vmem:[#allocation2 + $0x1f] sm:$0xff]  ;;  %v384_v35 = vld [vmem:[#allocation2 + $0x27] sm:$0xf] }
 0x250   :  { %440 = vrot.lane.b32.xlu0 %v11939_v16, %s11834_s13 }
 0x251   :  { %417 = vrot.lane.b32.xlu1 %v386_v60, %s11831_s0 }
 0x255   :  { %419 = vrot.lane.b32.xlu1 %v387_v62, %s11831_s0 }
 0x259   :  { %421 = vrot.lane.b32.xlu1 %v388_v63, %s11831_s0 }
 0x25d   :  { %423 = vrot.lane.b32.xlu1 %v389_v6, %s11831_s0 }
 0x2b6   :  { %v400_v7 = vpop.permute.xlu0 %399  ;;  %v396_v8 = vpop.permute.xlu1 %395 }
 0x2b7   :  { %v430_v14 = vsel %vm43_vm0, %v380_v13, %v396_v8  ;;  %v432_v26 = vsel %vm43_vm0, %v382_v25, %v400_v7 }
 0x2ba   :  { %v402_v9 = vpop.permute.xlu0 %401  ;;  %v398_v11 = vpop.permute.xlu1 %397 }
 0x2bb   :  { %v431_v21 = vsel %vm43_vm0, %v381_v19, %v398_v11  ;;  %v433_v32 = vsel %vm43_vm0, %v383_v31, %v402_v9 }
 0x2be   :  { %v404_v17 = vpop.permute.xlu0 %403 }
 0x2bf   :  { %v416_v15 = vpop.permute.xlu1 %415  ;;  %v434_v36 = vsel %vm43_vm0, %v384_v35, %v404_v17 }
 0x2c0   :  { %v435_v18 = vsel %vm145_vm4, %v430_v14, %v416_v15 }
 0x2c1   :  { %9694 = vmatmul.mubr.msk.f32.vlgmr.msra.gmra.mxu1 %vm155_vm5, %v435_v18 }
 0x2c2   :  { %9696 = vmatprep.mubr.msk.f32.mxu1 %vm11829_vm1, %v11828_v0  ;;  %v441_v24 = vpop.permute.xlu0 %440 }
 0x2c3   :  { %v418_v22 = vpop.permute.xlu1 %417  ;;  %10711 = vpush %v441_v24 }
 0x2c4   :  { %v436_v23 = vsel %vm145_vm4, %v431_v21, %v418_v22 }
 0x2c5   :  { %9697 = vmatmul.mubr.msk.f32.gmra.mxu1 %vm155_vm5, %v436_v23 }
 0x2c6   :  { %9699 = vmatprep.mubr.msk.f32.mxu1 %vm11829_vm1, %v11828_v0 }
 0x2c7   :  { %v420_v29 = vpop.permute.xlu1 %419 }
 0x2c8   :  { %v437_v30 = vsel %vm145_vm4, %v432_v26, %v420_v29 }
 0x2c9   :  { %9700 = vmatmul.mubr.msk.f32.gmra.mxu1 %vm155_vm5, %v437_v30 }
 0x2ca   :  { %9702 = vmatprep.mubr.msk.f32.mxu1 %vm11829_vm1, %v11828_v0 }
 0x2cb   :  { %v422_v33 = vpop.permute.xlu1 %421 }
 0x2cc   :  { %v438_v34 = vsel %vm145_vm4, %v433_v32, %v422_v33 }
 0x2cd   :  { %9703 = vmatmul.mubr.msk.f32.gmra.mxu1 %vm155_vm5, %v438_v34 }
 0x2ce   :  { %9705 = vmatprep.mubr.msk.f32.mxu1 %vm11829_vm1, %v11828_v0 }
 0x2cf   :  { %v424_v37 = vpop.permute.xlu1 %423 }
 0x2d0   :  { %v439_v38 = vsel %vm145_vm4, %v434_v36, %v424_v37 }
 0x2d1   :  { %9706 = vmatmul.mubr.msk.f32.gmra.mxu1 %vm155_vm5, %v439_v38 }
 0x2d2   :  { %9803 = vmatprep.mubr.msk.f32.mxu1 %vm11829_vm1, %v11828_v0 }
 0x2f4   :  { %s10712_s14 = spop %10711 }
 0x2f5   :  { %v443_v39 = vstv %s10712_s14 }
 0x381   :  { %v529_v40 = vpop.f32.mrf.mxu1 }
 0x382   :  { %v530_v41 = vadd.f32 %v529_v40, %v443_v39 }
 0x383   :  { %v9695_v51 = vpop.f32.mrf.mxu1 }
 0x384   :  { %v553_v59 = vadd.f32 %v530_v41, %v11892_v1 }
 0x385   :  { %v534_v10 = vpop.f32.mrf.mxu1 }
 0x386   :  { %v558_v42 = vmax.f32 %v553_v59, 0.0  ;;  %v535_v20 = vadd.f32 %v534_v10, %v443_v39 }
 0x387   :  { %v9698_v28 = vpop.f32.mrf.mxu1 }
 0x388   :  { %v554_v43 = vadd.f32 %v535_v20, %v11897_v2  ;;  %v12091_v44 = vmul.f32 %v558_v42, %v11975_v47 }
 0x389   :  { %v539_v45 = vpop.f32.mrf.mxu1 }
 0x38a   :  { %v559_v46 = vmax.f32 %v554_v43, 0.0  ;;  %v540_v48 = vadd.f32 %v539_v45, %v443_v39  ;;  %v568_v49 = vsel %vm43_vm0, %v12091_v44, 0.0  ;;  %v595_v50 = vmul.f32 %v12091_v44, %v12091_v44 }
 0x38b   :  { %569 = vadd.xlane.f32.xlu1 %v568_v49  ;;  %v9701_v1 = vpop.f32.mrf.mxu1 }
 0x38c   :  { %v555_v52 = vadd.f32 %v540_v48, %v11902_v3  ;;  %v12099_v54 = vmul.f32 %v559_v46, %v11980_v53  ;;  %v600_v47 = vsel %vm43_vm0, %v595_v50, 0.0 }
 0x38d   :  { %v544_v2 = vpop.f32.mrf.mxu1 }
 0x38e   :  { %v560_v55 = vmax.f32 %v555_v52, 0.0  ;;  %v545_v56 = vadd.f32 %v544_v2, %v443_v39  ;;  %v571_v57 = vsel %vm43_vm0, %v12099_v54, 0.0  ;;  %v596_v58 = vmul.f32 %v12099_v54, %v12099_v54 }
 0x38f   :  { %601 = vadd.xlane.f32.xlu1 %v600_v47  ;;  %572 = vadd.xlane.f32.xlu0 %v571_v57  ;;  %v9704_v60 = vpop.f32.mrf.mxu1 }
 0x390   :  { %v556_v62 = vadd.f32 %v545_v56, %v11917_v4  ;;  %v12108_v53 = vmul.f32 %v560_v55, %v11989_v61  ;;  %v603_v7 = vsel %vm43_vm0, %v596_v58, 0.0 }
 0x391   :  { %v549_v3 = vpop.f32.mrf.mxu1 }
 0x392   :  { %v561_v63 = vmax.f32 %v556_v62, 0.0  ;;  %v550_v6 = vadd.f32 %v549_v3, %v443_v39  ;;  %v574_v13 = vsel %vm43_vm0, %v12108_v53, 0.0  ;;  %v597_v61 = vmul.f32 %v12108_v53, %v12108_v53 }
 0x393   :  { %604 = vadd.xlane.f32.xlu0 %v603_v7  ;;  %v9707_v8 = vpop.f32.mrf.mxu1 }
 0x394   :  { %v557_v9 = vadd.f32 %v550_v6, %v11922_v5  ;;  %v12113_v11 = vmul.f32 %v561_v63, %v11999_v12  ;;  %v606_v5 = vsel %vm43_vm0, %v597_v61, 0.0 }
 0x396   :  { %v562_v14 = vmax.f32 %v557_v9, 0.0  ;;  %v577_v4 = vsel %vm43_vm0, %v12113_v11, 0.0  ;;  %v598_v15 = vmul.f32 %v12113_v11, %v12113_v11 }
 0x397   :  { %575 = vadd.xlane.f32.xlu0 %v574_v13  ;;  %578 = vadd.xlane.f32.xlu1 %v577_v4 }
 0x398   :  { %v609_v12 = vsel %vm43_vm0, %v598_v15, 0.0  ;;  %v12126_v17 = vmul.f32 %v562_v14, %v12014_v27 }
 0x39a   :  { %v580_v18 = vsel %vm88_vm2, %v12126_v17, 0.0  ;;  %v599_v19 = vmul.f32 %v12126_v17, %v12126_v17 }
 0x39b   :  { %607 = vadd.xlane.f32.xlu0 %v606_v5  ;;  %610 = vadd.xlane.f32.xlu1 %v609_v12 }
 0x39c   :  { %v612_v21 = vsel %vm88_vm2, %v599_v19, 0.0 }
 0x39f   :  { %581 = vadd.xlane.f32.xlu1 %v580_v18 }
 0x3a3   :  { %613 = vadd.xlane.f32.xlu1 %v612_v21 }
 0x3b1   :  { %641 = vrot.lane.b32.xlu0 %v11939_v16, %s11835_s15 }
 0x3b4   :  { %651 = vrot.lane.b32.xlu1 %v11939_v16, %s11836_s16 }
 0x414   :  { %v570_v27 = vpop.xlane.xlu1 %569 }
 0x418   :  { %v573_v22 = vpop.xlane.xlu0 %572  ;;  %v602_v23 = vpop.xlane.xlu1 %601 }
 0x419   :  { %v583_v29 = vadd.f32 %v573_v22, %v570_v27 }
 0x41c   :  { %v605_v24 = vpop.xlane.xlu0 %604 }
 0x41d   :  { %v615_v33 = vadd.f32 %v605_v24, %v602_v23 }
 0x420   :  { %v576_v25 = vpop.xlane.xlu0 %575  ;;  %v579_v26 = vpop.xlane.xlu1 %578 }
 0x421   :  { %v584_v30 = vadd.f32 %v583_v29, %v576_v25 }
 0x423   :  { %v585_v34 = vadd.f32 %v584_v30, %v579_v26 }
 0x424   :  { %v608_v31 = vpop.xlane.xlu0 %607  ;;  %v611_v32 = vpop.xlane.xlu1 %610 }
 0x425   :  { %v616_v35 = vadd.f32 %v615_v33, %v608_v31 }
 0x427   :  { %v617_v16 = vadd.f32 %v616_v35, %v611_v32 }
 0x428   :  { %v642_v36 = vpop.permute.xlu0 %641  ;;  %v582_v37 = vpop.xlane.xlu1 %581 }
 0x429   :  { %v586_v38 = vsel %vm293_vm6, %v582_v37, 0.0  ;;  %10713 = vpush %v642_v36  ;;  %v681_v37 = vld [vmem:[#allocation5 + $0x720] sm:$0xff] }
 0x42a   :  { %v587_v39 = vadd.f32 %v586_v38, %v585_v34  ;;  %v12159_v38 = vld [vmem:[#allocation5 + $0x9c8] sm:$0x3] }
 0x42c   :  { %v588_v40 = vrot.slane %v587_v39, 4  ;;  %v614_v41 = vpop.xlane.xlu1 %613 }
 0x42d   :  { %v618_v51 = vsel %vm293_vm6, %v614_v41, 0.0  ;;  %v12177_v41 = vld [vmem:[#allocation5 + $0x9d8] sm:$0xff] }
 0x42e   :  { %v589_v59 = vadd.f32 %v588_v40, %v587_v39  ;;  %v619_v10 = vadd.f32 %v618_v51, %v617_v16  ;;  %v12161_v39 = vld [vmem:[#allocation5 + $0x9e0] sm:$0x3]  ;;  %v682_v16 = vld [vmem:[#allocation5 + $0x728] sm:$0xff]  ;;  %v683_v51 = vld [vmem:[#allocation5 + $0x730] sm:$0xff] }
 0x42f   :  { %v12175_v40 = vld [vmem:[#allocation5 + $0x9c0] sm:$0xff] }
 0x430   :  { %v620_v42 = vrot.slane %v619_v10, 4  ;;  %v652_v20 = vpop.permute.xlu1 %651  ;;  %v590_v28 = vrot.slane %v589_v59, 2 }
 0x431   :  { %10715 = vpush %v652_v20  ;;  %v687_v20 = vld [vmem:[#allocation5 + $0x750] sm:$0xff] }
 0x432   :  { %v621_v43 = vadd.f32 %v620_v42, %v619_v10  ;;  %v591_v46 = vadd.f32 %v590_v28, %v589_v59  ;;  %v684_v59 = vld [vmem:[#allocation5 + $0x738] sm:$0xff]  ;;  %v685_v42 = vld [vmem:[#allocation5 + $0x740] sm:$0xff] }
 0x433   :  { %v12191_v10 = vld [vmem:[#allocation4] sm:$0xff] }
 0x434   :  { %v622_v45 = vrot.slane %v621_v43, 2  ;;  %v592_v49 = vrot.slane %v591_v46, 1  ;;  %v688_v28 = vld [vmem:[#allocation5 + $0x758] sm:$0xff] }
 0x436   :  { %v623_v48 = vadd.f32 %v622_v45, %v621_v43  ;;  %v593_v1 = vadd.f32 %v592_v49, %v591_v46  ;;  %v689_v43 = vld [vmem:[#allocation5 + $0x760] sm:$0xff]  ;;  %v690_v45 = vld [vmem:[#allocation5 + $0x768] sm:$0xff]  ;;  %v691_v46 = vld [vmem:[#allocation5 + $0x770] sm:$0xff] }
 0x437   :  { %v693_v49 = vld [vmem:[#allocation5 + $0x780] sm:$0xff] }
 0x438   :  { %v624_v50 = vrot.slane %v623_v48, 1  ;;  %v594_v2 = vmul.f32 0.001953125, %v593_v1  ;;  %v695_v1 = vld [vmem:[#allocation5 + $0x790] sm:$0xff] }
 0x43a   :  { %v625_v52 = vadd.f32 %v624_v50, %v623_v48  ;;  %v627_v55 = vmul.f32 %v594_v2, %v594_v2  ;;  %v629_v60 = vsub.f32 %v12091_v44, %v594_v2  ;;  %v630_v62 = vsub.f32 %v12099_v54, %v594_v2  ;;  %v692_v48 = vld [vmem:[#allocation5 + $0x778] sm:$0xff]  ;;  %v694_v50 = vld [vmem:[#allocation5 + $0x788] sm:$0xff] }
 0x43b   :  { %v631_v3 = vsub.f32 %v12108_v53, %v594_v2  ;;  %v632_v63 = vsub.f32 %v12113_v11, %v594_v2  ;;  %v633_v6 = vsub.f32 %v12126_v17, %v594_v2  ;;  %v697_v2 = vld [vmem:[#allocation5 + $0x7a0] sm:$0xff] }
 0x43c   :  { %v626_v47 = vmul.f32 0.001953125, %v625_v52  ;;  %v696_v52 = vld [vmem:[#allocation5 + $0x798] sm:$0xff] }
 0x43e   :  { %v628_v56 = vsub.f32 %v626_v47, %v627_v55  ;;  %v12277_v47 = vld [vmem:[#allocation5 + $0x9b8] sm:$0xff]  ;;  %v12279_v55 = vld [vmem:[#allocation5 + $0x9d0] sm:$0xff] }
 0x440   :  { %v634_v57 = vadd.f32 1e-05, %v628_v56  ;;  %v698_v56 = vld [vmem:[#allocation5 + $0x7a8] sm:$0xff] }
 0x442   :  { %11669 = vrsqrt.f32 %v634_v57  ;;  %v699_v57 = vld [vmem:[#allocation5 + $0x7b0] sm:$0xff] }
 0x44f   :  { %v11670_v58 = vpop.eup %11669 }
 0x450   :  { %v636_v8 = vmul.f32 %v11670_v58, %v629_v60  ;;  %v637_v9 = vmul.f32 %v11670_v58, %v630_v62  ;;  %v638_v13 = vmul.f32 %v11670_v58, %v631_v3  ;;  %v639_v14 = vmul.f32 %v11670_v58, %v632_v63  ;;  %v701_v60 = vld [vmem:[#allocation5 + $0x7c0] sm:$0xff]  ;;  %v702_v62 = vld [vmem:[#allocation5 + $0x7c8] sm:$0xff]  ;;  %v703_v3 = vld [vmem:[#allocation5 + $0x7d0] sm:$0xff] }
 0x451   :  { %v640_v4 = vmul.f32 %v11670_v58, %v633_v6  ;;  %v700_v58 = vld [vmem:[#allocation5 + $0x7b8] sm:$0xff]  ;;  %v705_v6 = vld [vmem:[#allocation5 + $0x7e0] sm:$0xff] }
 0x452   :  { %v704_v63 = vld [vmem:[#allocation5 + $0x7d8] sm:$0xff] }
 0x45a   :  { %s10714_s17 = spop %10713 }
 0x45b   :  { %v644_v7 = vstv %s10714_s17 }
 0x45c   :  { %v646_v61 = vmul.f32 %v644_v7, %v636_v8  ;;  %v647_v15 = vmul.f32 %v644_v7, %v637_v9  ;;  %v648_v5 = vmul.f32 %v644_v7, %v638_v13  ;;  %v649_v12 = vmul.f32 %v644_v7, %v639_v14 }
 0x45d   :  { %v650_v44 = vmul.f32 %v644_v7, %v640_v4 }
 0x462   :  { %s10716_s18 = spop %10715 }
 0x463   :  { %v654_v18 = vstv %s10716_s18 }
 0x464   :  { %v656_v54 = vadd.f32 %v654_v18, %v646_v61  ;;  %v657_v19 = vadd.f32 %v654_v18, %v647_v15  ;;  %v658_v53 = vadd.f32 %v654_v18, %v648_v5  ;;  %v659_v21 = vadd.f32 %v654_v18, %v649_v12 }
 0x465   :  { %v660_v11 = vadd.f32 %v654_v18, %v650_v44 }
 0x466   :  { %661 = vst.msk [vmem:[#allocation2 + $0x8] sm:$0xff] %vm43_vm0, %v656_v54  ;;  %662 = vst.msk [vmem:[#allocation2 + $0x10] sm:$0xff] %vm43_vm0, %v657_v19 }
 0x467   :  { %663 = vst.msk [vmem:[#allocation2 + $0x18] sm:$0xff] %vm43_vm0, %v658_v53  ;;  %664 = vst.msk [vmem:[#allocation2 + $0x20] sm:$0xff] %vm43_vm0, %v659_v21 }
 0x468   :  { %665 = vst.msk [vmem:[#allocation2 + $0x28] sm:$0xf] %vm88_vm2, %v660_v11 }
 0x46d   :  { %v666_v32 = vld [vmem:[#allocation2 + $0x9] sm:$0xff] }
 0x46e   :  { %v668_v24 = vld [vmem:[#allocation2 + $0x19] sm:$0xff]  ;;  %v667_v29 = vld [vmem:[#allocation2 + $0x11] sm:$0xff]  ;;  %v671_v35 = vmax.f32 %v656_v54, %v666_v32  ;;  %v676_v36 = vmin.f32 %v656_v54, %v666_v32 }
 0x46f   :  { %v670_v17 = vld [vmem:[#allocation2 + $0x29] sm:$0xf]  ;;  %v669_v27 = vld [vmem:[#allocation2 + $0x21] sm:$0xff]  ;;  %v673_v30 = vmax.f32 %v658_v53, %v668_v24  ;;  %v678_v31 = vmin.f32 %v658_v53, %v668_v24  ;;  %v672_v33 = vmax.f32 %v657_v19, %v667_v29  ;;  %v677_v34 = vmin.f32 %v657_v19, %v667_v29 }
 0x470   :  { %v675_v22 = vmax.f32 %v660_v11, %v670_v17  ;;  %v680_v23 = vmin.f32 %v660_v11, %v670_v17  ;;  %v674_v25 = vmax.f32 %v659_v21, %v669_v27  ;;  %v679_v26 = vmin.f32 %v659_v21, %v669_v27 }
 0x472   :  { %9709 = vmatpush3.msk.msra.mxu0 %vm293_vm6, %v675_v22  ;;  %9794 = vmatpush3.msk.msra.mxu1 %vm293_vm6, %v680_v23 }
 0x473   :  { %9710 = vmatprep.subr.mxu0 %v11828_v0  ;;  %9795 = vmatprep.subr.mxu1 %v11828_v0 }
 0x474   :  { %9711 = vmatpush3.msra.mxu0 %v674_v25  ;;  %9796 = vmatpush3.msra.mxu1 %v679_v26 }
 0x475   :  { %9712 = vmatprep.subr.mxu0 %v11828_v0  ;;  %9797 = vmatprep.subr.mxu1 %v11828_v0 }
 0x476   :  { %9713 = vmatpush3.msra.mxu0 %v673_v30  ;;  %9798 = vmatpush3.msra.mxu1 %v678_v31 }
 0x477   :  { %9714 = vmatprep.subr.mxu0 %v11828_v0  ;;  %9799 = vmatprep.subr.mxu1 %v11828_v0 }
 0x478   :  { %9715 = vmatpush3.msra.mxu0 %v672_v33  ;;  %9800 = vmatpush3.msra.mxu1 %v677_v34 }
 0x479   :  { %9716 = vmatprep.subr.mxu0 %v11828_v0  ;;  %9801 = vmatprep.subr.mxu1 %v11828_v0 }
 0x47a   :  { %9717 = vmatpush3.msra.mxu0 %v671_v35  ;;  %9802 = vmatpush3.msra.mxu1 %v676_v36 }
 0x47b   :  { %9719 = vmatmul.mubr.msk.f32.vlgmr.msra.gmra.mxu0 %vm145_vm4, %v681_v37  ;;  %9804 = vmatmul.mubr.msk.f32.vlgmr.msra.gmra.mxu1 %vm145_vm4, %v681_v37 }
 0x47c   :  { %9721 = vmatprep.mubr.msk.f32.mxu0 %vm11829_vm1, %v11828_v0  ;;  %9806 = vmatprep.mubr.msk.f32.mxu1 %vm11829_vm1, %v11828_v0 }
 0x47d   :  { %9878 = vmatprep.subr.mxu0 %v11828_v0  ;;  %9959 = vmatprep.subr.mxu1 %v11828_v0 }
 0x47e   :  { %9879 = vmatpush3.msk.msra.mxu0 %vm1273_vm7, %v12159_v38  ;;  %9960 = vmatpush3.msk.msra.mxu1 %vm1273_vm7, %v12161_v39 }
 0x47f   :  { %9722 = vmatmul.mubr.msk.f32.gmra.mxu0 %vm145_vm4, %v682_v16  ;;  %9807 = vmatmul.mubr.msk.f32.gmra.mxu1 %vm145_vm4, %v682_v16 }
 0x480   :  { %9724 = vmatprep.mubr.msk.f32.mxu0 %vm11829_vm1, %v11828_v0  ;;  %9809 = vmatprep.mubr.msk.f32.mxu1 %vm11829_vm1, %v11828_v0 }
 0x481   :  { %9880 = vmatprep.subr.mxu0 %v11828_v0  ;;  %9961 = vmatprep.subr.mxu1 %v11828_v0 }
 0x482   :  { %9881 = vmatpush3.msra.mxu0 %v12175_v40  ;;  %9962 = vmatpush3.msra.mxu1 %v12177_v41 }
 0x483   :  { %9725 = vmatmul.mubr.msk.f32.gmra.mxu0 %vm145_vm4, %v683_v51  ;;  %9810 = vmatmul.mubr.msk.f32.gmra.mxu1 %vm145_vm4, %v683_v51 }
 0x484   :  { %9727 = vmatprep.mubr.msk.f32.mxu0 %vm11829_vm1, %v11828_v0  ;;  %9812 = vmatprep.mubr.msk.f32.mxu1 %vm11829_vm1, %v12191_v10  ;;  %v686_v0 = vld [vmem:[#allocation5 + $0x748] sm:$0xff] }
 0x485   :  { %9882 = vmatprep.subr.mxu0 %v12191_v10  ;;  %9963 = vmatprep.subr.mxu1 %v12191_v10 }
 0x486   :  { %9883 = vmatpush3.msra.mxu0 %v12277_v47  ;;  %9964 = vmatpush3.msra.mxu1 %v12279_v55 }
 0x487   :  { %9728 = vmatmul.mubr.msk.f32.gmra.mxu0 %vm145_vm4, %v684_v59  ;;  %9813 = vmatmul.mubr.msk.f32.gmra.mxu1 %vm145_vm4, %v684_v59 }
 0x488   :  { %9730 = vmatprep.mubr.msk.f32.mxu0 %vm11829_vm1, %v12191_v10  ;;  %9815 = vmatprep.mubr.msk.f32.mxu1 %vm11829_vm1, %v12191_v10 }
 0x489   :  { %10040 = vmatprep.subr.mxu0 %v12191_v10  ;;  %10121 = vmatprep.subr.mxu1 %v12191_v10 }
 0x48b   :  { %9731 = vmatmul.mubr.msk.f32.gmra.mxu0 %vm145_vm4, %v685_v42  ;;  %9816 = vmatmul.mubr.msk.f32.gmra.mxu1 %vm145_vm4, %v685_v42 }
 0x48c   :  { %9733 = vmatprep.mubr.msk.f32.mxu0 %vm11829_vm1, %v12191_v10  ;;  %9818 = vmatprep.mubr.msk.f32.mxu1 %vm11829_vm1, %v12191_v10 }
 0x48f   :  { %9734 = vmatmul.mubr.msk.f32.gmra.mxu0 %vm145_vm4, %v686_v0  ;;  %9819 = vmatmul.mubr.msk.f32.gmra.mxu1 %vm145_vm4, %v686_v0 }
 0x490   :  { %9736 = vmatprep.mubr.msk.f32.mxu0 %vm11829_vm1, %v12191_v10  ;;  %9821 = vmatprep.mubr.msk.f32.mxu1 %vm11829_vm1, %v12191_v10 }
 0x493   :  { %9737 = vmatmul.mubr.msk.f32.gmra.mxu0 %vm145_vm4, %v687_v20  ;;  %9822 = vmatmul.mubr.msk.f32.gmra.mxu1 %vm145_vm4, %v687_v20 }
 0x494   :  { %9739 = vmatprep.mubr.msk.f32.mxu0 %vm11829_vm1, %v12191_v10  ;;  %9824 = vmatprep.mubr.msk.f32.mxu1 %vm11829_vm1, %v12191_v10 }
 0x497   :  { %9740 = vmatmul.mubr.msk.f32.gmra.mxu0 %vm145_vm4, %v688_v28  ;;  %9825 = vmatmul.mubr.msk.f32.gmra.mxu1 %vm145_vm4, %v688_v28 }
 0x498   :  { %9742 = vmatprep.mubr.msk.f32.mxu0 %vm11829_vm1, %v12191_v10  ;;  %9827 = vmatprep.mubr.msk.f32.mxu1 %vm11829_vm1, %v12191_v10 }
 0x49b   :  { %9743 = vmatmul.mubr.msk.f32.gmra.mxu0 %vm145_vm4, %v689_v43  ;;  %9828 = vmatmul.mubr.msk.f32.gmra.mxu1 %vm145_vm4, %v689_v43 }
 0x49c   :  { %9745 = vmatprep.mubr.msk.f32.mxu0 %vm11829_vm1, %v12191_v10  ;;  %9830 = vmatprep.mubr.msk.f32.mxu1 %vm11829_vm1, %v12191_v10 }
 0x49f   :  { %9746 = vmatmul.mubr.msk.f32.gmra.mxu0 %vm145_vm4, %v690_v45  ;;  %9831 = vmatmul.mubr.msk.f32.gmra.mxu1 %vm145_vm4, %v690_v45 }
 0x4a0   :  { %9748 = vmatprep.mubr.msk.f32.mxu0 %vm11829_vm1, %v12191_v10  ;;  %9833 = vmatprep.mubr.msk.f32.mxu1 %vm11829_vm1, %v12191_v10 }
 0x4a3   :  { %9749 = vmatmul.mubr.msk.f32.gmra.mxu0 %vm145_vm4, %v691_v46  ;;  %9834 = vmatmul.mubr.msk.f32.gmra.mxu1 %vm145_vm4, %v691_v46 }
 0x4a4   :  { %9751 = vmatprep.mubr.msk.f32.mxu0 %vm11829_vm1, %v12191_v10  ;;  %9836 = vmatprep.mubr.msk.f32.mxu1 %vm11829_vm1, %v12191_v10 }
 0x4a7   :  { %9752 = vmatmul.mubr.msk.f32.gmra.mxu0 %vm145_vm4, %v692_v48  ;;  %9837 = vmatmul.mubr.msk.f32.gmra.mxu1 %vm145_vm4, %v692_v48 }
 0x4a8   :  { %9754 = vmatprep.mubr.msk.f32.mxu0 %vm11829_vm1, %v12191_v10  ;;  %9839 = vmatprep.mubr.msk.f32.mxu1 %vm11829_vm1, %v12191_v10 }
 0x4ab   :  { %9755 = vmatmul.mubr.msk.f32.gmra.mxu0 %vm145_vm4, %v693_v49  ;;  %9840 = vmatmul.mubr.msk.f32.gmra.mxu1 %vm145_vm4, %v693_v49 }
 0x4ac   :  { %9757 = vmatprep.mubr.msk.f32.mxu0 %vm11829_vm1, %v12191_v10  ;;  %9842 = vmatprep.mubr.msk.f32.mxu1 %vm11829_vm1, %v12191_v10 }
 0x4af   :  { %9758 = vmatmul.mubr.msk.f32.gmra.mxu0 %vm145_vm4, %v694_v50  ;;  %9843 = vmatmul.mubr.msk.f32.gmra.mxu1 %vm145_vm4, %v694_v50 }
 0x4b0   :  { %9760 = vmatprep.mubr.msk.f32.mxu0 %vm11829_vm1, %v12191_v10  ;;  %9845 = vmatprep.mubr.msk.f32.mxu1 %vm11829_vm1, %v12191_v10 }
 0x4b3   :  { %9761 = vmatmul.mubr.msk.f32.gmra.mxu0 %vm145_vm4, %v695_v1  ;;  %9846 = vmatmul.mubr.msk.f32.gmra.mxu1 %vm145_vm4, %v695_v1 }
 0x4b4   :  { %9763 = vmatprep.mubr.msk.f32.mxu0 %vm11829_vm1, %v12191_v10  ;;  %9848 = vmatprep.mubr.msk.f32.mxu1 %vm11829_vm1, %v12191_v10 }
 0x4b7   :  { %9764 = vmatmul.mubr.msk.f32.gmra.mxu0 %vm145_vm4, %v696_v52  ;;  %9849 = vmatmul.mubr.msk.f32.gmra.mxu1 %vm145_vm4, %v696_v52 }
 0x4b8   :  { %9766 = vmatprep.mubr.msk.f32.mxu0 %vm11829_vm1, %v12191_v10  ;;  %9851 = vmatprep.mubr.msk.f32.mxu1 %vm11829_vm1, %v12191_v10 }
 0x4bb   :  { %9767 = vmatmul.mubr.msk.f32.gmra.mxu0 %vm145_vm4, %v697_v2  ;;  %9852 = vmatmul.mubr.msk.f32.gmra.mxu1 %vm145_vm4, %v697_v2 }
 0x4bc   :  { %9769 = vmatprep.mubr.msk.f32.mxu0 %vm11829_vm1, %v12191_v10  ;;  %9854 = vmatprep.mubr.msk.f32.mxu1 %vm11829_vm1, %v12191_v10 }
 0x4bf   :  { %9770 = vmatmul.mubr.msk.f32.gmra.mxu0 %vm145_vm4, %v698_v56  ;;  %9855 = vmatmul.mubr.msk.f32.gmra.mxu1 %vm145_vm4, %v698_v56 }
 0x4c0   :  { %9772 = vmatprep.mubr.msk.f32.mxu0 %vm11829_vm1, %v12191_v10  ;;  %9857 = vmatprep.mubr.msk.f32.mxu1 %vm11829_vm1, %v12191_v10 }
 0x4c3   :  { %9773 = vmatmul.mubr.msk.f32.gmra.mxu0 %vm145_vm4, %v699_v57  ;;  %9858 = vmatmul.mubr.msk.f32.gmra.mxu1 %vm145_vm4, %v699_v57 }
 0x4c4   :  { %9775 = vmatprep.mubr.msk.f32.mxu0 %vm11829_vm1, %v12191_v10  ;;  %9860 = vmatprep.mubr.msk.f32.mxu1 %vm11829_vm1, %v12191_v10 }
 0x4c7   :  { %9776 = vmatmul.mubr.msk.f32.gmra.mxu0 %vm145_vm4, %v700_v58  ;;  %9861 = vmatmul.mubr.msk.f32.gmra.mxu1 %vm145_vm4, %v700_v58 }
 0x4c8   :  { %9778 = vmatprep.mubr.msk.f32.mxu0 %vm11829_vm1, %v12191_v10  ;;  %9863 = vmatprep.mubr.msk.f32.mxu1 %vm11829_vm1, %v12191_v10 }
 0x4cb   :  { %9779 = vmatmul.mubr.msk.f32.gmra.mxu0 %vm145_vm4, %v701_v60  ;;  %9864 = vmatmul.mubr.msk.f32.gmra.mxu1 %vm145_vm4, %v701_v60 }
 0x4cc   :  { %9781 = vmatprep.mubr.msk.f32.mxu0 %vm11829_vm1, %v12191_v10  ;;  %9866 = vmatprep.mubr.msk.f32.mxu1 %vm11829_vm1, %v12191_v10 }
 0x4cf   :  { %9782 = vmatmul.mubr.msk.f32.gmra.mxu0 %vm145_vm4, %v702_v62  ;;  %9867 = vmatmul.mubr.msk.f32.gmra.mxu1 %vm145_vm4, %v702_v62 }
 0x4d0   :  { %9784 = vmatprep.mubr.msk.f32.mxu0 %vm11829_vm1, %v12191_v10  ;;  %9869 = vmatprep.mubr.msk.f32.mxu1 %vm11829_vm1, %v12191_v10 }
 0x4d3   :  { %9785 = vmatmul.mubr.msk.f32.gmra.mxu0 %vm145_vm4, %v703_v3  ;;  %9870 = vmatmul.mubr.msk.f32.gmra.mxu1 %vm145_vm4, %v703_v3 }
 0x4d4   :  { %9787 = vmatprep.mubr.msk.f32.mxu0 %vm11829_vm1, %v12191_v10  ;;  %9872 = vmatprep.mubr.msk.f32.mxu1 %vm11829_vm1, %v12191_v10 }
 0x4d7   :  { %9788 = vmatmul.mubr.msk.f32.gmra.mxu0 %vm145_vm4, %v704_v63  ;;  %9873 = vmatmul.mubr.msk.f32.gmra.mxu1 %vm145_vm4, %v704_v63 }
 0x4d8   :  { %9790 = vmatprep.mubr.msk.f32.mxu0 %vm11829_vm1, %v12191_v10  ;;  %9875 = vmatprep.mubr.msk.f32.mxu1 %vm11829_vm1, %v12191_v10 }
 0x4db   :  { %9791 = vmatmul.mubr.msk.f32.gmra.mxu0 %vm145_vm4, %v705_v6  ;;  %9876 = vmatmul.mubr.msk.f32.gmra.mxu1 %vm145_vm4, %v705_v6 }
 0x4dc   :  { %9884 = vmatprep.mubr.msk.f32.mxu0 %vm11829_vm1, %v12191_v10  ;;  %9965 = vmatprep.mubr.msk.f32.mxu1 %vm11829_vm1, %v12191_v10 }
 0x53b   :  { %v881_v7 = vpop.f32.mrf.mxu0  ;;  %v12337_v8 = vpop.f32.mrf.mxu1 }
 0x53c   :  { %9885 = vmatmul.mubr.msk.f32.vlgmr.msra.gmra.mxu0 %vm43_vm0, %v881_v7  ;;  %9966 = vmatmul.mubr.msk.f32.vlgmr.msra.gmra.mxu1 %vm43_vm0, %v881_v7 }
 0x53d   :  { %v9720_v9 = vpop.f32.mrf.mxu0  ;;  %9887 = vmatprep.mubr.msk.f32.mxu0 %vm11829_vm1, %v12191_v10  ;;  %9968 = vmatprep.mubr.msk.f32.mxu1 %vm11829_vm1, %v12191_v10  ;;  %v9805_v13 = vpop.f32.mrf.mxu1 }
 0x53e   :  { %10041 = vmatpush3.msk.msra.mxu0 %vm1273_vm7, %v12159_v38  ;;  %10122 = vmatpush3.msk.msra.mxu1 %vm1273_vm7, %v12161_v39 }
 0x53f   :  { %v886_v14 = vpop.f32.mrf.mxu0  ;;  %v12349_v4 = vpop.f32.mrf.mxu1  ;;  %10042 = vmatprep.subr.mxu0 %v12191_v10  ;;  %10123 = vmatprep.subr.mxu1 %v12191_v10 }
 0x540   :  { %9888 = vmatmul.mubr.msk.f32.gmra.mxu0 %vm43_vm0, %v886_v14  ;;  %9969 = vmatmul.mubr.msk.f32.gmra.mxu1 %vm43_vm0, %v886_v14 }
 0x541   :  { %v9723_v61 = vpop.f32.mrf.mxu0  ;;  %9890 = vmatprep.mubr.msk.f32.mxu0 %vm11829_vm1, %v12191_v10  ;;  %9971 = vmatprep.mubr.msk.f32.mxu1 %vm11829_vm1, %v12191_v10  ;;  %v9808_v15 = vpop.f32.mrf.mxu1 }
 0x542   :  { %10043 = vmatpush3.msra.mxu0 %v12175_v40  ;;  %10124 = vmatpush3.msra.mxu1 %v12177_v41 }
 0x543   :  { %v891_v5 = vpop.f32.mrf.mxu0  ;;  %v12361_v12 = vpop.f32.mrf.mxu1  ;;  %10044 = vmatprep.subr.mxu0 %v12191_v10  ;;  %10125 = vmatprep.subr.mxu1 %v12191_v10 }
 0x544   :  { %9891 = vmatmul.mubr.msk.f32.gmra.mxu0 %vm43_vm0, %v891_v5  ;;  %9972 = vmatmul.mubr.msk.f32.gmra.mxu1 %vm43_vm0, %v891_v5 }
 0x545   :  { %v9726_v44 = vpop.f32.mrf.mxu0  ;;  %9893 = vmatprep.mubr.msk.f32.mxu0 %vm11829_vm1, %v12191_v10  ;;  %9974 = vmatprep.mubr.msk.f32.mxu1 %vm11829_vm1, %v12191_v10  ;;  %v9811_v18 = vpop.f32.mrf.mxu1 }
 0x546   :  { %10045 = vmatpush3.msra.mxu0 %v12277_v47  ;;  %10126 = vmatpush3.msra.mxu1 %v12279_v55 }
 0x547   :  { %v896_v54 = vpop.f32.mrf.mxu0  ;;  %v12373_v19 = vpop.f32.mrf.mxu1  ;;  %10202 = vmatprep.subr.mxu1 %v12191_v10  ;;  %3559 = vmatprep.subr.mxu0 %v12191_v10 }
 0x548   :  { %9894 = vmatmul.mubr.msk.f32.gmra.mxu0 %vm43_vm0, %v896_v54  ;;  %9975 = vmatmul.mubr.msk.f32.gmra.mxu1 %vm43_vm0, %v896_v54 }
 0x549   :  { %v9729_v53 = vpop.f32.mrf.mxu0  ;;  %9896 = vmatprep.mubr.msk.f32.mxu0 %vm11829_vm1, %v12191_v10  ;;  %9977 = vmatprep.mubr.msk.f32.mxu1 %vm11829_vm1, %v12191_v10  ;;  %v9814_v21 = vpop.f32.mrf.mxu1 }
 0x54b   :  { %v901_v11 = vpop.f32.mrf.mxu0  ;;  %v12383_v17 = vpop.f32.mrf.mxu1 }
 0x54c   :  { %9897 = vmatmul.mubr.msk.f32.gmra.mxu0 %vm43_vm0, %v901_v11  ;;  %9978 = vmatmul.mubr.msk.f32.gmra.mxu1 %vm43_vm0, %v901_v11 }
 0x54d   :  { %v9732_v27 = vpop.f32.mrf.mxu0  ;;  %9899 = vmatprep.mubr.msk.f32.mxu0 %vm11829_vm1, %v12191_v10  ;;  %9980 = vmatprep.mubr.msk.f32.mxu1 %vm11829_vm1, %v12191_v10  ;;  %v9817_v22 = vpop.f32.mrf.mxu1 }
 0x54f   :  { %v906_v23 = vpop.f32.mrf.mxu0  ;;  %v12391_v24 = vpop.f32.mrf.mxu1 }
 0x550   :  { %9900 = vmatmul.mubr.msk.f32.gmra.mxu0 %vm43_vm0, %v906_v23  ;;  %9981 = vmatmul.mubr.msk.f32.gmra.mxu1 %vm43_vm0, %v906_v23 }
 0x551   :  { %v9735_v25 = vpop.f32.mrf.mxu0  ;;  %9902 = vmatprep.mubr.msk.f32.mxu0 %vm11829_vm1, %v12191_v10  ;;  %9983 = vmatprep.mubr.msk.f32.mxu1 %vm11829_vm1, %v12191_v10  ;;  %v9820_v26 = vpop.f32.mrf.mxu1 }
 0x553   :  { %v911_v29 = vpop.f32.mrf.mxu0  ;;  %v12399_v30 = vpop.f32.mrf.mxu1 }
 0x554   :  { %9903 = vmatmul.mubr.msk.f32.gmra.mxu0 %vm43_vm0, %v911_v29  ;;  %9984 = vmatmul.mubr.msk.f32.gmra.mxu1 %vm43_vm0, %v911_v29 }
 0x555   :  { %v9738_v31 = vpop.f32.mrf.mxu0  ;;  %9905 = vmatprep.mubr.msk.f32.mxu0 %vm11829_vm1, %v12191_v10  ;;  %9986 = vmatprep.mubr.msk.f32.mxu1 %vm11829_vm1, %v12191_v10  ;;  %v9823_v32 = vpop.f32.mrf.mxu1 }
 0x557   :  { %v916_v33 = vpop.f32.mrf.mxu0  ;;  %v12407_v34 = vpop.f32.mrf.mxu1 }
 0x558   :  { %9906 = vmatmul.mubr.msk.f32.gmra.mxu0 %vm43_vm0, %v916_v33  ;;  %9987 = vmatmul.mubr.msk.f32.gmra.mxu1 %vm43_vm0, %v916_v33 }
 0x559   :  { %v9741_v35 = vpop.f32.mrf.mxu0  ;;  %9908 = vmatprep.mubr.msk.f32.mxu0 %vm11829_vm1, %v12191_v10  ;;  %9989 = vmatprep.mubr.msk.f32.mxu1 %vm11829_vm1, %v12191_v10  ;;  %v9826_v36 = vpop.f32.mrf.mxu1 }
 0x55b   :  { %v921_v37 = vpop.f32.mrf.mxu0  ;;  %v12415_v38 = vpop.f32.mrf.mxu1 }
 0x55c   :  { %9909 = vmatmul.mubr.msk.f32.gmra.mxu0 %vm43_vm0, %v921_v37  ;;  %9990 = vmatmul.mubr.msk.f32.gmra.mxu1 %vm43_vm0, %v921_v37 }
 0x55d   :  { %v9744_v39 = vpop.f32.mrf.mxu0  ;;  %9911 = vmatprep.mubr.msk.f32.mxu0 %vm11829_vm1, %v12191_v10  ;;  %9992 = vmatprep.mubr.msk.f32.mxu1 %vm11829_vm1, %v12191_v10  ;;  %v9829_v16 = vpop.f32.mrf.mxu1 }
 0x55f   :  { %v926_v40 = vpop.f32.mrf.mxu0  ;;  %v12423_v41 = vpop.f32.mrf.mxu1 }
 0x560   :  { %9912 = vmatmul.mubr.msk.f32.gmra.mxu0 %vm43_vm0, %v926_v40  ;;  %9993 = vmatmul.mubr.msk.f32.gmra.mxu1 %vm43_vm0, %v926_v40 }
 0x561   :  { %v9747_v51 = vpop.f32.mrf.mxu0  ;;  %9914 = vmatprep.mubr.msk.f32.mxu0 %vm11829_vm1, %v12191_v10  ;;  %9995 = vmatprep.mubr.msk.f32.mxu1 %vm11829_vm1, %v12191_v10  ;;  %v9832_v59 = vpop.f32.mrf.mxu1 }
 0x563   :  { %v931_v42 = vpop.f32.mrf.mxu0  ;;  %v12431_v0 = vpop.f32.mrf.mxu1 }
 0x564   :  { %9915 = vmatmul.mubr.msk.f32.gmra.mxu0 %vm43_vm0, %v931_v42  ;;  %9996 = vmatmul.mubr.msk.f32.gmra.mxu1 %vm43_vm0, %v931_v42 }
 0x565   :  { %v9750_v20 = vpop.f32.mrf.mxu0  ;;  %9917 = vmatprep.mubr.msk.f32.mxu0 %vm11829_vm1, %v12191_v10  ;;  %9998 = vmatprep.mubr.msk.f32.mxu1 %vm11829_vm1, %v12191_v10  ;;  %v9835_v28 = vpop.f32.mrf.mxu1 }
 0x567   :  { %v936_v43 = vpop.f32.mrf.mxu0  ;;  %v12439_v45 = vpop.f32.mrf.mxu1 }
 0x568   :  { %9918 = vmatmul.mubr.msk.f32.gmra.mxu0 %vm43_vm0, %v936_v43  ;;  %9999 = vmatmul.mubr.msk.f32.gmra.mxu1 %vm43_vm0, %v936_v43 }
 0x569   :  { %v9753_v46 = vpop.f32.mrf.mxu0  ;;  %9920 = vmatprep.mubr.msk.f32.mxu0 %vm11829_vm1, %v12191_v10  ;;  %10001 = vmatprep.mubr.msk.f32.mxu1 %vm11829_vm1, %v12191_v10  ;;  %v9838_v48 = vpop.f32.mrf.mxu1 }
 0x56b   :  { %v941_v49 = vpop.f32.mrf.mxu0  ;;  %v12447_v50 = vpop.f32.mrf.mxu1 }
 0x56c   :  { %9921 = vmatmul.mubr.msk.f32.gmra.mxu0 %vm43_vm0, %v941_v49  ;;  %10002 = vmatmul.mubr.msk.f32.gmra.mxu1 %vm43_vm0, %v941_v49 }
 0x56d   :  { %v9756_v1 = vpop.f32.mrf.mxu0  ;;  %9923 = vmatprep.mubr.msk.f32.mxu0 %vm11829_vm1, %v12191_v10  ;;  %10004 = vmatprep.mubr.msk.f32.mxu1 %vm11829_vm1, %v12191_v10  ;;  %v9841_v52 = vpop.f32.mrf.mxu1 }
 0x56f   :  { %v946_v2 = vpop.f32.mrf.mxu0  ;;  %v12455_v47 = vpop.f32.mrf.mxu1 }
 0x570   :  { %9924 = vmatmul.mubr.msk.f32.gmra.mxu0 %vm43_vm0, %v946_v2  ;;  %10005 = vmatmul.mubr.msk.f32.gmra.mxu1 %vm43_vm0, %v946_v2 }
 0x571   :  { %v9759_v55 = vpop.f32.mrf.mxu0  ;;  %9926 = vmatprep.mubr.msk.f32.mxu0 %vm11829_vm1, %v12191_v10  ;;  %10007 = vmatprep.mubr.msk.f32.mxu1 %vm11829_vm1, %v12191_v10  ;;  %v9844_v56 = vpop.f32.mrf.mxu1 }
 0x572   :  { %v12756_v55 = vld [vmem:[#allocation5 + $0x9f8] sm:$0xff] }
 0x573   :  { %v951_v57 = vpop.f32.mrf.mxu0  ;;  %v12463_v58 = vpop.f32.mrf.mxu1 }
 0x574   :  { %9927 = vmatmul.mubr.msk.f32.gmra.mxu0 %vm43_vm0, %v951_v57  ;;  %10008 = vmatmul.mubr.msk.f32.gmra.mxu1 %vm43_vm0, %v951_v57 }
 0x575   :  { %v9762_v60 = vpop.f32.mrf.mxu0  ;;  %9929 = vmatprep.mubr.msk.f32.mxu0 %vm11829_vm1, %v12191_v10  ;;  %10010 = vmatprep.mubr.msk.f32.mxu1 %vm11829_vm1, %v12191_v10  ;;  %v9847_v62 = vpop.f32.mrf.mxu1 }
 0x577   :  { %v956_v3 = vpop.f32.mrf.mxu0  ;;  %v12471_v63 = vpop.f32.mrf.mxu1 }
 0x578   :  { %9930 = vmatmul.mubr.msk.f32.gmra.mxu0 %vm43_vm0, %v956_v3  ;;  %10011 = vmatmul.mubr.msk.f32.gmra.mxu1 %vm43_vm0, %v956_v3 }
 0x579   :  { %v9765_v6 = vpop.f32.mrf.mxu0  ;;  %9932 = vmatprep.mubr.msk.f32.mxu0 %vm11829_vm1, %v12191_v10  ;;  %10013 = vmatprep.mubr.msk.f32.mxu1 %vm11829_vm1, %v12191_v10  ;;  %v9850_v7 = vpop.f32.mrf.mxu1 }
 0x57b   :  { %v961_v9 = vpop.f32.mrf.mxu0  ;;  %v12479_v13 = vpop.f32.mrf.mxu1 }
 0x57c   :  { %9933 = vmatmul.mubr.msk.f32.gmra.mxu0 %vm43_vm0, %v961_v9  ;;  %10014 = vmatmul.mubr.msk.f32.gmra.mxu1 %vm43_vm0, %v961_v9 }
 0x57d   :  { %v9768_v14 = vpop.f32.mrf.mxu0  ;;  %9935 = vmatprep.mubr.msk.f32.mxu0 %vm11829_vm1, %v12191_v10  ;;  %10016 = vmatprep.mubr.msk.f32.mxu1 %vm11829_vm1, %v12191_v10  ;;  %v9853_v61 = vpop.f32.mrf.mxu1 }
 0x57f   :  { %v966_v15 = vpop.f32.mrf.mxu0  ;;  %v12487_v5 = vpop.f32.mrf.mxu1 }
 0x580   :  { %9936 = vmatmul.mubr.msk.f32.gmra.mxu0 %vm43_vm0, %v966_v15  ;;  %10017 = vmatmul.mubr.msk.f32.gmra.mxu1 %vm43_vm0, %v966_v15 }
 0x581   :  { %v9771_v44 = vpop.f32.mrf.mxu0  ;;  %9938 = vmatprep.mubr.msk.f32.mxu0 %vm11829_vm1, %v12191_v10  ;;  %10019 = vmatprep.mubr.msk.f32.mxu1 %vm11829_vm1, %v12191_v10  ;;  %v9856_v18 = vpop.f32.mrf.mxu1 }
 0x583   :  { %v971_v54 = vpop.f32.mrf.mxu0  ;;  %v12495_v53 = vpop.f32.mrf.mxu1 }
 0x584   :  { %9939 = vmatmul.mubr.msk.f32.gmra.mxu0 %vm43_vm0, %v971_v54  ;;  %10020 = vmatmul.mubr.msk.f32.gmra.mxu1 %vm43_vm0, %v971_v54 }
 0x585   :  { %v9774_v21 = vpop.f32.mrf.mxu0  ;;  %9941 = vmatprep.mubr.msk.f32.mxu0 %vm11829_vm1, %v12191_v10  ;;  %10022 = vmatprep.mubr.msk.f32.mxu1 %vm11829_vm1, %v12191_v10  ;;  %v9859_v11 = vpop.f32.mrf.mxu1 }
 0x587   :  { %v976_v27 = vpop.f32.mrf.mxu0  ;;  %v12503_v22 = vpop.f32.mrf.mxu1 }
 0x588   :  { %9942 = vmatmul.mubr.msk.f32.gmra.mxu0 %vm43_vm0, %v976_v27  ;;  %10023 = vmatmul.mubr.msk.f32.gmra.mxu1 %vm43_vm0, %v976_v27 }
 0x589   :  { %v9777_v23 = vpop.f32.mrf.mxu0  ;;  %9944 = vmatprep.mubr.msk.f32.mxu0 %vm11829_vm1, %v12191_v10  ;;  %10025 = vmatprep.mubr.msk.f32.mxu1 %vm11829_vm1, %v12191_v10  ;;  %v9862_v25 = vpop.f32.mrf.mxu1 }
 0x58b   :  { %v981_v26 = vpop.f32.mrf.mxu0  ;;  %v12511_v29 = vpop.f32.mrf.mxu1 }
 0x58c   :  { %9945 = vmatmul.mubr.msk.f32.gmra.mxu0 %vm43_vm0, %v981_v26  ;;  %10026 = vmatmul.mubr.msk.f32.gmra.mxu1 %vm43_vm0, %v981_v26 }
 0x58d   :  { %v9780_v31 = vpop.f32.mrf.mxu0  ;;  %9947 = vmatprep.mubr.msk.f32.mxu0 %vm11829_vm1, %v12191_v10  ;;  %10028 = vmatprep.mubr.msk.f32.mxu1 %vm11829_vm1, %v12191_v10  ;;  %v9865_v32 = vpop.f32.mrf.mxu1 }
 0x58f   :  { %v986_v33 = vpop.f32.mrf.mxu0  ;;  %v12519_v35 = vpop.f32.mrf.mxu1 }
 0x590   :  { %9948 = vmatmul.mubr.msk.f32.gmra.mxu0 %vm43_vm0, %v986_v33  ;;  %10029 = vmatmul.mubr.msk.f32.gmra.mxu1 %vm43_vm0, %v986_v33 }
 0x591   :  { %v9783_v36 = vpop.f32.mrf.mxu0  ;;  %9950 = vmatprep.mubr.msk.f32.mxu0 %vm11829_vm1, %v12191_v10  ;;  %10031 = vmatprep.mubr.msk.f32.mxu1 %vm11829_vm1, %v12191_v10  ;;  %v9868_v37 = vpop.f32.mrf.mxu1 }
 0x593   :  { %v991_v39 = vpop.f32.mrf.mxu0  ;;  %v12527_v16 = vpop.f32.mrf.mxu1 }
 0x594   :  { %9951 = vmatmul.mubr.msk.f32.gmra.mxu0 %vm43_vm0, %v991_v39  ;;  %10032 = vmatmul.mubr.msk.f32.gmra.mxu1 %vm43_vm0, %v991_v39 }
 0x595   :  { %v9786_v40 = vpop.f32.mrf.mxu0  ;;  %9953 = vmatprep.mubr.msk.f32.mxu0 %vm11829_vm1, %v12191_v10  ;;  %10034 = vmatprep.mubr.msk.f32.mxu1 %vm11829_vm1, %v12191_v10  ;;  %v9871_v51 = vpop.f32.mrf.mxu1 }
 0x597   :  { %v996_v59 = vpop.f32.mrf.mxu0  ;;  %v12535_v42 = vpop.f32.mrf.mxu1 }
 0x598   :  { %9954 = vmatmul.mubr.msk.f32.gmra.mxu0 %vm43_vm0, %v996_v59  ;;  %10035 = vmatmul.mubr.msk.f32.gmra.mxu1 %vm43_vm0, %v996_v59 }
 0x599   :  { %v9789_v20 = vpop.f32.mrf.mxu0  ;;  %9956 = vmatprep.mubr.msk.f32.mxu0 %vm11829_vm1, %v12191_v10  ;;  %10037 = vmatprep.mubr.msk.f32.mxu1 %vm11829_vm1, %v12191_v10  ;;  %v9874_v28 = vpop.f32.mrf.mxu1 }
 0x59b   :  { %v1001_v43 = vpop.f32.mrf.mxu0  ;;  %v12543_v46 = vpop.f32.mrf.mxu1 }
 0x59c   :  { %9957 = vmatmul.mubr.msk.f32.gmra.mxu0 %vm43_vm0, %v1001_v43  ;;  %10038 = vmatmul.mubr.msk.f32.gmra.mxu1 %vm43_vm0, %v1001_v43 }
 0x59d   :  { %v9792_v48 = vpop.f32.mrf.mxu0  ;;  %10046 = vmatprep.mubr.msk.f32.mxu0 %vm11829_vm1, %v12191_v10  ;;  %10127 = vmatprep.mubr.msk.f32.mxu1 %vm11829_vm1, %v12191_v10  ;;  %v9877_v49 = vpop.f32.mrf.mxu1 }
 0x5a0   :  { %10047 = vmatmul.mubr.msk.f32.vlgmr.msra.gmra.mxu0 %vm43_vm0, %v12337_v8  ;;  %10128 = vmatmul.mubr.msk.f32.vlgmr.msra.gmra.mxu1 %vm43_vm0, %v12337_v8 }
 0x5a1   :  { %10049 = vmatprep.mubr.msk.f32.mxu0 %vm11829_vm1, %v12191_v10  ;;  %10130 = vmatprep.mubr.msk.f32.mxu1 %vm11829_vm1, %v12191_v10 }
 0x5a4   :  { %10050 = vmatmul.mubr.msk.f32.gmra.mxu0 %vm43_vm0, %v12349_v4  ;;  %10131 = vmatmul.mubr.msk.f32.gmra.mxu1 %vm43_vm0, %v12349_v4 }
 0x5a5   :  { %10052 = vmatprep.mubr.msk.f32.mxu0 %vm11829_vm1, %v12191_v10  ;;  %10133 = vmatprep.mubr.msk.f32.mxu1 %vm11829_vm1, %v12191_v10 }
 0x5a8   :  { %10053 = vmatmul.mubr.msk.f32.gmra.mxu0 %vm43_vm0, %v12361_v12  ;;  %10134 = vmatmul.mubr.msk.f32.gmra.mxu1 %vm43_vm0, %v12361_v12  ;;  %v12739_v12 = vld [vmem:[#allocation5 + $0x9e8] sm:$0xff] }
 0x5a9   :  { %10055 = vmatprep.mubr.msk.f32.mxu0 %vm11829_vm1, %v12191_v10  ;;  %10136 = vmatprep.mubr.msk.f32.mxu1 %vm11829_vm1, %v12191_v10 }
 0x5ac   :  { %10056 = vmatmul.mubr.msk.f32.gmra.mxu0 %vm43_vm0, %v12373_v19  ;;  %10137 = vmatmul.mubr.msk.f32.gmra.mxu1 %vm43_vm0, %v12373_v19 }
 0x5ad   :  { %10058 = vmatprep.mubr.msk.f32.mxu0 %vm11829_vm1, %v12191_v10  ;;  %10139 = vmatprep.mubr.msk.f32.mxu1 %vm11829_vm1, %v12191_v10 }
 0x5b0   :  { %10059 = vmatmul.mubr.msk.f32.gmra.mxu0 %vm43_vm0, %v12383_v17  ;;  %10140 = vmatmul.mubr.msk.f32.gmra.mxu1 %vm43_vm0, %v12383_v17 }
 0x5b1   :  { %10061 = vmatprep.mubr.msk.f32.mxu0 %vm11829_vm1, %v12191_v10  ;;  %10142 = vmatprep.mubr.msk.f32.mxu1 %vm11829_vm1, %v12191_v10 }
 0x5b4   :  { %10062 = vmatmul.mubr.msk.f32.gmra.mxu0 %vm43_vm0, %v12391_v24  ;;  %10143 = vmatmul.mubr.msk.f32.gmra.mxu1 %vm43_vm0, %v12391_v24 }
 0x5b5   :  { %10064 = vmatprep.mubr.msk.f32.mxu0 %vm11829_vm1, %v12191_v10  ;;  %10145 = vmatprep.mubr.msk.f32.mxu1 %vm11829_vm1, %v12191_v10 }
 0x5b8   :  { %10065 = vmatmul.mubr.msk.f32.gmra.mxu0 %vm43_vm0, %v12399_v30  ;;  %10146 = vmatmul.mubr.msk.f32.gmra.mxu1 %vm43_vm0, %v12399_v30 }
 0x5b9   :  { %10067 = vmatprep.mubr.msk.f32.mxu0 %vm11829_vm1, %v12191_v10  ;;  %10148 = vmatprep.mubr.msk.f32.mxu1 %vm11829_vm1, %v12191_v10 }
 0x5bc   :  { %10068 = vmatmul.mubr.msk.f32.gmra.mxu0 %vm43_vm0, %v12407_v34  ;;  %10149 = vmatmul.mubr.msk.f32.gmra.mxu1 %vm43_vm0, %v12407_v34 }
 0x5bd   :  { %10070 = vmatprep.mubr.msk.f32.mxu0 %vm11829_vm1, %v12191_v10  ;;  %10151 = vmatprep.mubr.msk.f32.mxu1 %vm11829_vm1, %v12191_v10 }
 0x5c0   :  { %10071 = vmatmul.mubr.msk.f32.gmra.mxu0 %vm43_vm0, %v12415_v38  ;;  %10152 = vmatmul.mubr.msk.f32.gmra.mxu1 %vm43_vm0, %v12415_v38 }
 0x5c1   :  { %10073 = vmatprep.mubr.msk.f32.mxu0 %vm11829_vm1, %v12191_v10  ;;  %10154 = vmatprep.mubr.msk.f32.mxu1 %vm11829_vm1, %v12191_v10 }
 0x5c4   :  { %10074 = vmatmul.mubr.msk.f32.gmra.mxu0 %vm43_vm0, %v12423_v41  ;;  %10155 = vmatmul.mubr.msk.f32.gmra.mxu1 %vm43_vm0, %v12423_v41  ;;  %v12750_v41 = vld [vmem:[#allocation5 + $0x9f0] sm:$0xff] }
 0x5c5   :  { %10076 = vmatprep.mubr.msk.f32.mxu0 %vm11829_vm1, %v12191_v10  ;;  %10157 = vmatprep.mubr.msk.f32.mxu1 %vm11829_vm1, %v12191_v10 }
 0x5c8   :  { %10077 = vmatmul.mubr.msk.f32.gmra.mxu0 %vm43_vm0, %v12431_v0  ;;  %10158 = vmatmul.mubr.msk.f32.gmra.mxu1 %vm43_vm0, %v12431_v0 }
 0x5c9   :  { %10079 = vmatprep.mubr.msk.f32.mxu0 %vm11829_vm1, %v12191_v10  ;;  %10160 = vmatprep.mubr.msk.f32.mxu1 %vm11829_vm1, %v12191_v10 }
 0x5cc   :  { %10080 = vmatmul.mubr.msk.f32.gmra.mxu0 %vm43_vm0, %v12439_v45  ;;  %10161 = vmatmul.mubr.msk.f32.gmra.mxu1 %vm43_vm0, %v12439_v45 }
 0x5cd   :  { %10082 = vmatprep.mubr.msk.f32.mxu0 %vm11829_vm1, %v12191_v10  ;;  %10163 = vmatprep.mubr.msk.f32.mxu1 %vm11829_vm1, %v12191_v10 }
 0x5d0   :  { %10083 = vmatmul.mubr.msk.f32.gmra.mxu0 %vm43_vm0, %v12447_v50  ;;  %10164 = vmatmul.mubr.msk.f32.gmra.mxu1 %vm43_vm0, %v12447_v50 }
 0x5d1   :  { %10085 = vmatprep.mubr.msk.f32.mxu0 %vm11829_vm1, %v12191_v10  ;;  %10166 = vmatprep.mubr.msk.f32.mxu1 %vm11829_vm1, %v12191_v10 }
 0x5d4   :  { %10086 = vmatmul.mubr.msk.f32.gmra.mxu0 %vm43_vm0, %v12455_v47  ;;  %10167 = vmatmul.mubr.msk.f32.gmra.mxu1 %vm43_vm0, %v12455_v47 }
 0x5d5   :  { %10088 = vmatprep.mubr.msk.f32.mxu0 %vm11829_vm1, %v12191_v10  ;;  %10169 = vmatprep.mubr.msk.f32.mxu1 %vm11829_vm1, %v12191_v10 }
 0x5d8   :  { %10089 = vmatmul.mubr.msk.f32.gmra.mxu0 %vm43_vm0, %v12463_v58  ;;  %10170 = vmatmul.mubr.msk.f32.gmra.mxu1 %vm43_vm0, %v12463_v58 }
 0x5d9   :  { %10091 = vmatprep.mubr.msk.f32.mxu0 %vm11829_vm1, %v12191_v10  ;;  %10172 = vmatprep.mubr.msk.f32.mxu1 %vm11829_vm1, %v12191_v10 }
 0x5dc   :  { %10092 = vmatmul.mubr.msk.f32.gmra.mxu0 %vm43_vm0, %v12471_v63  ;;  %10173 = vmatmul.mubr.msk.f32.gmra.mxu1 %vm43_vm0, %v12471_v63 }
 0x5dd   :  { %10094 = vmatprep.mubr.msk.f32.mxu0 %vm11829_vm1, %v12191_v10  ;;  %10175 = vmatprep.mubr.msk.f32.mxu1 %vm11829_vm1, %v12191_v10 }
 0x5e0   :  { %10095 = vmatmul.mubr.msk.f32.gmra.mxu0 %vm43_vm0, %v12479_v13  ;;  %10176 = vmatmul.mubr.msk.f32.gmra.mxu1 %vm43_vm0, %v12479_v13 }
 0x5e1   :  { %10097 = vmatprep.mubr.msk.f32.mxu0 %vm11829_vm1, %v12191_v10  ;;  %10178 = vmatprep.mubr.msk.f32.mxu1 %vm11829_vm1, %v12191_v10 }
 0x5e4   :  { %10098 = vmatmul.mubr.msk.f32.gmra.mxu0 %vm43_vm0, %v12487_v5  ;;  %10179 = vmatmul.mubr.msk.f32.gmra.mxu1 %vm43_vm0, %v12487_v5  ;;  %v12764_v5 = vld [vmem:[#allocation5 + $0xa08] sm:$0xff] }
 0x5e5   :  { %10100 = vmatprep.mubr.msk.f32.mxu0 %vm11829_vm1, %v12191_v10  ;;  %10181 = vmatprep.mubr.msk.f32.mxu1 %vm11829_vm1, %v12191_v10 }
 0x5e8   :  { %10101 = vmatmul.mubr.msk.f32.gmra.mxu0 %vm43_vm0, %v12495_v53  ;;  %10182 = vmatmul.mubr.msk.f32.gmra.mxu1 %vm43_vm0, %v12495_v53 }
 0x5e9   :  { %10103 = vmatprep.mubr.msk.f32.mxu0 %vm11829_vm1, %v12191_v10  ;;  %10184 = vmatprep.mubr.msk.f32.mxu1 %vm11829_vm1, %v12191_v10 }
 0x5ec   :  { %10104 = vmatmul.mubr.msk.f32.gmra.mxu0 %vm43_vm0, %v12503_v22  ;;  %10185 = vmatmul.mubr.msk.f32.gmra.mxu1 %vm43_vm0, %v12503_v22  ;;  %v12768_v22 = vld [vmem:[#allocation5 + $0xa10] sm:$0xff] }
 0x5ed   :  { %10106 = vmatprep.mubr.msk.f32.mxu0 %vm11829_vm1, %v12191_v10  ;;  %10187 = vmatprep.mubr.msk.f32.mxu1 %vm11829_vm1, %v12191_v10 }
 0x5f0   :  { %10107 = vmatmul.mubr.msk.f32.gmra.mxu0 %vm43_vm0, %v12511_v29  ;;  %10188 = vmatmul.mubr.msk.f32.gmra.mxu1 %vm43_vm0, %v12511_v29 }
 0x5f1   :  { %10109 = vmatprep.mubr.msk.f32.mxu0 %vm11829_vm1, %v12191_v10  ;;  %10190 = vmatprep.mubr.msk.f32.mxu1 %vm11829_vm1, %v12191_v10 }
 0x5f4   :  { %10110 = vmatmul.mubr.msk.f32.gmra.mxu0 %vm43_vm0, %v12519_v35  ;;  %10191 = vmatmul.mubr.msk.f32.gmra.mxu1 %vm43_vm0, %v12519_v35  ;;  %v12772_v35 = vld [vmem:[#allocation5 + $0xa18] sm:$0xff] }
 0x5f5   :  { %10112 = vmatprep.mubr.msk.f32.mxu0 %vm11829_vm1, %v12191_v10  ;;  %10193 = vmatprep.mubr.msk.f32.mxu1 %vm11829_vm1, %v12191_v10 }
 0x5f8   :  { %10113 = vmatmul.mubr.msk.f32.gmra.mxu0 %vm43_vm0, %v12527_v16  ;;  %10194 = vmatmul.mubr.msk.f32.gmra.mxu1 %vm43_vm0, %v12527_v16 }
 0x5f9   :  { %10115 = vmatprep.mubr.msk.f32.mxu0 %vm11829_vm1, %v12191_v10  ;;  %10196 = vmatprep.mubr.msk.f32.mxu1 %vm11829_vm1, %v12191_v10 }
 0x5fc   :  { %v1343_v8 = vpop.f32.mrf.mxu0  ;;  %v1536_v4 = vpop.f32.mrf.mxu1  ;;  %10116 = vmatmul.mubr.msk.f32.gmra.mxu0 %vm43_vm0, %v12535_v42  ;;  %10197 = vmatmul.mubr.msk.f32.gmra.mxu1 %vm43_vm0, %v12535_v42  ;;  %v12776_v42 = vld [vmem:[#allocation5 + $0xa20] sm:$0xff] }
 0x5fd   :  { %v1660_v19 = vmax.f32 %v1343_v8, %v1536_v4  ;;  %10118 = vmatprep.mubr.msk.f32.mxu0 %vm11829_vm1, %v12191_v10  ;;  %10199 = vmatprep.mubr.msk.f32.mxu1 %vm11829_vm1, %v12191_v10  ;;  %v12780_v4 = vld [vmem:[#allocation5 + $0xa28] sm:$0xff] }
 0x5fe   :  { %v9886_v17 = vpop.f32.mrf.mxu0  ;;  %v9967_v24 = vpop.f32.mrf.mxu1 }
 0x5ff   :  { %v2165_v30 = vmul.f32 %v1660_v19, %v12739_v12 }
 0x600   :  { %v1348_v34 = vpop.f32.mrf.mxu0  ;;  %v1541_v38 = vpop.f32.mrf.mxu1  ;;  %10119 = vmatmul.mubr.msk.f32.gmra.mxu0 %vm43_vm0, %v12543_v46  ;;  %10200 = vmatmul.mubr.msk.f32.gmra.mxu1 %vm43_vm0, %v12543_v46 }
 0x601   :  { %v1661_v0 = vmax.f32 %v1348_v34, %v1541_v38  ;;  %v2191_v45 = vsel %vm2190_vm8, %v2165_v30, 0.0  ;;  %10210 = vmatprep.mubr.msk.f32.mxu1 %vm11829_vm1, %v12191_v10  ;;  %v12760_v10 = vld [vmem:[#allocation5 + $0xa00] sm:$0xff] }
 0x602   :  { %v9970_v50 = vpop.f32.mrf.mxu1  ;;  %2192 = vadd.xlane.f32.xlu0 %v2191_v45  ;;  %v9889_v1 = vpop.f32.mrf.mxu0  ;;  %v12784_v45 = vld [vmem:[#allocation5 + $0xa30] sm:$0xff] }
 0x603   :  { %v2166_v52 = vmul.f32 %v1661_v0, %v12750_v41 }
 0x604   :  { %v1353_v2 = vpop.f32.mrf.mxu0  ;;  %v1546_v47 = vpop.f32.mrf.mxu1 }
 0x605   :  { %v1662_v56 = vmax.f32 %v1353_v2, %v1546_v47  ;;  %v2194_v57 = vsel %vm2190_vm8, %v2166_v52, 0.0 }
 0x606   :  { %v9973_v58 = vpop.f32.mrf.mxu1  ;;  %2195 = vadd.xlane.f32.xlu1 %v2194_v57  ;;  %v9892_v60 = vpop.f32.mrf.mxu0 }
 0x607   :  { %v2167_v62 = vmul.f32 %v1662_v56, %v12756_v55  ;;  %v12788_v58 = vld [vmem:[#allocation5 + $0xa38] sm:$0xff] }
 0x608   :  { %v1358_v3 = vpop.f32.mrf.mxu0  ;;  %v1551_v63 = vpop.f32.mrf.mxu1 }
 0x609   :  { %v1663_v6 = vmax.f32 %v1358_v3, %v1551_v63  ;;  %v2197_v7 = vsel %vm2190_vm8, %v2167_v62, 0.0 }
 0x60a   :  { %v9976_v9 = vpop.f32.mrf.mxu1  ;;  %2198 = vadd.xlane.f32.xlu0 %v2197_v7  ;;  %v9895_v13 = vpop.f32.mrf.mxu0 }
 0x60b   :  { %v2168_v14 = vmul.f32 %v1663_v6, %v12760_v10  ;;  %v12792_v13 = vld [vmem:[#allocation5 + $0xa40] sm:$0xff] }
 0x60c   :  { %v1363_v61 = vpop.f32.mrf.mxu0  ;;  %v1556_v15 = vpop.f32.mrf.mxu1 }
 0x60d   :  { %v1664_v44 = vmax.f32 %v1363_v61, %v1556_v15  ;;  %v2200_v18 = vsel %vm2190_vm8, %v2168_v14, 0.0 }
 0x60e   :  { %v9979_v54 = vpop.f32.mrf.mxu1  ;;  %2201 = vadd.xlane.f32.xlu0 %v2200_v18  ;;  %v9898_v53 = vpop.f32.mrf.mxu0 }
 0x60f   :  { %v2169_v21 = vmul.f32 %v1664_v44, %v12764_v5 }
 0x610   :  { %v1368_v11 = vpop.f32.mrf.mxu0  ;;  %v1561_v27 = vpop.f32.mrf.mxu1 }
 0x611   :  { %v1665_v23 = vmax.f32 %v1368_v11, %v1561_v27  ;;  %v2203_v25 = vsel %vm2190_vm8, %v2169_v21, 0.0  ;;  %v12796_v21 = vld [vmem:[#allocation5 + $0xa48] sm:$0xff] }
 0x612   :  { %v9982_v26 = vpop.f32.mrf.mxu1  ;;  %2204 = vadd.xlane.f32.xlu0 %v2203_v25  ;;  %v9901_v29 = vpop.f32.mrf.mxu0 }
 0x613   :  { %v2170_v31 = vmul.f32 %v1665_v23, %v12768_v22 }
 0x614   :  { %v1373_v32 = vpop.f32.mrf.mxu0  ;;  %v1566_v33 = vpop.f32.mrf.mxu1 }
 0x615   :  { %v1666_v36 = vmax.f32 %v1373_v32, %v1566_v33  ;;  %v2206_v37 = vsel %vm2190_vm8, %v2170_v31, 0.0  ;;  %v12800_v32 = vld [vmem:[#allocation5 + $0xa50] sm:$0xff] }
 0x616   :  { %v9985_v39 = vpop.f32.mrf.mxu1  ;;  %2207 = vadd.xlane.f32.xlu0 %v2206_v37  ;;  %v9904_v16 = vpop.f32.mrf.mxu0 }
 0x617   :  { %v2171_v40 = vmul.f32 %v1666_v36, %v12772_v35 }
 0x618   :  { %v1378_v51 = vpop.f32.mrf.mxu0  ;;  %v1571_v59 = vpop.f32.mrf.mxu1 }
 0x619   :  { %v1667_v20 = vmax.f32 %v1378_v51, %v1571_v59  ;;  %v2209_v28 = vsel %vm2190_vm8, %v2171_v40, 0.0  ;;  %v12804_v59 = vld [vmem:[#allocation5 + $0xa58] sm:$0xff] }
 0x61a   :  { %v9988_v43 = vpop.f32.mrf.mxu1  ;;  %2210 = vadd.xlane.f32.xlu0 %v2209_v28  ;;  %v9907_v46 = vpop.f32.mrf.mxu0 }
 0x61b   :  { %v2172_v48 = vmul.f32 %v1667_v20, %v12776_v42 }
 0x61c   :  { %v1383_v49 = vpop.f32.mrf.mxu0  ;;  %v1576_v8 = vpop.f32.mrf.mxu1 }
 0x61d   :  { %v1668_v19 = vmax.f32 %v1383_v49, %v1576_v8  ;;  %v2212_v17 = vsel %vm2190_vm8, %v2172_v48, 0.0 }
 0x61e   :  { %v9991_v24 = vpop.f32.mrf.mxu1  ;;  %2213 = vadd.xlane.f32.xlu0 %v2212_v17  ;;  %v9910_v30 = vpop.f32.mrf.mxu0 }
 0x61f   :  { %v2173_v34 = vmul.f32 %v1668_v19, %v12780_v4  ;;  %v12808_v19 = vld [vmem:[#allocation5 + $0xa60] sm:$0xff] }
 0x620   :  { %v1388_v38 = vpop.f32.mrf.mxu0  ;;  %v1581_v0 = vpop.f32.mrf.mxu1 }
 0x621   :  { %v1669_v50 = vmax.f32 %v1388_v38, %v1581_v0  ;;  %v2215_v1 = vsel %vm2190_vm8, %v2173_v34, 0.0 }
 0x622   :  { %v9994_v52 = vpop.f32.mrf.mxu1  ;;  %2216 = vadd.xlane.f32.xlu0 %v2215_v1  ;;  %v9913_v2 = vpop.f32.mrf.mxu0  ;;  %v12812_v1 = vld [vmem:[#allocation5 + $0xa68] sm:$0xff] }
 0x623   :  { %v2174_v47 = vmul.f32 %v1669_v50, %v12784_v45 }
 0x624   :  { %v1393_v56 = vpop.f32.mrf.mxu0  ;;  %v1586_v57 = vpop.f32.mrf.mxu1 }
 0x625   :  { %v1670_v60 = vmax.f32 %v1393_v56, %v1586_v57  ;;  %v2218_v62 = vsel %vm2190_vm8, %v2174_v47, 0.0 }
 0x626   :  { %v9997_v3 = vpop.f32.mrf.mxu1  ;;  %2219 = vadd.xlane.f32.xlu0 %v2218_v62  ;;  %v9916_v63 = vpop.f32.mrf.mxu0 }
 0x627   :  { %v2175_v6 = vmul.f32 %v1670_v60, %v12788_v58  ;;  %v12816_v3 = vld [vmem:[#allocation5 + $0xa70] sm:$0xff] }
 0x628   :  { %v1398_v7 = vpop.f32.mrf.mxu0  ;;  %v1591_v9 = vpop.f32.mrf.mxu1 }
 0x629   :  { %v1671_v14 = vmax.f32 %v1398_v7, %v1591_v9  ;;  %v2221_v61 = vsel %vm2190_vm8, %v2175_v6, 0.0 }
 0x62a   :  { %v10000_v15 = vpop.f32.mrf.mxu1  ;;  %2222 = vadd.xlane.f32.xlu0 %v2221_v61  ;;  %v9919_v44 = vpop.f32.mrf.mxu0 }
 0x62b   :  { %v2176_v18 = vmul.f32 %v1671_v14, %v12792_v13  ;;  %v12820_v44 = vld [vmem:[#allocation5 + $0xa78] sm:$0xff] }
 0x62c   :  { %v1403_v54 = vpop.f32.mrf.mxu0  ;;  %v1596_v53 = vpop.f32.mrf.mxu1 }
 0x62d   :  { %v1672_v11 = vmax.f32 %v1403_v54, %v1596_v53  ;;  %v2224_v27 = vsel %vm2190_vm8, %v2176_v18, 0.0 }
 0x62e   :  { %v10003_v23 = vpop.f32.mrf.mxu1  ;;  %2225 = vadd.xlane.f32.xlu0 %v2224_v27  ;;  %v9922_v25 = vpop.f32.mrf.mxu0 }
 0x62f   :  { %v2177_v26 = vmul.f32 %v1672_v11, %v12796_v21 }
 0x630   :  { %v1408_v29 = vpop.f32.mrf.mxu0  ;;  %v1601_v31 = vpop.f32.mrf.mxu1 }
 0x631   :  { %v1673_v33 = vmax.f32 %v1408_v29, %v1601_v31  ;;  %v2227_v36 = vsel %vm2190_vm8, %v2177_v26, 0.0  ;;  %v12824_v26 = vld [vmem:[#allocation5 + $0xa80] sm:$0xff] }
 0x632   :  { %v10006_v37 = vpop.f32.mrf.mxu1  ;;  %2228 = vadd.xlane.f32.xlu0 %v2227_v36  ;;  %v9925_v39 = vpop.f32.mrf.mxu0 }
 0x633   :  { %v2178_v16 = vmul.f32 %v1673_v33, %v12800_v32 }
 0x634   :  { %v1413_v40 = vpop.f32.mrf.mxu0  ;;  %v1606_v51 = vpop.f32.mrf.mxu1 }
 0x635   :  { %v1674_v20 = vmax.f32 %v1413_v40, %v1606_v51  ;;  %v2230_v28 = vsel %vm2190_vm8, %v2178_v16, 0.0  ;;  %v12828_v40 = vld [vmem:[#allocation5 + $0xa88] sm:$0xff] }
 0x636   :  { %v10009_v43 = vpop.f32.mrf.mxu1  ;;  %2231 = vadd.xlane.f32.xlu0 %v2230_v28  ;;  %v9928_v46 = vpop.f32.mrf.mxu0 }
 0x637   :  { %v2179_v48 = vmul.f32 %v1674_v20, %v12804_v59 }
 0x638   :  { %v1418_v49 = vpop.f32.mrf.mxu0  ;;  %v1611_v8 = vpop.f32.mrf.mxu1 }
 0x639   :  { %v1675_v17 = vmax.f32 %v1418_v49, %v1611_v8  ;;  %v2233_v24 = vsel %vm2190_vm8, %v2179_v48, 0.0  ;;  %v12832_v8 = vld [vmem:[#allocation5 + $0xa90] sm:$0xff] }
 0x63a   :  { %v10012_v30 = vpop.f32.mrf.mxu1  ;;  %2234 = vadd.xlane.f32.xlu0 %v2233_v24  ;;  %v9931_v34 = vpop.f32.mrf.mxu0 }
 0x63b   :  { %v2180_v38 = vmul.f32 %v1675_v17, %v12808_v19 }
 0x63c   :  { %v1423_v0 = vpop.f32.mrf.mxu0  ;;  %v1616_v50 = vpop.f32.mrf.mxu1 }
 0x63d   :  { %v1676_v52 = vmax.f32 %v1423_v0, %v1616_v50  ;;  %v2236_v2 = vsel %vm2190_vm8, %v2180_v38, 0.0 }
 0x63e   :  { %v10015_v47 = vpop.f32.mrf.mxu1  ;;  %2237 = vadd.xlane.f32.xlu0 %v2236_v2  ;;  %v9934_v56 = vpop.f32.mrf.mxu0 }
 0x63f   :  { %v2181_v57 = vmul.f32 %v1676_v52, %v12812_v1  ;;  %v12836_v52 = vld [vmem:[#allocation5 + $0xa98] sm:$0xff] }
 0x640   :  { %v1428_v60 = vpop.f32.mrf.mxu0  ;;  %v1621_v62 = vpop.f32.mrf.mxu1 }
 0x641   :  { %v1677_v63 = vmax.f32 %v1428_v60, %v1621_v62  ;;  %v2239_v6 = vsel %vm2190_vm8, %v2181_v57, 0.0 }
 0x642   :  { %v10018_v7 = vpop.f32.mrf.mxu1  ;;  %2240 = vadd.xlane.f32.xlu0 %v2239_v6  ;;  %v9937_v9 = vpop.f32.mrf.mxu0 }
 0x643   :  { %v2182_v14 = vmul.f32 %v1677_v63, %v12816_v3 }
 0x644   :  { %v1433_v61 = vpop.f32.mrf.mxu0  ;;  %v1626_v15 = vpop.f32.mrf.mxu1 }
 0x645   :  { %v1678_v18 = vmax.f32 %v1433_v61, %v1626_v15  ;;  %v2242_v54 = vsel %vm2190_vm8, %v2182_v14, 0.0 }
 0x646   :  { %v10021_v53 = vpop.f32.mrf.mxu1  ;;  %2243 = vadd.xlane.f32.xlu0 %v2242_v54  ;;  %v9940_v11 = vpop.f32.mrf.mxu0 }
 0x647   :  { %v2183_v27 = vmul.f32 %v1678_v18, %v12820_v44 }
 0x648   :  { %v1438_v23 = vpop.f32.mrf.mxu0  ;;  %v1631_v25 = vpop.f32.mrf.mxu1 }
 0x649   :  { %v1679_v29 = vmax.f32 %v1438_v23, %v1631_v25  ;;  %v2245_v31 = vsel %vm2190_vm8, %v2183_v27, 0.0 }
 0x64a   :  { %v10024_v33 = vpop.f32.mrf.mxu1  ;;  %2246 = vadd.xlane.f32.xlu0 %v2245_v31  ;;  %v9943_v36 = vpop.f32.mrf.mxu0 }
 0x64b   :  { %v2184_v37 = vmul.f32 %v1679_v29, %v12824_v26 }
 0x64c   :  { %v1443_v39 = vpop.f32.mrf.mxu0  ;;  %v1636_v16 = vpop.f32.mrf.mxu1 }
 0x64d   :  { %v1680_v51 = vmax.f32 %v1443_v39, %v1636_v16  ;;  %v2248_v20 = vsel %vm2190_vm8, %v2184_v37, 0.0 }
 0x64e   :  { %v10027_v28 = vpop.f32.mrf.mxu1  ;;  %2249 = vadd.xlane.f32.xlu0 %v2248_v20  ;;  %v9946_v43 = vpop.f32.mrf.mxu0 }
 0x64f   :  { %v2185_v46 = vmul.f32 %v1680_v51, %v12828_v40  ;;  %v12843_v51 = vld [vmem:[#allocation5 + $0xaa0] sm:$0xff] }
 0x650   :  { %v1448_v48 = vpop.f32.mrf.mxu0  ;;  %v1641_v49 = vpop.f32.mrf.mxu1 }
 0x651   :  { %v1681_v17 = vmax.f32 %v1448_v48, %v1641_v49  ;;  %v2251_v24 = vsel %vm2190_vm8, %v2185_v46, 0.0 }
 0x652   :  { %v10030_v30 = vpop.f32.mrf.mxu1  ;;  %2252 = vadd.xlane.f32.xlu0 %v2251_v24  ;;  %v9949_v34 = vpop.f32.mrf.mxu0 }
 0x653   :  { %v2186_v38 = vmul.f32 %v1681_v17, %v12832_v8  ;;  %v12848_v30 = vld [vmem:[#allocation5 + $0xaa8] sm:$0xff] }
 0x654   :  { %v1453_v0 = vpop.f32.mrf.mxu0  ;;  %v1646_v50 = vpop.f32.mrf.mxu1 }
 0x655   :  { %v1682_v2 = vmax.f32 %v1453_v0, %v1646_v50  ;;  %v2254_v47 = vsel %vm2190_vm8, %v2186_v38, 0.0 }
 0x656   :  { %v10033_v56 = vpop.f32.mrf.mxu1  ;;  %2255 = vadd.xlane.f32.xlu0 %v2254_v47  ;;  %v9952_v57 = vpop.f32.mrf.mxu0 }
 0x657   :  { %v2187_v60 = vmul.f32 %v1682_v2, %v12836_v52 }
 0x658   :  { %v1458_v62 = vpop.f32.mrf.mxu0  ;;  %v1651_v63 = vpop.f32.mrf.mxu1 }
 0x659   :  { %v2257_v6 = vsel %vm2190_vm8, %v2187_v60, 0.0  ;;  %v1683_v33 = vmax.f32 %v1458_v62, %v1651_v63 }
 0x65a   :  { %v10036_v7 = vpop.f32.mrf.mxu1  ;;  %2258 = vadd.xlane.f32.xlu0 %v2257_v6  ;;  %v9955_v9 = vpop.f32.mrf.mxu0 }
 0x65c   :  { %v1463_v14 = vpop.f32.mrf.mxu0  ;;  %v1656_v61 = vpop.f32.mrf.mxu1 }
 0x65d   :  { %v1684_v46 = vmax.f32 %v1463_v14, %v1656_v61 }
 0x65e   :  { %v9958_v15 = vpop.f32.mrf.mxu0  ;;  %v10039_v18 = vpop.f32.mrf.mxu1 }
 0x65f   :  { %v2189_v47 = vmul.f32 %v1684_v46, %v12848_v30 }
 0x660   :  { %v1826_v54 = vpop.f32.mrf.mxu0  ;;  %v2016_v53 = vpop.f32.mrf.mxu1 }
 0x661   :  { %v2140_v11 = vmin.f32 %v1826_v54, %v2016_v53 }
 0x662   :  { %v10048_v27 = vpop.f32.mrf.mxu0  ;;  %v10129_v23 = vpop.f32.mrf.mxu1 }
 0x663   :  { %v2266_v25 = vmul.f32 %v2140_v11, %v12739_v12  ;;  %v2188_v12 = vmul.f32 %v1683_v33, %v12843_v51 }
 0x664   :  { %v1831_v29 = vpop.f32.mrf.mxu0  ;;  %v2021_v31 = vpop.f32.mrf.mxu1 }
 0x665   :  { %v2141_v36 = vmin.f32 %v1831_v29, %v2021_v31  ;;  %v2291_v37 = vsel %vm2190_vm8, %v2266_v25, 0.0 }
 0x666   :  { %v10132_v39 = vpop.f32.mrf.mxu1  ;;  %2292 = vadd.xlane.f32.xlu0 %v2291_v37  ;;  %v10051_v16 = vpop.f32.mrf.mxu0 }
 0x667   :  { %v2267_v20 = vmul.f32 %v2141_v36, %v12750_v41  ;;  %v2260_v41 = vsel %vm2190_vm8, %v2188_v12, 0.0 }
 0x668   :  { %v1836_v28 = vpop.f32.mrf.mxu0  ;;  %v2026_v43 = vpop.f32.mrf.mxu1 }
 0x669   :  { %v2142_v48 = vmin.f32 %v1836_v28, %v2026_v43  ;;  %v2294_v49 = vsel %vm2190_vm8, %v2267_v20, 0.0 }
 0x66a   :  { %v10135_v17 = vpop.f32.mrf.mxu1  ;;  %2295 = vadd.xlane.f32.xlu0 %v2294_v49  ;;  %v10054_v24 = vpop.f32.mrf.mxu0 }
 0x66b   :  { %v2268_v34 = vmul.f32 %v2142_v48, %v12756_v55  ;;  %v2263_v55 = vsel %vm2190_vm8, %v2189_v47, 0.0 }
 0x66c   :  { %v1841_v38 = vpop.f32.mrf.mxu0  ;;  %v2031_v0 = vpop.f32.mrf.mxu1 }
 0x66d   :  { %v2143_v50 = vmin.f32 %v1841_v38, %v2031_v0  ;;  %v2297_v2 = vsel %vm2190_vm8, %v2268_v34, 0.0  ;;  %v2561_v38 = vld [vmem:[#allocation5 + $0x118] sm:$0xff] }
 0x66e   :  { %v10138_v56 = vpop.f32.mrf.mxu1  ;;  %2261 = vadd.xlane.f32.xlu0 %v2260_v41  ;;  %2298 = vadd.xlane.f32.xlu1 %v2297_v2  ;;  %v10057_v57 = vpop.f32.mrf.mxu0  ;;  %v2560_v41 = vld [vmem:[#allocation5 + $0x110] sm:$0xff] }
 0x66f   :  { %v2269_v60 = vmul.f32 %v2143_v50, %v12760_v10  ;;  %10203 = vmatpush3.msra.mxu1 %v2561_v38  ;;  %v2559_v57 = vld [vmem:[#allocation5 + $0x108] sm:$0xff] }
 0x670   :  { %v1846_v62 = vpop.f32.mrf.mxu0  ;;  %v2036_v63 = vpop.f32.mrf.mxu1 }
 0x671   :  { %v2144_v6 = vmin.f32 %v1846_v62, %v2036_v63  ;;  %v2300_v7 = vsel %vm2190_vm8, %v2269_v60, 0.0  ;;  %v2558_v63 = vld [vmem:[#allocation5 + $0x100] sm:$0xff] }
 0x672   :  { %v10141_v9 = vpop.f32.mrf.mxu1  ;;  %2264 = vadd.xlane.f32.xlu0 %v2263_v55  ;;  %2301 = vadd.xlane.f32.xlu1 %v2300_v7  ;;  %v10060_v14 = vpop.f32.mrf.mxu0 }
 0x673   :  { %v2270_v61 = vmul.f32 %v2144_v6, %v12764_v5  ;;  %v12861_v5 = vld [vmem:[#allocation4] sm:$0xff] }
 0x674   :  { %v1851_v15 = vpop.f32.mrf.mxu0  ;;  %v2041_v18 = vpop.f32.mrf.mxu1  ;;  %51 = vst.msk [vmem:[#allocation3] sm:$0xff] %vm50_vm9, %v12861_v5  ;;  %52 = vst.msk [vmem:[#allocation3 + $0x8] sm:$0xff] %vm50_vm9, %v12861_v5  ;;  %10204 = vmatprep.subr.mxu1 %v12861_v5 }
 0x675   :  { %v2145_v54 = vmin.f32 %v1851_v15, %v2041_v18  ;;  %v2303_v53 = vsel %vm2190_vm8, %v2270_v61, 0.0  ;;  %53 = vst.msk [vmem:[#allocation3 + $0xd8] sm:$0xff] %vm50_vm9, %v12861_v5  ;;  %54 = vst.msk [vmem:[#allocation3 + $0xe0] sm:$0xff] %vm50_vm9, %v12861_v5  ;;  %10205 = vmatpush3.msra.mxu1 %v2560_v41 }
 0x676   :  { %v10144_v11 = vpop.f32.mrf.mxu1  ;;  %2304 = vadd.xlane.f32.xlu1 %v2303_v53  ;;  %v10063_v10 = vpop.f32.mrf.mxu0  ;;  %10206 = vmatprep.subr.mxu1 %v12861_v5 }
 0x677   :  { %v2271_v27 = vmul.f32 %v2145_v54, %v12768_v22  ;;  %10207 = vmatpush3.msra.mxu1 %v2559_v57 }
 0x678   :  { %v1856_v23 = vpop.f32.mrf.mxu0  ;;  %v2046_v25 = vpop.f32.mrf.mxu1  ;;  %10208 = vmatprep.subr.mxu1 %v12861_v5 }
 0x679   :  { %v2146_v29 = vmin.f32 %v1856_v23, %v2046_v25  ;;  %v2306_v31 = vsel %vm2190_vm8, %v2271_v27, 0.0  ;;  %10209 = vmatpush3.msra.mxu1 %v2558_v63 }
 0x67a   :  { %v10147_v33 = vpop.f32.mrf.mxu1  ;;  %2307 = vadd.xlane.f32.xlu1 %v2306_v31  ;;  %v10066_v36 = vpop.f32.mrf.mxu0  ;;  %10285 = vmatprep.subr.mxu1 %v12861_v5 }
 0x67b   :  { %v2272_v22 = vmul.f32 %v2146_v29, %v12772_v35 }
 0x67c   :  { %v1861_v37 = vpop.f32.mrf.mxu0  ;;  %v2051_v39 = vpop.f32.mrf.mxu1 }
 0x67d   :  { %v2147_v16 = vmin.f32 %v1861_v37, %v2051_v39  ;;  %v2309_v20 = vsel %vm2190_vm8, %v2272_v22, 0.0 }
 0x67e   :  { %v10150_v28 = vpop.f32.mrf.mxu1  ;;  %2310 = vadd.xlane.f32.xlu1 %v2309_v20  ;;  %v10069_v43 = vpop.f32.mrf.mxu0 }
 0x67f   :  { %v2273_v46 = vmul.f32 %v2147_v16, %v12776_v42 }
 0x680   :  { %v1866_v48 = vpop.f32.mrf.mxu0  ;;  %v2056_v49 = vpop.f32.mrf.mxu1 }
 0x681   :  { %v2148_v12 = vmin.f32 %v1866_v48, %v2056_v49  ;;  %v2312_v17 = vsel %vm2190_vm8, %v2273_v46, 0.0 }
 0x682   :  { %v10153_v24 = vpop.f32.mrf.mxu1  ;;  %2313 = vadd.xlane.f32.xlu1 %v2312_v17  ;;  %v10072_v34 = vpop.f32.mrf.mxu0 }
 0x683   :  { %v2274_v35 = vmul.f32 %v2148_v12, %v12780_v4 }
 0x684   :  { %v1871_v0 = vpop.f32.mrf.mxu0  ;;  %v2061_v50 = vpop.f32.mrf.mxu1 }
 0x685   :  { %v2149_v2 = vmin.f32 %v1871_v0, %v2061_v50  ;;  %v2315_v42 = vsel %vm2190_vm8, %v2274_v35, 0.0 }
 0x686   :  { %v10156_v47 = vpop.f32.mrf.mxu1  ;;  %2316 = vadd.xlane.f32.xlu1 %v2315_v42  ;;  %v10075_v56 = vpop.f32.mrf.mxu0 }
 0x687   :  { %v2275_v60 = vmul.f32 %v2149_v2, %v12784_v45 }
 0x688   :  { %v1876_v4 = vpop.f32.mrf.mxu0  ;;  %v2066_v62 = vpop.f32.mrf.mxu1 }
 0x689   :  { %v2150_v6 = vmin.f32 %v1876_v4, %v2066_v62  ;;  %v2318_v55 = vsel %vm2190_vm8, %v2275_v60, 0.0 }
 0x68a   :  { %v10159_v7 = vpop.f32.mrf.mxu1  ;;  %2319 = vadd.xlane.f32.xlu1 %v2318_v55  ;;  %v10078_v9 = vpop.f32.mrf.mxu0 }
 0x68b   :  { %v2276_v14 = vmul.f32 %v2150_v6, %v12788_v58  ;;  %v12885_v11 = vpop.xlane.xlu0 %2192 }
 0x68c   :  { %v1881_v61 = vpop.f32.mrf.mxu0  ;;  %v2071_v15 = vpop.f32.mrf.mxu1 }
 0x68d   :  { %v2151_v45 = vmin.f32 %v1881_v61, %v2071_v15  ;;  %v2321_v18 = vsel %vm2190_vm8, %v2276_v14, 0.0 }
 0x68e   :  { %v10162_v54 = vpop.f32.mrf.mxu1  ;;  %2322 = vadd.xlane.f32.xlu1 %v2321_v18  ;;  %v10081_v53 = vpop.f32.mrf.mxu0 }
 0x68f   :  { %v2277_v10 = vmul.f32 %v2151_v45, %v12792_v13 }
 0x690   :  { %v1886_v27 = vpop.f32.mrf.mxu0  ;;  %v2076_v23 = vpop.f32.mrf.mxu1 }
 0x691   :  { %v2152_v25 = vmin.f32 %v1886_v27, %v2076_v23  ;;  %v2324_v29 = vsel %vm2190_vm8, %v2277_v10, 0.0 }
 0x692   :  { %v10165_v31 = vpop.f32.mrf.mxu1  ;;  %2325 = vadd.xlane.f32.xlu1 %v2324_v29  ;;  %v10084_v58 = vpop.f32.mrf.mxu0 }
 0x693   :  { %v12889_v33 = vpop.xlane.xlu0 %2198  ;;  %v2278_v36 = vmul.f32 %v2152_v25, %v12796_v21 }
 0x694   :  { %v1891_v22 = vpop.f32.mrf.mxu0  ;;  %v2081_v37 = vpop.f32.mrf.mxu1 }
 0x695   :  { %v2153_v39 = vmin.f32 %v1891_v22, %v2081_v37  ;;  %v2327_v16 = vsel %vm2190_vm8, %v2278_v36, 0.0 }
 0x696   :  { %v10168_v20 = vpop.f32.mrf.mxu1  ;;  %2328 = vadd.xlane.f32.xlu1 %v2327_v16  ;;  %v10087_v13 = vpop.f32.mrf.mxu0 }
 0x697   :  { %v12893_v28 = vpop.xlane.xlu0 %2201  ;;  %v2279_v43 = vmul.f32 %v2153_v39, %v12800_v32 }
 0x698   :  { %v1896_v46 = vpop.f32.mrf.mxu0  ;;  %v2086_v48 = vpop.f32.mrf.mxu1 }
 0x699   :  { %v2154_v49 = vmin.f32 %v1896_v46, %v2086_v48  ;;  %v2330_v12 = vsel %vm2190_vm8, %v2279_v43, 0.0 }
 0x69a   :  { %v10171_v17 = vpop.f32.mrf.mxu1  ;;  %2331 = vadd.xlane.f32.xlu1 %v2330_v12  ;;  %v10090_v21 = vpop.f32.mrf.mxu0 }
 0x69b   :  { %v12897_v24 = vpop.xlane.xlu0 %2204  ;;  %v2280_v34 = vmul.f32 %v2154_v49, %v12804_v59 }
 0x69c   :  { %v1901_v38 = vpop.f32.mrf.mxu0  ;;  %v2091_v35 = vpop.f32.mrf.mxu1 }
 0x69d   :  { %v2155_v0 = vmin.f32 %v1901_v38, %v2091_v35  ;;  %v2333_v50 = vsel %vm2190_vm8, %v2280_v34, 0.0 }
 0x69e   :  { %v10174_v41 = vpop.f32.mrf.mxu1  ;;  %2334 = vadd.xlane.f32.xlu1 %v2333_v50  ;;  %v10093_v32 = vpop.f32.mrf.mxu0 }
 0x69f   :  { %v12901_v2 = vpop.xlane.xlu0 %2207  ;;  %v2281_v42 = vmul.f32 %v2155_v0, %v12808_v19 }
 0x6a0   :  { %v1906_v47 = vpop.f32.mrf.mxu0  ;;  %v2096_v56 = vpop.f32.mrf.mxu1 }
 0x6a1   :  { %v2156_v57 = vmin.f32 %v1906_v47, %v2096_v56  ;;  %v2336_v60 = vsel %vm2190_vm8, %v2281_v42, 0.0 }
 0x6a2   :  { %v10177_v4 = vpop.f32.mrf.mxu1  ;;  %2337 = vadd.xlane.f32.xlu1 %v2336_v60  ;;  %v10096_v59 = vpop.f32.mrf.mxu0 }
 0x6a3   :  { %v12905_v62 = vpop.xlane.xlu0 %2210  ;;  %v2282_v63 = vmul.f32 %v2156_v57, %v12812_v1 }
 0x6a4   :  { %v1911_v6 = vpop.f32.mrf.mxu0  ;;  %v2101_v55 = vpop.f32.mrf.mxu1 }
 0x6a5   :  { %v2157_v7 = vmin.f32 %v1911_v6, %v2101_v55  ;;  %v2339_v9 = vsel %vm2190_vm8, %v2282_v63, 0.0 }
 0x6a6   :  { %v10180_v14 = vpop.f32.mrf.mxu1  ;;  %2340 = vadd.xlane.f32.xlu1 %v2339_v9  ;;  %v10099_v19 = vpop.f32.mrf.mxu0 }
 0x6a7   :  { %v12909_v61 = vpop.xlane.xlu0 %2213  ;;  %v2283_v15 = vmul.f32 %v2157_v7, %v12816_v3 }
 0x6a8   :  { %v1916_v45 = vpop.f32.mrf.mxu0  ;;  %v2106_v18 = vpop.f32.mrf.mxu1 }
 0x6a9   :  { %v2158_v54 = vmin.f32 %v1916_v45, %v2106_v18  ;;  %v2342_v53 = vsel %vm2190_vm8, %v2283_v15, 0.0 }
 0x6aa   :  { %v10183_v10 = vpop.f32.mrf.mxu1  ;;  %2343 = vadd.xlane.f32.xlu1 %v2342_v53  ;;  %v10102_v1 = vpop.f32.mrf.mxu0 }
 0x6ab   :  { %v12913_v27 = vpop.xlane.xlu0 %2216  ;;  %v2284_v23 = vmul.f32 %v2158_v54, %v12820_v44  ;;  %v2541_v10 = vld [vmem:[#allocation5 + $0x78] sm:$0xff] }
 0x6ac   :  { %v1921_v25 = vpop.f32.mrf.mxu0  ;;  %v2111_v29 = vpop.f32.mrf.mxu1  ;;  %3560 = vmatpush1.msra.mxu0 %v2541_v10 }
 0x6ad   :  { %v2159_v31 = vmin.f32 %v1921_v25, %v2111_v29  ;;  %v2345_v58 = vsel %vm2190_vm8, %v2284_v23, 0.0  ;;  %3561 = vmatprep.subr.mxu0 %v12861_v5  ;;  %v2539_v23 = vld [vmem:[#allocation5 + $0x68] sm:$0xff]  ;;  %v2537_v29 = vld [vmem:[#allocation5 + $0x58] sm:$0xff] }
 0x6ae   :  { %v10186_v36 = vpop.f32.mrf.mxu1  ;;  %2346 = vadd.xlane.f32.xlu1 %v2345_v58  ;;  %v10105_v3 = vpop.f32.mrf.mxu0 }
 0x6af   :  { %v12917_v22 = vpop.xlane.xlu0 %2219  ;;  %v2285_v37 = vmul.f32 %v2159_v31, %v12824_v26  ;;  %v2536_v31 = vld [vmem:[#allocation5 + $0x50] sm:$0xff]  ;;  %v2535_v36 = vld [vmem:[#allocation5 + $0x48] sm:$0xff]  ;;  %v2534_v3 = vld [vmem:[#allocation5 + $0x40] sm:$0xff] }
 0x6b0   :  { %v1926_v39 = vpop.f32.mrf.mxu0  ;;  %v2116_v16 = vpop.f32.mrf.mxu1 }
 0x6b1   :  { %v2160_v20 = vmin.f32 %v1926_v39, %v2116_v16  ;;  %v2348_v13 = vsel %vm2190_vm8, %v2285_v37, 0.0  ;;  %v2533_v37 = vld [vmem:[#allocation5 + $0x38] sm:$0xff]  ;;  %v2532_v39 = vld [vmem:[#allocation5 + $0x30] sm:$0xff] }
 0x6b2   :  { %v10189_v43 = vpop.f32.mrf.mxu1  ;;  %2349 = vadd.xlane.f32.xlu1 %v2348_v13  ;;  %v10108_v44 = vpop.f32.mrf.mxu0  ;;  %v2530_v13 = vld [vmem:[#allocation5 + $0x20] sm:$0xff] }
 0x6b3   :  { %v12921_v46 = vpop.xlane.xlu0 %2222  ;;  %v2286_v48 = vmul.f32 %v2160_v20, %v12828_v40  ;;  %v2531_v20 = vld [vmem:[#allocation5 + $0x28] sm:$0xff]  ;;  %v2529_v43 = vld [vmem:[#allocation5 + $0x18] sm:$0xff] }
 0x6b4   :  { %v1931_v49 = vpop.f32.mrf.mxu0  ;;  %v2121_v12 = vpop.f32.mrf.mxu1 }
 0x6b5   :  { %v2161_v17 = vmin.f32 %v1931_v49, %v2121_v12  ;;  %v2351_v21 = vsel %vm2190_vm8, %v2286_v48, 0.0  ;;  %v2528_v48 = vld [vmem:[#allocation5 + $0x10] sm:$0xff]  ;;  %v2527_v49 = vld [vmem:[#allocation5 + $0x8] sm:$0xff]  ;;  %v2526_v12 = vld [vmem:[#allocation5] sm:$0xff] }
 0x6b6   :  { %v10192_v34 = vpop.f32.mrf.mxu1  ;;  %2352 = vadd.xlane.f32.xlu1 %v2351_v21  ;;  %v10111_v26 = vpop.f32.mrf.mxu0  ;;  %v2557_v21 = vld [vmem:[#allocation5 + $0xf8] sm:$0xff] }
 0x6b7   :  { %v12925_v38 = vpop.xlane.xlu0 %2225  ;;  %v2287_v35 = vmul.f32 %v2161_v17, %v12832_v8  ;;  %v2556_v34 = vld [vmem:[#allocation5 + $0xf0] sm:$0xff]  ;;  %v2555_v26 = vld [vmem:[#allocation5 + $0xe8] sm:$0xff] }
 0x6b8   :  { %v1936_v0 = vpop.f32.mrf.mxu0  ;;  %v2126_v50 = vpop.f32.mrf.mxu1 }
 0x6b9   :  { %v2162_v41 = vmin.f32 %v1936_v0, %v2126_v50  ;;  %v2354_v32 = vsel %vm2190_vm8, %v2287_v35, 0.0  ;;  %v2554_v0 = vld [vmem:[#allocation5 + $0xe0] sm:$0xff]  ;;  %v12975_v50 = vld [vmem:[#allocation5 + $0xb28] ss:$0 sm:$0xff] }
 0x6ba   :  { %v10195_v42 = vpop.f32.mrf.mxu1  ;;  %2355 = vadd.xlane.f32.xlu1 %v2354_v32  ;;  %v10114_v40 = vpop.f32.mrf.mxu0  ;;  %v2399_v10 = vmul.f32 %v12975_v50, %v12889_v33  ;;  %v2546_v33 = vld [vmem:[#allocation5 + $0xa0] sm:$0xff] }
 0x6bb   :  { %v12929_v47 = vpop.xlane.xlu0 %2228  ;;  %v2288_v56 = vmul.f32 %v2162_v41, %v12836_v52  ;;  %v2553_v41 = vld [vmem:[#allocation5 + $0xd8] sm:$0xff]  ;;  %v2552_v42 = vld [vmem:[#allocation5 + $0xd0] sm:$0xff]  ;;  %v2397_v40 = vmul.f32 %v12975_v50, %v12885_v11 }
 0x6bc   :  { %v1941_v57 = vpop.f32.mrf.mxu0  ;;  %v2131_v60 = vpop.f32.mrf.mxu1 }
 0x6bd   :  { %v2163_v4 = vmin.f32 %v1941_v57, %v2131_v60  ;;  %v2357_v59 = vsel %vm2190_vm8, %v2288_v56, 0.0  ;;  %v2196_v57 = vpop.xlane.xlu1 %2195  ;;  %v12982_v60 = vld [vmem:[#allocation5 + $0xb30] ss:$0 sm:$0xff] }
 0x6be   :  { %v10198_v63 = vpop.f32.mrf.mxu1  ;;  %2358 = vadd.xlane.f32.xlu1 %v2357_v59  ;;  %v10117_v8 = vpop.f32.mrf.mxu0 }
 0x6bf   :  { %v12933_v6 = vpop.xlane.xlu0 %2231  ;;  %v2289_v55 = vmul.f32 %v2163_v4, %v12843_v51  ;;  %v2540_v51 = vld [vmem:[#allocation5 + $0x70] sm:$0xff]  ;;  %v2551_v4 = vld [vmem:[#allocation5 + $0xc8] sm:$0xff] }
 0x6c0   :  { %v1946_v7 = vpop.f32.mrf.mxu0  ;;  %v2136_v9 = vpop.f32.mrf.mxu1  ;;  %3562 = vmatpush1.msra.mxu0 %v2540_v51  ;;  %v2368_v63 = vld [vmem:[#allocation5 + $0x8a8] sm:$0xff] }
 0x6c1   :  { %v2164_v14 = vmin.f32 %v1946_v7, %v2136_v9  ;;  %v2360_v19 = vsel %vm2190_vm8, %v2289_v55, 0.0  ;;  %3563 = vmatprep.subr.mxu0 %v12861_v5  ;;  %v2550_v55 = vld [vmem:[#allocation5 + $0xc0] sm:$0xff]  ;;  %v2398_v7 = vmul.f32 %v12975_v50, %v2196_v57 }
 0x6c2   :  { %v10201_v15 = vpop.f32.mrf.mxu1  ;;  %2361 = vadd.xlane.f32.xlu1 %v2360_v19  ;;  %v10120_v52 = vpop.f32.mrf.mxu0  ;;  %3564 = vmatpush1.msra.mxu0 %v2539_v23 }
 0x6c3   :  { %v12937_v45 = vpop.xlane.xlu0 %2234  ;;  %v2290_v18 = vmul.f32 %v2164_v14, %v12848_v30  ;;  %3565 = vmatprep.subr.mxu0 %v12861_v5  ;;  %v2538_v30 = vld [vmem:[#allocation5 + $0x60] sm:$0xff]  ;;  %v2549_v14 = vld [vmem:[#allocation5 + $0xb8] sm:$0xff]  ;;  %v2369_v52 = vld [vmem:[#allocation5 + $0x8b0] sm:$0xff] }
 0x6c4   :  { %3566 = vmatpush1.msra.mxu0 %v2538_v30 }
 0x6c5   :  { %v2363_v54 = vsel %vm2190_vm8, %v2290_v18, 0.0  ;;  %3567 = vmatprep.subr.mxu0 %v12861_v5 }
 0x6c6   :  { %2364 = vadd.xlane.f32.xlu1 %v2363_v54  ;;  %3568 = vmatpush1.msra.mxu0 %v2537_v29  ;;  %v2548_v54 = vld [vmem:[#allocation5 + $0xb0] sm:$0xff] }
 0x6c7   :  { %v12941_v53 = vpop.xlane.xlu0 %2237  ;;  %3569 = vmatprep.subr.mxu0 %v12861_v5 }
 0x6c8   :  { %3570 = vmatpush1.msra.mxu0 %v2536_v31  ;;  %v2370_v31 = vld [vmem:[#allocation5 + $0x8b8] sm:$0xff] }
 0x6c9   :  { %3571 = vmatprep.subr.mxu0 %v12861_v5 }
 0x6ca   :  { %3572 = vmatpush1.msra.mxu0 %v2535_v36 }
 0x6cb   :  { %v12944_v1 = vpop.xlane.xlu0 %2240  ;;  %3573 = vmatprep.subr.mxu0 %v12861_v5 }
 0x6cc   :  { %3574 = vmatpush1.msra.mxu0 %v2534_v3  ;;  %v2547_v3 = vld [vmem:[#allocation5 + $0xa8] sm:$0xff] }
 0x6cd   :  { %3575 = vmatprep.subr.mxu0 %v12861_v5 }
 0x6ce   :  { %3576 = vmatpush1.msra.mxu0 %v2533_v37  ;;  %v2400_v37 = vmul.f32 %v12975_v50, %v12893_v28  ;;  %v2401_v28 = vmul.f32 %v12975_v50, %v12897_v24  ;;  %v2402_v24 = vmul.f32 %v12975_v50, %v12901_v2  ;;  %v2403_v2 = vmul.f32 %v12975_v50, %v12905_v62 }
 0x6cf   :  { %v12948_v25 = vpop.xlane.xlu0 %2243  ;;  %3577 = vmatprep.subr.mxu0 %v12861_v5 }
 0x6d0   :  { %3578 = vmatpush1.msra.mxu0 %v2532_v39 }
 0x6d1   :  { %3579 = vmatprep.subr.mxu0 %v12861_v5 }
 0x6d2   :  { %3580 = vmatpush1.msra.mxu0 %v2531_v20 }
 0x6d3   :  { %v12952_v58 = vpop.xlane.xlu0 %2246  ;;  %3581 = vmatprep.subr.mxu0 %v12861_v5 }
 0x6d4   :  { %3582 = vmatpush1.msra.mxu0 %v2530_v13 }
 0x6d5   :  { %3583 = vmatprep.subr.mxu0 %v12861_v5 }
 0x6d6   :  { %3584 = vmatpush1.msra.mxu0 %v2529_v43 }
 0x6d7   :  { %v12957_v16 = vpop.xlane.xlu0 %2249  ;;  %3585 = vmatprep.subr.mxu0 %v12861_v5 }
 0x6d8   :  { %3586 = vmatpush1.msra.mxu0 %v2528_v48  ;;  %v2371_v48 = vld [vmem:[#allocation5 + $0x8c0] sm:$0xff] }
 0x6d9   :  { %3587 = vmatprep.subr.mxu0 %v12861_v5 }
 0x6da   :  { %3588 = vmatpush1.msra.mxu0 %v2527_v49 }
 0x6db   :  { %v12962_v44 = vpop.xlane.xlu0 %2252  ;;  %3589 = vmatprep.subr.mxu0 %v12861_v5 }
 0x6dc   :  { %3590 = vmatpush1.msra.mxu0 %v2526_v12  ;;  %v2545_v12 = vld [vmem:[#allocation5 + $0x98] sm:$0xff] }
 0x6dd   :  { %3591 = vmatprep.subr.mxu0 %v12861_v5 }
 0x6de   :  { %3592 = vmatpush2.msra.mxu0 %v2557_v21 }
 0x6df   :  { %v12967_v17 = vpop.xlane.xlu0 %2255  ;;  %3593 = vmatprep.subr.mxu0 %v12861_v5 }
 0x6e0   :  { %3594 = vmatpush2.msra.mxu0 %v2556_v34 }
 0x6e1   :  { %3595 = vmatprep.subr.mxu0 %v12861_v5 }
 0x6e2   :  { %3596 = vmatpush2.msra.mxu0 %v2555_v26  ;;  %v2544_v26 = vld [vmem:[#allocation5 + $0x90] sm:$0xff] }
 0x6e3   :  { %v12972_v35 = vpop.xlane.xlu0 %2258  ;;  %3597 = vmatprep.subr.mxu0 %v12861_v5 }
 0x6e4   :  { %3598 = vmatpush2.msra.mxu0 %v2554_v0  ;;  %v2650_v0 = vld [vmem:[#allocation3 + $0x6] sm:$0xff] }
 0x6e5   :  { %3599 = vmatprep.subr.mxu0 %v12861_v5 }
 0x6e6   :  { %3600 = vmatpush2.msra.mxu0 %v2553_v41 }
 0x6e7   :  { %3601 = vmatprep.subr.mxu0 %v12861_v5 }
 0x6e8   :  { %3602 = vmatpush2.msra.mxu0 %v2552_v42  ;;  %v2372_v42 = vld [vmem:[#allocation5 + $0x8c8] sm:$0xff] }
 0x6e9   :  { %3603 = vmatprep.subr.mxu0 %v12861_v5 }
 0x6ea   :  { %3604 = vmatpush2.msra.mxu0 %v2551_v4 }
 0x6eb   :  { %3605 = vmatprep.subr.mxu0 %v12861_v5 }
 0x6ec   :  { %3606 = vmatpush2.msra.mxu0 %v2550_v55  ;;  %v2675_v55 = vld [vmem:[#allocation3 + $0x7] sm:$0xff] }
 0x6ed   :  { %3607 = vmatprep.subr.mxu0 %v12861_v5 }
 0x6ee   :  { %3608 = vmatpush2.msra.mxu0 %v2549_v14 }
 0x6ef   :  { %v2293_v32 = vpop.xlane.xlu0 %2292  ;;  %3609 = vmatprep.subr.mxu0 %v12861_v5 }
 0x6f0   :  { %v2422_v56 = vmul.f32 %v12975_v50, %v2293_v32  ;;  %3610 = vmatpush2.msra.mxu0 %v2548_v54 }
 0x6f1   :  { %3611 = vmatprep.subr.mxu0 %v12861_v5 }
 0x6f2   :  { %v2447_v59 = vmax.f32 %v2397_v40, %v2422_v56  ;;  %3612 = vmatpush2.msra.mxu0 %v2547_v3 }
 0x6f3   :  { %v2296_v8 = vpop.xlane.xlu0 %2295  ;;  %3613 = vmatprep.subr.mxu0 %v12861_v5 }
 0x6f4   :  { %v2476_v11 = vadd.f32 %v12982_v60, %v2447_v59  ;;  %v2423_v9 = vmul.f32 %v12975_v50, %v2296_v8  ;;  %3614 = vmatpush2.msra.mxu0 %v2546_v33  ;;  %v2542_v8 = vld [vmem:[#allocation5 + $0x80] sm:$0xff]  ;;  %v2404_v33 = vmul.f32 %v12975_v50, %v12909_v61 }
 0x6f5   :  { %3615 = vmatprep.subr.mxu0 %v12861_v5 }
 0x6f6   :  { %v12990_v19 = vmul.f32 %v2476_v11, %v2368_v63  ;;  %v2448_v15 = vmax.f32 %v2398_v7, %v2423_v9  ;;  %3616 = vmatpush2.msra.mxu0 %v2545_v12  ;;  %v2543_v63 = vld [vmem:[#allocation5 + $0x88] sm:$0xff]  ;;  %v2373_v11 = vld [vmem:[#allocation5 + $0x8d0] sm:$0xff] }
 0x6f7   :  { %v2299_v18 = vpop.xlane.xlu1 %2298  ;;  %3617 = vmatprep.subr.mxu0 %v12861_v5 }
 0x6f8   :  { %16104 = vst [vmem:[#allocation14_spill] sm:$0xff] %v12990_v19  ;;  %2600 = vst.msk [vmem:[#allocation3 + $0x10] sm:$0xff] %vm2599_vm10, %v12990_v19  ;;  %v2477_v51 = vadd.f32 %v12982_v60, %v2448_v15  ;;  %v2424_v23 = vmul.f32 %v12975_v50, %v2299_v18  ;;  %3618 = vmatpush2.msra.mxu0 %v2544_v26  ;;  %v2405_v26 = vmul.f32 %v12975_v50, %v12913_v27  ;;  %v2376_v27 = vld [vmem:[#allocation5 + $0x8e8] sm:$0xff] }
 0x6f9   :  { %3619 = vmatprep.subr.mxu0 %v12861_v5 }
 0x6fa   :  { %v13000_v30 = vmul.f32 %v2477_v51, %v2369_v52  ;;  %v2449_v29 = vmax.f32 %v2399_v10, %v2424_v23  ;;  %3620 = vmatpush2.msra.mxu0 %v2543_v63 }
 0x6fb   :  { %v2302_v36 = vpop.xlane.xlu1 %2301  ;;  %3621 = vmatprep.subr.mxu0 %v12861_v5 }
 0x6fc   :  { %16105 = vst [vmem:[#allocation15_spill] sm:$0xff] %v13000_v30  ;;  %2601 = vst.msk [vmem:[#allocation3 + $0x18] sm:$0xff] %vm2599_vm10, %v13000_v30  ;;  %v2478_v39 = vadd.f32 %v12982_v60, %v2449_v29  ;;  %v2425_v20 = vmul.f32 %v12975_v50, %v2302_v36  ;;  %3622 = vmatpush2.msra.mxu0 %v2542_v8  ;;  %v2406_v8 = vmul.f32 %v12975_v50, %v12917_v22 }
 0x6fd   :  { %5222 = vmatprep.subr.mxu0 %v12861_v5 }
 0x6fe   :  { %v13010_v13 = vmul.f32 %v2478_v39, %v2370_v31  ;;  %v2450_v43 = vmax.f32 %v2400_v37, %v2425_v20  ;;  %v2374_v31 = vld [vmem:[#allocation5 + $0x8d8] sm:$0xff] }
 0x6ff   :  { %v2305_v49 = vpop.xlane.xlu1 %2304  ;;  %v2651_v52 = vld [vmem:[#allocation3 + $0xe] sm:$0xff] }
 0x700   :  { %16106 = vst [vmem:[#allocation16_spill] sm:$0xff] %v13010_v13  ;;  %2602 = vst.msk [vmem:[#allocation3 + $0x20] sm:$0xff] %vm2599_vm10, %v13010_v13  ;;  %v2479_v21 = vadd.f32 %v12982_v60, %v2450_v43  ;;  %v2426_v34 = vmul.f32 %v12975_v50, %v2305_v49  ;;  %v2676_v3 = vld [vmem:[#allocation3 + $0xf] sm:$0xff] }
 0x702   :  { %v13020_v41 = vmul.f32 %v2479_v21, %v2371_v48  ;;  %v2451_v32 = vmax.f32 %v2401_v28, %v2426_v34 }
 0x703   :  { %v2308_v40 = vpop.xlane.xlu1 %2307  ;;  %v2701_v56 = vld [vmem:[#allocation3 + $0x11] sm:$0xff] }
 0x704   :  { %16107 = vst [vmem:[#allocation17_spill] sm:$0xff] %v13020_v41  ;;  %2603 = vst.msk [vmem:[#allocation3 + $0x28] sm:$0xff] %vm2599_vm10, %v13020_v41  ;;  %v2480_v57 = vadd.f32 %v12982_v60, %v2451_v32  ;;  %v2427_v4 = vmul.f32 %v12975_v50, %v2308_v40  ;;  %v10737_v59 = vpack.i.bf16 %v2650_v0, %v2701_v56  ;;  %v2677_v20 = vld [vmem:[#allocation3 + $0x17] sm:$0xff] }
 0x705   :  { %v2375_v0 = vld [vmem:[#allocation5 + $0x8e0] sm:$0xff] }
 0x706   :  { %v13029_v7 = vmul.f32 %v2480_v57, %v2372_v42  ;;  %v2452_v9 = vmax.f32 %v2402_v24, %v2427_v4  ;;  %10738 = vrot.lane.b32.xlu0 %v10737_v59, %s11837_s19 }
 0x707   :  { %v2311_v14 = vpop.xlane.xlu1 %2310  ;;  %v2752_v15 = vld [vmem:[#allocation3 + $0x1b] sm:$0xff] }
 0x708   :  { %16108 = vst [vmem:[#allocation18_spill] sm:$0xff] %v13029_v7  ;;  %v2702_v18 = vld [vmem:[#allocation3 + $0x19] sm:$0xff]  ;;  %2604 = vst.msk [vmem:[#allocation3 + $0x30] sm:$0xff] %vm2599_vm10, %v13029_v7  ;;  %v2481_v54 = vadd.f32 %v12982_v60, %v2452_v9  ;;  %v2428_v10 = vmul.f32 %v12975_v50, %v2311_v14  ;;  %10211 = vmatmul.mubr.msk.f32.vlgmr.msra.gmra.mxu1 %vm2599_vm10, %v2752_v15 }
 0x709   :  { %v10752_v51 = vpack.i.bf16 %v2651_v52, %v2702_v18  ;;  %v10742_v23 = vpack.i.bf16 %v2675_v55, %v2702_v18  ;;  %10213 = vmatprep.mubr.msk.f32.mxu1 %vm11829_vm1, %v12861_v5  ;;  %v2727_v62 = vld [vmem:[#allocation3 + $0x1a] sm:$0xff] }
 0x70a   :  { %v13043_v29 = vmul.f32 %v2481_v54, %v2373_v11  ;;  %v2453_v36 = vmax.f32 %v2403_v2, %v2428_v10  ;;  %v10747_v28 = vpack.i.bf16 %v2676_v3, %v2727_v62  ;;  %v2653_v9 = vld [vmem:[#allocation3 + $0x1e] sm:$0xff]  ;;  %v2652_v2 = vld [vmem:[#allocation3 + $0x16] sm:$0xff]  ;;  %v2407_v62 = vmul.f32 %v12975_v50, %v12921_v46 }
 0x70b   :  { %10753 = vrot.lane.b32.xlu0 %v10752_v51, %s11837_s19  ;;  %10743 = vrot.lane.b32.xlu1 %v10742_v23, %s11838_s20  ;;  %v2314_v37 = vpop.xlane.xlu1 %2313  ;;  %v2753_v39 = vld [vmem:[#allocation3 + $0x23] sm:$0xff] }
 0x70c   :  { %16109 = vst [vmem:[#allocation19_spill] sm:$0xff] %v13043_v29  ;;  %v2728_v43 = vld [vmem:[#allocation3 + $0x22] sm:$0xff]  ;;  %2605 = vst.msk [vmem:[#allocation3 + $0x38] sm:$0xff] %vm2599_vm10, %v13043_v29  ;;  %v2482_v48 = vadd.f32 %v12982_v60, %v2453_v36  ;;  %v2429_v49 = vmul.f32 %v12975_v50, %v2314_v37  ;;  %10214 = vmatmul.mubr.msk.f32.gmra.mxu1 %vm2599_vm10, %v2753_v39 }
 0x70d   :  { %v10762_v12 = vpack.i.bf16 %v2677_v20, %v2728_v43  ;;  %10216 = vmatprep.mubr.msk.f32.mxu1 %vm11829_vm1, %v12861_v5  ;;  %v2703_v21 = vld [vmem:[#allocation3 + $0x21] sm:$0xff] }
 0x70e   :  { %v13056_v61 = vmul.f32 %v2482_v48, %v2374_v31  ;;  %v2454_v34 = vmax.f32 %v2404_v33, %v2429_v49  ;;  %v10757_v4 = vpack.i.bf16 %v2676_v3, %v2703_v21  ;;  %v10767_v18 = vpack.i.bf16 %v2652_v2, %v2703_v21  ;;  %v2377_v51 = vld [vmem:[#allocation5 + $0x8f0] sm:$0xff]  ;;  %v2378_v21 = vld [vmem:[#allocation5 + $0x8f8] sm:$0xff] }
 0x70f   :  { %10763 = vrot.lane.b32.xlu0 %v10762_v12, %s11839_s21  ;;  %10748 = vrot.lane.b32.xlu1 %v10747_v28, %s11839_s21  ;;  %v2317_v32 = vpop.xlane.xlu1 %2316  ;;  %v2754_v42 = vld [vmem:[#allocation3 + $0x2b] sm:$0xff]  ;;  %v2678_v33 = vld [vmem:[#allocation3 + $0x1f] sm:$0xff]  ;;  %v2408_v28 = vmul.f32 %v12975_v50, %v12925_v38 }
 0x710   :  { %16110 = vst [vmem:[#allocation20_spill] sm:$0xff] %v13056_v61  ;;  %v2704_v40 = vld [vmem:[#allocation3 + $0x29] sm:$0xff]  ;;  %2606 = vst.msk [vmem:[#allocation3 + $0x40] sm:$0xff] %vm2599_vm10, %v13056_v61  ;;  %v2483_v56 = vadd.f32 %v12982_v60, %v2454_v34  ;;  %v2430_v24 = vmul.f32 %v12975_v50, %v2317_v32  ;;  %10217 = vmatmul.mubr.msk.f32.gmra.mxu1 %vm2599_vm10, %v2754_v42 }
 0x711   :  { %v10772_v57 = vpack.i.bf16 %v2677_v20, %v2704_v40  ;;  %10219 = vmatprep.mubr.msk.f32.mxu1 %vm11829_vm1, %v12861_v5  ;;  %v10782_v52 = vpack.i.bf16 %v2653_v9, %v2704_v40  ;;  %v2729_v22 = vld [vmem:[#allocation3 + $0x2a] sm:$0xff] }
 0x712   :  { %v13069_v59 = vmul.f32 %v2483_v56, %v2375_v0  ;;  %v2455_v63 = vmax.f32 %v2405_v26, %v2430_v24  ;;  %v2679_v3 = vld [vmem:[#allocation3 + $0x27] sm:$0xff]  ;;  %v10777_v43 = vpack.i.bf16 %v2678_v33, %v2729_v22  ;;  %v2379_v38 = vld [vmem:[#allocation5 + $0x900] sm:$0xff] }
 0x713   :  { %10773 = vrot.lane.b32.xlu0 %v10772_v57, %s11838_s20  ;;  %10758 = vrot.lane.b32.xlu1 %v10757_v4, %s11838_s20  ;;  %v2320_v55 = vpop.xlane.xlu1 %2319  ;;  %v2755_v11 = vld [vmem:[#allocation3 + $0x33] sm:$0xff]  ;;  %v2409_v57 = vmul.f32 %v12975_v50, %v12929_v47 }
 0x714   :  { %16111 = vst [vmem:[#allocation21_spill] sm:$0xff] %v13069_v59  ;;  %2607 = vst.msk [vmem:[#allocation3 + $0x48] sm:$0xff] %vm2599_vm10, %v13069_v59  ;;  %v2484_v14 = vadd.f32 %v12982_v60, %v2455_v63  ;;  %v2431_v15 = vmul.f32 %v12975_v50, %v2320_v55  ;;  %10220 = vmatmul.mubr.msk.f32.gmra.mxu1 %vm2599_vm10, %v2755_v11  ;;  %v2730_v54 = vld [vmem:[#allocation3 + $0x32] sm:$0xff] }
 0x715   :  { %10222 = vmatprep.mubr.msk.f32.mxu1 %vm11829_vm1, %v12861_v5  ;;  %v10792_v20 = vpack.i.bf16 %v2679_v3, %v2730_v54  ;;  %v2705_v46 = vld [vmem:[#allocation3 + $0x31] sm:$0xff]  ;;  %v2410_v54 = vmul.f32 %v12975_v50, %v12933_v6 }
 0x716   :  { %v13082_v10 = vmul.f32 %v2484_v14, %v2376_v27  ;;  %v2456_v23 = vmax.f32 %v2406_v8, %v2431_v15  ;;  %v10787_v40 = vpack.i.bf16 %v2678_v33, %v2705_v46  ;;  %v2655_v63 = vld [vmem:[#allocation3 + $0x2e] sm:$0xff]  ;;  %v2654_v8 = vld [vmem:[#allocation3 + $0x26] sm:$0xff] }
 0x717   :  { %10783 = vrot.lane.b32.xlu0 %v10782_v52, %s11837_s19  ;;  %10768 = vrot.lane.b32.xlu1 %v10767_v18, %s11837_s19  ;;  %v2323_v31 = vpop.xlane.xlu1 %2322  ;;  %v2756_v36 = vld [vmem:[#allocation3 + $0x3b] sm:$0xff]  ;;  %v10797_v2 = vpack.i.bf16 %v2654_v8, %v2705_v46 }
 0x718   :  { %16112 = vst [vmem:[#allocation22_spill] sm:$0xff] %v13082_v10  ;;  %2608 = vst.msk [vmem:[#allocation3 + $0x50] sm:$0xff] %vm2599_vm10, %v13082_v10  ;;  %v2485_v37 = vadd.f32 %v12982_v60, %v2456_v23  ;;  %v2432_v39 = vmul.f32 %v12975_v50, %v2323_v31  ;;  %10223 = vmatmul.mubr.msk.f32.gmra.mxu1 %vm2599_vm10, %v2756_v36  ;;  %v2706_v48 = vld [vmem:[#allocation3 + $0x39] sm:$0xff] }
 0x719   :  { %10225 = vmatprep.mubr.msk.f32.mxu1 %vm11829_vm1, %v12861_v5  ;;  %v10802_v42 = vpack.i.bf16 %v2679_v3, %v2706_v48  ;;  %v10812_v9 = vpack.i.bf16 %v2655_v63, %v2706_v48  ;;  %v2731_v47 = vld [vmem:[#allocation3 + $0x3a] sm:$0xff] }
 0x71a   :  { %v13095_v49 = vmul.f32 %v2485_v37, %v2377_v51  ;;  %v2457_v12 = vmax.f32 %v2407_v62, %v2432_v39  ;;  %v2380_v52 = vld [vmem:[#allocation5 + $0x908] sm:$0xff]  ;;  %v2680_v62 = vld [vmem:[#allocation3 + $0x2f] sm:$0xff]  ;;  %v2381_v48 = vld [vmem:[#allocation5 + $0x910] sm:$0xff] }
 0x71b   :  { %10793 = vrot.lane.b32.xlu0 %v10792_v20, %s11839_s21  ;;  %10778 = vrot.lane.b32.xlu1 %v10777_v43, %s11839_s21  ;;  %v2326_v34 = vpop.xlane.xlu1 %2325  ;;  %v2757_v26 = vld [vmem:[#allocation3 + $0x43] sm:$0xff]  ;;  %v2681_v23 = vld [vmem:[#allocation3 + $0x37] sm:$0xff]  ;;  %v10807_v33 = vpack.i.bf16 %v2680_v62, %v2731_v47  ;;  %v2411_v43 = vmul.f32 %v12975_v50, %v12937_v45 }
 0x71c   :  { %16113 = vst [vmem:[#allocation23_spill] sm:$0xff] %v13095_v49  ;;  %2609 = vst.msk [vmem:[#allocation3 + $0x58] sm:$0xff] %vm2599_vm10, %v13095_v49  ;;  %v2486_v0 = vadd.f32 %v12982_v60, %v2457_v12  ;;  %v2433_v32 = vmul.f32 %v12975_v50, %v2326_v34  ;;  %10226 = vmatmul.mubr.msk.f32.gmra.mxu1 %vm2599_vm10, %v2757_v26  ;;  %v2732_v14 = vld [vmem:[#allocation3 + $0x42] sm:$0xff] }
 0x71d   :  { %10228 = vmatprep.mubr.msk.f32.mxu1 %vm11829_vm1, %v12861_v5  ;;  %v10822_v3 = vpack.i.bf16 %v2681_v23, %v2732_v14  ;;  %v2707_v6 = vld [vmem:[#allocation3 + $0x41] sm:$0xff]  ;;  %v2413_v14 = vmul.f32 %v12975_v50, %v12944_v1 }
 0x71e   :  { %v13108_v56 = vmul.f32 %v2486_v0, %v2378_v21  ;;  %v2458_v24 = vmax.f32 %v2408_v28, %v2433_v32  ;;  %v10817_v26 = vpack.i.bf16 %v2680_v62, %v2707_v6  ;;  %v2382_v45 = vld [vmem:[#allocation5 + $0x918] sm:$0xff] }
 0x71f   :  { %10803 = vrot.lane.b32.xlu0 %v10802_v42, %s11838_s20  ;;  %10788 = vrot.lane.b32.xlu1 %v10787_v40, %s11838_s20  ;;  %v2329_v4 = vpop.xlane.xlu1 %2328  ;;  %v2758_v27 = vld [vmem:[#allocation3 + $0x4b] sm:$0xff]  ;;  %v2412_v42 = vmul.f32 %v12975_v50, %v12941_v53 }
 0x720   :  { %16114 = vst [vmem:[#allocation24_spill] sm:$0xff] %v13108_v56  ;;  %2610 = vst.msk [vmem:[#allocation3 + $0x60] sm:$0xff] %vm2599_vm10, %v13108_v56  ;;  %v2487_v55 = vadd.f32 %v12982_v60, %v2458_v24  ;;  %v2434_v11 = vmul.f32 %v12975_v50, %v2329_v4  ;;  %10229 = vmatmul.mubr.msk.f32.gmra.mxu1 %vm2599_vm10, %v2758_v27  ;;  %v2708_v37 = vld [vmem:[#allocation3 + $0x49] sm:$0xff]  ;;  %v2657_v24 = vld [vmem:[#allocation3 + $0x3e] sm:$0xff] }
 0x721   :  { %10231 = vmatprep.mubr.msk.f32.mxu1 %vm11829_vm1, %v12861_v5  ;;  %v10832_v34 = vpack.i.bf16 %v2681_v23, %v2708_v37  ;;  %v10842_v63 = vpack.i.bf16 %v2657_v24, %v2708_v37  ;;  %v2733_v53 = vld [vmem:[#allocation3 + $0x4a] sm:$0xff]  ;;  %v2384_v37 = vld [vmem:[#allocation5 + $0x928] sm:$0xff] }
 0x722   :  { %v13121_v15 = vmul.f32 %v2487_v55, %v2379_v38  ;;  %v2459_v18 = vmax.f32 %v2409_v57, %v2434_v11  ;;  %v2656_v57 = vld [vmem:[#allocation3 + $0x36] sm:$0xff]  ;;  %v13171_v62 = vld [vmem:[#allocation4] sm:$0xff] }
 0x723   :  { %10813 = vrot.lane.b32.xlu0 %v10812_v9, %s11837_s19  ;;  %10798 = vrot.lane.b32.xlu1 %v10797_v2, %s11837_s19  ;;  %v2332_v22 = vpop.xlane.xlu1 %2331  ;;  %v2759_v51 = vld [vmem:[#allocation3 + $0x53] sm:$0xff]  ;;  %v10827_v8 = vpack.i.bf16 %v2656_v57, %v2707_v6 }
 0x724   :  { %16115 = vst [vmem:[#allocation25_spill] sm:$0xff] %v13121_v15  ;;  %2611 = vst.msk [vmem:[#allocation3 + $0x68] sm:$0xff] %vm2599_vm10, %v13121_v15  ;;  %v2488_v31 = vadd.f32 %v12982_v60, %v2459_v18  ;;  %v2435_v36 = vmul.f32 %v12975_v50, %v2332_v22  ;;  %10232 = vmatmul.mubr.msk.f32.gmra.mxu1 %vm2599_vm10, %v2759_v51  ;;  %v2734_v55 = vld [vmem:[#allocation3 + $0x52] sm:$0xff]  ;;  %v2683_v18 = vld [vmem:[#allocation3 + $0x47] sm:$0xff] }
 0x725   :  { %10234 = vmatprep.mubr.msk.f32.mxu1 %vm11829_vm1, %v12861_v5  ;;  %v2383_v9 = vld [vmem:[#allocation5 + $0x920] sm:$0xff]  ;;  %v10852_v51 = vpack.i.bf16 %v2683_v18, %v2734_v55  ;;  %v2416_v55 = vmul.f32 %v12975_v50, %v12957_v16 }
 0x726   :  { %v13134_v39 = vmul.f32 %v2488_v31, %v2380_v52  ;;  %v2460_v20 = vmax.f32 %v2410_v54, %v2435_v36  ;;  %v2682_v54 = vld [vmem:[#allocation3 + $0x3f] sm:$0xff]  ;;  %v2709_v31 = vld [vmem:[#allocation3 + $0x51] sm:$0xff] }
 0x727   :  { %10823 = vrot.lane.b32.xlu0 %v10822_v3, %s11839_s21  ;;  %10808 = vrot.lane.b32.xlu1 %v10807_v33, %s11839_s21  ;;  %v2335_v46 = vpop.xlane.xlu1 %2334  ;;  %v2760_v12 = vld [vmem:[#allocation3 + $0x5b] sm:$0xff]  ;;  %v10837_v23 = vpack.i.bf16 %v2682_v54, %v2733_v53  ;;  %v2414_v33 = vmul.f32 %v12975_v50, %v12948_v25 }
 0x728   :  { %16116 = vst [vmem:[#allocation26_spill] sm:$0xff] %v13134_v39  ;;  %2612 = vst.msk [vmem:[#allocation3 + $0x70] sm:$0xff] %vm2599_vm10, %v13134_v39  ;;  %v2489_v28 = vadd.f32 %v12982_v60, %v2460_v20  ;;  %v2436_v21 = vmul.f32 %v12975_v50, %v2335_v46  ;;  %10235 = vmatmul.mubr.msk.f32.gmra.mxu1 %vm2599_vm10, %v2760_v12  ;;  %v2710_v1 = vld [vmem:[#allocation3 + $0x59] sm:$0xff]  ;;  %v10847_v12 = vpack.i.bf16 %v2682_v54, %v2709_v31 }
 0x729   :  { %10237 = vmatprep.mubr.msk.f32.mxu1 %vm11829_vm1, %v12861_v5  ;;  %v10862_v46 = vpack.i.bf16 %v2683_v18, %v2710_v1  ;;  %v2385_v25 = vld [vmem:[#allocation5 + $0x930] sm:$0xff] }
 0x72a   :  { %v13147_v0 = vmul.f32 %v2489_v28, %v2381_v48  ;;  %v2461_v32 = vmax.f32 %v2411_v43, %v2436_v21 }
 0x72b   :  { %10833 = vrot.lane.b32.xlu0 %v10832_v34, %s11838_s20  ;;  %10818 = vrot.lane.b32.xlu1 %v10817_v26, %s11838_s20  ;;  %v2338_v40 = vpop.xlane.xlu1 %2337  ;;  %v2761_v38 = vld [vmem:[#allocation3 + $0x63] sm:$0xff]  ;;  %v2415_v34 = vmul.f32 %v12975_v50, %v12952_v58  ;;  %v2735_v58 = vld [vmem:[#allocation3 + $0x5a] sm:$0xff] }
 0x72c   :  { %16117 = vst [vmem:[#allocation27_spill] sm:$0xff] %v13147_v0  ;;  %2613 = vst.msk [vmem:[#allocation3 + $0x78] sm:$0xff] %vm2599_vm10, %v13147_v0  ;;  %v2490_v4 = vadd.f32 %v12982_v60, %v2461_v32  ;;  %v2437_v27 = vmul.f32 %v12975_v50, %v2338_v40  ;;  %10238 = vmatmul.mubr.msk.f32.gmra.mxu1 %vm2599_vm10, %v2761_v38  ;;  %v2659_v32 = vld [vmem:[#allocation3 + $0x4e] sm:$0xff]  ;;  %v2711_v16 = vld [vmem:[#allocation3 + $0x61] sm:$0xff] }
 0x72d   :  { %10240 = vmatprep.mubr.msk.f32.mxu1 %vm11829_vm1, %v12861_v5  ;;  %v10872_v24 = vpack.i.bf16 %v2659_v32, %v2710_v1  ;;  %v2387_v1 = vld [vmem:[#allocation5 + $0x940] sm:$0xff] }
 0x72e   :  { %v13160_v11 = vmul.f32 %v2490_v4, %v2382_v45  ;;  %v2462_v2 = vmax.f32 %v2412_v42, %v2437_v27  ;;  %v2658_v42 = vld [vmem:[#allocation3 + $0x46] sm:$0xff] }
 0x72f   :  { %10843 = vrot.lane.b32.xlu0 %v10842_v63, %s11837_s19  ;;  %10828 = vrot.lane.b32.xlu1 %v10827_v8, %s11837_s19  ;;  %v2341_v47 = vpop.xlane.xlu1 %2340  ;;  %v2762_v52 = vld [vmem:[#allocation3 + $0x6b] sm:$0xff]  ;;  %v10857_v57 = vpack.i.bf16 %v2658_v42, %v2709_v31  ;;  %v2736_v4 = vld [vmem:[#allocation3 + $0x62] sm:$0xff] }
 0x730   :  { %16118 = vst [vmem:[#allocation28_spill] sm:$0xff] %v13160_v11  ;;  %2614 = vst.msk [vmem:[#allocation3 + $0x80] sm:$0xff] %vm2599_vm10, %v13160_v11  ;;  %v2491_v5 = vadd.f32 %v12982_v60, %v2462_v2  ;;  %v2438_v22 = vmul.f32 %v12975_v50, %v2341_v47  ;;  %10241 = vmatmul.mubr.msk.f32.gmra.mxu1 %vm2599_vm10, %v2762_v52  ;;  %v2386_v63 = vld [vmem:[#allocation5 + $0x938] sm:$0xff]  ;;  %v2685_v2 = vld [vmem:[#allocation3 + $0x57] sm:$0xff] }
 0x731   :  { %10243 = vmatprep.mubr.msk.f32.mxu1 %vm11829_vm1, %v13171_v62  ;;  %v10882_v18 = vpack.i.bf16 %v2685_v2, %v2736_v4 }
 0x732   :  { %v13175_v36 = vmul.f32 %v2491_v5, %v2383_v9  ;;  %v2463_v3 = vmax.f32 %v2413_v14, %v2438_v22  ;;  %v2684_v14 = vld [vmem:[#allocation3 + $0x4f] sm:$0xff] }
 0x733   :  { %10853 = vrot.lane.b32.xlu0 %v10852_v51, %s11839_s21  ;;  %10838 = vrot.lane.b32.xlu1 %v10837_v23, %s11839_s21  ;;  %v2344_v6 = vpop.xlane.xlu1 %2343  ;;  %v2763_v20 = vld [vmem:[#allocation3 + $0x73] sm:$0xff]  ;;  %v10867_v54 = vpack.i.bf16 %v2684_v14, %v2735_v58  ;;  %v2712_v5 = vld [vmem:[#allocation3 + $0x69] sm:$0xff]  ;;  %v2417_v23 = vmul.f32 %v12975_v50, %v12962_v44  ;;  %v2419_v58 = vmul.f32 %v12975_v50, %v12972_v35 }
 0x734   :  { %16119 = vst [vmem:[#allocation29_spill] sm:$0xff] %v13175_v36  ;;  %2615 = vst.msk [vmem:[#allocation3 + $0x88] sm:$0xff] %vm2599_vm10, %v13175_v36  ;;  %v2492_v43 = vadd.f32 %v12982_v60, %v2463_v3  ;;  %v2439_v48 = vmul.f32 %v12975_v50, %v2344_v6  ;;  %10244 = vmatmul.mubr.msk.f32.gmra.mxu1 %vm2599_vm10, %v2763_v20  ;;  %v10892_v6 = vpack.i.bf16 %v2685_v2, %v2712_v5  ;;  %v2388_v44 = vld [vmem:[#allocation5 + $0x948] sm:$0xff] }
 0x735   :  { %10246 = vmatprep.mubr.msk.f32.mxu1 %vm11829_vm1, %v13171_v62  ;;  %v10877_v20 = vpack.i.bf16 %v2684_v14, %v2711_v16  ;;  %v2713_v35 = vld [vmem:[#allocation3 + $0x71] sm:$0xff] }
 0x736   :  { %v13188_v28 = vmul.f32 %v2492_v43, %v2384_v37  ;;  %v2464_v21 = vmax.f32 %v2414_v33, %v2439_v48 }
 0x737   :  { %10863 = vrot.lane.b32.xlu0 %v10862_v46, %s11838_s20  ;;  %10848 = vrot.lane.b32.xlu1 %v10847_v12, %s11838_s20  ;;  %v2347_v26 = vpop.xlane.xlu1 %2346  ;;  %v2764_v45 = vld [vmem:[#allocation3 + $0x7b] sm:$0xff]  ;;  %v2418_v46 = vmul.f32 %v12975_v50, %v12967_v17  ;;  %v2737_v17 = vld [vmem:[#allocation3 + $0x6a] sm:$0xff] }
 0x738   :  { %16120 = vst [vmem:[#allocation30_spill] sm:$0xff] %v13188_v28  ;;  %2616 = vst.msk [vmem:[#allocation3 + $0x90] sm:$0xff] %vm2599_vm10, %v13188_v28  ;;  %v2493_v40 = vadd.f32 %v12982_v60, %v2464_v21  ;;  %v2440_v38 = vmul.f32 %v12975_v50, %v2347_v26  ;;  %10247 = vmatmul.mubr.msk.f32.gmra.mxu1 %vm2599_vm10, %v2764_v45  ;;  %v2661_v21 = vld [vmem:[#allocation3 + $0x5e] sm:$0xff] }
 0x739   :  { %10249 = vmatprep.mubr.msk.f32.mxu1 %vm11829_vm1, %v13171_v62  ;;  %v10902_v32 = vpack.i.bf16 %v2661_v21, %v2712_v5  ;;  %v2662_v21 = vld [vmem:[#allocation3 + $0x66] sm:$0xff] }
 0x73a   :  { %v13201_v27 = vmul.f32 %v2493_v40, %v2385_v25  ;;  %v2465_v8 = vmax.f32 %v2415_v34, %v2440_v38  ;;  %v2660_v34 = vld [vmem:[#allocation3 + $0x56] sm:$0xff]  ;;  %v2262_v38 = vpop.xlane.xlu0 %2261 }
 0x73b   :  { %10873 = vrot.lane.b32.xlu0 %v10872_v24, %s11837_s19  ;;  %10858 = vrot.lane.b32.xlu1 %v10857_v57, %s11837_s19  ;;  %v2350_v53 = vpop.xlane.xlu1 %2349  ;;  %v2765_v9 = vld [vmem:[#allocation3 + $0x83] sm:$0xff]  ;;  %v10887_v42 = vpack.i.bf16 %v2660_v34, %v2711_v16  ;;  %v2738_v40 = vld [vmem:[#allocation3 + $0x72] sm:$0xff]  ;;  %v2420_v5 = vmul.f32 %v12975_v50, %v2262_v38 }
 0x73c   :  { %16121 = vst [vmem:[#allocation31_spill] sm:$0xff] %v13201_v27  ;;  %2617 = vst.msk [vmem:[#allocation3 + $0x98] sm:$0xff] %vm2599_vm10, %v13201_v27  ;;  %v2494_v47 = vadd.f32 %v12982_v60, %v2465_v8  ;;  %v2441_v52 = vmul.f32 %v12975_v50, %v2350_v53  ;;  %10250 = vmatmul.mubr.msk.f32.gmra.mxu1 %vm2599_vm10, %v2765_v9  ;;  %v2389_v57 = vld [vmem:[#allocation5 + $0x950] sm:$0xff]  ;;  %v2390_v16 = vld [vmem:[#allocation5 + $0x958] sm:$0xff] }
 0x73d   :  { %10252 = vmatprep.mubr.msk.f32.mxu1 %vm11829_vm1, %v13171_v62  ;;  %v2686_v53 = vld [vmem:[#allocation3 + $0x5f] sm:$0xff] }
 0x73e   :  { %v13214_v22 = vmul.f32 %v2494_v47, %v2386_v63  ;;  %v2466_v51 = vmax.f32 %v2416_v55, %v2441_v52  ;;  %v2687_v55 = vld [vmem:[#allocation3 + $0x67] sm:$0xff]  ;;  %v10897_v47 = vpack.i.bf16 %v2686_v53, %v2737_v17  ;;  %v2714_v52 = vld [vmem:[#allocation3 + $0x79] sm:$0xff] }
 0x73f   :  { %10883 = vrot.lane.b32.xlu0 %v10882_v18, %s11839_s21  ;;  %10868 = vrot.lane.b32.xlu1 %v10867_v54, %s11839_s21  ;;  %v2353_v31 = vpop.xlane.xlu1 %2352  ;;  %v2766_v3 = vld [vmem:[#allocation3 + $0x8b] sm:$0xff]  ;;  %v10912_v14 = vpack.i.bf16 %v2687_v55, %v2738_v40  ;;  %v2739_v40 = vld [vmem:[#allocation3 + $0x7a] sm:$0xff] }
 0x740   :  { %16122 = vst [vmem:[#allocation32_spill] sm:$0xff] %v13214_v22  ;;  %2618 = vst.msk [vmem:[#allocation3 + $0xa0] sm:$0xff] %vm2599_vm10, %v13214_v22  ;;  %v2495_v33 = vadd.f32 %v12982_v60, %v2466_v51  ;;  %v2442_v37 = vmul.f32 %v12975_v50, %v2353_v31  ;;  %10253 = vmatmul.mubr.msk.f32.gmra.mxu1 %vm2599_vm10, %v2766_v3  ;;  %v2392_v38 = vld [vmem:[#allocation5 + $0x968] sm:$0xff] }
 0x741   :  { %10255 = vmatprep.mubr.msk.f32.mxu1 %vm11829_vm1, %v13171_v62 }
 0x742   :  { %v13227_v43 = vmul.f32 %v2495_v33, %v2387_v1  ;;  %v2467_v48 = vmax.f32 %v2417_v23, %v2442_v37  ;;  %v2265_v1 = vpop.xlane.xlu0 %2264  ;;  %v10922_v33 = vpack.i.bf16 %v2687_v55, %v2714_v52  ;;  %v10907_v37 = vpack.i.bf16 %v2686_v53, %v2713_v35  ;;  %v2716_v53 = vld [vmem:[#allocation3 + $0x89] sm:$0xff] }
 0x743   :  { %10893 = vrot.lane.b32.xlu0 %v10892_v6, %s11838_s20  ;;  %10878 = vrot.lane.b32.xlu1 %v10877_v20, %s11838_s20  ;;  %v2356_v12 = vpop.xlane.xlu1 %2355  ;;  %v2767_v25 = vld [vmem:[#allocation3 + $0x93] sm:$0xff] }
 0x744   :  { %16123 = vst [vmem:[#allocation33_spill] sm:$0xff] %v13227_v43  ;;  %2619 = vst.msk [vmem:[#allocation3 + $0xa8] sm:$0xff] %vm2599_vm10, %v13227_v43  ;;  %v2496_v26 = vadd.f32 %v12982_v60, %v2467_v48  ;;  %v2443_v45 = vmul.f32 %v12975_v50, %v2356_v12  ;;  %10256 = vmatmul.mubr.msk.f32.gmra.mxu1 %vm2599_vm10, %v2767_v25  ;;  %v2391_v20 = vld [vmem:[#allocation5 + $0x960] sm:$0xff]  ;;  %v2421_v48 = vmul.f32 %v12975_v50, %v2265_v1 }
 0x745   :  { %10258 = vmatprep.mubr.msk.f32.mxu1 %vm11829_vm1, %v13171_v62  ;;  %v2663_v25 = vld [vmem:[#allocation3 + $0x6e] sm:$0xff] }
 0x746   :  { %v13240_v24 = vmul.f32 %v2496_v26, %v2388_v44  ;;  %v2468_v4 = vmax.f32 %v2418_v46, %v2443_v45  ;;  %v10932_v45 = vpack.i.bf16 %v2663_v25, %v2714_v52  ;;  %v2667_v25 = vld [vmem:[#allocation3 + $0x8e] sm:$0xff] }
 0x747   :  { %10903 = vrot.lane.b32.xlu0 %v10902_v32, %s11837_s19  ;;  %10888 = vrot.lane.b32.xlu1 %v10887_v42, %s11837_s19  ;;  %v2359_v63 = vpop.xlane.xlu1 %2358  ;;  %v2768_v8 = vld [vmem:[#allocation3 + $0x9b] sm:$0xff]  ;;  %v10917_v32 = vpack.i.bf16 %v2662_v21, %v2713_v35  ;;  %v2666_v21 = vld [vmem:[#allocation3 + $0x86] sm:$0xff] }
 0x748   :  { %16124 = vst [vmem:[#allocation34_spill] sm:$0xff] %v13240_v24  ;;  %2620 = vst.msk [vmem:[#allocation3 + $0xb0] sm:$0xff] %vm2599_vm10, %v13240_v24  ;;  %v2497_v9 = vadd.f32 %v12982_v60, %v2468_v4  ;;  %v2444_v2 = vmul.f32 %v12975_v50, %v2359_v63  ;;  %10259 = vmatmul.mubr.msk.f32.gmra.mxu1 %vm2599_vm10, %v2768_v8  ;;  %v2740_v42 = vld [vmem:[#allocation3 + $0x82] sm:$0xff] }
 0x749   :  { %10261 = vmatprep.mubr.msk.f32.mxu1 %vm11829_vm1, %v13171_v62  ;;  %v2665_v35 = vld [vmem:[#allocation3 + $0x7e] sm:$0xff] }
 0x74a   :  { %v13253_v18 = vmul.f32 %v2497_v9, %v2389_v57  ;;  %v2469_v54 = vmax.f32 %v2419_v58, %v2444_v2  ;;  %v2689_v58 = vld [vmem:[#allocation3 + $0x77] sm:$0xff]  ;;  %v2715_v9 = vld [vmem:[#allocation3 + $0x81] sm:$0xff] }
 0x74b   :  { %10913 = vrot.lane.b32.xlu0 %v10912_v14, %s11839_s21  ;;  %10898 = vrot.lane.b32.xlu1 %v10897_v47, %s11839_s21  ;;  %v2362_v51 = vpop.xlane.xlu1 %2361  ;;  %v2769_v23 = vld [vmem:[#allocation3 + $0xa3] sm:$0xff]  ;;  %v10942_v8 = vpack.i.bf16 %v2689_v58, %v2740_v42  ;;  %v2693_v42 = vld [vmem:[#allocation3 + $0x97] sm:$0xff] }
 0x74c   :  { %16125 = vst [vmem:[#allocation35_spill] sm:$0xff] %v13253_v18  ;;  %2621 = vst.msk [vmem:[#allocation3 + $0xb8] sm:$0xff] %vm2599_vm10, %v13253_v18  ;;  %v2498_v31 = vadd.f32 %v12982_v60, %v2469_v54  ;;  %v2445_v3 = vmul.f32 %v12975_v50, %v2362_v51  ;;  %10262 = vmatmul.mubr.msk.f32.gmra.mxu1 %vm2599_vm10, %v2769_v23  ;;  %v2664_v54 = vld [vmem:[#allocation3 + $0x76] sm:$0xff]  ;;  %v2741_v23 = vld [vmem:[#allocation3 + $0x8a] sm:$0xff] }
 0x74d   :  { %10264 = vmatprep.mubr.msk.f32.mxu1 %vm11829_vm1, %v13171_v62  ;;  %v2742_v51 = vld [vmem:[#allocation3 + $0x92] sm:$0xff] }
 0x74e   :  { %v13265_v6 = vmul.f32 %v2498_v31, %v2390_v16  ;;  %v2470_v44 = vmax.f32 %v2420_v5, %v2445_v3  ;;  %v10962_v5 = vpack.i.bf16 %v2665_v35, %v2716_v53  ;;  %v10947_v16 = vpack.i.bf16 %v2664_v54, %v2715_v9  ;;  %v2691_v31 = vld [vmem:[#allocation3 + $0x87] sm:$0xff]  ;;  %v2690_v3 = vld [vmem:[#allocation3 + $0x7f] sm:$0xff] }
 0x74f   :  { %10923 = vrot.lane.b32.xlu0 %v10922_v33, %s11838_s20  ;;  %10908 = vrot.lane.b32.xlu1 %v10907_v37, %s11838_s20  ;;  %v2365_v46 = vpop.xlane.xlu1 %2364  ;;  %v2770_v12 = vld [vmem:[#allocation3 + $0xab] sm:$0xff]  ;;  %v10972_v33 = vpack.i.bf16 %v2691_v31, %v2742_v51  ;;  %v10957_v37 = vpack.i.bf16 %v2690_v3, %v2741_v23 }
 0x750   :  { %16126 = vst [vmem:[#allocation36_spill] sm:$0xff] %v13265_v6  ;;  %2622 = vst.msk [vmem:[#allocation3 + $0xc0] sm:$0xff] %vm2599_vm10, %v13265_v6  ;;  %v2499_v34 = vadd.f32 %v12982_v60, %v2470_v44  ;;  %v2446_v26 = vmul.f32 %v12975_v50, %v2365_v46  ;;  %10265 = vmatmul.mubr.msk.f32.gmra.mxu1 %vm2599_vm10, %v2770_v12  ;;  %v2688_v50 = vld [vmem:[#allocation3 + $0x6f] sm:$0xff] }
 0x751   :  { %10267 = vmatprep.mubr.msk.f32.mxu1 %vm11829_vm1, %v13171_v62  ;;  %v10927_v55 = vpack.i.bf16 %v2688_v50, %v2739_v40  ;;  %v10937_v47 = vpack.i.bf16 %v2688_v50, %v2715_v9  ;;  %v2717_v44 = vld [vmem:[#allocation3 + $0x91] sm:$0xff] }
 0x752   :  { %v13277_v17 = vmul.f32 %v2499_v34, %v2391_v20  ;;  %v2471_v57 = vmax.f32 %v2421_v48, %v2446_v26  ;;  %v2718_v20 = vld [vmem:[#allocation3 + $0x99] sm:$0xff]  ;;  %v10967_v12 = vpack.i.bf16 %v2690_v3, %v2717_v44  ;;  %v10977_v26 = vpack.i.bf16 %v2666_v21, %v2717_v44  ;;  %v2692_v40 = vld [vmem:[#allocation3 + $0x8f] sm:$0xff] }
 0x753   :  { %10933 = vrot.lane.b32.xlu0 %v10932_v45, %s11837_s19  ;;  %10918 = vrot.lane.b32.xlu1 %v10917_v32, %s11837_s19  ;;  %v2771_v4 = vld [vmem:[#allocation3 + $0xb3] sm:$0xff]  ;;  %v10982_v46 = vpack.i.bf16 %v2691_v31, %v2718_v20  ;;  %v10992_v34 = vpack.i.bf16 %v2667_v25, %v2718_v20  ;;  %v2744_v45 = vld [vmem:[#allocation3 + $0xa2] sm:$0xff] }
 0x754   :  { %16127 = vst [vmem:[#allocation37_spill] sm:$0xff] %v13277_v17  ;;  %2623 = vst.msk [vmem:[#allocation3 + $0xc8] sm:$0xff] %vm2599_vm10, %v13277_v17  ;;  %v2500_v63 = vadd.f32 %v12982_v60, %v2471_v57  ;;  %10268 = vmatmul.mubr.msk.f32.gmra.mxu1 %vm2599_vm10, %v2771_v4  ;;  %v10952_v60 = vpack.i.bf16 %v2689_v58, %v2716_v53  ;;  %v2743_v32 = vld [vmem:[#allocation3 + $0x9a] sm:$0xff]  ;;  %v2720_v4 = vld [vmem:[#allocation3 + $0xa9] sm:$0xff] }
 0x755   :  { %10270 = vmatprep.mubr.msk.f32.mxu1 %vm11829_vm1, %v13171_v62  ;;  %v10987_v57 = vpack.i.bf16 %v2692_v40, %v2743_v32  ;;  %v2719_v58 = vld [vmem:[#allocation3 + $0xa1] sm:$0xff]  ;;  %v11012_v50 = vpack.i.bf16 %v2693_v42, %v2720_v4  ;;  %v2721_v51 = vld [vmem:[#allocation3 + $0xb1] sm:$0xff] }
 0x756   :  { %v13287_v2 = vmul.f32 %v2500_v63, %v2392_v38  ;;  %v11002_v38 = vpack.i.bf16 %v2693_v42, %v2744_v45  ;;  %v10997_v63 = vpack.i.bf16 %v2692_v40, %v2719_v58  ;;  %v2625_v20 = vld [vmem:[#allocation3 + $0x5] sm:$0xff] }
 0x757   :  { %10943 = vrot.lane.b32.xlu0 %v10942_v8, %s11839_s21  ;;  %10928 = vrot.lane.b32.xlu1 %v10927_v55, %s11839_s21  ;;  %v2772_v14 = vld [vmem:[#allocation3 + $0xbb] sm:$0xff] }
 0x758   :  { %16128 = vst [vmem:[#allocation38_spill] sm:$0xff] %v13287_v2  ;;  %2624 = vst.msk [vmem:[#allocation3 + $0xd0] sm:$0xff] %vm2599_vm10, %v13287_v2  ;;  %10271 = vmatmul.mubr.msk.f32.gmra.mxu1 %vm2599_vm10, %v2772_v14  ;;  %v2669_v8 = vld [vmem:[#allocation3 + $0x9e] sm:$0xff]  ;;  %v2668_v55 = vld [vmem:[#allocation3 + $0x96] sm:$0xff] }
 0x759   :  { %10273 = vmatprep.mubr.msk.f32.mxu1 %vm11829_vm1, %v13171_v62  ;;  %v11022_v53 = vpack.i.bf16 %v2669_v8, %v2720_v4  ;;  %v11007_v9 = vpack.i.bf16 %v2668_v55, %v2719_v58  ;;  %v2746_v14 = vld [vmem:[#allocation3 + $0xb2] sm:$0xff] }
 0x75b   :  { %10953 = vrot.lane.b32.xlu0 %v10952_v60, %s11838_s20  ;;  %10938 = vrot.lane.b32.xlu1 %v10937_v47, %s11838_s20  ;;  %v2773_v52 = vld [vmem:[#allocation3 + $0xc3] sm:$0xff] }
 0x75c   :  { %10274 = vmatmul.mubr.msk.f32.gmra.mxu1 %vm2599_vm10, %v2773_v52  ;;  %v2745_v60 = vld [vmem:[#allocation3 + $0xaa] sm:$0xff]  ;;  %v2694_v52 = vld [vmem:[#allocation3 + $0x9f] sm:$0xff] }
 0x75d   :  { %10276 = vmatprep.mubr.msk.f32.mxu1 %vm11829_vm1, %v13171_v62  ;;  %v2695_v47 = vld [vmem:[#allocation3 + $0xa7] sm:$0xff]  ;;  %v11027_v3 = vpack.i.bf16 %v2694_v52, %v2721_v51 }
 0x75e   :  { %v11032_v54 = vpack.i.bf16 %v2695_v47, %v2746_v14 }
 0x75f   :  { %10963 = vrot.lane.b32.xlu0 %v10962_v5, %s11837_s19  ;;  %10948 = vrot.lane.b32.xlu1 %v10947_v16, %s11837_s19  ;;  %v2774_v1 = vld [vmem:[#allocation3 + $0xcb] sm:$0xff]  ;;  %v2775_v48 = vld [vmem:[#allocation3 + $0xd3] sm:$0xff]  ;;  %v11017_v5 = vpack.i.bf16 %v2694_v52, %v2745_v60 }
 0x760   :  { %10277 = vmatmul.mubr.msk.f32.gmra.mxu1 %vm2599_vm10, %v2774_v1  ;;  %v2722_v16 = vld [vmem:[#allocation3 + $0xb9] sm:$0xff] }
 0x761   :  { %10279 = vmatprep.mubr.msk.f32.mxu1 %vm11829_vm1, %v13171_v62  ;;  %v11042_v31 = vpack.i.bf16 %v2695_v47, %v2722_v16 }
 0x763   :  { %10973 = vrot.lane.b32.xlu0 %v10972_v33, %s11839_s21  ;;  %10958 = vrot.lane.b32.xlu1 %v10957_v37, %s11839_s21 }
 0x764   :  { %10280 = vmatmul.mubr.msk.f32.gmra.mxu1 %vm2599_vm10, %v2775_v48 }
 0x765   :  { %10282 = vmatprep.mubr.msk.f32.mxu1 %vm11829_vm1, %v13171_v62 }
 0x767   :  { %10983 = vrot.lane.b32.xlu0 %v10982_v46, %s11838_s20  ;;  %10968 = vrot.lane.b32.xlu1 %v10967_v12, %s11838_s20  ;;  %v2671_v46 = vld [vmem:[#allocation3 + $0xae] sm:$0xff]  ;;  %v2670_v12 = vld [vmem:[#allocation3 + $0xa6] sm:$0xff] }
 0x76b   :  { %10993 = vrot.lane.b32.xlu0 %v10992_v34, %s11837_s19  ;;  %10978 = vrot.lane.b32.xlu1 %v10977_v26, %s11837_s19  ;;  %v11052_v34 = vpack.i.bf16 %v2671_v46, %v2722_v16  ;;  %v11037_v26 = vpack.i.bf16 %v2670_v12, %v2721_v51  ;;  %v2724_v16 = vld [vmem:[#allocation3 + $0xc9] sm:$0xff] }
 0x76c   :  { %v2626_v51 = vld [vmem:[#allocation3 + $0xd] sm:$0xff] }
 0x76f   :  { %11003 = vrot.lane.b32.xlu0 %v11002_v38, %s11839_s21  ;;  %10988 = vrot.lane.b32.xlu1 %v10987_v57, %s11839_s21  ;;  %v2748_v38 = vld [vmem:[#allocation3 + $0xc2] sm:$0xff]  ;;  %v2747_v57 = vld [vmem:[#allocation3 + $0xba] sm:$0xff] }
 0x773   :  { %11013 = vrot.lane.b32.xlu0 %v11012_v50, %s11838_s20  ;;  %10998 = vrot.lane.b32.xlu1 %v10997_v63, %s11838_s20 }
 0x777   :  { %11023 = vrot.lane.b32.xlu0 %v11022_v53, %s11837_s19  ;;  %11008 = vrot.lane.b32.xlu1 %v11007_v9, %s11837_s19  ;;  %v2697_v53 = vld [vmem:[#allocation3 + $0xb7] sm:$0xff]  ;;  %v2696_v9 = vld [vmem:[#allocation3 + $0xaf] sm:$0xff] }
 0x778   :  { %v10739_v35 = vpop.permute.xlu0 %10738  ;;  %v11062_v47 = vpack.i.bf16 %v2697_v53, %v2748_v38  ;;  %v11047_v52 = vpack.i.bf16 %v2696_v9, %v2747_v57  ;;  %v11072_v12 = vpack.i.bf16 %v2697_v53, %v2724_v16  ;;  %v2749_v53 = vld [vmem:[#allocation3 + $0xca] sm:$0xff] }
 0x779   :  { %v10741_v33 = vunpack.i.h.bf16 %v10739_v35  ;;  %v10740_v37 = vunpack.i.l.bf16 %v10739_v35 }
 0x77b   :  { %11033 = vrot.lane.b32.xlu0 %v11032_v54, %s11839_s21  ;;  %11018 = vrot.lane.b32.xlu1 %v11017_v5, %s11839_s21  ;;  %v3329_v45 = vsel %vm2599_vm10, %v2625_v20, %v10741_v33  ;;  %v3405_v40 = vsel %vm2599_vm10, %v12990_v19, %v10740_v37  ;;  %v2723_v5 = vld [vmem:[#allocation3 + $0xc1] sm:$0xff] }
 0x77c   :  { %v11057_v46 = vpack.i.bf16 %v2696_v9, %v2723_v5  ;;  %v2750_v9 = vld [vmem:[#allocation3 + $0xd2] sm:$0xff] }
 0x77d   :  { %v10754_v23 = vpop.permute.xlu0 %10753  ;;  %v10744_v1 = vpop.permute.xlu1 %10743 }
 0x77e   :  { %v10746_v44 = vunpack.i.h.bf16 %v10744_v1  ;;  %v10745_v48 = vunpack.i.l.bf16 %v10744_v1  ;;  %v10756_v4 = vunpack.i.h.bf16 %v10754_v23  ;;  %v10755_v58 = vunpack.i.l.bf16 %v10754_v23 }
 0x77f   :  { %11043 = vrot.lane.b32.xlu0 %v11042_v31, %s11838_s20  ;;  %11028 = vrot.lane.b32.xlu1 %v11027_v3, %s11838_s20 }
 0x780   :  { %v3354_v50 = vsel %vm50_vm9, %v3329_v45, %v10746_v44  ;;  %v3430_v63 = vsel %vm50_vm9, %v3405_v40, %v10745_v48  ;;  %v3406_v31 = vsel %vm2599_vm10, %v13000_v30, %v10755_v58  ;;  %v3330_v3 = vsel %vm2599_vm10, %v2626_v51, %v10756_v4  ;;  %v2672_v45 = vld [vmem:[#allocation3 + $0xb6] sm:$0xff] }
 0x781   :  { %v10764_v25 = vpop.permute.xlu0 %10763  ;;  %v10749_v21 = vpop.permute.xlu1 %10748 }
 0x782   :  { %v10751_v32 = vunpack.i.h.bf16 %v10749_v21  ;;  %v10750_v42 = vunpack.i.l.bf16 %v10749_v21  ;;  %v10766_v23 = vunpack.i.h.bf16 %v10764_v25  ;;  %v10765_v1 = vunpack.i.l.bf16 %v10764_v25 }
 0x783   :  { %11053 = vrot.lane.b32.xlu0 %v11052_v34, %s11837_s19  ;;  %11038 = vrot.lane.b32.xlu1 %v11037_v26, %s11837_s19  ;;  %v2627_v26 = vld [vmem:[#allocation3 + $0x15] sm:$0xff] }
 0x784   :  { %v3380_v8 = vsel %vm3379_vm11, %v3354_v50, %v10751_v32  ;;  %v3455_v55 = vsel %vm3379_vm11, %v3430_v63, %v10750_v42  ;;  %v2673_v32 = vld [vmem:[#allocation3 + $0xbe] sm:$0xff]  ;;  %v11067_v50 = vpack.i.bf16 %v2672_v45, %v2723_v5 }
 0x785   :  { %v10774_v14 = vpop.permute.xlu0 %10773  ;;  %v10759_v60 = vpop.permute.xlu1 %10758  ;;  %3623 = vmatprep.mubr.f32.mxu0 %v3455_v55  ;;  %v11082_v63 = vpack.i.bf16 %v2673_v32, %v2724_v16  ;;  %v2698_v5 = vld [vmem:[#allocation3 + $0xbf] sm:$0xff]  ;;  %v2699_v16 = vld [vmem:[#allocation3 + $0xc7] sm:$0xff] }
 0x786   :  { %v10761_v35 = vunpack.i.h.bf16 %v10759_v60  ;;  %v10760_v54 = vunpack.i.l.bf16 %v10759_v60  ;;  %3624 = vmatmul.mubr.f32.vlgmr.msra.gmra.mxu0 %v3380_v8  ;;  %v10776_v38 = vunpack.i.h.bf16 %v10774_v14  ;;  %v10775_v57 = vunpack.i.l.bf16 %v10774_v14 }
 0x787   :  { %11063 = vrot.lane.b32.xlu0 %v11062_v47, %s11839_s21  ;;  %11048 = vrot.lane.b32.xlu1 %v11047_v52, %s11839_s21 }
 0x788   :  { %v3431_v33 = vsel %vm50_vm9, %v3406_v31, %v10760_v54  ;;  %v3355_v37 = vsel %vm50_vm9, %v3330_v3, %v10761_v35  ;;  %v11092_v31 = vpack.i.bf16 %v2699_v16, %v2750_v9 }
 0x789   :  { %v10784_v20 = vpop.permute.xlu0 %10783  ;;  %v10769_v44 = vpop.permute.xlu1 %10768  ;;  %v3456_v48 = vsel %vm3379_vm11, %v3431_v33, %v10765_v1  ;;  %v3381_v25 = vsel %vm3379_vm11, %v3355_v37, %v10766_v23  ;;  %v11077_v1 = vpack.i.bf16 %v2698_v5, %v2749_v53  ;;  %v2725_v37 = vld [vmem:[#allocation3 + $0xd1] sm:$0xff] }
 0x78a   :  { %v10771_v21 = vunpack.i.h.bf16 %v10769_v44  ;;  %v10770_v34 = vunpack.i.l.bf16 %v10769_v44  ;;  %3628 = vmatprep.mubr.f32.mxu0 %v3456_v48  ;;  %v10786_v60 = vunpack.i.h.bf16 %v10784_v20  ;;  %v10785_v47 = vunpack.i.l.bf16 %v10784_v20  ;;  %v2726_v20 = vld [vmem:[#allocation3 + $0xd9] sm:$0xff] }
 0x78b   :  { %11058 = vrot.lane.b32.xlu1 %v11057_v46, %s11838_s20  ;;  %11073 = vrot.lane.b32.xlu0 %v11072_v12, %s11838_s20  ;;  %v2628_v44 = vld [vmem:[#allocation3 + $0x1d] sm:$0xff] }
 0x78c   :  { %3629 = vmatmul.mubr.f32.gmra.mxu0 %v3381_v25  ;;  %v3407_v42 = vsel %vm2599_vm10, %v13010_v13, %v10770_v34  ;;  %v3331_v40 = vsel %vm2599_vm10, %v2627_v26, %v10771_v21  ;;  %v3408_v12 = vsel %vm2599_vm10, %v13020_v41, %v10785_v47  ;;  %v3332_v25 = vsel %vm2599_vm10, %v2628_v44, %v10786_v60  ;;  %v13679_v41 = vld [vmem:[#allocation5 + $0x8d8] sm:$0xff] }
 0x78d   :  { %v10794_v4 = vpop.permute.xlu0 %10793  ;;  %v10779_v58 = vpop.permute.xlu1 %10778  ;;  %v3432_v52 = vsel %vm50_vm9, %v3407_v42, %v10775_v57  ;;  %v3356_v35 = vsel %vm50_vm9, %v3331_v40, %v10776_v38  ;;  %v11087_v42 = vpack.i.bf16 %v2698_v5, %v2725_v37  ;;  %v11097_v40 = vpack.i.bf16 %v2699_v16, %v2726_v20  ;;  %v2751_v5 = vld [vmem:[#allocation3 + $0xda] sm:$0xff] }
 0x78e   :  { %v10781_v8 = vunpack.i.h.bf16 %v10779_v58  ;;  %v10780_v55 = vunpack.i.l.bf16 %v10779_v58  ;;  %v10796_v48 = vunpack.i.h.bf16 %v10794_v4  ;;  %v10795_v46 = vunpack.i.l.bf16 %v10794_v4  ;;  %v2629_v58 = vld [vmem:[#allocation3 + $0x25] sm:$0xff] }
 0x78f   :  { %11068 = vrot.lane.b32.xlu1 %v11067_v50, %s11837_s19  ;;  %11083 = vrot.lane.b32.xlu0 %v11082_v63, %s11837_s19  ;;  %v2776_v50 = vld [vmem:[#allocation3 + $0xdb] sm:$0xff]  ;;  %v2674_v63 = vld [vmem:[#allocation3 + $0xc6] sm:$0xff] }
 0x790   :  { %v3457_v14 = vsel %vm3379_vm11, %v3432_v52, %v10780_v55  ;;  %v3382_v54 = vsel %vm3379_vm11, %v3356_v35, %v10781_v8  ;;  %v11102_v52 = vpack.i.bf16 %v2674_v63, %v2725_v37  ;;  %10283 = vmatmul.mubr.msk.f32.gmra.mxu1 %vm2599_vm10, %v2776_v50 }
 0x791   :  { %v10804_v51 = vpop.permute.xlu0 %10803  ;;  %v10789_v23 = vpop.permute.xlu1 %10788  ;;  %3633 = vmatprep.mubr.f32.mxu0 %v3457_v14  ;;  %10293 = vmatprep.mubr.msk.f32.mxu1 %vm11829_vm1, %v13171_v62  ;;  %v2630_v62 = vld [vmem:[#allocation3 + $0x2d] sm:$0xff] }
 0x792   :  { %v10791_v3 = vunpack.i.h.bf16 %v10789_v23  ;;  %v10790_v33 = vunpack.i.l.bf16 %v10789_v23  ;;  %3634 = vmatmul.mubr.f32.gmra.mxu0 %v3382_v54  ;;  %v10806_v53 = vunpack.i.h.bf16 %v10804_v51  ;;  %v10805_v9 = vunpack.i.l.bf16 %v10804_v51  ;;  %v2700_v54 = vld [vmem:[#allocation3 + $0xcf] sm:$0xff] }
 0x793   :  { %11078 = vrot.lane.b32.xlu1 %v11077_v1, %s11839_s21  ;;  %11093 = vrot.lane.b32.xlu0 %v11092_v31, %s11839_s21  ;;  %v11107_v20 = vpack.i.bf16 %v2700_v54, %v2751_v5 }
 0x794   :  { %v3433_v21 = vsel %vm50_vm9, %v3408_v12, %v10790_v33  ;;  %v3357_v34 = vsel %vm50_vm9, %v3332_v25, %v10791_v3 }
 0x795   :  { %v10814_v26 = vpop.permute.xlu0 %10813  ;;  %v10799_v45 = vpop.permute.xlu1 %10798  ;;  %v3458_v32 = vsel %vm3379_vm11, %v3433_v21, %v10795_v46  ;;  %v3383_v38 = vsel %vm3379_vm11, %v3357_v34, %v10796_v48 }
 0x796   :  { %v10801_v57 = vunpack.i.h.bf16 %v10799_v45  ;;  %v10800_v4 = vunpack.i.l.bf16 %v10799_v45  ;;  %3638 = vmatprep.mubr.f32.mxu0 %v3458_v32  ;;  %v10816_v16 = vunpack.i.h.bf16 %v10814_v26  ;;  %v10815_v23 = vunpack.i.l.bf16 %v10814_v26 }
 0x797   :  { %11088 = vrot.lane.b32.xlu1 %v11087_v42, %s11838_s20  ;;  %11098 = vrot.lane.b32.xlu0 %v11097_v40, %s11838_s20 }
 0x798   :  { %3639 = vmatmul.mubr.f32.gmra.mxu0 %v3383_v38  ;;  %v3409_v8 = vsel %vm2599_vm10, %v13029_v7, %v10800_v4  ;;  %v3333_v55 = vsel %vm2599_vm10, %v2629_v58, %v10801_v57  ;;  %v3410_v25 = vsel %vm2599_vm10, %v13043_v29, %v10815_v23  ;;  %v3334_v21 = vsel %vm2599_vm10, %v2630_v62, %v10816_v16  ;;  %v2631_v4 = vld [vmem:[#allocation3 + $0x35] sm:$0xff] }
 0x799   :  { %v10824_v60 = vpop.permute.xlu0 %10823  ;;  %v10809_v47 = vpop.permute.xlu1 %10808  ;;  %v3434_v1 = vsel %vm50_vm9, %v3409_v8, %v10805_v9  ;;  %v3358_v51 = vsel %vm50_vm9, %v3333_v55, %v10806_v53 }
 0x79a   :  { %v10811_v35 = vunpack.i.h.bf16 %v10809_v47  ;;  %v10810_v14 = vunpack.i.l.bf16 %v10809_v47  ;;  %v10826_v46 = vunpack.i.h.bf16 %v10824_v60  ;;  %v10825_v12 = vunpack.i.l.bf16 %v10824_v60 }
 0x79b   :  { %11103 = vrot.lane.b32.xlu1 %v11102_v52, %s11837_s19 }
 0x79c   :  { %v3459_v31 = vsel %vm3379_vm11, %v3434_v1, %v10810_v14  ;;  %v3384_v3 = vsel %vm3379_vm11, %v3358_v51, %v10811_v35 }
 0x79d   :  { %v10834_v33 = vpop.permute.xlu0 %10833  ;;  %v10819_v37 = vpop.permute.xlu1 %10818  ;;  %3643 = vmatprep.mubr.f32.mxu0 %v3459_v31  ;;  %v2632_v31 = vld [vmem:[#allocation3 + $0x3d] sm:$0xff] }
 0x79e   :  { %v10821_v44 = vunpack.i.h.bf16 %v10819_v37  ;;  %v10820_v48 = vunpack.i.l.bf16 %v10819_v37  ;;  %3644 = vmatmul.mubr.f32.gmra.mxu0 %v3384_v3  ;;  %v10836_v63 = vunpack.i.h.bf16 %v10834_v33  ;;  %v10835_v8 = vunpack.i.l.bf16 %v10834_v33 }
 0x79f   :  { %11108 = vrot.lane.b32.xlu1 %v11107_v20, %s11839_s21 }
 0x7a0   :  { %v3435_v34 = vsel %vm50_vm9, %v3410_v25, %v10820_v48  ;;  %v3359_v26 = vsel %vm50_vm9, %v3334_v21, %v10821_v44 }
 0x7a1   :  { %v10844_v45 = vpop.permute.xlu0 %10843  ;;  %v10829_v32 = vpop.permute.xlu1 %10828  ;;  %v3460_v42 = vsel %vm3379_vm11, %v3435_v34, %v10825_v12  ;;  %v3385_v40 = vsel %vm3379_vm11, %v3359_v26, %v10826_v46  ;;  %v2633_v26 = vld [vmem:[#allocation3 + $0x45] sm:$0xff] }
 0x7a2   :  { %v10831_v38 = vunpack.i.h.bf16 %v10829_v32  ;;  %v10830_v57 = vunpack.i.l.bf16 %v10829_v32  ;;  %3648 = vmatprep.mubr.f32.mxu0 %v3460_v42  ;;  %v10846_v47 = vunpack.i.h.bf16 %v10844_v45  ;;  %v10845_v52 = vunpack.i.l.bf16 %v10844_v45 }
 0x7a3   :  { %3649 = vmatmul.mubr.f32.gmra.mxu0 %v3385_v40 }
 0x7a4   :  { %v3411_v58 = vsel %vm2599_vm10, %v13056_v61, %v10830_v57  ;;  %v3335_v50 = vsel %vm2599_vm10, %v2631_v4, %v10831_v38  ;;  %v3412_v37 = vsel %vm2599_vm10, %v13069_v59, %v10845_v52  ;;  %v3336_v20 = vsel %vm2599_vm10, %v2632_v31, %v10846_v47  ;;  %v13665_v59 = vld [vmem:[#allocation5 + $0x8d0] sm:$0xff] }
 0x7a5   :  { %v10854_v55 = vpop.permute.xlu0 %10853  ;;  %v10839_v53 = vpop.permute.xlu1 %10838  ;;  %v3436_v35 = vsel %vm50_vm9, %v3411_v58, %v10835_v8  ;;  %v3360_v14 = vsel %vm50_vm9, %v3335_v50, %v10836_v63 }
 0x7a6   :  { %v10841_v9 = vunpack.i.h.bf16 %v10839_v53  ;;  %v10840_v60 = vunpack.i.l.bf16 %v10839_v53  ;;  %v10856_v3 = vunpack.i.h.bf16 %v10854_v55  ;;  %v10855_v33 = vunpack.i.l.bf16 %v10854_v55 }
 0x7a8   :  { %v3461_v54 = vsel %vm3379_vm11, %v3436_v35, %v10840_v60  ;;  %v3386_v5 = vsel %vm3379_vm11, %v3360_v14, %v10841_v9  ;;  %v2634_v14 = vld [vmem:[#allocation3 + $0x4d] sm:$0xff] }
 0x7a9   :  { %v10864_v16 = vpop.permute.xlu0 %10863  ;;  %v10849_v23 = vpop.permute.xlu1 %10848  ;;  %3653 = vmatprep.mubr.f32.mxu0 %v3461_v54 }
 0x7aa   :  { %v10851_v1 = vunpack.i.h.bf16 %v10849_v23  ;;  %v10850_v51 = vunpack.i.l.bf16 %v10849_v23  ;;  %3654 = vmatmul.mubr.f32.gmra.mxu0 %v3386_v5  ;;  %v10866_v42 = vunpack.i.h.bf16 %v10864_v16  ;;  %v10865_v40 = vunpack.i.l.bf16 %v10864_v16 }
 0x7ac   :  { %v3437_v44 = vsel %vm50_vm9, %v3412_v37, %v10850_v51  ;;  %v3361_v48 = vsel %vm50_vm9, %v3336_v20, %v10851_v1 }
 0x7ad   :  { %v10874_v62 = vpop.permute.xlu0 %10873  ;;  %v10859_v46 = vpop.permute.xlu1 %10858  ;;  %v3462_v12 = vsel %vm3379_vm11, %v3437_v44, %v10855_v33  ;;  %v3387_v25 = vsel %vm3379_vm11, %v3361_v48, %v10856_v3  ;;  %v2635_v48 = vld [vmem:[#allocation3 + $0x55] sm:$0xff] }
 0x7ae   :  { %v10861_v21 = vunpack.i.h.bf16 %v10859_v46  ;;  %v10860_v34 = vunpack.i.l.bf16 %v10859_v46  ;;  %3658 = vmatprep.mubr.f32.mxu0 %v3462_v12  ;;  %v10876_v50 = vunpack.i.h.bf16 %v10874_v62  ;;  %v10875_v63 = vunpack.i.l.bf16 %v10874_v62 }
 0x7af   :  { %3659 = vmatmul.mubr.f32.gmra.mxu0 %v3387_v25 }
 0x7b0   :  { %v3413_v45 = vsel %vm2599_vm10, %v13082_v10, %v10860_v34  ;;  %v3337_v32 = vsel %vm2599_vm10, %v2633_v26, %v10861_v21  ;;  %v3414_v16 = vsel %vm2599_vm10, %v13095_v49, %v10875_v63  ;;  %v3338_v23 = vsel %vm2599_vm10, %v2634_v14, %v10876_v50 }
 0x7b1   :  { %v10884_v38 = vpop.permute.xlu0 %10883  ;;  %v10869_v57 = vpop.permute.xlu1 %10868  ;;  %v3438_v8 = vsel %vm50_vm9, %v3413_v45, %v10865_v40  ;;  %v3362_v55 = vsel %vm50_vm9, %v3337_v32, %v10866_v42 }
 0x7b2   :  { %v10871_v4 = vunpack.i.h.bf16 %v10869_v57  ;;  %v10870_v58 = vunpack.i.l.bf16 %v10869_v57  ;;  %v10886_v54 = vunpack.i.h.bf16 %v10884_v38  ;;  %v10885_v5 = vunpack.i.l.bf16 %v10884_v38 }
 0x7b4   :  { %v3463_v53 = vsel %vm3379_vm11, %v3438_v8, %v10870_v58  ;;  %v3388_v9 = vsel %vm3379_vm11, %v3362_v55, %v10871_v4  ;;  %v2636_v55 = vld [vmem:[#allocation3 + $0x5d] sm:$0xff] }
 0x7b5   :  { %v10894_v60 = vpop.permute.xlu0 %10893  ;;  %v10879_v47 = vpop.permute.xlu1 %10878  ;;  %3663 = vmatprep.mubr.f32.mxu0 %v3463_v53 }
 0x7b6   :  { %v10881_v52 = vunpack.i.h.bf16 %v10879_v47  ;;  %v10880_v35 = vunpack.i.l.bf16 %v10879_v47  ;;  %3664 = vmatmul.mubr.f32.gmra.mxu0 %v3388_v9  ;;  %v10896_v12 = vunpack.i.h.bf16 %v10894_v60  ;;  %v10895_v25 = vunpack.i.l.bf16 %v10894_v60 }
 0x7b8   :  { %v3439_v1 = vsel %vm50_vm9, %v3414_v16, %v10880_v35  ;;  %v3363_v51 = vsel %vm50_vm9, %v3338_v23, %v10881_v52 }
 0x7b9   :  { %v10904_v31 = vpop.permute.xlu0 %10903  ;;  %v10889_v3 = vpop.permute.xlu1 %10888  ;;  %v3464_v33 = vsel %vm3379_vm11, %v3439_v1, %v10885_v5  ;;  %v3389_v37 = vsel %vm3379_vm11, %v3363_v51, %v10886_v54  ;;  %v2637_v51 = vld [vmem:[#allocation3 + $0x65] sm:$0xff] }
 0x7ba   :  { %v10891_v20 = vunpack.i.h.bf16 %v10889_v3  ;;  %v10890_v44 = vunpack.i.l.bf16 %v10889_v3  ;;  %3668 = vmatprep.mubr.f32.mxu0 %v3464_v33  ;;  %v10906_v32 = vunpack.i.h.bf16 %v10904_v31  ;;  %v10905_v42 = vunpack.i.l.bf16 %v10904_v31 }
 0x7bb   :  { %3669 = vmatmul.mubr.f32.gmra.mxu0 %v3389_v37 }
 0x7bc   :  { %v3415_v62 = vsel %vm2599_vm10, %v13108_v56, %v10890_v44  ;;  %v3339_v46 = vsel %vm2599_vm10, %v2635_v48, %v10891_v20  ;;  %v3416_v60 = vsel %vm2599_vm10, %v13121_v15, %v10905_v42  ;;  %v3340_v47 = vsel %vm2599_vm10, %v2636_v55, %v10906_v32 }
 0x7bd   :  { %v10914_v21 = vpop.permute.xlu0 %10913  ;;  %v10899_v34 = vpop.permute.xlu1 %10898  ;;  %v3440_v40 = vsel %vm50_vm9, %v3415_v62, %v10895_v25  ;;  %v3364_v38 = vsel %vm50_vm9, %v3339_v46, %v10896_v12 }
 0x7be   :  { %v10901_v26 = vunpack.i.h.bf16 %v10899_v34  ;;  %v10900_v45 = vunpack.i.l.bf16 %v10899_v34  ;;  %v10916_v53 = vunpack.i.h.bf16 %v10914_v21  ;;  %v10915_v9 = vunpack.i.l.bf16 %v10914_v21 }
 0x7c0   :  { %v3465_v57 = vsel %vm3379_vm11, %v3440_v40, %v10900_v45  ;;  %v3390_v4 = vsel %vm3379_vm11, %v3364_v38, %v10901_v26 }
 0x7c1   :  { %v10924_v58 = vpop.permute.xlu0 %10923  ;;  %v10909_v50 = vpop.permute.xlu1 %10908  ;;  %3673 = vmatprep.mubr.f32.mxu0 %v3465_v57 }
 0x7c2   :  { %v10911_v63 = vunpack.i.h.bf16 %v10909_v50  ;;  %v10910_v8 = vunpack.i.l.bf16 %v10909_v50  ;;  %3674 = vmatmul.mubr.f32.gmra.mxu0 %v3390_v4  ;;  %v10926_v20 = vunpack.i.h.bf16 %v10924_v58  ;;  %v10925_v44 = vunpack.i.l.bf16 %v10924_v58  ;;  %v2638_v50 = vld [vmem:[#allocation3 + $0x6d] sm:$0xff] }
 0x7c4   :  { %v3441_v52 = vsel %vm50_vm9, %v3416_v60, %v10910_v8  ;;  %v3365_v35 = vsel %vm50_vm9, %v3340_v47, %v10911_v63 }
 0x7c5   :  { %v10934_v14 = vpop.permute.xlu0 %10933  ;;  %v10919_v54 = vpop.permute.xlu1 %10918  ;;  %v3466_v5 = vsel %vm3379_vm11, %v3441_v52, %v10915_v9  ;;  %v3391_v16 = vsel %vm3379_vm11, %v3365_v35, %v10916_v53 }
 0x7c6   :  { %v10921_v23 = vunpack.i.h.bf16 %v10919_v54  ;;  %v10920_v1 = vunpack.i.l.bf16 %v10919_v54  ;;  %3678 = vmatprep.mubr.f32.mxu0 %v3466_v5  ;;  %v10936_v25 = vunpack.i.h.bf16 %v10934_v14  ;;  %v10935_v21 = vunpack.i.l.bf16 %v10934_v14 }
 0x7c7   :  { %3679 = vmatmul.mubr.f32.gmra.mxu0 %v3391_v16 }
 0x7c8   :  { %v13426_v31 = vpop.f32.mrf.mxu1  ;;  %v3417_v33 = vsel %vm2599_vm10, %v13134_v39, %v10920_v1  ;;  %v3341_v37 = vsel %vm2599_vm10, %v2637_v51, %v10921_v23  ;;  %v3418_v55 = vsel %vm2599_vm10, %v13147_v0, %v10935_v21  ;;  %v3342_v53 = vsel %vm2599_vm10, %v2638_v50, %v10936_v25  ;;  %v2639_v1 = vld [vmem:[#allocation3 + $0x75] sm:$0xff] }
 0x7c9   :  { %v10944_v3 = vpop.permute.xlu0 %10943  ;;  %v10929_v48 = vpop.permute.xlu1 %10928  ;;  %v3442_v34 = vsel %vm50_vm9, %v3417_v33, %v10925_v44  ;;  %v3366_v26 = vsel %vm50_vm9, %v3341_v37, %v10926_v20 }
 0x7ca   :  { %v10931_v62 = vunpack.i.h.bf16 %v10929_v48  ;;  %v10930_v46 = vunpack.i.l.bf16 %v10929_v48  ;;  %v10212_v12 = vpop.f32.mrf.mxu1  ;;  %v10946_v63 = vunpack.i.h.bf16 %v10944_v3  ;;  %v10945_v8 = vunpack.i.l.bf16 %v10944_v3 }
 0x7cc   :  { %v13433_v45 = vpop.f32.mrf.mxu1  ;;  %v3467_v42 = vsel %vm3379_vm11, %v3442_v34, %v10930_v46  ;;  %v3392_v40 = vsel %vm3379_vm11, %v3366_v26, %v10931_v62 }
 0x7cd   :  { %v10954_v32 = vpop.permute.xlu0 %10953  ;;  %v10939_v38 = vpop.permute.xlu1 %10938  ;;  %3683 = vmatprep.mubr.f32.mxu0 %v3467_v42 }
 0x7ce   :  { %v10941_v57 = vunpack.i.h.bf16 %v10939_v38  ;;  %v10940_v4 = vunpack.i.l.bf16 %v10939_v38  ;;  %3684 = vmatmul.mubr.f32.gmra.mxu0 %v3392_v40  ;;  %v10215_v58 = vpop.f32.mrf.mxu1  ;;  %v10956_v20 = vunpack.i.h.bf16 %v10954_v32  ;;  %v10955_v44 = vunpack.i.l.bf16 %v10954_v32 }
 0x7d0   :  { %v13440_v9 = vpop.f32.mrf.mxu1  ;;  %v3443_v47 = vsel %vm50_vm9, %v3418_v55, %v10940_v4  ;;  %v3367_v52 = vsel %vm50_vm9, %v3342_v53, %v10941_v57 }
 0x7d1   :  { %v10964_v60 = vpop.permute.xlu0 %10963  ;;  %v10949_v35 = vpop.permute.xlu1 %10948  ;;  %v3468_v14 = vsel %vm3379_vm11, %v3443_v47, %v10945_v8  ;;  %v3393_v54 = vsel %vm3379_vm11, %v3367_v52, %v10946_v63  ;;  %v2640_v63 = vld [vmem:[#allocation3 + $0x7d] sm:$0xff] }
 0x7d2   :  { %v10951_v5 = vunpack.i.h.bf16 %v10949_v35  ;;  %v10950_v16 = vunpack.i.l.bf16 %v10949_v35  ;;  %3688 = vmatprep.mubr.f32.mxu0 %v3468_v14  ;;  %v10218_v23 = vpop.f32.mrf.mxu1  ;;  %v10966_v25 = vunpack.i.h.bf16 %v10964_v60  ;;  %v10965_v21 = vunpack.i.l.bf16 %v10964_v60 }
 0x7d3   :  { %3689 = vmatmul.mubr.f32.gmra.mxu0 %v3393_v54 }
 0x7d4   :  { %v13446_v51 = vpop.f32.mrf.mxu1  ;;  %v3419_v33 = vsel %vm2599_vm10, %v13160_v11, %v10950_v16  ;;  %v3343_v37 = vsel %vm2599_vm10, %v2639_v1, %v10951_v5  ;;  %v3420_v53 = vsel %vm2599_vm10, %v13175_v36, %v10965_v21  ;;  %v3344_v60 = vsel %vm2599_vm10, %v2640_v63, %v10966_v25 }
 0x7d5   :  { %v10974_v3 = vpop.permute.xlu0 %10973  ;;  %v10959_v48 = vpop.permute.xlu1 %10958  ;;  %v3444_v34 = vsel %vm50_vm9, %v3419_v33, %v10955_v44  ;;  %v3368_v26 = vsel %vm50_vm9, %v3343_v37, %v10956_v20  ;;  %v2641_v33 = vld [vmem:[#allocation3 + $0x85] sm:$0xff] }
 0x7d6   :  { %v10961_v62 = vunpack.i.h.bf16 %v10959_v48  ;;  %v10960_v46 = vunpack.i.l.bf16 %v10959_v48  ;;  %v10221_v12 = vpop.f32.mrf.mxu1  ;;  %v10976_v8 = vunpack.i.h.bf16 %v10974_v3  ;;  %v10975_v55 = vunpack.i.l.bf16 %v10974_v3 }
 0x7d8   :  { %v13453_v42 = vpop.f32.mrf.mxu1  ;;  %v3469_v38 = vsel %vm3379_vm11, %v3444_v34, %v10960_v46  ;;  %v3394_v57 = vsel %vm3379_vm11, %v3368_v26, %v10961_v62 }
 0x7d9   :  { %v10984_v40 = vpop.permute.xlu0 %10983  ;;  %v10969_v4 = vpop.permute.xlu1 %10968  ;;  %3693 = vmatprep.mubr.f32.mxu0 %v3469_v38 }
 0x7da   :  { %v10971_v32 = vunpack.i.h.bf16 %v10969_v4  ;;  %v10970_v58 = vunpack.i.l.bf16 %v10969_v4  ;;  %3694 = vmatmul.mubr.f32.gmra.mxu0 %v3394_v57  ;;  %v10224_v50 = vpop.f32.mrf.mxu1  ;;  %v10986_v62 = vunpack.i.h.bf16 %v10984_v40  ;;  %v10985_v46 = vunpack.i.l.bf16 %v10984_v40 }
 0x7dc   :  { %v13460_v47 = vpop.f32.mrf.mxu1  ;;  %v3445_v35 = vsel %vm50_vm9, %v3420_v53, %v10970_v58  ;;  %v3369_v14 = vsel %vm50_vm9, %v3344_v60, %v10971_v32  ;;  %v2642_v60 = vld [vmem:[#allocation3 + $0x8d] sm:$0xff] }
 0x7dd   :  { %v10994_v52 = vpop.permute.xlu0 %10993  ;;  %v10979_v54 = vpop.permute.xlu1 %10978  ;;  %v3470_v5 = vsel %vm3379_vm11, %v3445_v35, %v10975_v55  ;;  %v3395_v16 = vsel %vm3379_vm11, %v3369_v14, %v10976_v8 }
 0x7de   :  { %v10981_v23 = vunpack.i.h.bf16 %v10979_v54  ;;  %v10980_v1 = vunpack.i.l.bf16 %v10979_v54  ;;  %3698 = vmatprep.mubr.f32.mxu0 %v3470_v5  ;;  %v10227_v3 = vpop.f32.mrf.mxu1  ;;  %v10996_v26 = vunpack.i.h.bf16 %v10994_v52  ;;  %v10995_v38 = vunpack.i.l.bf16 %v10994_v52 }
 0x7df   :  { %3699 = vmatmul.mubr.f32.gmra.mxu0 %v3395_v16 }
 0x7e0   :  { %v13466_v37 = vpop.f32.mrf.mxu1  ;;  %v3421_v44 = vsel %vm2599_vm10, %v13188_v28, %v10980_v1  ;;  %v3345_v48 = vsel %vm2599_vm10, %v2641_v33, %v10981_v23  ;;  %v3422_v14 = vsel %vm2599_vm10, %v13201_v27, %v10995_v38  ;;  %v3346_v54 = vsel %vm2599_vm10, %v2642_v60, %v10996_v26  ;;  %v2596_v27 = vld [vmem:[#allocation5 + $0x230] sm:$0xff]  ;;  %v13589_v28 = vld [vmem:[#allocation5 + $0xb38] sm:$0x3f] }
 0x7e1   :  { %v11004_v20 = vpop.permute.xlu0 %11003  ;;  %v10989_v12 = vpop.permute.xlu1 %10988  ;;  %v3446_v57 = vsel %vm50_vm9, %v3421_v44, %v10985_v46  ;;  %v3370_v4 = vsel %vm50_vm9, %v3345_v48, %v10986_v62  ;;  %v2643_v46 = vld [vmem:[#allocation3 + $0x95] sm:$0xff] }
 0x7e2   :  { %v10991_v25 = vunpack.i.h.bf16 %v10989_v12  ;;  %v10990_v21 = vunpack.i.l.bf16 %v10989_v12  ;;  %v10230_v34 = vpop.f32.mrf.mxu1  ;;  %v11006_v35 = vunpack.i.h.bf16 %v11004_v20  ;;  %v11005_v52 = vunpack.i.l.bf16 %v11004_v20 }
 0x7e4   :  { %v13473_v32 = vpop.f32.mrf.mxu1  ;;  %v3471_v50 = vsel %vm3379_vm11, %v3446_v57, %v10990_v21  ;;  %v3396_v63 = vsel %vm3379_vm11, %v3370_v4, %v10991_v25 }
 0x7e5   :  { %v11014_v58 = vpop.permute.xlu0 %11013  ;;  %v10999_v8 = vpop.permute.xlu1 %10998  ;;  %3703 = vmatprep.mubr.f32.mxu0 %v3471_v50 }
 0x7e6   :  { %v11001_v40 = vunpack.i.h.bf16 %v10999_v8  ;;  %v11000_v55 = vunpack.i.l.bf16 %v10999_v8  ;;  %3704 = vmatmul.mubr.f32.gmra.mxu0 %v3396_v63  ;;  %v10233_v53 = vpop.f32.mrf.mxu1  ;;  %v11016_v26 = vunpack.i.h.bf16 %v11014_v58  ;;  %v11015_v38 = vunpack.i.l.bf16 %v11014_v58 }
 0x7e8   :  { %v13480_v5 = vpop.f32.mrf.mxu1  ;;  %v3447_v23 = vsel %vm50_vm9, %v3422_v14, %v11000_v55  ;;  %v3371_v1 = vsel %vm50_vm9, %v3346_v54, %v11001_v40 }
 0x7e9   :  { %v11024_v16 = vpop.permute.xlu0 %11023  ;;  %v11009_v3 = vpop.permute.xlu1 %11008  ;;  %v3472_v33 = vsel %vm3379_vm11, %v3447_v23, %v11005_v52  ;;  %v3397_v44 = vsel %vm3379_vm11, %v3371_v1, %v11006_v35 }
 0x7ea   :  { %v11011_v48 = vunpack.i.h.bf16 %v11009_v3  ;;  %v11010_v62 = vunpack.i.l.bf16 %v11009_v3  ;;  %3708 = vmatprep.mubr.f32.mxu0 %v3472_v33  ;;  %v10236_v20 = vpop.f32.mrf.mxu1  ;;  %v11026_v8 = vunpack.i.h.bf16 %v11024_v16  ;;  %v11025_v40 = vunpack.i.l.bf16 %v11024_v16  ;;  %v2644_v3 = vld [vmem:[#allocation3 + $0x9d] sm:$0xff] }
 0x7eb   :  { %3709 = vmatmul.mubr.f32.gmra.mxu0 %v3397_v44 }
 0x7ec   :  { %v13486_v12 = vpop.f32.mrf.mxu1  ;;  %v3423_v21 = vsel %vm2599_vm10, %v13214_v22, %v11010_v62  ;;  %v3347_v34 = vsel %vm2599_vm10, %v2643_v46, %v11011_v48  ;;  %v3424_v44 = vsel %vm2599_vm10, %v13227_v43, %v11025_v40  ;;  %v3348_v48 = vsel %vm2599_vm10, %v2644_v3, %v11026_v8 }
 0x7ed   :  { %v11034_v25 = vpop.permute.xlu0 %11033  ;;  %v11019_v57 = vpop.permute.xlu1 %11018  ;;  %v3448_v55 = vsel %vm50_vm9, %v3423_v21, %v11015_v38  ;;  %v3372_v53 = vsel %vm50_vm9, %v3347_v34, %v11016_v26 }
 0x7ee   :  { %v11021_v4 = vunpack.i.h.bf16 %v11019_v57  ;;  %v11020_v50 = vunpack.i.l.bf16 %v11019_v57  ;;  %v10239_v63 = vpop.f32.mrf.mxu1  ;;  %v11036_v33 = vunpack.i.h.bf16 %v11034_v25  ;;  %v11035_v16 = vunpack.i.l.bf16 %v11034_v25 }
 0x7f0   :  { %v13493_v60 = vpop.f32.mrf.mxu1  ;;  %v3473_v52 = vsel %vm3379_vm11, %v3448_v55, %v11020_v50  ;;  %v3398_v14 = vsel %vm3379_vm11, %v3372_v53, %v11021_v4  ;;  %v2645_v50 = vld [vmem:[#allocation3 + $0xa5] sm:$0xff] }
 0x7f1   :  { %v11044_v35 = vpop.permute.xlu0 %11043  ;;  %v11029_v54 = vpop.permute.xlu1 %11028  ;;  %3713 = vmatprep.mubr.f32.mxu0 %v3473_v52 }
 0x7f2   :  { %v11031_v58 = vunpack.i.h.bf16 %v11029_v54  ;;  %v11030_v23 = vunpack.i.l.bf16 %v11029_v54  ;;  %3714 = vmatmul.mubr.f32.gmra.mxu0 %v3398_v14  ;;  %v10242_v1 = vpop.f32.mrf.mxu1  ;;  %v11046_v53 = vunpack.i.h.bf16 %v11044_v35  ;;  %v11045_v52 = vunpack.i.l.bf16 %v11044_v35 }
 0x7f4   :  { %v13500_v62 = vpop.f32.mrf.mxu1  ;;  %v3449_v46 = vsel %vm50_vm9, %v3424_v44, %v11030_v23  ;;  %v3373_v21 = vsel %vm50_vm9, %v3348_v48, %v11031_v58 }
 0x7f5   :  { %v11054_v20 = vpop.permute.xlu0 %11053  ;;  %v11039_v34 = vpop.permute.xlu1 %11038  ;;  %v3474_v26 = vsel %vm3379_vm11, %v3449_v46, %v11035_v16  ;;  %v3399_v38 = vsel %vm3379_vm11, %v3373_v21, %v11036_v33 }
 0x7f6   :  { %v11041_v57 = vunpack.i.h.bf16 %v11039_v34  ;;  %v11040_v4 = vunpack.i.l.bf16 %v11039_v34  ;;  %3718 = vmatprep.mubr.f32.mxu0 %v3474_v26  ;;  %v10245_v25 = vpop.f32.mrf.mxu1  ;;  %v11056_v1 = vunpack.i.h.bf16 %v11054_v20  ;;  %v11055_v3 = vunpack.i.l.bf16 %v11054_v20 }
 0x7f7   :  { %3719 = vmatmul.mubr.f32.gmra.mxu0 %v3399_v38 }
 0x7f8   :  { %v13506_v63 = vpop.f32.mrf.mxu1  ;;  %v3425_v40 = vsel %vm2599_vm10, %v13240_v24, %v11040_v4  ;;  %v3349_v55 = vsel %vm2599_vm10, %v2645_v50, %v11041_v57  ;;  %v2646_v57 = vld [vmem:[#allocation3 + $0xad] sm:$0xff]  ;;  %v3426_v25 = vsel %vm2599_vm10, %v13253_v18, %v11055_v3  ;;  %v2647_v3 = vld [vmem:[#allocation3 + $0xb5] sm:$0xff] }
 0x7f9   :  { %v11064_v8 = vpop.permute.xlu0 %11063  ;;  %v11049_v14 = vpop.permute.xlu1 %11048  ;;  %v3450_v33 = vsel %vm50_vm9, %v3425_v40, %v11045_v52  ;;  %v3374_v16 = vsel %vm50_vm9, %v3349_v55, %v11046_v53  ;;  %v3350_v50 = vsel %vm2599_vm10, %v2646_v57, %v11056_v1 }
 0x7fa   :  { %v11051_v54 = vunpack.i.h.bf16 %v11049_v14  ;;  %v11050_v58 = vunpack.i.l.bf16 %v11049_v14  ;;  %v10248_v23 = vpop.f32.mrf.mxu1  ;;  %v11066_v4 = vunpack.i.h.bf16 %v11064_v8  ;;  %v11065_v20 = vunpack.i.l.bf16 %v11064_v8 }
 0x7fc   :  { %v13513_v44 = vpop.f32.mrf.mxu1  ;;  %v3475_v46 = vsel %vm3379_vm11, %v3450_v33, %v11050_v58  ;;  %v3400_v21 = vsel %vm3379_vm11, %v3374_v16, %v11051_v54 }
 0x7fd   :  { %v11074_v48 = vpop.permute.xlu0 %11073  ;;  %v11059_v34 = vpop.permute.xlu1 %11058  ;;  %3723 = vmatprep.mubr.f32.mxu0 %v3475_v46 }
 0x7fe   :  { %v11061_v35 = vunpack.i.h.bf16 %v11059_v34  ;;  %v11060_v26 = vunpack.i.l.bf16 %v11059_v34  ;;  %3724 = vmatmul.mubr.f32.gmra.mxu0 %v3400_v21  ;;  %v10251_v38 = vpop.f32.mrf.mxu1  ;;  %v11076_v21 = vunpack.i.h.bf16 %v11074_v48  ;;  %v11075_v34 = vunpack.i.l.bf16 %v11074_v48 }
 0x800   :  { %v13520_v40 = vpop.f32.mrf.mxu1  ;;  %v3451_v55 = vsel %vm50_vm9, %v3426_v25, %v11060_v26  ;;  %v3375_v53 = vsel %vm50_vm9, %v3350_v50, %v11061_v35 }
 0x801   :  { %v11069_v52 = vpop.permute.xlu1 %11068  ;;  %v3476_v14 = vsel %vm3379_vm11, %v3451_v55, %v11065_v20  ;;  %v3401_v54 = vsel %vm3379_vm11, %v3375_v53, %v11066_v4  ;;  %v11084_v58 = vpop.permute.xlu0 %11083 }
 0x802   :  { %v11071_v23 = vunpack.i.h.bf16 %v11069_v52  ;;  %v11070_v33 = vunpack.i.l.bf16 %v11069_v52  ;;  %3728 = vmatprep.mubr.f32.mxu0 %v3476_v14  ;;  %v10254_v8 = vpop.f32.mrf.mxu1  ;;  %v11086_v4 = vunpack.i.h.bf16 %v11084_v58  ;;  %v11085_v20 = vunpack.i.l.bf16 %v11084_v58 }
 0x803   :  { %3729 = vmatmul.mubr.f32.gmra.mxu0 %v3401_v54  ;;  %v2648_v8 = vld [vmem:[#allocation3 + $0xbd] sm:$0xff] }
 0x804   :  { %v13526_v16 = vpop.f32.mrf.mxu1  ;;  %v3427_v1 = vsel %vm2599_vm10, %v13265_v6, %v11070_v33  ;;  %v3351_v46 = vsel %vm2599_vm10, %v2647_v3, %v11071_v23 }
 0x805   :  { %v11079_v35 = vpop.permute.xlu1 %11078  ;;  %v3452_v25 = vsel %vm50_vm9, %v3427_v1, %v11075_v34  ;;  %v3376_v50 = vsel %vm50_vm9, %v3351_v46, %v11076_v21  ;;  %v11094_v55 = vpop.permute.xlu0 %11093  ;;  %v3428_v1 = vsel %vm2599_vm10, %v13277_v17, %v11085_v20  ;;  %v3352_v46 = vsel %vm2599_vm10, %v2648_v8, %v11086_v4  ;;  %v2649_v20 = vld [vmem:[#allocation3 + $0xc5] sm:$0xff] }
 0x806   :  { %v11081_v26 = vunpack.i.h.bf16 %v11079_v35  ;;  %v11080_v38 = vunpack.i.l.bf16 %v11079_v35  ;;  %v10257_v57 = vpop.f32.mrf.mxu1  ;;  %v11096_v3 = vunpack.i.h.bf16 %v11094_v55  ;;  %v11095_v58 = vunpack.i.l.bf16 %v11094_v55 }
 0x808   :  { %v13533_v53 = vpop.f32.mrf.mxu1  ;;  %v3477_v52 = vsel %vm3379_vm11, %v3452_v25, %v11080_v38  ;;  %v3402_v14 = vsel %vm3379_vm11, %v3376_v50, %v11081_v26 }
 0x809   :  { %v11089_v54 = vpop.permute.xlu1 %11088  ;;  %3733 = vmatprep.mubr.f32.mxu0 %v3477_v52  ;;  %v11099_v25 = vpop.permute.xlu0 %11098 }
 0x80a   :  { %v11091_v48 = vunpack.i.h.bf16 %v11089_v54  ;;  %v11090_v23 = vunpack.i.l.bf16 %v11089_v54  ;;  %3734 = vmatmul.mubr.f32.gmra.mxu0 %v3402_v14  ;;  %v10260_v33 = vpop.f32.mrf.mxu1 }
 0x80c   :  { %v13540_v21 = vpop.f32.mrf.mxu1  ;;  %v3453_v34 = vsel %vm50_vm9, %v3428_v1, %v11090_v23  ;;  %v3377_v35 = vsel %vm50_vm9, %v3352_v46, %v11091_v48  ;;  %v11101_v48 = vunpack.i.h.bf16 %v11099_v25  ;;  %v11100_v23 = vunpack.i.l.bf16 %v11099_v25 }
 0x80d   :  { %v11104_v26 = vpop.permute.xlu1 %11103  ;;  %v3478_v38 = vsel %vm3379_vm11, %v3453_v34, %v11095_v58  ;;  %v3403_v57 = vsel %vm3379_vm11, %v3377_v35, %v11096_v3 }
 0x80e   :  { %v11106_v50 = vunpack.i.h.bf16 %v11104_v26  ;;  %v11105_v52 = vunpack.i.l.bf16 %v11104_v26  ;;  %3738 = vmatprep.mubr.f32.mxu0 %v3478_v38  ;;  %v10263_v55 = vpop.f32.mrf.mxu1 }
 0x80f   :  { %3739 = vmatmul.mubr.f32.gmra.mxu0 %v3403_v57 }
 0x810   :  { %v13546_v14 = vpop.f32.mrf.mxu1  ;;  %v3429_v4 = vsel %vm2599_vm10, %v13287_v2, %v11105_v52  ;;  %v3353_v54 = vsel %vm2599_vm10, %v2649_v20, %v11106_v50 }
 0x811   :  { %v11109_v33 = vpop.permute.xlu1 %11108  ;;  %v3454_v1 = vsel %vm50_vm9, %v3429_v4, %v11100_v23  ;;  %v3378_v46 = vsel %vm50_vm9, %v3353_v54, %v11101_v48 }
 0x812   :  { %v11111_v8 = vunpack.i.h.bf16 %v11109_v33  ;;  %v11110_v58 = vunpack.i.l.bf16 %v11109_v33  ;;  %v10266_v3 = vpop.f32.mrf.mxu1 }
 0x814   :  { %v3479_v34 = vsel %vm3379_vm11, %v3454_v1, %v11110_v58  ;;  %v13554_v35 = vpop.f32.mrf.mxu1  ;;  %v3404_v26 = vsel %vm3379_vm11, %v3378_v46, %v11111_v8 }
 0x815   :  { %3743 = vmatprep.mubr.f32.mxu0 %v3479_v34 }
 0x816   :  { %3744 = vmatmul.mubr.f32.gmra.mxu0 %v3404_v26  ;;  %v10269_v38 = vpop.f32.mrf.mxu1 }
 0x818   :  { %v13557_v57 = vpop.f32.mrf.mxu1 }
 0x81a   :  { %v10272_v25 = vpop.f32.mrf.mxu1 }
 0x81c   :  { %v13559_v50 = vpop.f32.mrf.mxu1 }
 0x81e   :  { %v10275_v52 = vpop.f32.mrf.mxu1 }
 0x820   :  { %v13561_v55 = vpop.f32.mrf.mxu1 }
 0x822   :  { %v10278_v20 = vpop.f32.mrf.mxu1 }
 0x824   :  { %v13563_v4 = vpop.f32.mrf.mxu1 }
 0x826   :  { %v10281_v54 = vpop.f32.mrf.mxu1 }
 0x846   :  { %v3625_v48 = vpop.f32.mrf.mxu0 }
 0x848   :  { %v3627_v23 = vpop.f32.mrf.mxu0 }
 0x84c   :  { %v3630_v33 = vpop.f32.mrf.mxu0 }
 0x84e   :  { %v3632_v58 = vpop.f32.mrf.mxu0 }
 0x850   :  { %v13565_v46 = vpop.f32.mrf.mxu1 }
 0x852   :  { %v3635_v8 = vpop.f32.mrf.mxu0  ;;  %v10284_v26 = vpop.f32.mrf.mxu1 }
 0x853   :  { %v3480_v26 = vlaneseq }
 0x854   :  { %v3637_v3 = vpop.f32.mrf.mxu0 }
 0x858   :  { %v3640_v1 = vpop.f32.mrf.mxu0 }
 0x85a   :  { %v3642_v34 = vpop.f32.mrf.mxu0 }
 0x85e   :  { %v3645_v38 = vpop.f32.mrf.mxu0 }
 0x860   :  { %v3647_v25 = vpop.f32.mrf.mxu0 }
 0x861   :  { %v2597_v25 = vld [vmem:[#allocation5 + $0x238] sm:$0xff] }
 0x862   :  { %10286 = vmatpush3.msra.mxu1 %v2597_v25 }
 0x863   :  { %v3650_v52 = vpop.f32.mrf.mxu0 }
 0x865   :  { %v3652_v2 = vpop.f32.mrf.mxu0 }
 0x86a   :  { %v3655_v17 = vpop.f32.mrf.mxu0 }
 0x86c   :  { %v3657_v20 = vpop.f32.mrf.mxu0 }
 0x86d   :  { %v13577_v20 = vld [vmem:[#allocation4] sm:$0xff] }
 0x86e   :  { %10287 = vmatprep.subr.mxu1 %v13577_v20 }
 0x86f   :  { %v3660_v6 = vpop.f32.mrf.mxu0  ;;  %10288 = vmatpush3.msra.mxu1 %v2596_v27 }
 0x870   :  { %10289 = vmatprep.subr.mxu1 %v13577_v20 }
 0x871   :  { %v3662_v18 = vpop.f32.mrf.mxu0 }
 0x872   :  { %v2595_v18 = vld [vmem:[#allocation5 + $0x228] sm:$0xff] }
 0x873   :  { %10290 = vmatpush3.msra.mxu1 %v2595_v18 }
 0x874   :  { %10291 = vmatprep.subr.mxu1 %v13577_v20 }
 0x876   :  { %v13567_v54 = vpop.f32.mrf.mxu0 }
 0x878   :  { %v3667_v23 = vpop.f32.mrf.mxu0 }
 0x879   :  { %v13580_v23 = vshrl.u32 %v3480_v26, 7 }
 0x87b   :  { %v13569_v24 = vpop.f32.mrf.mxu0 }
 0x87d   :  { %v3672_v58 = vpop.f32.mrf.mxu0 }
 0x882   :  { %v13571_v3 = vpop.f32.mrf.mxu0 }
 0x884   :  { %v3677_v43 = vpop.f32.mrf.mxu0 }
 0x885   :  { %v2594_v43 = vld [vmem:[#allocation5 + $0x220] sm:$0xff] }
 0x886   :  { %10292 = vmatpush3.msra.mxu1 %v2594_v43 }
 0x887   :  { %v13573_v22 = vpop.f32.mrf.mxu0  ;;  %10451 = vmatprep.subr.mxu1 %v13577_v20 }
 0x889   :  { %v3682_v34 = vpop.f32.mrf.mxu0 }
 0x88a   :  { %v13585_v34 = vsub.s32 0, %v13580_v23 }
 0x88c   :  { %16129 = vst [vmem:[#allocation39_spill] sm:$0xff] %v13585_v34  ;;  %v13594_v27 = vrot.slane %v13589_v28, %v13585_v34 }
 0x88e   :  { %v13575_v2 = vpop.f32.mrf.mxu0  ;;  %v3626_v36 = vadd.f32 %v3625_v48, %v13594_v27  ;;  %v3636_v11 = vadd.f32 %v3635_v8, %v13594_v27  ;;  %v3641_v39 = vadd.f32 %v3640_v1, %v13594_v27  ;;  %v3646_v34 = vadd.f32 %v3645_v38, %v13594_v27 }
 0x88f   :  { %v3651_v48 = vadd.f32 %v3650_v52, %v13594_v27  ;;  %v3656_v1 = vadd.f32 %v3655_v17, %v13594_v27  ;;  %v3676_v61 = vadd.f32 %v13571_v3, %v13594_v27  ;;  %v3681_v3 = vadd.f32 %v13573_v22, %v13594_v27 }
 0x890   :  { %v3687_v58 = vpop.f32.mrf.mxu0  ;;  %v3816_v15 = vadd.f32 %v13426_v31, %v3626_v36  ;;  %v3831_v49 = vadd.f32 %v13446_v51, %v3641_v39  ;;  %v13626_v51 = vld [vmem:[#allocation5 + $0x8b8] sm:$0xff] }
 0x891   :  { %v3631_v58 = vadd.f32 %v3630_v33, %v13594_v27  ;;  %v3841_v31 = vadd.f32 %v13460_v47, %v3651_v48  ;;  %v3846_v38 = vadd.f32 %v13466_v37, %v3656_v1  ;;  %v3671_v48 = vadd.f32 %v13569_v24, %v13594_v27 }
 0x892   :  { %v3939_v8 = vmax.f32 %v3816_v15, 0.0  ;;  %v3942_v36 = vmax.f32 %v3831_v49, 0.0 }
 0x893   :  { %v13587_v25 = vpop.f32.mrf.mxu0  ;;  %v3821_v43 = vadd.f32 %v13433_v45, %v3631_v58  ;;  %v3836_v45 = vadd.f32 %v13453_v42, %v3646_v34  ;;  %v13612_v58 = vld [vmem:[#allocation5 + $0x8b0] sm:$0xff]  ;;  %v3666_v34 = vadd.f32 %v13567_v54, %v13594_v27 }
 0x895   :  { %v3692_v26 = vpop.f32.mrf.mxu0  ;;  %v3940_v33 = vmax.f32 %v3821_v43, 0.0  ;;  %v3943_v42 = vmax.f32 %v3836_v45, 0.0  ;;  %v3944_v43 = vmax.f32 %v3841_v31, 0.0  ;;  %v13652_v45 = vld [vmem:[#allocation5 + $0x8c8] sm:$0xff]  ;;  %v3856_v24 = vadd.f32 %v13480_v5, %v3666_v34 }
 0x896   :  { %v3826_v26 = vadd.f32 %v13440_v9, %v3636_v11  ;;  %v3661_v9 = vadd.f32 %v3660_v6, %v13594_v27  ;;  %v13634_v6 = vld [vmem:[#allocation5 + $0x8c0] sm:$0xff]  ;;  %v3861_v5 = vadd.f32 %v13486_v12, %v3671_v48 }
 0x897   :  { %v13615_v11 = vmul.f32 %v13612_v58, %v3940_v33  ;;  %v13637_v52 = vmul.f32 %v13634_v6, %v3942_v36  ;;  %v13655_v54 = vmul.f32 %v13652_v45, %v3943_v42  ;;  %v13668_v42 = vmul.f32 %v13665_v59, %v3944_v43 }
 0x899   :  { %v4047_v47 = vmul.f32 %v13615_v11, %v13615_v11  ;;  %v4049_v31 = vmul.f32 %v13637_v52, %v13637_v52  ;;  %v3994_v34 = vsel %vm2599_vm10, %v13637_v52, 0.0  ;;  %v3996_v12 = vsel %vm2599_vm10, %v13655_v54, 0.0 }
 0x89a   :  { %v13597_v18 = vpop.f32.mrf.mxu0  ;;  %v4051_v48 = vmul.f32 %v13668_v42, %v13668_v42 }
 0x89b   :  { %v4072_v36 = vsel %vm2599_vm10, %v4047_v47, 0.0 }
 0x89c   :  { %v3697_v0 = vpop.f32.mrf.mxu0 }
 0x89d   :  { %v3941_v0 = vmax.f32 %v3826_v26, 0.0  ;;  %v3851_v26 = vadd.f32 %v13473_v32, %v3661_v9  ;;  %v3945_v32 = vmax.f32 %v3846_v38, 0.0 }
 0x89f   :  { %v13605_v56 = vpop.f32.mrf.mxu0  ;;  %v13629_v17 = vmul.f32 %v13626_v51, %v3941_v0  ;;  %v3990_v0 = vsel %vm2599_vm10, %v13615_v11, 0.0  ;;  %v3946_v38 = vmax.f32 %v3851_v26, 0.0  ;;  %v13682_v43 = vmul.f32 %v13679_v41, %v3945_v32 }
 0x8a0   :  { %v3866_v32 = vadd.f32 %v13493_v60, %v3676_v61  ;;  %v13707_v60 = vld [vmem:[#allocation5 + $0x8e8] sm:$0xff] }
 0x8a1   :  { %v3702_v10 = vpop.f32.mrf.mxu0  ;;  %v4048_v37 = vmul.f32 %v13629_v17, %v13629_v17 }
 0x8a2   :  { %v13621_v10 = vld [vmem:[#allocation5 + $0x8a8] sm:$0xff] }
 0x8a3   :  { %v13624_v15 = vmul.f32 %v13621_v10, %v3939_v8  ;;  %v4074_v7 = vsel %vm2599_vm10, %v4048_v37, 0.0  ;;  %v4076_v37 = vsel %vm2599_vm10, %v4049_v31, 0.0  ;;  %v3686_v31 = vadd.f32 %v13575_v2, %v13594_v27 }
 0x8a5   :  { %v4046_v33 = vmul.f32 %v13624_v15, %v13624_v15  ;;  %v3989_v1 = vsel %vm2599_vm10, %v13624_v15, 0.0 }
 0x8a6   :  { %v13619_v39 = vpop.f32.mrf.mxu0  ;;  %v3991_v29 = vadd.f32 %v3990_v0, %v3989_v1  ;;  %v3947_v0 = vmax.f32 %v3856_v24, 0.0  ;;  %v13691_v1 = vld [vmem:[#allocation5 + $0x8e0] sm:$0xff] }
 0x8a7   :  { %v4071_v47 = vsel %vm2599_vm10, %v4046_v33, 0.0  ;;  %16130 = vst [vmem:[#allocation40_spill] sm:$0xff] %v13691_v1  ;;  %v13694_v13 = vmul.f32 %v13691_v1, %v3946_v38  ;;  %v3691_v38 = vadd.f32 %v13587_v25, %v13594_v27  ;;  %v3696_v25 = vadd.f32 %v13597_v18, %v13594_v27 }
 0x8a8   :  { %v3707_v49 = vpop.f32.mrf.mxu0  ;;  %v4073_v26 = vadd.f32 %v4072_v36, %v4071_v47  ;;  %v3871_v47 = vadd.f32 %v13500_v62, %v3681_v3  ;;  %v13710_v2 = vmul.f32 %v13707_v60, %v3947_v0  ;;  %v3949_v62 = vmax.f32 %v3866_v32, 0.0  ;;  %v13719_v3 = vld [vmem:[#allocation5 + $0x8f0] sm:$0xff] }
 0x8a9   :  { %v3992_v49 = vsel %vm2599_vm10, %v13629_v17, 0.0  ;;  %v3701_v18 = vadd.f32 %v13605_v56, %v13594_v27  ;;  %v3706_v56 = vadd.f32 %v13619_v39, %v13594_v27 }
 0x8aa   :  { %v3993_v33 = vadd.f32 %v3992_v49, %v3991_v29  ;;  %v4075_v22 = vadd.f32 %v4074_v7, %v4073_v26  ;;  %v3948_v29 = vmax.f32 %v3861_v5, 0.0  ;;  %v4052_v49 = vmul.f32 %v13682_v43, %v13682_v43 }
 0x8ab   :  { %v13648_v8 = vpop.f32.mrf.mxu0  ;;  %v3998_v7 = vsel %vm2599_vm10, %v13668_v42, 0.0  ;;  %v4080_v5 = vsel %vm2599_vm10, %v4051_v48, 0.0  ;;  %v3881_v48 = vadd.f32 %v13513_v44, %v3691_v38  ;;  %v3886_v44 = vadd.f32 %v13520_v40, %v3696_v25 }
 0x8ac   :  { %v3995_v36 = vadd.f32 %v3994_v34, %v3993_v33  ;;  %v4077_v1 = vadd.f32 %v4076_v37, %v4075_v22  ;;  %v4053_v34 = vmul.f32 %v13694_v13, %v13694_v13  ;;  %v13722_v26 = vmul.f32 %v13719_v3, %v3948_v29 }
 0x8ad   :  { %v3712_v9 = vpop.f32.mrf.mxu0  ;;  %v3876_v33 = vadd.f32 %v13506_v63, %v3686_v31  ;;  %v4082_v0 = vsel %vm2599_vm10, %v4052_v49, 0.0  ;;  %v4002_v22 = vsel %vm2599_vm10, %v13694_v13, 0.0  ;;  %v13734_v31 = vld [vmem:[#allocation5 + $0x8f8] sm:$0xff]  ;;  %v3891_v40 = vadd.f32 %v13526_v16, %v3701_v18  ;;  %v13761_v18 = vld [vmem:[#allocation5 + $0x908] sm:$0xff] }
 0x8ae   :  { %v4050_v9 = vmul.f32 %v13655_v54, %v13655_v54  ;;  %v3997_v61 = vadd.f32 %v3996_v12, %v3995_v36  ;;  %v3950_v12 = vmax.f32 %v3871_v47, 0.0  ;;  %v4054_v36 = vmul.f32 %v13710_v2, %v13710_v2 }
 0x8af   :  { %v4084_v63 = vsel %vm2599_vm10, %v4053_v34, 0.0  ;;  %v4055_v38 = vmul.f32 %v13722_v26, %v13722_v26 }
 0x8b0   :  { %v4078_v24 = vsel %vm2599_vm10, %v4050_v9, 0.0  ;;  %v4000_v9 = vsel %vm2599_vm10, %v13682_v43, 0.0  ;;  %v4086_v39 = vsel %vm2599_vm10, %v4054_v36, 0.0 }
 0x8b1   :  { %v4088_v16 = vsel %vm2599_vm10, %v4055_v38, 0.0 }
 0x8b2   :  { %v3715_v30 = vpop.f32.mrf.mxu0 }
 0x8b4   :  { %v3717_v19 = vpop.f32.mrf.mxu0 }
 0x8b5   :  { %v4079_v19 = vadd.f32 %v4078_v24, %v4077_v1  ;;  %v3999_v1 = vadd.f32 %v3998_v7, %v3997_v61  ;;  %v13737_v24 = vmul.f32 %v13734_v31, %v3949_v62  ;;  %v3951_v61 = vmax.f32 %v3876_v33, 0.0 }
 0x8b6   :  { %v4004_v7 = vsel %vm2599_vm10, %v13710_v2, 0.0  ;;  %v3952_v62 = vmax.f32 %v3881_v48, 0.0  ;;  %v4006_v33 = vsel %vm2599_vm10, %v13722_v26, 0.0 }
 0x8b7   :  { %v3720_v37 = vpop.f32.mrf.mxu0  ;;  %v4081_v32 = vadd.f32 %v4080_v5, %v4079_v19  ;;  %v4001_v49 = vadd.f32 %v4000_v9, %v3999_v1  ;;  %v13746_v5 = vld [vmem:[#allocation5 + $0x900] sm:$0xff]  ;;  %v3711_v9 = vadd.f32 %v13648_v8, %v13594_v27  ;;  %v3953_v1 = vmax.f32 %v3886_v44, 0.0 }
 0x8b8   :  { %v13749_v34 = vmul.f32 %v13746_v5, %v3950_v12  ;;  %v3896_v12 = vadd.f32 %v13533_v53, %v3706_v56  ;;  %v3716_v8 = vadd.f32 %v3715_v30, %v13594_v27  ;;  %v3954_v53 = vmax.f32 %v3891_v40, 0.0 }
 0x8b9   :  { %v3722_v29 = vpop.f32.mrf.mxu0  ;;  %v4083_v47 = vadd.f32 %v4082_v0, %v4081_v32  ;;  %v4003_v25 = vadd.f32 %v4002_v22, %v4001_v49  ;;  %v4056_v0 = vmul.f32 %v13737_v24, %v13737_v24  ;;  %v13764_v22 = vmul.f32 %v13761_v18, %v3951_v61 }
 0x8ba   :  { %v4057_v29 = vmul.f32 %v13749_v34, %v13749_v34  ;;  %v3901_v38 = vadd.f32 %v13540_v21, %v3711_v9  ;;  %v3721_v61 = vadd.f32 %v3720_v37, %v13594_v27  ;;  %v4010_v40 = vsel %vm2599_vm10, %v13749_v34, 0.0 }
 0x8bb   :  { %v4085_v19 = vadd.f32 %v4084_v63, %v4083_v47  ;;  %v4005_v48 = vadd.f32 %v4004_v7, %v4003_v25  ;;  %v13769_v63 = vld [vmem:[#allocation5 + $0x910] sm:$0xff]  ;;  %v4008_v47 = vsel %vm2599_vm10, %v13737_v24, 0.0  ;;  %v4090_v7 = vsel %vm2599_vm10, %v4056_v0, 0.0  ;;  %v13779_v25 = vld [vmem:[#allocation5 + $0x918] sm:$0xff] }
 0x8bc   :  { %v13772_v44 = vmul.f32 %v13769_v63, %v3952_v62  ;;  %16131 = vst [vmem:[#allocation41_spill] sm:$0xff] %v13779_v25  ;;  %v3955_v62 = vmax.f32 %v3896_v12, 0.0  ;;  %v4092_v0 = vsel %vm2599_vm10, %v4057_v29, 0.0 }
 0x8bd   :  { %v4087_v36 = vadd.f32 %v4086_v39, %v4085_v19  ;;  %v4007_v49 = vadd.f32 %v4006_v33, %v4005_v48  ;;  %v13782_v19 = vmul.f32 %v13779_v25, %v3953_v1  ;;  %v4058_v39 = vmul.f32 %v13764_v22, %v13764_v22  ;;  %v13793_v1 = vld [vmem:[#allocation5 + $0x920] sm:$0xff] }
 0x8be   :  { %v3725_v32 = vpop.f32.mrf.mxu0  ;;  %v3906_v33 = vadd.f32 %v13546_v14, %v3716_v8  ;;  %v4059_v48 = vmul.f32 %v13772_v44, %v13772_v44  ;;  %16132 = vst [vmem:[#allocation42_spill] sm:$0xff] %v13793_v1  ;;  %v13796_v12 = vmul.f32 %v13793_v1, %v3954_v53  ;;  %v3911_v14 = vadd.f32 %v13554_v35, %v3721_v61 }
 0x8bf   :  { %v4089_v30 = vadd.f32 %v4088_v16, %v4087_v36  ;;  %v3726_v21 = vadd.f32 %v3725_v32, %v13594_v27  ;;  %v4009_v9 = vadd.f32 %v4008_v47, %v4007_v49  ;;  %v4012_v16 = vsel %vm2599_vm10, %v13764_v22, 0.0  ;;  %v13804_v47 = vld [vmem:[#allocation5 + $0x928] sm:$0xff] }
 0x8c0   :  { %v3727_v56 = vpop.f32.mrf.mxu0  ;;  %v3956_v36 = vmax.f32 %v3901_v38, 0.0  ;;  %v4060_v29 = vmul.f32 %v13782_v19, %v13782_v19  ;;  %v13807_v25 = vmul.f32 %v13804_v47, %v3955_v62  ;;  %v4094_v53 = vsel %vm2599_vm10, %v4058_v39, 0.0  ;;  %v13818_v62 = vld [vmem:[#allocation5 + $0x930] sm:$0xff] }
 0x8c1   :  { %v4091_v56 = vadd.f32 %v4090_v7, %v4089_v30  ;;  %v4011_v49 = vadd.f32 %v4010_v40, %v4009_v9  ;;  %v4014_v38 = vsel %vm2599_vm10, %v13772_v44, 0.0  ;;  %v3957_v1 = vmax.f32 %v3906_v33, 0.0  ;;  %16133 = vst [vmem:[#allocation43_spill] sm:$0xff] %v13818_v62 }
 0x8c2   :  { %v3916_v35 = vadd.f32 %v13557_v57, %v3726_v21  ;;  %v4096_v30 = vsel %vm2599_vm10, %v4059_v48, 0.0  ;;  %v4061_v7 = vmul.f32 %v13796_v12, %v13796_v12  ;;  %v4016_v40 = vsel %vm2599_vm10, %v13782_v19, 0.0 }
 0x8c3   :  { %v3730_v37 = vpop.f32.mrf.mxu0  ;;  %v4093_v61 = vadd.f32 %v4092_v0, %v4091_v56  ;;  %v13821_v39 = vmul.f32 %v13818_v62, %v3956_v36  ;;  %v3958_v9 = vmax.f32 %v3911_v14, 0.0  ;;  %v4098_v21 = vsel %vm2599_vm10, %v4060_v29, 0.0  ;;  %v13829_v56 = vld [vmem:[#allocation5 + $0x938] sm:$0xff] }
 0x8c4   :  { %v3731_v32 = vadd.f32 %v3730_v37, %v13594_v27  ;;  %v4013_v37 = vadd.f32 %v4012_v16, %v4011_v49  ;;  %v4062_v0 = vmul.f32 %v13807_v25, %v13807_v25  ;;  %v4018_v16 = vsel %vm2599_vm10, %v13796_v12, 0.0  ;;  %16134 = vst [vmem:[#allocation44_spill] sm:$0xff] %v13829_v56 }
 0x8c5   :  { %v3732_v8 = vpop.f32.mrf.mxu0  ;;  %v13832_v49 = vmul.f32 %v13829_v56, %v3957_v1  ;;  %v3959_v36 = vmax.f32 %v3916_v35, 0.0  ;;  %v4020_v29 = vsel %vm2599_vm10, %v13807_v25, 0.0 }
 0x8c6   :  { %v3921_v33 = vadd.f32 %v13559_v50, %v3731_v32  ;;  %v4095_v8 = vadd.f32 %v4094_v53, %v4093_v61  ;;  %v4015_v57 = vadd.f32 %v4014_v38, %v4013_v37  ;;  %v4100_v53 = vsel %vm2599_vm10, %v4061_v7, 0.0  ;;  %v13840_v37 = vld [vmem:[#allocation5 + $0x940] sm:$0xff] }
 0x8c7   :  { %v4063_v61 = vmul.f32 %v13821_v39, %v13821_v39  ;;  %16135 = vst [vmem:[#allocation45_spill] sm:$0xff] %v13840_v37  ;;  %v13843_v62 = vmul.f32 %v13840_v37, %v3958_v9  ;;  %v4022_v7 = vsel %vm2599_vm10, %v13821_v39, 0.0 }
 0x8c8   :  { %v4097_v50 = vadd.f32 %v4096_v30, %v4095_v8  ;;  %v4017_v32 = vadd.f32 %v4016_v40, %v4015_v57  ;;  %v3960_v1 = vmax.f32 %v3921_v33, 0.0  ;;  %v4102_v40 = vsel %vm2599_vm10, %v4062_v0, 0.0  ;;  %v13851_v57 = vld [vmem:[#allocation5 + $0x948] sm:$0xff] }
 0x8c9   :  { %v4064_v8 = vmul.f32 %v13832_v49, %v13832_v49  ;;  %16136 = vst [vmem:[#allocation46_spill] sm:$0xff] %v13851_v57  ;;  %v4104_v0 = vsel %vm2599_vm10, %v4063_v61, 0.0  ;;  %v2576_v61 = vld [vmem:[#allocation5 + $0x190] sm:$0xff] }
 0x8ca   :  { %v3735_v48 = vpop.f32.mrf.mxu0  ;;  %v4019_v30 = vadd.f32 %v4018_v16, %v4017_v32  ;;  %v4024_v16 = vsel %vm2599_vm10, %v13832_v49, 0.0 }
 0x8cb   :  { %v3736_v14 = vadd.f32 %v3735_v48, %v13594_v27  ;;  %v4099_v48 = vadd.f32 %v4098_v21, %v4097_v50  ;;  %v2577_v21 = vld [vmem:[#allocation5 + $0x198] sm:$0xff]  ;;  %v13862_v50 = vld [vmem:[#allocation5 + $0x950] sm:$0xff] }
 0x8cc   :  { %v3737_v38 = vpop.f32.mrf.mxu0  ;;  %v4021_v56 = vadd.f32 %v4020_v29, %v4019_v30  ;;  %5223 = vmatpush1.msra.mxu0 %v2577_v21 }
 0x8cd   :  { %v3926_v35 = vadd.f32 %v13561_v55, %v3736_v14  ;;  %v13854_v38 = vmul.f32 %v13851_v57, %v3959_v36  ;;  %v4101_v33 = vadd.f32 %v4100_v53, %v4099_v48  ;;  %v4065_v14 = vmul.f32 %v13843_v62, %v13843_v62  ;;  %5224 = vmatprep.subr.mxu0 %v13577_v20  ;;  %v13874_v57 = vld [vmem:[#allocation5 + $0x958] sm:$0xff] }
 0x8ce   :  { %v13865_v36 = vmul.f32 %v13862_v50, %v3960_v1  ;;  %v4023_v29 = vadd.f32 %v4022_v7, %v4021_v56  ;;  %v4026_v48 = vsel %vm2599_vm10, %v13843_v62, 0.0  ;;  %16137 = vst [vmem:[#allocation47_spill] sm:$0xff] %v13874_v57  ;;  %5225 = vmatpush1.msra.mxu0 %v2576_v61  ;;  %v2575_v7 = vld [vmem:[#allocation5 + $0x188] sm:$0xff] }
 0x8cf   :  { %v3961_v9 = vmax.f32 %v3926_v35, 0.0  ;;  %v3740_v37 = vpop.f32.mrf.mxu0  ;;  %v4103_v53 = vadd.f32 %v4102_v40, %v4101_v33  ;;  %v4106_v35 = vsel %vm2599_vm10, %v4064_v8, 0.0  ;;  %v4066_v30 = vmul.f32 %v13854_v38, %v13854_v38  ;;  %5226 = vmatprep.subr.mxu0 %v13577_v20 }
 0x8d0   :  { %v3741_v55 = vadd.f32 %v3740_v37, %v13594_v27  ;;  %v4025_v40 = vadd.f32 %v4024_v16, %v4023_v29  ;;  %v4108_v8 = vsel %vm2599_vm10, %v4065_v14, 0.0  ;;  %v4028_v33 = vsel %vm2599_vm10, %v13854_v38, 0.0  ;;  %5227 = vmatpush1.msra.mxu0 %v2575_v7 }
 0x8d1   :  { %v3742_v32 = vpop.f32.mrf.mxu0  ;;  %v13877_v1 = vmul.f32 %v13874_v57, %v3961_v9  ;;  %v4105_v56 = vadd.f32 %v4104_v0, %v4103_v53  ;;  %v13885_v9 = vld [vmem:[#allocation5 + $0x960] sm:$0xff]  ;;  %5228 = vmatprep.subr.mxu0 %v13577_v20  ;;  %v4110_v14 = vsel %vm2599_vm10, %v4066_v30, 0.0  ;;  %v4030_v29 = vsel %vm2599_vm10, %v13865_v36, 0.0 }
 0x8d2   :  { %v3931_v37 = vadd.f32 %v13563_v4, %v3741_v55  ;;  %v4067_v55 = vmul.f32 %v13865_v36, %v13865_v36  ;;  %v4027_v32 = vadd.f32 %v4026_v48, %v4025_v40  ;;  %16138 = vst [vmem:[#allocation48_spill] sm:$0xff] %v13885_v9  ;;  %v2574_v53 = vld [vmem:[#allocation5 + $0x180] sm:$0xff]  ;;  %v2573_v40 = vld [vmem:[#allocation5 + $0x178] sm:$0xff] }
 0x8d3   :  { %v4107_v21 = vadd.f32 %v4106_v35, %v4105_v56  ;;  %5229 = vmatpush1.msra.mxu0 %v2574_v53  ;;  %v4032_v30 = vsel %vm2599_vm10, %v13877_v1, 0.0  ;;  %v2571_v53 = vld [vmem:[#allocation5 + $0x168] sm:$0xff] }
 0x8d4   :  { %v3962_v4 = vmax.f32 %v3931_v37, 0.0  ;;  %v4068_v37 = vmul.f32 %v13877_v1, %v13877_v1  ;;  %v4029_v48 = vadd.f32 %v4028_v33, %v4027_v32  ;;  %5230 = vmatprep.subr.mxu0 %v13577_v20 }
 0x8d5   :  { %v4109_v35 = vadd.f32 %v4108_v8, %v4107_v21  ;;  %5231 = vmatpush1.msra.mxu0 %v2573_v40  ;;  %v2572_v8 = vld [vmem:[#allocation5 + $0x170] sm:$0xff]  ;;  %v2569_v40 = vld [vmem:[#allocation5 + $0x158] sm:$0xff] }
 0x8d6   :  { %v13888_v0 = vmul.f32 %v13885_v9, %v3962_v4  ;;  %v3745_v16 = vpop.f32.mrf.mxu0  ;;  %v4112_v4 = vsel %vm2599_vm10, %v4067_v55, 0.0  ;;  %5232 = vmatprep.subr.mxu0 %v13577_v20  ;;  %v4114_v33 = vsel %vm2599_vm10, %v4068_v37, 0.0 }
 0x8d7   :  { %v3746_v61 = vadd.f32 %v3745_v16, %v13594_v27  ;;  %v4111_v57 = vadd.f32 %v4110_v14, %v4109_v35  ;;  %v4031_v27 = vadd.f32 %v4030_v29, %v4029_v48  ;;  %5233 = vmatpush1.msra.mxu0 %v2572_v8  ;;  %v2570_v35 = vld [vmem:[#allocation5 + $0x160] sm:$0xff] }
 0x8d8   :  { %v3747_v56 = vpop.f32.mrf.mxu0  ;;  %v4069_v7 = vmul.f32 %v13888_v0, %v13888_v0  ;;  %v4034_v21 = vsel %vm2599_vm10, %v13888_v0, 0.0  ;;  %5234 = vmatprep.subr.mxu0 %v13577_v20 }
 0x8d9   :  { %v3936_v9 = vadd.f32 %v13565_v46, %v3746_v61  ;;  %v4113_v32 = vadd.f32 %v4112_v4, %v4111_v57  ;;  %v4033_v16 = vadd.f32 %v4032_v30, %v4031_v27  ;;  %v13910_v61 = vld [vmem:[#allocation5 + $0x968] sm:$0xff]  ;;  %5235 = vmatpush1.msra.mxu0 %v2571_v53  ;;  %v2568_v27 = vld [vmem:[#allocation5 + $0x150] sm:$0xff] }
 0x8da   :  { %v4116_v46 = vsel %vm2599_vm10, %v4069_v7, 0.0  ;;  %5236 = vmatprep.subr.mxu0 %v13577_v20 }
 0x8db   :  { %v3963_v55 = vmax.f32 %v3936_v9, 0.0  ;;  %v4115_v29 = vadd.f32 %v4114_v33, %v4113_v32  ;;  %v4035_v37 = vadd.f32 %v4034_v21, %v4033_v16  ;;  %5237 = vmatpush1.msra.mxu0 %v2570_v35  ;;  %v2567_v21 = vld [vmem:[#allocation5 + $0x148] sm:$0xff]  ;;  %v2566_v16 = vld [vmem:[#allocation5 + $0x140] sm:$0xff] }
 0x8dc   :  { %5238 = vmatprep.subr.mxu0 %v13577_v20 }
 0x8dd   :  { %v13913_v14 = vmul.f32 %v13910_v61, %v3963_v55  ;;  %v4117_v56 = vadd.f32 %v4116_v46, %v4115_v29  ;;  %5239 = vmatpush1.msra.mxu0 %v2569_v40  ;;  %v2565_v29 = vld [vmem:[#allocation5 + $0x138] sm:$0xff] }
 0x8de   :  { %5240 = vmatprep.subr.mxu0 %v13577_v20 }
 0x8df   :  { %v4036_v57 = vsel %vm2599_vm10, %v13913_v14, 0.0  ;;  %v4070_v9 = vmul.f32 %v13913_v14, %v13913_v14  ;;  %5241 = vmatpush1.msra.mxu0 %v2568_v27 }
 0x8e0   :  { %v4037_v48 = vadd.f32 %v4036_v57, %v4035_v37  ;;  %5242 = vmatprep.subr.mxu0 %v13577_v20  ;;  %v2564_v57 = vld [vmem:[#allocation5 + $0x130] sm:$0xff] }
 0x8e1   :  { %v4118_v4 = vsel %vm2599_vm10, %v4070_v9, 0.0  ;;  %5243 = vmatpush1.msra.mxu0 %v2567_v21  ;;  %v2592_v21 = vld [vmem:[#allocation5 + $0x210] sm:$0xff] }
 0x8e2   :  { %v4038_v30 = vrot.slane %v4037_v48, 4  ;;  %v4119_v7 = vadd.f32 %v4118_v4, %v4117_v56  ;;  %5244 = vmatprep.subr.mxu0 %v13577_v20  ;;  %v2563_v56 = vld [vmem:[#allocation5 + $0x128] sm:$0xff] }
 0x8e3   :  { %5245 = vmatpush1.msra.mxu0 %v2566_v16  ;;  %v2590_v16 = vld [vmem:[#allocation5 + $0x200] sm:$0xff] }
 0x8e4   :  { %v4039_v8 = vadd.f32 %v4038_v30, %v4037_v48  ;;  %v4120_v33 = vrot.slane %v4119_v7, 4  ;;  %5246 = vmatprep.subr.mxu0 %v13577_v20  ;;  %v2562_v30 = vld [vmem:[#allocation5 + $0x120] sm:$0xff] }
 0x8e5   :  { %5247 = vmatpush1.msra.mxu0 %v2565_v29  ;;  %v16103_v29 = vsub.s32 2, %v13580_v23 }
 0x8e6   :  { %v4040_v55 = vrot.slane %v4039_v8, 2  ;;  %v4121_v32 = vadd.f32 %v4120_v33, %v4119_v7  ;;  %5248 = vmatprep.subr.mxu0 %v13577_v20 }
 0x8e7   :  { %5249 = vmatpush1.msra.mxu0 %v2564_v57 }
 0x8e8   :  { %v4041_v53 = vadd.f32 %v4040_v55, %v4039_v8  ;;  %v4122_v46 = vrot.slane %v4121_v32, 2  ;;  %5250 = vmatprep.subr.mxu0 %v13577_v20  ;;  %v2593_v8 = vld [vmem:[#allocation5 + $0x218] sm:$0xff]  ;;  %v2591_v55 = vld [vmem:[#allocation5 + $0x208] sm:$0xff] }
 0x8e9   :  { %5251 = vmatpush1.msra.mxu0 %v2563_v56  ;;  %v2586_v56 = vld [vmem:[#allocation5 + $0x1e0] sm:$0xff] }
 0x8ea   :  { %v4042_v37 = vrot.slane %v4041_v53, 1  ;;  %v4123_v35 = vadd.f32 %v4122_v46, %v4121_v32  ;;  %5252 = vmatprep.subr.mxu0 %v13577_v20  ;;  %v13939_v46 = vsub.s32 1, %v13580_v23 }
 0x8eb   :  { %5253 = vmatpush1.msra.mxu0 %v2562_v30 }
 0x8ec   :  { %v4043_v9 = vadd.f32 %v4042_v37, %v4041_v53  ;;  %v4124_v48 = vrot.slane %v4123_v35, 1  ;;  %5254 = vmatprep.subr.mxu0 %v13577_v20  ;;  %v2589_v53 = vld [vmem:[#allocation5 + $0x1f8] sm:$0xff]  ;;  %v2588_v37 = vld [vmem:[#allocation5 + $0x1f0] sm:$0xff] }
 0x8ed   :  { %5255 = vmatpush2.msra.mxu0 %v2593_v8 }
 0x8ee   :  { %v13928_v40 = vmul.f32 0.0078125, %v4043_v9  ;;  %v4125_v4 = vadd.f32 %v4124_v48, %v4123_v35  ;;  %5256 = vmatprep.subr.mxu0 %v13577_v20  ;;  %v2587_v35 = vld [vmem:[#allocation5 + $0x1e8] sm:$0xff]  ;;  %v13948_v9 = vrot.slane %v13589_v28, %v13939_v46  ;;  %v13953_v48 = vrot.slane %v13589_v28, %v16103_v29 }
 0x8ef   :  { %5257 = vmatpush2.msra.mxu0 %v2592_v21 }
 0x8f0   :  { %v4126_v7 = vmul.f32 0.0078125, %v4125_v4  ;;  %v4127_v27 = vmul.f32 %v13928_v40, %v13928_v40  ;;  %5258 = vmatprep.subr.mxu0 %v13577_v20  ;;  %v4153_v57 = vsub.f32 %v13913_v14, %v13928_v40  ;;  %v2585_v4 = vld [vmem:[#allocation5 + $0x1d8] sm:$0xff]  ;;  %v4130_v30 = vsub.f32 %v13615_v11, %v13928_v40 }
 0x8f1   :  { %5259 = vmatpush2.msra.mxu0 %v2591_v55  ;;  %v4129_v14 = vsub.f32 %v13624_v15, %v13928_v40  ;;  %v4133_v28 = vsub.f32 %v13655_v54, %v13928_v40  ;;  %v4134_v8 = vsub.f32 %v13668_v42, %v13928_v40  ;;  %v4136_v11 = vsub.f32 %v13694_v13, %v13928_v40 }
 0x8f2   :  { %v4128_v33 = vsub.f32 %v4126_v7, %v4127_v27  ;;  %5260 = vmatprep.subr.mxu0 %v13577_v20  ;;  %v4131_v7 = vsub.f32 %v13629_v17, %v13928_v40  ;;  %v4132_v27 = vsub.f32 %v13637_v52, %v13928_v40  ;;  %v4137_v15 = vsub.f32 %v13710_v2, %v13928_v40 }
 0x8f3   :  { %5261 = vmatpush2.msra.mxu0 %v2590_v16  ;;  %v4138_v17 = vsub.f32 %v13722_v26, %v13928_v40  ;;  %v4139_v52 = vsub.f32 %v13737_v24, %v13928_v40  ;;  %v4140_v54 = vsub.f32 %v13749_v34, %v13928_v40  ;;  %v2583_v16 = vld [vmem:[#allocation5 + $0x1c8] sm:$0xff]  ;;  %v16140_v2 = vsub.f32 %v13772_v44, %v13928_v40 }
 0x8f4   :  { %v4154_v32 = vadd.f32 1e-05, %v4128_v33  ;;  %5262 = vmatprep.subr.mxu0 %v13577_v20  ;;  %v4135_v33 = vsub.f32 %v13682_v43, %v13928_v40  ;;  %v16141_v24 = vsub.f32 %v13782_v19, %v13928_v40 }
 0x8f5   :  { %5263 = vmatpush2.msra.mxu0 %v2589_v53 }
 0x8f6   :  { %11671 = vrsqrt.f32 %v4154_v32  ;;  %5264 = vmatprep.subr.mxu0 %v13577_v20  ;;  %v2584_v32 = vld [vmem:[#allocation5 + $0x1d0] sm:$0xff] }
 0x8f7   :  { %5265 = vmatpush2.msra.mxu0 %v2588_v37 }
 0x8f8   :  { %5266 = vmatprep.subr.mxu0 %v13577_v20 }
 0x8f9   :  { %5267 = vmatpush2.msra.mxu0 %v2587_v35 }
 0x8fa   :  { %5268 = vmatprep.subr.mxu0 %v13577_v20 }
 0x8fb   :  { %5269 = vmatpush2.msra.mxu0 %v2586_v56 }
 0x8fc   :  { %5270 = vmatprep.subr.mxu0 %v13577_v20 }
 0x8fd   :  { %5271 = vmatpush2.msra.mxu0 %v2585_v4  ;;  %v4148_v4 = vsub.f32 %v13843_v62, %v13928_v40 }
 0x8fe   :  { %5272 = vmatprep.subr.mxu0 %v13577_v20 }
 0x8ff   :  { %5273 = vmatpush2.msra.mxu0 %v2584_v32 }
 0x900   :  { %5274 = vmatprep.subr.mxu0 %v13577_v20 }
 0x901   :  { %5275 = vmatpush2.msra.mxu0 %v2583_v16 }
 0x902   :  { %5276 = vmatprep.subr.mxu0 %v13577_v20 }
 0x903   :  { %v13990_v53 = vpop.eup %11671 }
 0x904   :  { %v4180_v29 = vmul.f32 %v13990_v53, %v4153_v57  ;;  %v4157_v55 = vmul.f32 %v13990_v53, %v4130_v30  ;;  %v4158_v21 = vmul.f32 %v13990_v53, %v4131_v7  ;;  %v4156_v43 = vmul.f32 %v13990_v53, %v4129_v14  ;;  %v2582_v14 = vld [vmem:[#allocation5 + $0x1c0] sm:$0xff] }
 0x905   :  { %v4159_v37 = vmul.f32 %v13990_v53, %v4132_v27  ;;  %v4160_v35 = vmul.f32 %v13990_v53, %v4133_v28  ;;  %v4161_v56 = vmul.f32 %v13990_v53, %v4134_v8  ;;  %v4162_v42 = vmul.f32 %v13990_v53, %v4135_v33  ;;  %5277 = vmatpush2.msra.mxu0 %v2582_v14 }
 0x906   :  { %v4209_v32 = vmul.f32 %v13948_v9, %v4180_v29  ;;  %v4186_v57 = vmul.f32 %v13948_v9, %v4157_v55  ;;  %v4187_v30 = vmul.f32 %v13948_v9, %v4158_v21  ;;  %v4185_v7 = vmul.f32 %v13948_v9, %v4156_v43  ;;  %5278 = vmatprep.subr.mxu0 %v13577_v20 }
 0x907   :  { %v4188_v27 = vmul.f32 %v13948_v9, %v4159_v37  ;;  %v4189_v28 = vmul.f32 %v13948_v9, %v4160_v35  ;;  %v4190_v8 = vmul.f32 %v13948_v9, %v4161_v56  ;;  %v4191_v33 = vmul.f32 %v13948_v9, %v4162_v42 }
 0x908   :  { %v4238_v29 = vadd.f32 %v13953_v48, %v4209_v32  ;;  %v4215_v55 = vadd.f32 %v13953_v48, %v4186_v57  ;;  %v4216_v21 = vadd.f32 %v13953_v48, %v4187_v30  ;;  %v4214_v43 = vadd.f32 %v13953_v48, %v4185_v7 }
 0x909   :  { %v4217_v16 = vadd.f32 %v13953_v48, %v4188_v27  ;;  %v4218_v37 = vadd.f32 %v13953_v48, %v4189_v28  ;;  %v4219_v35 = vadd.f32 %v13953_v48, %v4190_v8  ;;  %v4220_v56 = vadd.f32 %v13953_v48, %v4191_v33  ;;  %v2580_v28 = vld [vmem:[#allocation5 + $0x1b0] sm:$0xff]  ;;  %v2579_v8 = vld [vmem:[#allocation5 + $0x1a8] sm:$0xff]  ;;  %v2578_v33 = vld [vmem:[#allocation5 + $0x1a0] sm:$0xff] }
 0x90a   :  { %v14028_v42 = vmul.f32 %v13910_v61, %v4238_v29  ;;  %v14031_v32 = vmul.f32 %v13612_v58, %v4215_v55  ;;  %v14034_v57 = vmul.f32 %v13626_v51, %v4216_v21  ;;  %v14037_v30 = vmul.f32 %v13621_v10, %v4214_v43  ;;  %v2581_v58 = vld [vmem:[#allocation5 + $0x1b8] sm:$0xff] }
 0x90b   :  { %v14040_v7 = vmul.f32 %v13634_v6, %v4217_v16  ;;  %v14043_v14 = vmul.f32 %v13652_v45, %v4218_v37  ;;  %v14046_v27 = vmul.f32 %v13665_v59, %v4219_v35  ;;  %v14049_v61 = vmul.f32 %v13679_v41, %v4220_v56  ;;  %5279 = vmatpush2.msra.mxu0 %v2581_v58  ;;  %v4339_v16 = vld [vmem:[#allocation3 + $0x7] sm:$0xff] }
 0x90c   :  { %4288 = vst.msk [vmem:[#allocation3 + $0xd0] sm:$0xff] %vm2599_vm10, %v14028_v42  ;;  %4265 = vst.msk [vmem:[#allocation3 + $0x18] sm:$0xff] %vm2599_vm10, %v14031_v32  ;;  %v4163_v41 = vmul.f32 %v13990_v53, %v4136_v11  ;;  %v4164_v59 = vmul.f32 %v13990_v53, %v4137_v15  ;;  %v4165_v10 = vmul.f32 %v13990_v53, %v4138_v17  ;;  %5280 = vmatprep.subr.mxu0 %v13577_v20  ;;  %v4314_v37 = vld [vmem:[#allocation3 + $0x6] sm:$0xff] }
 0x90d   :  { %4266 = vst.msk [vmem:[#allocation3 + $0x20] sm:$0xff] %vm2599_vm10, %v14034_v57  ;;  %4264 = vst.msk [vmem:[#allocation3 + $0x10] sm:$0xff] %vm2599_vm10, %v14037_v30  ;;  %v4166_v51 = vmul.f32 %v13990_v53, %v4139_v52  ;;  %v4167_v13 = vmul.f32 %v13990_v53, %v4140_v54  ;;  %v16139_v6 = vsub.f32 %v13764_v22, %v13928_v40  ;;  %5281 = vmatpush2.msra.mxu0 %v2580_v28 }
 0x90e   :  { %4267 = vst.msk [vmem:[#allocation3 + $0x28] sm:$0xff] %vm2599_vm10, %v14040_v7  ;;  %4268 = vst.msk [vmem:[#allocation3 + $0x30] sm:$0xff] %vm2599_vm10, %v14043_v14  ;;  %v4169_v26 = vmul.f32 %v13990_v53, %v16140_v2  ;;  %v4170_v11 = vmul.f32 %v13990_v53, %v16141_v24  ;;  %v4192_v34 = vmul.f32 %v13948_v9, %v4163_v41  ;;  %5282 = vmatprep.subr.mxu0 %v13577_v20  ;;  %v16142_v41 = vld [vmem:[#allocation40_spill] sm:$0xff] }
 0x90f   :  { %4269 = vst.msk [vmem:[#allocation3 + $0x38] sm:$0xff] %vm2599_vm10, %v14046_v27  ;;  %4270 = vst.msk [vmem:[#allocation3 + $0x40] sm:$0xff] %vm2599_vm10, %v14049_v61  ;;  %v4168_v45 = vmul.f32 %v13990_v53, %v16139_v6  ;;  %v4193_v15 = vmul.f32 %v13948_v9, %v4164_v59  ;;  %v4194_v22 = vmul.f32 %v13948_v9, %v4165_v10  ;;  %5283 = vmatpush2.msra.mxu0 %v2579_v8 }
 0x910   :  { %v4195_v17 = vmul.f32 %v13948_v9, %v4166_v51  ;;  %v4196_v44 = vmul.f32 %v13948_v9, %v4167_v13  ;;  %v4198_v54 = vmul.f32 %v13948_v9, %v4169_v26  ;;  %v4199_v19 = vmul.f32 %v13948_v9, %v4170_v11  ;;  %5284 = vmatprep.subr.mxu0 %v13577_v20 }
 0x911   :  { %v4197_v52 = vmul.f32 %v13948_v9, %v4168_v45  ;;  %v4221_v29 = vadd.f32 %v13953_v48, %v4192_v34  ;;  %v4222_v55 = vadd.f32 %v13953_v48, %v4193_v15  ;;  %v4223_v21 = vadd.f32 %v13953_v48, %v4194_v22  ;;  %5285 = vmatpush2.msra.mxu0 %v2578_v33 }
 0x912   :  { %v4224_v43 = vadd.f32 %v13953_v48, %v4195_v17  ;;  %v4225_v35 = vadd.f32 %v13953_v48, %v4196_v44  ;;  %v4227_v58 = vadd.f32 %v13953_v48, %v4198_v54  ;;  %v4228_v28 = vadd.f32 %v13953_v48, %v4199_v19  ;;  %10368 = vmatprep.subr.mxu0 %v13577_v20 }
 0x913   :  { %v4226_v56 = vadd.f32 %v13953_v48, %v4197_v52  ;;  %v14119_v59 = vmul.f32 %v16142_v41, %v4221_v29  ;;  %v14122_v10 = vmul.f32 %v13707_v60, %v4222_v55  ;;  %v14125_v51 = vmul.f32 %v13719_v3, %v4223_v21  ;;  %v16143_v60 = vld [vmem:[#allocation41_spill] sm:$0xff]  ;;  %v16148_v41 = vld [vmem:[#allocation42_spill] sm:$0xff] }
 0x914   :  { %v14128_v13 = vmul.f32 %v13734_v31, %v4224_v43  ;;  %v4416_v6 = vld [vmem:[#allocation3 + $0x1b] sm:$0xff]  ;;  %v4365_v2 = vld [vmem:[#allocation3 + $0x11] sm:$0xff]  ;;  %v14131_v26 = vmul.f32 %v13746_v5, %v4225_v35  ;;  %v14137_v11 = vmul.f32 %v13769_v63, %v4227_v58  ;;  %v14140_v34 = vmul.f32 %v16143_v60, %v4228_v28 }
 0x915   :  { %v4366_v45 = vld [vmem:[#allocation3 + $0x19] sm:$0xff]  ;;  %v14134_v24 = vmul.f32 %v13761_v18, %v4226_v56  ;;  %10294 = vmatmul.mubr.msk.f32.vlgmr.msra.gmra.mxu1 %vm2599_vm10, %v4416_v6  ;;  %v11112_v31 = vpack.i.bf16 %v4314_v37, %v4365_v2  ;;  %v4340_v15 = vld [vmem:[#allocation3 + $0xf] sm:$0xff]  ;;  %4271 = vst.msk [vmem:[#allocation3 + $0x48] sm:$0xff] %vm2599_vm10, %v14119_v59  ;;  %4272 = vst.msk [vmem:[#allocation3 + $0x50] sm:$0xff] %vm2599_vm10, %v14122_v10  ;;  %v16144_v5 = vsub.f32 %v13796_v12, %v13928_v40 }
 0x916   :  { %v11117_v3 = vpack.i.bf16 %v4339_v16, %v4366_v45  ;;  %v4391_v22 = vld [vmem:[#allocation3 + $0x1a] sm:$0xff]  ;;  %4273 = vst.msk [vmem:[#allocation3 + $0x58] sm:$0xff] %vm2599_vm10, %v14125_v51  ;;  %4274 = vst.msk [vmem:[#allocation3 + $0x60] sm:$0xff] %vm2599_vm10, %v14128_v13  ;;  %v16145_v63 = vsub.f32 %v13807_v25, %v13928_v40  ;;  %10296 = vmatprep.mubr.msk.f32.mxu1 %vm11829_vm1, %v13577_v20  ;;  %v4315_v44 = vld [vmem:[#allocation3 + $0xe] sm:$0xff]  ;;  %v16146_v25 = vsub.f32 %v13821_v39, %v13928_v40 }
 0x917   :  { %v4171_v18 = vmul.f32 %v13990_v53, %v16144_v5  ;;  %4275 = vst.msk [vmem:[#allocation3 + $0x68] sm:$0xff] %vm2599_vm10, %v14131_v26  ;;  %4276 = vst.msk [vmem:[#allocation3 + $0x70] sm:$0xff] %vm2599_vm10, %v14134_v24  ;;  %v16147_v20 = vsub.f32 %v13832_v49, %v13928_v40  ;;  %v4175_v54 = vmul.f32 %v13990_v53, %v4148_v4  ;;  %11113 = vrot.lane.b32.xlu0 %v11112_v31, %s11837_s19  ;;  %v4417_v8 = vld [vmem:[#allocation3 + $0x23] sm:$0xff]  ;;  %v4341_v21 = vld [vmem:[#allocation3 + $0x17] sm:$0xff] }
 0x918   :  { %v4172_v17 = vmul.f32 %v13990_v53, %v16145_v63  ;;  %4277 = vst.msk [vmem:[#allocation3 + $0x78] sm:$0xff] %vm2599_vm10, %v14137_v11  ;;  %4278 = vst.msk [vmem:[#allocation3 + $0x80] sm:$0xff] %vm2599_vm10, %v14140_v34  ;;  %v4173_v12 = vmul.f32 %v13990_v53, %v16146_v25  ;;  %11118 = vrot.lane.b32.xlu1 %v11117_v3, %s11838_s20  ;;  %v11122_v39 = vpack.i.bf16 %v4340_v15, %v4391_v22  ;;  %v4367_v55 = vld [vmem:[#allocation3 + $0x21] sm:$0xff]  ;;  %v4418_v60 = vld [vmem:[#allocation3 + $0x2b] sm:$0xff] }
 0x919   :  { %v4174_v52 = vmul.f32 %v13990_v53, %v16147_v20  ;;  %v4200_v19 = vmul.f32 %v13948_v9, %v4171_v18  ;;  %10297 = vmatmul.mubr.msk.f32.gmra.mxu1 %vm2599_vm10, %v4417_v8  ;;  %v11127_v49 = vpack.i.bf16 %v4315_v44, %v4366_v45  ;;  %v4392_v62 = vld [vmem:[#allocation3 + $0x22] sm:$0xff]  ;;  %v4204_v16 = vmul.f32 %v13948_v9, %v4175_v54  ;;  %v4316_v5 = vld [vmem:[#allocation3 + $0x16] sm:$0xff] }
 0x91a   :  { %v4201_v33 = vmul.f32 %v13948_v9, %v4172_v17  ;;  %v4202_v29 = vmul.f32 %v13948_v9, %v4173_v12  ;;  %v14191_v37 = vld [vmem:[#allocation4] sm:$0xff]  ;;  %v4149_v58 = vsub.f32 %v13854_v38, %v13928_v40  ;;  %v4150_v28 = vsub.f32 %v13865_v36, %v13928_v40  ;;  %v4419_v25 = vld [vmem:[#allocation3 + $0x33] sm:$0xff] }
 0x91b   :  { %v4229_v4 = vadd.f32 %v13953_v48, %v4200_v19  ;;  %v4203_v43 = vmul.f32 %v13948_v9, %v4174_v52  ;;  %10299 = vmatprep.mubr.msk.f32.mxu1 %vm11829_vm1, %v14191_v37  ;;  %11123 = vrot.lane.b32.xlu0 %v11122_v39, %s11839_s21  ;;  %v4151_v45 = vsub.f32 %v13877_v1, %v13928_v40  ;;  %v16149_v36 = vld [vmem:[#allocation43_spill] sm:$0xff]  ;;  %v16150_v17 = vld [vmem:[#allocation44_spill] sm:$0xff]  ;;  %v16151_v20 = vld [vmem:[#allocation45_spill] sm:$0xff] }
 0x91c   :  { %v4230_v35 = vadd.f32 %v13953_v48, %v4201_v33  ;;  %v4231_v56 = vadd.f32 %v13953_v48, %v4202_v29  ;;  %11128 = vrot.lane.b32.xlu1 %v11127_v49, %s11837_s19  ;;  %v4152_v2 = vsub.f32 %v13888_v0, %v13928_v40  ;;  %v11132_v3 = vpack.i.bf16 %v4340_v15, %v4367_v55  ;;  %v4342_v33 = vld [vmem:[#allocation3 + $0x1f] sm:$0xff]  ;;  %v4393_v29 = vld [vmem:[#allocation3 + $0x2a] sm:$0xff] }
 0x91d   :  { %v14204_v6 = vmul.f32 %v16148_v41, %v4229_v4  ;;  %v11137_v31 = vpack.i.bf16 %v4341_v21, %v4392_v62  ;;  %10300 = vmatmul.mubr.msk.f32.gmra.mxu1 %vm2599_vm10, %v4418_v60  ;;  %v4232_v1 = vadd.f32 %v13953_v48, %v4203_v43  ;;  %v4233_v18 = vadd.f32 %v13953_v48, %v4204_v16  ;;  %v4317_v49 = vld [vmem:[#allocation3 + $0x1e] sm:$0xff]  ;;  %v4394_v60 = vld [vmem:[#allocation3 + $0x32] sm:$0xff] }
 0x91e   :  { %v14211_v38 = vmul.f32 %v13804_v47, %v4230_v35  ;;  %v14214_v22 = vmul.f32 %v16149_v36, %v4231_v56  ;;  %v4176_v0 = vmul.f32 %v13990_v53, %v4149_v58  ;;  %v4177_v40 = vmul.f32 %v13990_v53, %v4150_v28  ;;  %10302 = vmatprep.mubr.msk.f32.mxu1 %vm11829_vm1, %v14191_v37  ;;  %v4368_v47 = vld [vmem:[#allocation3 + $0x29] sm:$0xff]  ;;  %v16152_v4 = vld [vmem:[#allocation46_spill] sm:$0xff] }
 0x91f   :  { %4279 = vst.msk [vmem:[#allocation3 + $0x88] sm:$0xff] %vm2599_vm10, %v14204_v6  ;;  %v4178_v15 = vmul.f32 %v13990_v53, %v4151_v45  ;;  %v4179_v63 = vmul.f32 %v13990_v53, %v4152_v2  ;;  %11133 = vrot.lane.b32.xlu0 %v11132_v3, %s11838_s20  ;;  %v14234_v44 = vmul.f32 %v16150_v17, %v4232_v1  ;;  %v16153_v28 = vld [vmem:[#allocation47_spill] sm:$0xff]  ;;  %v4369_v45 = vld [vmem:[#allocation3 + $0x31] sm:$0xff]  ;;  %v4370_v1 = vld [vmem:[#allocation3 + $0x39] sm:$0xff] }
 0x920   :  { %4280 = vst.msk [vmem:[#allocation3 + $0x90] sm:$0xff] %vm2599_vm10, %v14211_v38  ;;  %4281 = vst.msk [vmem:[#allocation3 + $0x98] sm:$0xff] %vm2599_vm10, %v14214_v22  ;;  %11138 = vrot.lane.b32.xlu1 %v11137_v31, %s11839_s21  ;;  %v11142_v12 = vpack.i.bf16 %v4316_v5, %v4367_v55  ;;  %v14237_v52 = vmul.f32 %v16151_v20, %v4233_v18  ;;  %v4205_v54 = vmul.f32 %v13948_v9, %v4176_v0  ;;  %v4343_v2 = vld [vmem:[#allocation3 + $0x27] sm:$0xff]  ;;  %v4423_v17 = vld [vmem:[#allocation3 + $0x53] sm:$0xff] }
 0x921   :  { %10303 = vmatmul.mubr.msk.f32.gmra.mxu1 %vm2599_vm10, %v4419_v25  ;;  %v11147_v19 = vpack.i.bf16 %v4341_v21, %v4368_v47  ;;  %4282 = vst.msk [vmem:[#allocation3 + $0xa0] sm:$0xff] %vm2599_vm10, %v14234_v44  ;;  %v4206_v53 = vmul.f32 %v13948_v9, %v4177_v40  ;;  %v4207_v8 = vmul.f32 %v13948_v9, %v4178_v15  ;;  %v4318_v5 = vld [vmem:[#allocation3 + $0x26] sm:$0xff]  ;;  %v4395_v15 = vld [vmem:[#allocation3 + $0x3a] sm:$0xff] }
 0x922   :  { %v4208_v39 = vmul.f32 %v13948_v9, %v4179_v63  ;;  %10305 = vmatprep.mubr.msk.f32.mxu1 %vm11829_vm1, %v14191_v37  ;;  %4283 = vst.msk [vmem:[#allocation3 + $0xa8] sm:$0xff] %vm2599_vm10, %v14237_v52  ;;  %v4234_v55 = vadd.f32 %v13953_v48, %v4205_v54  ;;  %v4420_v9 = vld [vmem:[#allocation3 + $0x3b] sm:$0xff]  ;;  %v11152_v35 = vpack.i.bf16 %v4342_v33, %v4393_v29  ;;  %v4422_v18 = vld [vmem:[#allocation3 + $0x4b] sm:$0xff] }
 0x923   :  { %11143 = vrot.lane.b32.xlu0 %v11142_v12, %s11837_s19  ;;  %v4235_v21 = vadd.f32 %v13953_v48, %v4206_v53  ;;  %v4236_v62 = vadd.f32 %v13953_v48, %v4207_v8  ;;  %v11157_v56 = vpack.i.bf16 %v4317_v49, %v4368_v47  ;;  %v11162_v31 = vpack.i.bf16 %v4342_v33, %v4369_v45  ;;  %v4344_v47 = vld [vmem:[#allocation3 + $0x2f] sm:$0xff]  ;;  %v4371_v20 = vld [vmem:[#allocation3 + $0x41] sm:$0xff]  ;;  %v4345_v54 = vld [vmem:[#allocation3 + $0x37] sm:$0xff] }
 0x924   :  { %11148 = vrot.lane.b32.xlu1 %v11147_v19, %s11838_s20  ;;  %v14256_v43 = vmul.f32 %v16152_v4, %v4234_v55  ;;  %v4237_v16 = vadd.f32 %v13953_v48, %v4208_v39  ;;  %v16154_v48 = vld [vmem:[#allocation48_spill] sm:$0xff]  ;;  %v11167_v36 = vpack.i.bf16 %v4343_v2, %v4394_v60  ;;  %v11172_v0 = vpack.i.bf16 %v4318_v5, %v4369_v45  ;;  %v4396_v19 = vld [vmem:[#allocation3 + $0x42] sm:$0xff]  ;;  %v4320_v33 = vld [vmem:[#allocation3 + $0x36] sm:$0xff] }
 0x925   :  { %10306 = vmatmul.mubr.msk.f32.gmra.mxu1 %vm2599_vm10, %v4420_v9  ;;  %v14261_v58 = vmul.f32 %v13862_v50, %v4235_v21  ;;  %v14264_v41 = vmul.f32 %v16153_v28, %v4236_v62  ;;  %v4421_v50 = vld [vmem:[#allocation3 + $0x43] sm:$0xff]  ;;  %v11177_v40 = vpack.i.bf16 %v4343_v2, %v4370_v1  ;;  %v4319_v63 = vld [vmem:[#allocation3 + $0x2e] sm:$0xff]  ;;  %v11182_v25 = vpack.i.bf16 %v4344_v47, %v4395_v15  ;;  %v4424_v53 = vld [vmem:[#allocation3 + $0x5b] sm:$0xff] }
 0x926   :  { %10308 = vmatprep.mubr.msk.f32.mxu1 %vm11829_vm1, %v14191_v37  ;;  %4284 = vst.msk [vmem:[#allocation3 + $0xb0] sm:$0xff] %vm2599_vm10, %v14256_v43  ;;  %v14271_v3 = vmul.f32 %v16154_v48, %v4237_v16  ;;  %v11187_v12 = vpack.i.bf16 %v4319_v63, %v4370_v1  ;;  %v11192_v8 = vpack.i.bf16 %v4344_v47, %v4371_v20  ;;  %v4372_v29 = vld [vmem:[#allocation3 + $0x49] sm:$0xff]  ;;  %v4346_v62 = vld [vmem:[#allocation3 + $0x3f] sm:$0xff]  ;;  %v4373_v28 = vld [vmem:[#allocation3 + $0x51] sm:$0xff] }
 0x927   :  { %11153 = vrot.lane.b32.xlu0 %v11152_v35, %s11839_s21  ;;  %4285 = vst.msk [vmem:[#allocation3 + $0xb8] sm:$0xff] %vm2599_vm10, %v14261_v58  ;;  %4286 = vst.msk [vmem:[#allocation3 + $0xc0] sm:$0xff] %vm2599_vm10, %v14264_v41  ;;  %v11197_v39 = vpack.i.bf16 %v4345_v54, %v4396_v19  ;;  %v4425_v49 = vld [vmem:[#allocation3 + $0x63] sm:$0xff]  ;;  %v11202_v55 = vpack.i.bf16 %v4320_v33, %v4371_v20  ;;  %v11207_v21 = vpack.i.bf16 %v4345_v54, %v4372_v29  ;;  %v4426_v16 = vld [vmem:[#allocation3 + $0x6b] sm:$0xff] }
 0x928   :  { %11158 = vrot.lane.b32.xlu1 %v11157_v56, %s11837_s19  ;;  %4287 = vst.msk [vmem:[#allocation3 + $0xc8] sm:$0xff] %vm2599_vm10, %v14271_v3  ;;  %v4397_v9 = vld [vmem:[#allocation3 + $0x4a] sm:$0xff]  ;;  %v4321_v4 = vld [vmem:[#allocation3 + $0x3e] sm:$0xff]  ;;  %v4398_v2 = vld [vmem:[#allocation3 + $0x52] sm:$0xff]  ;;  %v11222_v48 = vpack.i.bf16 %v4346_v62, %v4373_v28 }
 0x929   :  { %10309 = vmatmul.mubr.msk.f32.gmra.mxu1 %vm2599_vm10, %v4421_v50  ;;  %v11212_v35 = vpack.i.bf16 %v4346_v62, %v4397_v9  ;;  %v11217_v56 = vpack.i.bf16 %v4321_v4, %v4372_v29  ;;  %v4347_v45 = vld [vmem:[#allocation3 + $0x47] sm:$0xff]  ;;  %v4427_v60 = vld [vmem:[#allocation3 + $0x73] sm:$0xff]  ;;  %v4428_v5 = vld [vmem:[#allocation3 + $0x7b] sm:$0xff] }
 0x92a   :  { %10311 = vmatprep.mubr.msk.f32.mxu1 %vm11829_vm1, %v14191_v37  ;;  %v11227_v50 = vpack.i.bf16 %v4347_v45, %v4398_v2  ;;  %v4323_v47 = vld [vmem:[#allocation3 + $0x4e] sm:$0xff]  ;;  %v4429_v15 = vld [vmem:[#allocation3 + $0x83] sm:$0xff]  ;;  %v4432_v9 = vld [vmem:[#allocation3 + $0x9b] sm:$0xff] }
 0x92b   :  { %11163 = vrot.lane.b32.xlu0 %v11162_v31, %s11838_s20  ;;  %v4322_v31 = vld [vmem:[#allocation3 + $0x46] sm:$0xff]  ;;  %v4431_v33 = vld [vmem:[#allocation3 + $0x93] sm:$0xff]  ;;  %v4325_v62 = vld [vmem:[#allocation3 + $0x5e] sm:$0xff] }
 0x92c   :  { %11168 = vrot.lane.b32.xlu1 %v11167_v36, %s11839_s21  ;;  %v4374_v36 = vld [vmem:[#allocation3 + $0x59] sm:$0xff]  ;;  %v11232_v1 = vpack.i.bf16 %v4322_v31, %v4373_v28  ;;  %v4400_v20 = vld [vmem:[#allocation3 + $0x62] sm:$0xff]  ;;  %v4430_v54 = vld [vmem:[#allocation3 + $0x8b] sm:$0xff] }
 0x92d   :  { %10312 = vmatmul.mubr.msk.f32.gmra.mxu1 %vm2599_vm10, %v4422_v18  ;;  %v11237_v18 = vpack.i.bf16 %v4347_v45, %v4374_v36  ;;  %v4402_v28 = vld [vmem:[#allocation3 + $0x72] sm:$0xff]  ;;  %v4433_v45 = vld [vmem:[#allocation3 + $0xa3] sm:$0xff] }
 0x92e   :  { %10314 = vmatprep.mubr.msk.f32.mxu1 %vm11829_vm1, %v14191_v37  ;;  %v4434_v31 = vld [vmem:[#allocation3 + $0xab] sm:$0xff] }
 0x92f   :  { %11173 = vrot.lane.b32.xlu0 %v11172_v0, %s11837_s19  ;;  %v4348_v0 = vld [vmem:[#allocation3 + $0x4f] sm:$0xff] }
 0x930   :  { %11178 = vrot.lane.b32.xlu1 %v11177_v40, %s11838_s20  ;;  %v4399_v40 = vld [vmem:[#allocation3 + $0x5a] sm:$0xff] }
 0x931   :  { %10315 = vmatmul.mubr.msk.f32.gmra.mxu1 %vm2599_vm10, %v4423_v17  ;;  %v11242_v63 = vpack.i.bf16 %v4348_v0, %v4399_v40  ;;  %v11247_v17 = vpack.i.bf16 %v4323_v47, %v4374_v36  ;;  %v4435_v40 = vld [vmem:[#allocation3 + $0xb3] sm:$0xff] }
 0x932   :  { %10317 = vmatprep.mubr.msk.f32.mxu1 %vm11829_vm1, %v14191_v37 }
 0x933   :  { %11183 = vrot.lane.b32.xlu0 %v11182_v25, %s11839_s21  ;;  %v4375_v25 = vld [vmem:[#allocation3 + $0x61] sm:$0xff] }
 0x934   :  { %11188 = vrot.lane.b32.xlu1 %v11187_v12, %s11837_s19  ;;  %v4349_v12 = vld [vmem:[#allocation3 + $0x57] sm:$0xff]  ;;  %v11252_v19 = vpack.i.bf16 %v4348_v0, %v4375_v25  ;;  %v4327_v0 = vld [vmem:[#allocation3 + $0x6e] sm:$0xff] }
 0x935   :  { %10318 = vmatmul.mubr.msk.f32.gmra.mxu1 %vm2599_vm10, %v4424_v53  ;;  %v11257_v53 = vpack.i.bf16 %v4349_v12, %v4400_v20 }
 0x936   :  { %10320 = vmatprep.mubr.msk.f32.mxu1 %vm11829_vm1, %v14191_v37 }
 0x937   :  { %11193 = vrot.lane.b32.xlu0 %v11192_v8, %s11838_s20  ;;  %v4324_v8 = vld [vmem:[#allocation3 + $0x56] sm:$0xff] }
 0x938   :  { %11198 = vrot.lane.b32.xlu1 %v11197_v39, %s11839_s21  ;;  %v4376_v39 = vld [vmem:[#allocation3 + $0x69] sm:$0xff]  ;;  %v11262_v29 = vpack.i.bf16 %v4324_v8, %v4375_v25 }
 0x939   :  { %10321 = vmatmul.mubr.msk.f32.gmra.mxu1 %vm2599_vm10, %v4425_v49  ;;  %v11267_v49 = vpack.i.bf16 %v4349_v12, %v4376_v39  ;;  %v4404_v25 = vld [vmem:[#allocation3 + $0x82] sm:$0xff] }
 0x93a   :  { %10323 = vmatprep.mubr.msk.f32.mxu1 %vm11829_vm1, %v14191_v37  ;;  %v4436_v12 = vld [vmem:[#allocation3 + $0xbb] sm:$0xff]  ;;  %v4437_v8 = vld [vmem:[#allocation3 + $0xc3] sm:$0xff] }
 0x93b   :  { %11203 = vrot.lane.b32.xlu0 %v11202_v55, %s11837_s19  ;;  %v4350_v55 = vld [vmem:[#allocation3 + $0x5f] sm:$0xff] }
 0x93c   :  { %11208 = vrot.lane.b32.xlu1 %v11207_v21, %s11838_s20  ;;  %v4401_v21 = vld [vmem:[#allocation3 + $0x6a] sm:$0xff] }
 0x93d   :  { %10324 = vmatmul.mubr.msk.f32.gmra.mxu1 %vm2599_vm10, %v4426_v16  ;;  %v11272_v4 = vpack.i.bf16 %v4350_v55, %v4401_v21  ;;  %v11277_v16 = vpack.i.bf16 %v4325_v62, %v4376_v39  ;;  %v4438_v21 = vld [vmem:[#allocation3 + $0xcb] sm:$0xff] }
 0x93e   :  { %10326 = vmatprep.mubr.msk.f32.mxu1 %vm11829_vm1, %v14191_v37 }
 0x93f   :  { %11213 = vrot.lane.b32.xlu0 %v11212_v35, %s11839_s21  ;;  %v4377_v35 = vld [vmem:[#allocation3 + $0x71] sm:$0xff] }
 0x940   :  { %11218 = vrot.lane.b32.xlu1 %v11217_v56, %s11837_s19  ;;  %v4351_v56 = vld [vmem:[#allocation3 + $0x67] sm:$0xff]  ;;  %v11282_v2 = vpack.i.bf16 %v4350_v55, %v4377_v35  ;;  %v4329_v55 = vld [vmem:[#allocation3 + $0x7e] sm:$0xff] }
 0x941   :  { %10327 = vmatmul.mubr.msk.f32.gmra.mxu1 %vm2599_vm10, %v4427_v60  ;;  %v11287_v60 = vpack.i.bf16 %v4351_v56, %v4402_v28 }
 0x942   :  { %10329 = vmatprep.mubr.msk.f32.mxu1 %vm11829_vm1, %v14191_v37 }
 0x943   :  { %11223 = vrot.lane.b32.xlu0 %v11222_v48, %s11838_s20  ;;  %v4326_v48 = vld [vmem:[#allocation3 + $0x66] sm:$0xff] }
 0x944   :  { %11228 = vrot.lane.b32.xlu1 %v11227_v50, %s11839_s21  ;;  %v4378_v50 = vld [vmem:[#allocation3 + $0x79] sm:$0xff]  ;;  %v11292_v36 = vpack.i.bf16 %v4326_v48, %v4377_v35 }
 0x945   :  { %10330 = vmatmul.mubr.msk.f32.gmra.mxu1 %vm2599_vm10, %v4428_v5  ;;  %v11297_v5 = vpack.i.bf16 %v4351_v56, %v4378_v50  ;;  %v4406_v35 = vld [vmem:[#allocation3 + $0x92] sm:$0xff] }
 0x946   :  { %10332 = vmatprep.mubr.msk.f32.mxu1 %vm11829_vm1, %v14191_v37  ;;  %v4439_v56 = vld [vmem:[#allocation3 + $0xd3] sm:$0xff] }
 0x947   :  { %11233 = vrot.lane.b32.xlu0 %v11232_v1, %s11837_s19  ;;  %v4352_v1 = vld [vmem:[#allocation3 + $0x6f] sm:$0xff] }
 0x948   :  { %11238 = vrot.lane.b32.xlu1 %v11237_v18, %s11838_s20  ;;  %v4403_v18 = vld [vmem:[#allocation3 + $0x7a] sm:$0xff] }
 0x949   :  { %10333 = vmatmul.mubr.msk.f32.gmra.mxu1 %vm2599_vm10, %v4429_v15  ;;  %v11302_v47 = vpack.i.bf16 %v4352_v1, %v4403_v18  ;;  %v11307_v15 = vpack.i.bf16 %v4327_v0, %v4378_v50  ;;  %v4383_v0 = vld [vmem:[#allocation3 + $0xa1] sm:$0xff] }
 0x94a   :  { %10335 = vmatprep.mubr.msk.f32.mxu1 %vm11829_vm1, %v14191_v37 }
 0x94b   :  { %11243 = vrot.lane.b32.xlu0 %v11242_v63, %s11839_s21  ;;  %v4379_v63 = vld [vmem:[#allocation3 + $0x81] sm:$0xff] }
 0x94c   :  { %11248 = vrot.lane.b32.xlu1 %v11247_v17, %s11837_s19  ;;  %v4353_v17 = vld [vmem:[#allocation3 + $0x77] sm:$0xff]  ;;  %v11312_v20 = vpack.i.bf16 %v4352_v1, %v4379_v63 }
 0x94d   :  { %10336 = vmatmul.mubr.msk.f32.gmra.mxu1 %vm2599_vm10, %v4430_v54  ;;  %v11317_v54 = vpack.i.bf16 %v4353_v17, %v4404_v25  ;;  %v4384_v25 = vld [vmem:[#allocation3 + $0xa9] sm:$0xff] }
 0x94e   :  { %10338 = vmatprep.mubr.msk.f32.mxu1 %vm11829_vm1, %v14191_v37 }
 0x94f   :  { %11253 = vrot.lane.b32.xlu0 %v11252_v19, %s11838_s20  ;;  %v4328_v19 = vld [vmem:[#allocation3 + $0x76] sm:$0xff] }
 0x950   :  { %11258 = vrot.lane.b32.xlu1 %v11257_v53, %s11839_s21  ;;  %v4380_v53 = vld [vmem:[#allocation3 + $0x89] sm:$0xff]  ;;  %v11322_v39 = vpack.i.bf16 %v4328_v19, %v4379_v63 }
 0x951   :  { %10339 = vmatmul.mubr.msk.f32.gmra.mxu1 %vm2599_vm10, %v4431_v33  ;;  %v11327_v33 = vpack.i.bf16 %v4353_v17, %v4380_v53  ;;  %v4332_v17 = vld [vmem:[#allocation3 + $0x96] sm:$0xff]  ;;  %v4409_v19 = vld [vmem:[#allocation3 + $0xaa] sm:$0xff] }
 0x952   :  { %10341 = vmatprep.mubr.msk.f32.mxu1 %vm11829_vm1, %v14191_v37 }
 0x953   :  { %11263 = vrot.lane.b32.xlu0 %v11262_v29, %s11837_s19  ;;  %v4354_v29 = vld [vmem:[#allocation3 + $0x7f] sm:$0xff] }
 0x954   :  { %11268 = vrot.lane.b32.xlu1 %v11267_v49, %s11838_s20  ;;  %v4405_v49 = vld [vmem:[#allocation3 + $0x8a] sm:$0xff] }
 0x955   :  { %10342 = vmatmul.mubr.msk.f32.gmra.mxu1 %vm2599_vm10, %v4432_v9  ;;  %v11332_v62 = vpack.i.bf16 %v4354_v29, %v4405_v49  ;;  %v11337_v9 = vpack.i.bf16 %v4329_v55, %v4380_v53  ;;  %v4333_v53 = vld [vmem:[#allocation3 + $0x9e] sm:$0xff]  ;;  %v4410_v49 = vld [vmem:[#allocation3 + $0xb2] sm:$0xff] }
 0x956   :  { %10344 = vmatprep.mubr.msk.f32.mxu1 %vm11829_vm1, %v14191_v37 }
 0x957   :  { %11273 = vrot.lane.b32.xlu0 %v11272_v4, %s11839_s21  ;;  %v4381_v4 = vld [vmem:[#allocation3 + $0x91] sm:$0xff] }
 0x958   :  { %11278 = vrot.lane.b32.xlu1 %v11277_v16, %s11837_s19  ;;  %v4355_v16 = vld [vmem:[#allocation3 + $0x87] sm:$0xff]  ;;  %v11342_v28 = vpack.i.bf16 %v4354_v29, %v4381_v4 }
 0x959   :  { %10345 = vmatmul.mubr.msk.f32.gmra.mxu1 %vm2599_vm10, %v4433_v45  ;;  %v11347_v45 = vpack.i.bf16 %v4355_v16, %v4406_v35  ;;  %v4359_v29 = vld [vmem:[#allocation3 + $0xa7] sm:$0xff] }
 0x95a   :  { %10347 = vmatprep.mubr.msk.f32.mxu1 %vm11829_vm1, %v14191_v37 }
 0x95b   :  { %11283 = vrot.lane.b32.xlu0 %v11282_v2, %s11838_s20  ;;  %v4330_v2 = vld [vmem:[#allocation3 + $0x86] sm:$0xff] }
 0x95c   :  { %11288 = vrot.lane.b32.xlu1 %v11287_v60, %s11839_s21  ;;  %v4382_v60 = vld [vmem:[#allocation3 + $0x99] sm:$0xff]  ;;  %v11352_v48 = vpack.i.bf16 %v4330_v2, %v4381_v4  ;;  %v11407_v4 = vpack.i.bf16 %v4359_v29, %v4410_v49 }
 0x95d   :  { %10348 = vmatmul.mubr.msk.f32.gmra.mxu1 %vm2599_vm10, %v4434_v31  ;;  %v11357_v50 = vpack.i.bf16 %v4355_v16, %v4382_v60  ;;  %v4356_v31 = vld [vmem:[#allocation3 + $0x8f] sm:$0xff] }
 0x95e   :  { %10350 = vmatprep.mubr.msk.f32.mxu1 %vm11829_vm1, %v14191_v37 }
 0x95f   :  { %11293 = vrot.lane.b32.xlu0 %v11292_v36, %s11837_s19  ;;  %v4407_v36 = vld [vmem:[#allocation3 + $0x9a] sm:$0xff] }
 0x960   :  { %11298 = vrot.lane.b32.xlu1 %v11297_v5, %s11838_s20  ;;  %v4331_v5 = vld [vmem:[#allocation3 + $0x8e] sm:$0xff]  ;;  %v11362_v1 = vpack.i.bf16 %v4356_v31, %v4407_v36 }
 0x961   :  { %10351 = vmatmul.mubr.msk.f32.gmra.mxu1 %vm2599_vm10, %v4435_v40  ;;  %v11367_v18 = vpack.i.bf16 %v4331_v5, %v4382_v60  ;;  %v4357_v40 = vld [vmem:[#allocation3 + $0x97] sm:$0xff] }
 0x962   :  { %10353 = vmatprep.mubr.msk.f32.mxu1 %vm11829_vm1, %v14191_v37 }
 0x963   :  { %11303 = vrot.lane.b32.xlu0 %v11302_v47, %s11839_s21  ;;  %v4408_v47 = vld [vmem:[#allocation3 + $0xa2] sm:$0xff] }
 0x964   :  { %11308 = vrot.lane.b32.xlu1 %v11307_v15, %s11837_s19  ;;  %v11372_v15 = vpack.i.bf16 %v4356_v31, %v4383_v0  ;;  %v11377_v63 = vpack.i.bf16 %v4357_v40, %v4408_v47  ;;  %v4335_v47 = vld [vmem:[#allocation3 + $0xae] sm:$0xff] }
 0x965   :  { %10354 = vmatmul.mubr.msk.f32.gmra.mxu1 %vm2599_vm10, %v4436_v12  ;;  %v11382_v12 = vpack.i.bf16 %v4332_v17, %v4383_v0  ;;  %v4360_v0 = vld [vmem:[#allocation3 + $0xaf] sm:$0xff] }
 0x966   :  { %10356 = vmatprep.mubr.msk.f32.mxu1 %vm11829_vm1, %v14191_v37 }
 0x967   :  { %11313 = vrot.lane.b32.xlu0 %v11312_v20, %s11838_s20  ;;  %v11387_v20 = vpack.i.bf16 %v4357_v40, %v4384_v25  ;;  %v4411_v40 = vld [vmem:[#allocation3 + $0xba] sm:$0xff] }
 0x968   :  { %11318 = vrot.lane.b32.xlu1 %v11317_v54, %s11839_s21  ;;  %v4358_v54 = vld [vmem:[#allocation3 + $0x9f] sm:$0xff] }
 0x969   :  { %10357 = vmatmul.mubr.msk.f32.gmra.mxu1 %vm2599_vm10, %v4437_v8  ;;  %v11392_v8 = vpack.i.bf16 %v4358_v54, %v4409_v19  ;;  %v11422_v19 = vpack.i.bf16 %v4360_v0, %v4411_v40 }
 0x96a   :  { %10359 = vmatprep.mubr.msk.f32.mxu1 %vm11829_vm1, %v14191_v37 }
 0x96b   :  { %11323 = vrot.lane.b32.xlu0 %v11322_v39, %s11837_s19  ;;  %v11397_v39 = vpack.i.bf16 %v4333_v53, %v4384_v25 }
 0x96c   :  { %11328 = vrot.lane.b32.xlu1 %v11327_v33, %s11838_s20  ;;  %v4385_v33 = vld [vmem:[#allocation3 + $0xb1] sm:$0xff] }
 0x96d   :  { %10360 = vmatmul.mubr.msk.f32.gmra.mxu1 %vm2599_vm10, %v4438_v21  ;;  %v4289_v21 = vld [vmem:[#allocation3 + $0x5] sm:$0xff] }
 0x96e   :  { %10362 = vmatprep.mubr.msk.f32.mxu1 %vm11829_vm1, %v14191_v37 }
 0x96f   :  { %11333 = vrot.lane.b32.xlu0 %v11332_v62, %s11839_s21 }
 0x970   :  { %11338 = vrot.lane.b32.xlu1 %v11337_v9, %s11837_s19  ;;  %v11402_v9 = vpack.i.bf16 %v4358_v54, %v4385_v33 }
 0x971   :  { %10363 = vmatmul.mubr.msk.f32.gmra.mxu1 %vm2599_vm10, %v4439_v56  ;;  %v4334_v56 = vld [vmem:[#allocation3 + $0xa6] sm:$0xff] }
 0x972   :  { %10365 = vmatprep.mubr.msk.f32.mxu1 %vm11829_vm1, %v14191_v37  ;;  %v11412_v36 = vpack.i.bf16 %v4334_v56, %v4385_v33 }
 0x973   :  { %11343 = vrot.lane.b32.xlu0 %v11342_v28, %s11838_s20  ;;  %v4386_v28 = vld [vmem:[#allocation3 + $0xb9] sm:$0xff] }
 0x974   :  { %11348 = vrot.lane.b32.xlu1 %v11347_v45, %s11839_s21  ;;  %v11417_v5 = vpack.i.bf16 %v4359_v29, %v4386_v28  ;;  %v11427_v53 = vpack.i.bf16 %v4335_v47, %v4386_v28 }
 0x977   :  { %11353 = vrot.lane.b32.xlu0 %v11352_v48, %s11837_s19 }
 0x978   :  { %11358 = vrot.lane.b32.xlu1 %v11357_v50, %s11838_s20 }
 0x97b   :  { %11363 = vrot.lane.b32.xlu0 %v11362_v1, %s11839_s21 }
 0x97c   :  { %11368 = vrot.lane.b32.xlu1 %v11367_v18, %s11837_s19 }
 0x97f   :  { %11373 = vrot.lane.b32.xlu0 %v11372_v15, %s11838_s20 }
 0x980   :  { %11378 = vrot.lane.b32.xlu1 %v11377_v63, %s11839_s21 }
 0x983   :  { %11383 = vrot.lane.b32.xlu0 %v11382_v12, %s11837_s19 }
 0x984   :  { %11388 = vrot.lane.b32.xlu1 %v11387_v20, %s11838_s20 }
 0x987   :  { %11393 = vrot.lane.b32.xlu0 %v11392_v8, %s11839_s21  ;;  %v4387_v8 = vld [vmem:[#allocation3 + $0xc1] sm:$0xff] }
 0x988   :  { %11398 = vrot.lane.b32.xlu1 %v11397_v39, %s11837_s19 }
 0x989   :  { %v11114_v62 = vpop.permute.xlu0 %11113 }
 0x98a   :  { %v11119_v55 = vpop.permute.xlu1 %11118  ;;  %v11116_v16 = vunpack.i.h.bf16 %v11114_v62  ;;  %v11115_v35 = vunpack.i.l.bf16 %v11114_v62  ;;  %v4290_v62 = vld [vmem:[#allocation3 + $0xd] sm:$0xff] }
 0x98b   :  { %v11121_v45 = vunpack.i.h.bf16 %v11119_v55  ;;  %v11120_v2 = vunpack.i.l.bf16 %v11119_v55  ;;  %11403 = vrot.lane.b32.xlu0 %v11402_v9, %s11838_s20  ;;  %v4361_v55 = vld [vmem:[#allocation3 + $0xb7] sm:$0xff] }
 0x98c   :  { %11408 = vrot.lane.b32.xlu1 %v11407_v4, %s11839_s21  ;;  %v4993_v60 = vsel %vm2599_vm10, %v4289_v21, %v11116_v16  ;;  %v5068_v48 = vsel %vm2599_vm10, %v14037_v30, %v11115_v35  ;;  %v4412_v21 = vld [vmem:[#allocation3 + $0xc2] sm:$0xff] }
 0x98d   :  { %v11124_v50 = vpop.permute.xlu0 %11123  ;;  %v5018_v15 = vsel %vm50_vm9, %v4993_v60, %v11121_v45  ;;  %v5093_v25 = vsel %vm50_vm9, %v5068_v48, %v11120_v2  ;;  %v11432_v2 = vpack.i.bf16 %v4360_v0, %v4387_v8  ;;  %v11437_v60 = vpack.i.bf16 %v4361_v55, %v4412_v21 }
 0x98e   :  { %v11129_v31 = vpop.permute.xlu1 %11128  ;;  %v11126_v1 = vunpack.i.h.bf16 %v11124_v50  ;;  %v11125_v18 = vunpack.i.l.bf16 %v11124_v50 }
 0x98f   :  { %v11131_v63 = vunpack.i.h.bf16 %v11129_v31  ;;  %v11130_v17 = vunpack.i.l.bf16 %v11129_v31  ;;  %11413 = vrot.lane.b32.xlu0 %v11412_v36, %s11837_s19  ;;  %v4336_v36 = vld [vmem:[#allocation3 + $0xb6] sm:$0xff] }
 0x990   :  { %11418 = vrot.lane.b32.xlu1 %v11417_v5, %s11838_s20  ;;  %v5043_v30 = vsel %vm3379_vm11, %v5018_v15, %v11126_v1  ;;  %v5118_v12 = vsel %vm3379_vm11, %v5093_v25, %v11125_v18  ;;  %v4388_v5 = vld [vmem:[#allocation3 + $0xc9] sm:$0xff]  ;;  %v4291_v18 = vld [vmem:[#allocation3 + $0x15] sm:$0xff] }
 0x991   :  { %v11134_v20 = vpop.permute.xlu0 %11133  ;;  %5286 = vmatprep.mubr.f32.mxu0 %v5118_v12  ;;  %v5069_v9 = vsel %vm2599_vm10, %v14031_v32, %v11130_v17  ;;  %v4994_v4 = vsel %vm2599_vm10, %v4290_v62, %v11131_v63  ;;  %v11442_v63 = vpack.i.bf16 %v4336_v36, %v4387_v8  ;;  %v11447_v17 = vpack.i.bf16 %v4361_v55, %v4388_v5  ;;  %v4362_v12 = vld [vmem:[#allocation3 + $0xbf] sm:$0xff]  ;;  %v4389_v62 = vld [vmem:[#allocation3 + $0xd1] sm:$0xff] }
 0x992   :  { %v11139_v54 = vpop.permute.xlu1 %11138  ;;  %v11136_v39 = vunpack.i.h.bf16 %v11134_v20  ;;  %v11135_v33 = vunpack.i.l.bf16 %v11134_v20  ;;  %5287 = vmatmul.mubr.f32.vlgmr.msra.gmra.mxu0 %v5043_v30  ;;  %v4413_v20 = vld [vmem:[#allocation3 + $0xca] sm:$0xff] }
 0x993   :  { %v11141_v29 = vunpack.i.h.bf16 %v11139_v54  ;;  %v11140_v49 = vunpack.i.l.bf16 %v11139_v54  ;;  %11423 = vrot.lane.b32.xlu0 %v11422_v19, %s11839_s21  ;;  %v4337_v54 = vld [vmem:[#allocation3 + $0xbe] sm:$0xff]  ;;  %v11452_v55 = vpack.i.bf16 %v4362_v12, %v4413_v20 }
 0x994   :  { %11428 = vrot.lane.b32.xlu1 %v11427_v53, %s11837_s19  ;;  %v5094_v16 = vsel %vm50_vm9, %v5069_v9, %v11135_v33  ;;  %v5019_v35 = vsel %vm50_vm9, %v4994_v4, %v11136_v39  ;;  %v11457_v21 = vpack.i.bf16 %v4337_v54, %v4388_v5 }
 0x995   :  { %v11144_v56 = vpop.permute.xlu0 %11143  ;;  %v5119_v45 = vsel %vm3379_vm11, %v5094_v16, %v11140_v49  ;;  %v5044_v48 = vsel %vm3379_vm11, %v5019_v35, %v11141_v29 }
 0x996   :  { %v11149_v28 = vpop.permute.xlu1 %11148  ;;  %v11146_v50 = vunpack.i.h.bf16 %v11144_v56  ;;  %v11145_v31 = vunpack.i.l.bf16 %v11144_v56  ;;  %5291 = vmatprep.mubr.f32.mxu0 %v5119_v45  ;;  %v4363_v56 = vld [vmem:[#allocation3 + $0xc7] sm:$0xff]  ;;  %v4292_v45 = vld [vmem:[#allocation3 + $0x1d] sm:$0xff] }
 0x997   :  { %v11151_v32 = vunpack.i.h.bf16 %v11149_v28  ;;  %v11150_v1 = vunpack.i.l.bf16 %v11149_v28  ;;  %11433 = vrot.lane.b32.xlu0 %v11432_v2, %s11838_s20  ;;  %5292 = vmatmul.mubr.f32.gmra.mxu0 %v5044_v48  ;;  %v4414_v28 = vld [vmem:[#allocation3 + $0xd2] sm:$0xff] }
 0x998   :  { %11438 = vrot.lane.b32.xlu1 %v11437_v60, %s11839_s21  ;;  %v5070_v40 = vsel %vm2599_vm10, %v14034_v57, %v11145_v31  ;;  %v4995_v0 = vsel %vm2599_vm10, %v4291_v18, %v11146_v50 }
 0x999   :  { %v11154_v47 = vpop.permute.xlu0 %11153  ;;  %v5095_v39 = vsel %vm50_vm9, %v5070_v40, %v11150_v1  ;;  %v5020_v57 = vsel %vm50_vm9, %v4995_v0, %v11151_v32  ;;  %v11462_v32 = vpack.i.bf16 %v4362_v12, %v4389_v62  ;;  %v11467_v1 = vpack.i.bf16 %v4363_v56, %v4414_v28 }
 0x99a   :  { %v11159_v15 = vpop.permute.xlu1 %11158  ;;  %v11156_v25 = vunpack.i.h.bf16 %v11154_v47  ;;  %v11155_v30 = vunpack.i.l.bf16 %v11154_v47  ;;  %v4338_v47 = vld [vmem:[#allocation3 + $0xc6] sm:$0xff] }
 0x99b   :  { %v11161_v19 = vunpack.i.h.bf16 %v11159_v15  ;;  %v11160_v53 = vunpack.i.l.bf16 %v11159_v15  ;;  %11443 = vrot.lane.b32.xlu0 %v11442_v63, %s11837_s19  ;;  %v4390_v15 = vld [vmem:[#allocation3 + $0xd9] sm:$0xff] }
 0x99c   :  { %11448 = vrot.lane.b32.xlu1 %v11447_v17, %s11838_s20  ;;  %v5120_v33 = vsel %vm3379_vm11, %v5095_v39, %v11155_v30  ;;  %v5045_v8 = vsel %vm3379_vm11, %v5020_v57, %v11156_v25  ;;  %v4293_v25 = vld [vmem:[#allocation3 + $0x25] sm:$0xff] }
 0x99d   :  { %v11164_v29 = vpop.permute.xlu0 %11163  ;;  %5296 = vmatprep.mubr.f32.mxu0 %v5120_v33  ;;  %v5071_v2 = vsel %vm2599_vm10, %v14040_v7, %v11160_v53  ;;  %v4996_v60 = vsel %vm2599_vm10, %v4292_v45, %v11161_v19  ;;  %v4440_v7 = vld [vmem:[#allocation3 + $0xdb] sm:$0xff]  ;;  %v11472_v19 = vpack.i.bf16 %v4338_v47, %v4389_v62  ;;  %v11477_v53 = vpack.i.bf16 %v4363_v56, %v4390_v15  ;;  %v4364_v33 = vld [vmem:[#allocation3 + $0xcf] sm:$0xff] }
 0x99e   :  { %v11169_v49 = vpop.permute.xlu1 %11168  ;;  %v11166_v9 = vunpack.i.h.bf16 %v11164_v29  ;;  %v11165_v4 = vunpack.i.l.bf16 %v11164_v29  ;;  %5297 = vmatmul.mubr.f32.gmra.mxu0 %v5045_v8  ;;  %10366 = vmatmul.mubr.msk.f32.gmra.mxu1 %vm2599_vm10, %v4440_v7  ;;  %v4415_v8 = vld [vmem:[#allocation3 + $0xda] sm:$0xff] }
 0x99f   :  { %v11171_v16 = vunpack.i.h.bf16 %v11169_v49  ;;  %v11170_v35 = vunpack.i.l.bf16 %v11169_v49  ;;  %11453 = vrot.lane.b32.xlu0 %v11452_v55, %s11839_s21  ;;  %10469 = vmatprep.mubr.msk.f32.mxu1 %vm11829_vm1, %v14191_v37 }
 0x9a0   :  { %11458 = vrot.lane.b32.xlu1 %v11457_v21, %s11837_s19  ;;  %v5096_v48 = vsel %vm50_vm9, %v5071_v2, %v11165_v4  ;;  %v5021_v50 = vsel %vm50_vm9, %v4996_v60, %v11166_v9  ;;  %v11482_v4 = vpack.i.bf16 %v4364_v33, %v4415_v8  ;;  %v4296_v33 = vld [vmem:[#allocation3 + $0x3d] sm:$0xff] }
 0x9a1   :  { %v11174_v31 = vpop.permute.xlu0 %11173  ;;  %v5121_v5 = vsel %vm3379_vm11, %v5096_v48, %v11170_v35  ;;  %v5046_v18 = vsel %vm3379_vm11, %v5021_v50, %v11171_v16  ;;  %v4294_v16 = vld [vmem:[#allocation3 + $0x2d] sm:$0xff] }
 0x9a2   :  { %v11179_v36 = vpop.permute.xlu1 %11178  ;;  %v11176_v40 = vunpack.i.h.bf16 %v11174_v31  ;;  %v11175_v0 = vunpack.i.l.bf16 %v11174_v31  ;;  %5301 = vmatprep.mubr.f32.mxu0 %v5121_v5 }
 0x9a3   :  { %v11181_v63 = vunpack.i.h.bf16 %v11179_v36  ;;  %v11180_v17 = vunpack.i.l.bf16 %v11179_v36  ;;  %11463 = vrot.lane.b32.xlu0 %v11462_v32, %s11838_s20  ;;  %5302 = vmatmul.mubr.f32.gmra.mxu0 %v5046_v18 }
 0x9a4   :  { %11468 = vrot.lane.b32.xlu1 %v11467_v1, %s11839_s21  ;;  %v5072_v30 = vsel %vm2599_vm10, %v14043_v14, %v11175_v0  ;;  %v4997_v12 = vsel %vm2599_vm10, %v4293_v25, %v11176_v40  ;;  %v4295_v40 = vld [vmem:[#allocation3 + $0x35] sm:$0xff] }
 0x9a5   :  { %v11184_v20 = vpop.permute.xlu0 %11183  ;;  %v5097_v14 = vsel %vm50_vm9, %v5072_v30, %v11180_v17  ;;  %v5022_v55 = vsel %vm50_vm9, %v4997_v12, %v11181_v63 }
 0x9a6   :  { %v11189_v54 = vpop.permute.xlu1 %11188  ;;  %v11186_v39 = vunpack.i.h.bf16 %v11184_v20  ;;  %v11185_v57 = vunpack.i.l.bf16 %v11184_v20 }
 0x9a7   :  { %v11191_v29 = vunpack.i.h.bf16 %v11189_v54  ;;  %v11190_v49 = vunpack.i.l.bf16 %v11189_v54  ;;  %11473 = vrot.lane.b32.xlu0 %v11472_v19, %s11837_s19 }
 0x9a8   :  { %11478 = vrot.lane.b32.xlu1 %v11477_v53, %s11838_s20  ;;  %v5122_v21 = vsel %vm3379_vm11, %v5097_v14, %v11185_v57  ;;  %v5047_v62 = vsel %vm3379_vm11, %v5022_v55, %v11186_v39 }
 0x9a9   :  { %v11194_v9 = vpop.permute.xlu0 %11193  ;;  %5306 = vmatprep.mubr.f32.mxu0 %v5122_v21  ;;  %v4998_v2 = vsel %vm2599_vm10, %v4294_v16, %v11191_v29  ;;  %v5073_v60 = vsel %vm2599_vm10, %v14046_v27, %v11190_v49 }
 0x9aa   :  { %v11199_v37 = vpop.permute.xlu1 %11198  ;;  %v11196_v35 = vunpack.i.h.bf16 %v11194_v9  ;;  %v11195_v56 = vunpack.i.l.bf16 %v11194_v9  ;;  %5307 = vmatmul.mubr.f32.gmra.mxu0 %v5047_v62 }
 0x9ab   :  { %v11201_v28 = vunpack.i.h.bf16 %v11199_v37  ;;  %v11200_v45 = vunpack.i.l.bf16 %v11199_v37  ;;  %11483 = vrot.lane.b32.xlu0 %v11482_v4, %s11839_s21 }
 0x9ac   :  { %v5098_v48 = vsel %vm50_vm9, %v5073_v60, %v11195_v56  ;;  %v5023_v50 = vsel %vm50_vm9, %v4998_v2, %v11196_v35 }
 0x9ad   :  { %v11204_v31 = vpop.permute.xlu0 %11203  ;;  %v5123_v5 = vsel %vm3379_vm11, %v5098_v48, %v11200_v45  ;;  %v5048_v32 = vsel %vm3379_vm11, %v5023_v50, %v11201_v28  ;;  %v4297_v28 = vld [vmem:[#allocation3 + $0x45] sm:$0xff] }
 0x9ae   :  { %v11209_v36 = vpop.permute.xlu1 %11208  ;;  %v11206_v1 = vunpack.i.h.bf16 %v11204_v31  ;;  %v11205_v18 = vunpack.i.l.bf16 %v11204_v31  ;;  %5311 = vmatprep.mubr.f32.mxu0 %v5123_v5 }
 0x9af   :  { %v11211_v0 = vunpack.i.h.bf16 %v11209_v36  ;;  %v11210_v47 = vunpack.i.l.bf16 %v11209_v36  ;;  %5312 = vmatmul.mubr.f32.gmra.mxu0 %v5048_v32 }
 0x9b0   :  { %v4999_v15 = vsel %vm2599_vm10, %v4295_v40, %v11206_v1  ;;  %v5074_v27 = vsel %vm2599_vm10, %v14049_v61, %v11205_v18 }
 0x9b1   :  { %v11214_v7 = vpop.permute.xlu0 %11213  ;;  %v5099_v20 = vsel %vm50_vm9, %v5074_v27, %v11210_v47  ;;  %v5024_v54 = vsel %vm50_vm9, %v4999_v15, %v11211_v0  ;;  %v4298_v27 = vld [vmem:[#allocation3 + $0x4d] sm:$0xff] }
 0x9b2   :  { %v11219_v63 = vpop.permute.xlu1 %11218  ;;  %v11216_v17 = vunpack.i.h.bf16 %v11214_v7  ;;  %v11215_v25 = vunpack.i.l.bf16 %v11214_v7 }
 0x9b3   :  { %v11221_v30 = vunpack.i.h.bf16 %v11219_v63  ;;  %v11220_v12 = vunpack.i.l.bf16 %v11219_v63 }
 0x9b4   :  { %v5124_v19 = vsel %vm3379_vm11, %v5099_v20, %v11215_v25  ;;  %v5049_v53 = vsel %vm3379_vm11, %v5024_v54, %v11216_v17 }
 0x9b5   :  { %v11224_v39 = vpop.permute.xlu0 %11223  ;;  %5316 = vmatprep.mubr.f32.mxu0 %v5124_v19  ;;  %v5000_v14 = vsel %vm2599_vm10, %v4296_v33, %v11221_v30  ;;  %v5075_v55 = vsel %vm2599_vm10, %v14119_v59, %v11220_v12 }
 0x9b6   :  { %v11229_v57 = vpop.permute.xlu1 %11228  ;;  %v11226_v8 = vunpack.i.h.bf16 %v11224_v39  ;;  %v11225_v61 = vunpack.i.l.bf16 %v11224_v39  ;;  %5317 = vmatmul.mubr.f32.gmra.mxu0 %v5049_v53 }
 0x9b7   :  { %v11231_v29 = vunpack.i.h.bf16 %v11229_v57  ;;  %v11230_v49 = vunpack.i.l.bf16 %v11229_v57 }
 0x9b8   :  { %v5100_v21 = vsel %vm50_vm9, %v5075_v55, %v11225_v61  ;;  %v5025_v62 = vsel %vm50_vm9, %v5000_v14, %v11226_v8  ;;  %v4299_v8 = vld [vmem:[#allocation3 + $0x55] sm:$0xff] }
 0x9b9   :  { %v11234_v9 = vpop.permute.xlu0 %11233  ;;  %v5125_v4 = vsel %vm3379_vm11, %v5100_v21, %v11230_v49  ;;  %v5050_v16 = vsel %vm3379_vm11, %v5025_v62, %v11231_v29 }
 0x9ba   :  { %v11239_v37 = vpop.permute.xlu1 %11238  ;;  %v11236_v35 = vunpack.i.h.bf16 %v11234_v9  ;;  %v11235_v56 = vunpack.i.l.bf16 %v11234_v9  ;;  %5321 = vmatprep.mubr.f32.mxu0 %v5125_v4 }
 0x9bb   :  { %v11241_v45 = vunpack.i.h.bf16 %v11239_v37  ;;  %v11240_v2 = vunpack.i.l.bf16 %v11239_v37  ;;  %5322 = vmatmul.mubr.f32.gmra.mxu0 %v5050_v16 }
 0x9bc   :  { %v5001_v60 = vsel %vm2599_vm10, %v4297_v28, %v11236_v35  ;;  %v5076_v59 = vsel %vm2599_vm10, %v14122_v10, %v11235_v56 }
 0x9bd   :  { %v11244_v48 = vpop.permute.xlu0 %11243  ;;  %v5101_v1 = vsel %vm50_vm9, %v5076_v59, %v11240_v2  ;;  %v5026_v18 = vsel %vm50_vm9, %v5001_v60, %v11241_v45  ;;  %v4300_v2 = vld [vmem:[#allocation3 + $0x5d] sm:$0xff] }
 0x9be   :  { %v11249_v50 = vpop.permute.xlu1 %11248  ;;  %v11246_v31 = vunpack.i.h.bf16 %v11244_v48  ;;  %v11245_v36 = vunpack.i.l.bf16 %v11244_v48 }
 0x9bf   :  { %v11251_v5 = vunpack.i.h.bf16 %v11249_v50  ;;  %v11250_v32 = vunpack.i.l.bf16 %v11249_v50 }
 0x9c0   :  { %v5126_v40 = vsel %vm3379_vm11, %v5101_v1, %v11245_v36  ;;  %v5051_v0 = vsel %vm3379_vm11, %v5026_v18, %v11246_v31 }
 0x9c1   :  { %v11254_v47 = vpop.permute.xlu0 %11253  ;;  %5326 = vmatprep.mubr.f32.mxu0 %v5126_v40  ;;  %v5002_v25 = vsel %vm2599_vm10, %v4298_v27, %v11251_v5  ;;  %v5077_v30 = vsel %vm2599_vm10, %v14125_v51, %v11250_v32 }
 0x9c2   :  { %v11259_v15 = vpop.permute.xlu1 %11258  ;;  %v11256_v7 = vunpack.i.h.bf16 %v11254_v47  ;;  %v11255_v10 = vunpack.i.l.bf16 %v11254_v47  ;;  %5327 = vmatmul.mubr.f32.gmra.mxu0 %v5051_v0 }
 0x9c3   :  { %v11261_v63 = vunpack.i.h.bf16 %v11259_v15  ;;  %v11260_v17 = vunpack.i.l.bf16 %v11259_v15  ;;  %v4301_v15 = vld [vmem:[#allocation3 + $0x65] sm:$0xff] }
 0x9c4   :  { %v5102_v12 = vsel %vm50_vm9, %v5077_v30, %v11255_v10  ;;  %v5027_v20 = vsel %vm50_vm9, %v5002_v25, %v11256_v7 }
 0x9c5   :  { %v11264_v54 = vpop.permute.xlu0 %11263  ;;  %v5127_v53 = vsel %vm3379_vm11, %v5102_v12, %v11260_v17  ;;  %v5052_v39 = vsel %vm3379_vm11, %v5027_v20, %v11261_v63 }
 0x9c6   :  { %v11269_v19 = vpop.permute.xlu1 %11268  ;;  %v11266_v57 = vunpack.i.h.bf16 %v11264_v54  ;;  %v11265_v33 = vunpack.i.l.bf16 %v11264_v54  ;;  %5331 = vmatprep.mubr.f32.mxu0 %v5127_v53 }
 0x9c7   :  { %v11271_v61 = vunpack.i.h.bf16 %v11269_v19  ;;  %v11270_v29 = vunpack.i.l.bf16 %v11269_v19  ;;  %5332 = vmatmul.mubr.f32.gmra.mxu0 %v5052_v39 }
 0x9c8   :  { %v5003_v49 = vsel %vm2599_vm10, %v4299_v8, %v11266_v57  ;;  %v5078_v51 = vsel %vm2599_vm10, %v14128_v13, %v11265_v33 }
 0x9c9   :  { %v11274_v14 = vpop.permute.xlu0 %11273  ;;  %v5103_v4 = vsel %vm50_vm9, %v5078_v51, %v11270_v29  ;;  %v5028_v16 = vsel %vm50_vm9, %v5003_v49, %v11271_v61  ;;  %v4302_v61 = vld [vmem:[#allocation3 + $0x6d] sm:$0xff] }
 0x9ca   :  { %v11279_v55 = vpop.permute.xlu1 %11278  ;;  %v11276_v21 = vunpack.i.h.bf16 %v11274_v14  ;;  %v11275_v62 = vunpack.i.l.bf16 %v11274_v14 }
 0x9cb   :  { %v11281_v9 = vunpack.i.h.bf16 %v11279_v55  ;;  %v11280_v37 = vunpack.i.l.bf16 %v11279_v55 }
 0x9cc   :  { %v5128_v35 = vsel %vm3379_vm11, %v5103_v4, %v11275_v62  ;;  %v5053_v56 = vsel %vm3379_vm11, %v5028_v16, %v11276_v21 }
 0x9cd   :  { %v11284_v28 = vpop.permute.xlu0 %11283  ;;  %5336 = vmatprep.mubr.f32.mxu0 %v5128_v35  ;;  %v5004_v50 = vsel %vm2599_vm10, %v4300_v2, %v11281_v9  ;;  %v5079_v31 = vsel %vm2599_vm10, %v14131_v26, %v11280_v37 }
 0x9ce   :  { %v11289_v45 = vpop.permute.xlu1 %11288  ;;  %v11286_v60 = vunpack.i.h.bf16 %v11284_v28  ;;  %v11285_v13 = vunpack.i.l.bf16 %v11284_v28  ;;  %5337 = vmatmul.mubr.f32.gmra.mxu0 %v5053_v56 }
 0x9cf   :  { %v11291_v59 = vunpack.i.h.bf16 %v11289_v45  ;;  %v11290_v48 = vunpack.i.l.bf16 %v11289_v45 }
 0x9d0   :  { %v5104_v36 = vsel %vm50_vm9, %v5079_v31, %v11285_v13  ;;  %v5029_v5 = vsel %vm50_vm9, %v5004_v50, %v11286_v60  ;;  %v4303_v13 = vld [vmem:[#allocation3 + $0x75] sm:$0xff] }
 0x9d1   :  { %v11294_v32 = vpop.permute.xlu0 %11293  ;;  %v5129_v18 = vsel %vm3379_vm11, %v5104_v36, %v11290_v48  ;;  %v5054_v40 = vsel %vm3379_vm11, %v5029_v5, %v11291_v59 }
 0x9d2   :  { %v11299_v1 = vpop.permute.xlu1 %11298  ;;  %v11296_v0 = vunpack.i.h.bf16 %v11294_v32  ;;  %v11295_v47 = vunpack.i.l.bf16 %v11294_v32  ;;  %5341 = vmatprep.mubr.f32.mxu0 %v5129_v18 }
 0x9d3   :  { %v11301_v27 = vunpack.i.h.bf16 %v11299_v1  ;;  %v11300_v7 = vunpack.i.l.bf16 %v11299_v1  ;;  %5342 = vmatmul.mubr.f32.gmra.mxu0 %v5054_v40 }
 0x9d4   :  { %v5005_v10 = vsel %vm2599_vm10, %v4301_v15, %v11296_v0  ;;  %v5080_v26 = vsel %vm2599_vm10, %v14134_v24, %v11295_v47 }
 0x9d5   :  { %v14493_v63 = vpop.f32.mrf.mxu1  ;;  %v11304_v17 = vpop.permute.xlu0 %11303  ;;  %v5105_v53 = vsel %vm50_vm9, %v5080_v26, %v11300_v7  ;;  %v5030_v39 = vsel %vm50_vm9, %v5005_v10, %v11301_v27 }
 0x9d6   :  { %v11306_v25 = vunpack.i.h.bf16 %v11304_v17  ;;  %v11305_v30 = vunpack.i.l.bf16 %v11304_v17  ;;  %v11309_v12 = vpop.permute.xlu1 %11308  ;;  %v4304_v17 = vld [vmem:[#allocation3 + $0x7d] sm:$0xff] }
 0x9d7   :  { %v11311_v20 = vunpack.i.h.bf16 %v11309_v12  ;;  %v11310_v54 = vunpack.i.l.bf16 %v11309_v12  ;;  %v10295_v19 = vpop.f32.mrf.mxu1 }
 0x9d8   :  { %v5130_v57 = vsel %vm3379_vm11, %v5105_v53, %v11305_v30  ;;  %v5055_v33 = vsel %vm3379_vm11, %v5030_v39, %v11306_v25 }
 0x9d9   :  { %v14499_v8 = vpop.f32.mrf.mxu1  ;;  %v11314_v24 = vpop.permute.xlu0 %11313  ;;  %5346 = vmatprep.mubr.f32.mxu0 %v5130_v57  ;;  %v5006_v14 = vsel %vm2599_vm10, %v4302_v61, %v11311_v20  ;;  %v5081_v9 = vsel %vm2599_vm10, %v14137_v11, %v11310_v54 }
 0x9da   :  { %v11316_v29 = vunpack.i.h.bf16 %v11314_v24  ;;  %v11315_v49 = vunpack.i.l.bf16 %v11314_v24  ;;  %v11319_v51 = vpop.permute.xlu1 %11318  ;;  %5347 = vmatmul.mubr.f32.gmra.mxu0 %v5055_v33 }
 0x9db   :  { %v11321_v55 = vunpack.i.h.bf16 %v11319_v51  ;;  %v11320_v21 = vunpack.i.l.bf16 %v11319_v51  ;;  %v10298_v62 = vpop.f32.mrf.mxu1 }
 0x9dc   :  { %v5106_v37 = vsel %vm50_vm9, %v5081_v9, %v11315_v49  ;;  %v5031_v4 = vsel %vm50_vm9, %v5006_v14, %v11316_v29 }
 0x9dd   :  { %v14506_v16 = vpop.f32.mrf.mxu1  ;;  %v11324_v35 = vpop.permute.xlu0 %11323  ;;  %v5131_v56 = vsel %vm3379_vm11, %v5106_v37, %v11320_v21  ;;  %v5056_v28 = vsel %vm3379_vm11, %v5031_v4, %v11321_v55  ;;  %v4305_v21 = vld [vmem:[#allocation3 + $0x85] sm:$0xff] }
 0x9de   :  { %v11326_v45 = vunpack.i.h.bf16 %v11324_v35  ;;  %v11325_v2 = vunpack.i.l.bf16 %v11324_v35  ;;  %v11329_v60 = vpop.permute.xlu1 %11328  ;;  %5351 = vmatprep.mubr.f32.mxu0 %v5131_v56 }
 0x9df   :  { %v11331_v59 = vunpack.i.h.bf16 %v11329_v60  ;;  %v11330_v48 = vunpack.i.l.bf16 %v11329_v60  ;;  %5352 = vmatmul.mubr.f32.gmra.mxu0 %v5056_v28  ;;  %v10301_v11 = vpop.f32.mrf.mxu1 }
 0x9e0   :  { %v5007_v50 = vsel %vm2599_vm10, %v4303_v13, %v11326_v45  ;;  %v5082_v31 = vsel %vm2599_vm10, %v14140_v34, %v11325_v2 }
 0x9e1   :  { %v14513_v36 = vpop.f32.mrf.mxu1  ;;  %v11334_v5 = vpop.permute.xlu0 %11333  ;;  %v5107_v15 = vsel %vm50_vm9, %v5082_v31, %v11330_v48  ;;  %v5032_v27 = vsel %vm50_vm9, %v5007_v50, %v11331_v59 }
 0x9e2   :  { %v11336_v32 = vunpack.i.h.bf16 %v11334_v5  ;;  %v11335_v1 = vunpack.i.l.bf16 %v11334_v5  ;;  %v11339_v18 = vpop.permute.xlu1 %11338 }
 0x9e3   :  { %v11341_v40 = vunpack.i.h.bf16 %v11339_v18  ;;  %v11340_v0 = vunpack.i.l.bf16 %v11339_v18  ;;  %v10304_v47 = vpop.f32.mrf.mxu1 }
 0x9e4   :  { %v5132_v7 = vsel %vm3379_vm11, %v5107_v15, %v11335_v1  ;;  %v5057_v10 = vsel %vm3379_vm11, %v5032_v27, %v11336_v32  ;;  %v4306_v32 = vld [vmem:[#allocation3 + $0x8d] sm:$0xff] }
 0x9e5   :  { %v14519_v26 = vpop.f32.mrf.mxu1  ;;  %v11344_v34 = vpop.permute.xlu0 %11343  ;;  %5356 = vmatprep.mubr.f32.mxu0 %v5132_v7  ;;  %v5008_v20 = vsel %vm2599_vm10, %v4304_v17, %v11341_v40  ;;  %v5083_v39 = vsel %vm2599_vm10, %v14204_v6, %v11340_v0 }
 0x9e6   :  { %v11346_v25 = vunpack.i.h.bf16 %v11344_v34  ;;  %v11345_v30 = vunpack.i.l.bf16 %v11344_v34  ;;  %v11349_v12 = vpop.permute.xlu1 %11348  ;;  %5357 = vmatmul.mubr.f32.gmra.mxu0 %v5057_v10 }
 0x9e7   :  { %v11351_v54 = vunpack.i.h.bf16 %v11349_v12  ;;  %v11350_v19 = vunpack.i.l.bf16 %v11349_v12  ;;  %v10307_v53 = vpop.f32.mrf.mxu1 }
 0x9e8   :  { %v5108_v57 = vsel %vm50_vm9, %v5083_v39, %v11345_v30  ;;  %v5033_v33 = vsel %vm50_vm9, %v5008_v20, %v11346_v25  ;;  %v4307_v53 = vld [vmem:[#allocation3 + $0x95] sm:$0xff] }
 0x9e9   :  { %v14526_v24 = vpop.f32.mrf.mxu1  ;;  %v11354_v61 = vpop.permute.xlu0 %11353  ;;  %v5133_v29 = vsel %vm3379_vm11, %v5108_v57, %v11350_v19  ;;  %v5058_v49 = vsel %vm3379_vm11, %v5033_v33, %v11351_v54 }
 0x9ea   :  { %v11356_v51 = vunpack.i.h.bf16 %v11354_v61  ;;  %v11355_v14 = vunpack.i.l.bf16 %v11354_v61  ;;  %v11359_v55 = vpop.permute.xlu1 %11358  ;;  %5361 = vmatprep.mubr.f32.mxu0 %v5133_v29 }
 0x9eb   :  { %v11361_v62 = vunpack.i.h.bf16 %v11359_v55  ;;  %v11360_v9 = vunpack.i.l.bf16 %v11359_v55  ;;  %5362 = vmatmul.mubr.f32.gmra.mxu0 %v5058_v49  ;;  %v10310_v6 = vpop.f32.mrf.mxu1 }
 0x9ec   :  { %v5009_v37 = vsel %vm2599_vm10, %v4305_v21, %v11356_v51  ;;  %v5084_v4 = vsel %vm2599_vm10, %v14211_v38, %v11355_v14 }
 0x9ed   :  { %v14533_v35 = vpop.f32.mrf.mxu1  ;;  %v11364_v56 = vpop.permute.xlu0 %11363  ;;  %v5109_v48 = vsel %vm50_vm9, %v5084_v4, %v11360_v9  ;;  %v5034_v11 = vsel %vm50_vm9, %v5009_v37, %v11361_v62 }
 0x9ee   :  { %v11366_v28 = vunpack.i.h.bf16 %v11364_v56  ;;  %v11365_v45 = vunpack.i.l.bf16 %v11364_v56  ;;  %v11369_v2 = vpop.permute.xlu1 %11368 }
 0x9ef   :  { %v11371_v60 = vunpack.i.h.bf16 %v11369_v2  ;;  %v11370_v13 = vunpack.i.l.bf16 %v11369_v2  ;;  %v10313_v59 = vpop.f32.mrf.mxu1 }
 0x9f0   :  { %v5134_v50 = vsel %vm3379_vm11, %v5109_v48, %v11365_v45  ;;  %v5059_v31 = vsel %vm3379_vm11, %v5034_v11, %v11366_v28  ;;  %v4308_v45 = vld [vmem:[#allocation3 + $0x9d] sm:$0xff] }
 0x9f1   :  { %v14539_v5 = vpop.f32.mrf.mxu1  ;;  %v11374_v38 = vpop.permute.xlu0 %11373  ;;  %5366 = vmatprep.mubr.f32.mxu0 %v5134_v50  ;;  %v5010_v0 = vsel %vm2599_vm10, %v4306_v32, %v11371_v60  ;;  %v5085_v7 = vsel %vm2599_vm10, %v14214_v22, %v11370_v13 }
 0x9f2   :  { %v11376_v1 = vunpack.i.h.bf16 %v11374_v38  ;;  %v11375_v18 = vunpack.i.l.bf16 %v11374_v38  ;;  %v11379_v40 = vpop.permute.xlu1 %11378  ;;  %5367 = vmatmul.mubr.f32.gmra.mxu0 %v5059_v31 }
 0x9f3   :  { %v11381_v47 = vunpack.i.h.bf16 %v11379_v40  ;;  %v11380_v15 = vunpack.i.l.bf16 %v11379_v40  ;;  %v10316_v27 = vpop.f32.mrf.mxu1 }
 0x9f4   :  { %v5110_v10 = vsel %vm50_vm9, %v5085_v7, %v11375_v18  ;;  %v5035_v34 = vsel %vm50_vm9, %v5010_v0, %v11376_v1  ;;  %v4309_v7 = vld [vmem:[#allocation3 + $0xa5] sm:$0xff] }
 0x9f5   :  { %v14546_v17 = vpop.f32.mrf.mxu1  ;;  %v11384_v25 = vpop.permute.xlu0 %11383  ;;  %v5135_v30 = vsel %vm3379_vm11, %v5110_v10, %v11380_v15  ;;  %v5060_v12 = vsel %vm3379_vm11, %v5035_v34, %v11381_v47 }
 0x9f6   :  { %v11386_v20 = vunpack.i.h.bf16 %v11384_v25  ;;  %v11385_v54 = vunpack.i.l.bf16 %v11384_v25  ;;  %v11389_v19 = vpop.permute.xlu1 %11388  ;;  %5371 = vmatprep.mubr.f32.mxu0 %v5135_v30 }
 0x9f7   :  { %v11391_v39 = vunpack.i.h.bf16 %v11389_v19  ;;  %v11390_v57 = vunpack.i.l.bf16 %v11389_v19  ;;  %5372 = vmatmul.mubr.f32.gmra.mxu0 %v5060_v12  ;;  %v10319_v22 = vpop.f32.mrf.mxu1 }
 0x9f8   :  { %v5011_v33 = vsel %vm2599_vm10, %v4307_v53, %v11386_v20  ;;  %v5086_v61 = vsel %vm2599_vm10, %v14234_v44, %v11385_v54 }
 0x9f9   :  { %v14553_v29 = vpop.f32.mrf.mxu1  ;;  %v11394_v49 = vpop.permute.xlu0 %11393  ;;  %v5111_v6 = vsel %vm50_vm9, %v5086_v61, %v11390_v57  ;;  %v5036_v37 = vsel %vm50_vm9, %v5011_v33, %v11391_v39 }
 0x9fa   :  { %v11396_v51 = vunpack.i.h.bf16 %v11394_v49  ;;  %v11395_v14 = vunpack.i.l.bf16 %v11394_v49  ;;  %v11399_v55 = vpop.permute.xlu1 %11398 }
 0x9fb   :  { %v11401_v21 = vunpack.i.h.bf16 %v11399_v55  ;;  %v11400_v62 = vunpack.i.l.bf16 %v11399_v55  ;;  %v10322_v9 = vpop.f32.mrf.mxu1  ;;  %v4310_v55 = vld [vmem:[#allocation3 + $0xad] sm:$0xff] }
 0x9fc   :  { %v5136_v4 = vsel %vm3379_vm11, %v5111_v6, %v11395_v14  ;;  %v5061_v56 = vsel %vm3379_vm11, %v5036_v37, %v11396_v51 }
 0x9fd   :  { %v14559_v28 = vpop.f32.mrf.mxu1  ;;  %v11404_v44 = vpop.permute.xlu0 %11403  ;;  %5376 = vmatprep.mubr.f32.mxu0 %v5136_v4  ;;  %v5012_v59 = vsel %vm2599_vm10, %v4308_v45, %v11401_v21  ;;  %v5087_v31 = vsel %vm2599_vm10, %v14237_v52, %v11400_v62 }
 0x9fe   :  { %v11406_v2 = vunpack.i.h.bf16 %v11404_v44  ;;  %v11405_v60 = vunpack.i.l.bf16 %v11404_v44  ;;  %v11409_v13 = vpop.permute.xlu1 %11408  ;;  %5377 = vmatmul.mubr.f32.gmra.mxu0 %v5061_v56 }
 0x9ff   :  { %v11411_v48 = vunpack.i.h.bf16 %v11409_v13  ;;  %v11410_v11 = vunpack.i.l.bf16 %v11409_v13  ;;  %v10325_v50 = vpop.f32.mrf.mxu1 }
 0xa00   :  { %v5112_v38 = vsel %vm50_vm9, %v5087_v31, %v11405_v60  ;;  %v5037_v32 = vsel %vm50_vm9, %v5012_v59, %v11406_v2 }
 0xa01   :  { %v14566_v1 = vpop.f32.mrf.mxu1  ;;  %v11414_v18 = vpop.permute.xlu0 %11413  ;;  %v5137_v40 = vsel %vm3379_vm11, %v5112_v38, %v11410_v11  ;;  %v5062_v0 = vsel %vm3379_vm11, %v5037_v32, %v11411_v48  ;;  %v4311_v38 = vld [vmem:[#allocation3 + $0xb5] sm:$0xff] }
 0xa02   :  { %v11416_v47 = vunpack.i.h.bf16 %v11414_v18  ;;  %v11415_v15 = vunpack.i.l.bf16 %v11414_v18  ;;  %v11419_v27 = vpop.permute.xlu1 %11418  ;;  %5381 = vmatprep.mubr.f32.mxu0 %v5137_v40 }
 0xa03   :  { %v11421_v10 = vunpack.i.h.bf16 %v11419_v27  ;;  %v11420_v34 = vunpack.i.l.bf16 %v11419_v27  ;;  %5382 = vmatmul.mubr.f32.gmra.mxu0 %v5062_v0  ;;  %v10328_v52 = vpop.f32.mrf.mxu1 }
 0xa04   :  { %v5013_v25 = vsel %vm2599_vm10, %v4309_v7, %v11416_v47  ;;  %v5088_v30 = vsel %vm2599_vm10, %v14256_v43, %v11415_v15 }
 0xa05   :  { %v14573_v12 = vpop.f32.mrf.mxu1  ;;  %v11424_v20 = vpop.permute.xlu0 %11423  ;;  %v5113_v33 = vsel %vm50_vm9, %v5088_v30, %v11420_v34  ;;  %v5038_v61 = vsel %vm50_vm9, %v5013_v25, %v11421_v10 }
 0xa06   :  { %v11426_v54 = vunpack.i.h.bf16 %v11424_v20  ;;  %v11425_v19 = vunpack.i.l.bf16 %v11424_v20  ;;  %v11429_v53 = vpop.permute.xlu1 %11428 }
 0xa07   :  { %v11431_v39 = vunpack.i.h.bf16 %v11429_v53  ;;  %v11430_v57 = vunpack.i.l.bf16 %v11429_v53  ;;  %v10331_v22 = vpop.f32.mrf.mxu1 }
 0xa08   :  { %v5138_v49 = vsel %vm3379_vm11, %v5113_v33, %v11425_v19  ;;  %v5063_v51 = vsel %vm3379_vm11, %v5038_v61, %v11426_v54 }
 0xa09   :  { %v14579_v14 = vpop.f32.mrf.mxu1  ;;  %v11434_v43 = vpop.permute.xlu0 %11433  ;;  %5386 = vmatprep.mubr.f32.mxu0 %v5138_v49  ;;  %v5014_v6 = vsel %vm2599_vm10, %v4310_v55, %v11431_v39  ;;  %v5089_v44 = vsel %vm2599_vm10, %v14261_v58, %v11430_v57  ;;  %v4312_v39 = vld [vmem:[#allocation3 + $0xbd] sm:$0xff] }
 0xa0a   :  { %v11436_v21 = vunpack.i.h.bf16 %v11434_v43  ;;  %v11435_v62 = vunpack.i.l.bf16 %v11434_v43  ;;  %v11439_v9 = vpop.permute.xlu1 %11438  ;;  %5387 = vmatmul.mubr.f32.gmra.mxu0 %v5063_v51 }
 0xa0b   :  { %v11441_v37 = vunpack.i.h.bf16 %v11439_v9  ;;  %v11440_v4 = vunpack.i.l.bf16 %v11439_v9  ;;  %v10334_v56 = vpop.f32.mrf.mxu1 }
 0xa0c   :  { %v5114_v45 = vsel %vm50_vm9, %v5089_v44, %v11435_v62  ;;  %v5039_v2 = vsel %vm50_vm9, %v5014_v6, %v11436_v21 }
 0xa0d   :  { %v14586_v60 = vpop.f32.mrf.mxu1  ;;  %v11444_v13 = vpop.permute.xlu0 %11443  ;;  %v5139_v59 = vsel %vm3379_vm11, %v5114_v45, %v11440_v4  ;;  %v5064_v48 = vsel %vm3379_vm11, %v5039_v2, %v11441_v37  ;;  %v4313_v2 = vld [vmem:[#allocation3 + $0xc5] sm:$0xff] }
 0xa0e   :  { %v11446_v11 = vunpack.i.h.bf16 %v11444_v13  ;;  %v11445_v50 = vunpack.i.l.bf16 %v11444_v13  ;;  %v11449_v31 = vpop.permute.xlu1 %11448  ;;  %5391 = vmatprep.mubr.f32.mxu0 %v5139_v59 }
 0xa0f   :  { %v11451_v32 = vunpack.i.h.bf16 %v11449_v31  ;;  %v11450_v18 = vunpack.i.l.bf16 %v11449_v31  ;;  %5392 = vmatmul.mubr.f32.gmra.mxu0 %v5064_v48  ;;  %v10337_v58 = vpop.f32.mrf.mxu1 }
 0xa10   :  { %v5015_v40 = vsel %vm2599_vm10, %v4311_v38, %v11446_v11  ;;  %v5090_v0 = vsel %vm2599_vm10, %v14264_v41, %v11445_v50 }
 0xa11   :  { %v14593_v47 = vpop.f32.mrf.mxu1  ;;  %v11454_v15 = vpop.permute.xlu0 %11453  ;;  %v5115_v30 = vsel %vm50_vm9, %v5090_v0, %v11450_v18  ;;  %v5040_v20 = vsel %vm50_vm9, %v5015_v40, %v11451_v32 }
 0xa12   :  { %v11456_v27 = vunpack.i.h.bf16 %v11454_v15  ;;  %v11455_v7 = vunpack.i.l.bf16 %v11454_v15  ;;  %v11459_v10 = vpop.permute.xlu1 %11458 }
 0xa13   :  { %v11461_v34 = vunpack.i.h.bf16 %v11459_v10  ;;  %v11460_v52 = vunpack.i.l.bf16 %v11459_v10  ;;  %v10340_v25 = vpop.f32.mrf.mxu1 }
 0xa14   :  { %v5140_v54 = vsel %vm3379_vm11, %v5115_v30, %v11455_v7  ;;  %v5065_v19 = vsel %vm3379_vm11, %v5040_v20, %v11456_v27 }
 0xa15   :  { %v14599_v53 = vpop.f32.mrf.mxu1  ;;  %v11464_v41 = vpop.permute.xlu0 %11463  ;;  %5396 = vmatprep.mubr.f32.mxu0 %v5140_v54  ;;  %v5016_v61 = vsel %vm2599_vm10, %v4312_v39, %v11461_v34  ;;  %v5091_v55 = vsel %vm2599_vm10, %v14271_v3, %v11460_v52 }
 0xa16   :  { %v11466_v57 = vunpack.i.h.bf16 %v11464_v41  ;;  %v11465_v22 = vunpack.i.l.bf16 %v11464_v41  ;;  %v11469_v33 = vpop.permute.xlu1 %11468  ;;  %5397 = vmatmul.mubr.f32.gmra.mxu0 %v5065_v19 }
 0xa17   :  { %v11471_v49 = vunpack.i.h.bf16 %v11469_v33  ;;  %v11470_v51 = vunpack.i.l.bf16 %v11469_v33  ;;  %v10343_v43 = vpop.f32.mrf.mxu1 }
 0xa18   :  { %v5116_v21 = vsel %vm50_vm9, %v5091_v55, %v11465_v22  ;;  %v5041_v62 = vsel %vm50_vm9, %v5016_v61, %v11466_v57 }
 0xa19   :  { %v14606_v9 = vpop.f32.mrf.mxu1  ;;  %v11474_v6 = vpop.permute.xlu0 %11473  ;;  %v5141_v37 = vsel %vm3379_vm11, %v5116_v21, %v11470_v51  ;;  %v5066_v4 = vsel %vm3379_vm11, %v5041_v62, %v11471_v49 }
 0xa1a   :  { %v11476_v56 = vunpack.i.h.bf16 %v11474_v6  ;;  %v11475_v44 = vunpack.i.l.bf16 %v11474_v6  ;;  %v11479_v45 = vpop.permute.xlu1 %11478  ;;  %5401 = vmatprep.mubr.f32.mxu0 %v5141_v37 }
 0xa1b   :  { %v11481_v13 = vunpack.i.h.bf16 %v11479_v45  ;;  %v11480_v59 = vunpack.i.l.bf16 %v11479_v45  ;;  %5402 = vmatmul.mubr.f32.gmra.mxu0 %v5066_v4  ;;  %v10346_v3 = vpop.f32.mrf.mxu1 }
 0xa1c   :  { %v5017_v48 = vsel %vm2599_vm10, %v4313_v2, %v11476_v56  ;;  %v5092_v11 = vsel %vm2599_vm10, %v14028_v42, %v11475_v44  ;;  %v14621_v42 = vld [vmem:[#allocation4] sm:$0xff] }
 0xa1d   :  { %v14613_v50 = vpop.f32.mrf.mxu1  ;;  %v11484_v31 = vpop.permute.xlu0 %11483  ;;  %v5117_v58 = vsel %vm50_vm9, %v5092_v11, %v11480_v59  ;;  %v5042_v40 = vsel %vm50_vm9, %v5017_v48, %v11481_v13 }
 0xa1e   :  { %v11486_v38 = vunpack.i.h.bf16 %v11484_v31  ;;  %v11485_v32 = vunpack.i.l.bf16 %v11484_v31 }
 0xa1f   :  { %v10349_v18 = vpop.f32.mrf.mxu1 }
 0xa20   :  { %v5142_v0 = vsel %vm3379_vm11, %v5117_v58, %v11485_v32  ;;  %v5067_v15 = vsel %vm3379_vm11, %v5042_v40, %v11486_v38  ;;  %v5929_v38 = vld [vmem:[#allocation5 + $0x6d8] sm:$0xff]  ;;  %v5928_v32 = vld [vmem:[#allocation5 + $0x6d0] sm:$0xff]  ;;  %v5927_v58 = vld [vmem:[#allocation5 + $0x6c8] sm:$0xff]  ;;  %v5145_v40 = vsub.s32 3, %v13580_v23 }
 0xa21   :  { %5406 = vmatprep.mubr.f32.mxu0 %v5142_v0  ;;  %v14619_v27 = vpop.f32.mrf.mxu1  ;;  %10369 = vmatpush3.msra.mxu0 %v5929_v38  ;;  %v5926_v0 = vld [vmem:[#allocation5 + $0x6c0] sm:$0xff] }
 0xa22   :  { %5407 = vmatmul.mubr.f32.gmra.mxu0 %v5067_v15  ;;  %10370 = vmatprep.subr.mxu0 %v14621_v42 }
 0xa23   :  { %v10352_v7 = vpop.f32.mrf.mxu1  ;;  %10376 = vmatprep.mubr.msk.f32.mxu0 %vm11829_vm1, %v14621_v42  ;;  %10371 = vmatpush3.msra.mxu0 %v5928_v32 }
 0xa24   :  { %10372 = vmatprep.subr.mxu0 %v14621_v42  ;;  %v14647_v7 = vld [vmem:[#allocation5 + $0xb38] sm:$0x3f] }
 0xa25   :  { %v14625_v10 = vpop.f32.mrf.mxu1  ;;  %10373 = vmatpush3.msra.mxu0 %v5927_v58  ;;  %v16158_v58 = vld [vmem:[#allocation17_spill] sm:$0xff] }
 0xa26   :  { %10374 = vmatprep.subr.mxu0 %v14621_v42 }
 0xa27   :  { %v10355_v34 = vpop.f32.mrf.mxu1  ;;  %10375 = vmatpush3.msra.mxu0 %v5926_v0 }
 0xa28   :  { %v14652_v34 = vrot.slane %v14647_v7, %v5145_v40 }
 0xa29   :  { %v14627_v52 = vpop.f32.mrf.mxu1 }
 0xa2b   :  { %v10358_v25 = vpop.f32.mrf.mxu1 }
 0xa2d   :  { %v14629_v30 = vpop.f32.mrf.mxu1 }
 0xa2f   :  { %v10361_v20 = vpop.f32.mrf.mxu1 }
 0xa31   :  { %v14631_v54 = vpop.f32.mrf.mxu1 }
 0xa33   :  { %v10364_v19 = vpop.f32.mrf.mxu1 }
 0xa52   :  { %v5288_v41 = vpop.f32.mrf.mxu0 }
 0xa53   :  { %v5289_v19 = vadd.f32 %v5288_v41, %v14652_v34  ;;  %v16156_v41 = vld [vmem:[#allocation15_spill] sm:$0xff] }
 0xa54   :  { %v5290_v39 = vpop.f32.mrf.mxu0 }
 0xa57   :  { %v5293_v57 = vpop.f32.mrf.mxu0 }
 0xa58   :  { %v5294_v39 = vadd.f32 %v5293_v57, %v14652_v34 }
 0xa59   :  { %v5295_v22 = vpop.f32.mrf.mxu0 }
 0xa5e   :  { %v5298_v33 = vpop.f32.mrf.mxu0  ;;  %v14633_v43 = vpop.f32.mrf.mxu1 }
 0xa60   :  { %v5300_v61 = vpop.f32.mrf.mxu0  ;;  %v10367_v21 = vpop.f32.mrf.mxu1 }
 0xa61   :  { %v5299_v61 = vadd.f32 %v5298_v33, %v14652_v34  ;;  %v5484_v21 = vadd.f32 %v14499_v8, %v5294_v39 }
 0xa63   :  { %v5303_v49 = vpop.f32.mrf.mxu0 }
 0xa65   :  { %v5305_v51 = vpop.f32.mrf.mxu0 }
 0xa66   :  { %v5479_v51 = vadd.f32 %v14493_v63, %v5289_v19  ;;  %v16157_v63 = vld [vmem:[#allocation16_spill] sm:$0xff] }
 0xa6a   :  { %v5308_v55 = vpop.f32.mrf.mxu0 }
 0xa6c   :  { %v5310_v62 = vpop.f32.mrf.mxu0 }
 0xa6d   :  { %v5304_v62 = vadd.f32 %v5303_v49, %v14652_v34 }
 0xa6f   :  { %v5313_v6 = vpop.f32.mrf.mxu0  ;;  %v5494_v57 = vadd.f32 %v14513_v36, %v5304_v62  ;;  %v16159_v36 = vld [vmem:[#allocation18_spill] sm:$0xff] }
 0xa70   :  { %v5314_v33 = vadd.f32 %v5313_v6, %v14652_v34 }
 0xa71   :  { %v5315_v37 = vpop.f32.mrf.mxu0  ;;  %v5605_v0 = vadd.f32 %v5494_v57, %v16158_v58 }
 0xa72   :  { %v5489_v37 = vadd.f32 %v14506_v16, %v5299_v61 }
 0xa73   :  { %v5630_v62 = vmax.f32 %v5605_v0, 0.0 }
 0xa74   :  { %v5604_v32 = vadd.f32 %v5489_v37, %v16157_v63  ;;  %v16160_v37 = vld [vmem:[#allocation19_spill] sm:$0xff] }
 0xa76   :  { %v5318_v4 = vpop.f32.mrf.mxu0  ;;  %v5629_v39 = vmax.f32 %v5604_v32, 0.0 }
 0xa77   :  { %v5319_v49 = vadd.f32 %v5318_v4, %v14652_v34  ;;  %v11718_v4 = vld [vmem:[#allocation5 + $0x8b0] sm:$0xff] }
 0xa78   :  { %v5320_v56 = vpop.f32.mrf.mxu0 }
 0xa79   :  { %v5309_v56 = vadd.f32 %v5308_v55, %v14652_v34  ;;  %v5509_v6 = vadd.f32 %v14533_v35, %v5319_v49  ;;  %v16161_v35 = vld [vmem:[#allocation20_spill] sm:$0xff] }
 0xa7b   :  { %v5323_v44 = vpop.f32.mrf.mxu0  ;;  %v5499_v8 = vadd.f32 %v14519_v26, %v5309_v56  ;;  %v5608_v57 = vadd.f32 %v5509_v6, %v16161_v35 }
 0xa7c   :  { %v5324_v61 = vadd.f32 %v5323_v44, %v14652_v34 }
 0xa7d   :  { %v5325_v45 = vpop.f32.mrf.mxu0  ;;  %v5633_v0 = vmax.f32 %v5608_v57, 0.0 }
 0xa7e   :  { %v5514_v44 = vadd.f32 %v14539_v5, %v5324_v61 }
 0xa82   :  { %v5328_v2 = vpop.f32.mrf.mxu0 }
 0xa84   :  { %v5330_v13 = vpop.f32.mrf.mxu0 }
 0xa85   :  { %v16155_v13 = vld [vmem:[#allocation14_spill] sm:$0xff] }
 0xa87   :  { %v14635_v59 = vpop.f32.mrf.mxu0 }
 0xa89   :  { %v5335_v3 = vpop.f32.mrf.mxu0 }
 0xa8a   :  { %v5602_v3 = vadd.f32 %v5479_v51, %v16155_v13  ;;  %v11717_v51 = vld [vmem:[#allocation5 + $0x8a8] sm:$0xff]  ;;  %v5329_v13 = vadd.f32 %v5328_v2, %v14652_v34  ;;  %v11720_v2 = vld [vmem:[#allocation5 + $0x8c0] sm:$0xff] }
 0xa8b   :  { %v14698_v32 = vmul.f32 %v11720_v2, %v5630_v62  ;;  %v11722_v62 = vld [vmem:[#allocation5 + $0x8d0] sm:$0xff] }
 0xa8c   :  { %v5627_v55 = vmax.f32 %v5602_v3, 0.0 }
 0xa8d   :  { %v5682_v35 = vsel %vm2599_vm10, %v14698_v32, 0.0 }
 0xa8e   :  { %v14637_v48 = vpop.f32.mrf.mxu0  ;;  %v14680_v26 = vmul.f32 %v11717_v51, %v5627_v55  ;;  %v5519_v55 = vadd.f32 %v14546_v17, %v5329_v13  ;;  %v5736_v51 = vmul.f32 %v14698_v32, %v14698_v32 }
 0xa90   :  { %v5340_v11 = vpop.f32.mrf.mxu0  ;;  %v5677_v17 = vsel %vm2599_vm10, %v14680_v26, 0.0 }
 0xa91   :  { %v5603_v11 = vadd.f32 %v5484_v21, %v16156_v41 }
 0xa93   :  { %v14639_v31 = vpop.f32.mrf.mxu0 }
 0xa95   :  { %v5345_v18 = vpop.f32.mrf.mxu0 }
 0xa96   :  { %v5628_v18 = vmax.f32 %v5603_v11, 0.0 }
 0xa98   :  { %v14682_v21 = vmul.f32 %v11718_v4, %v5628_v18 }
 0xa9a   :  { %v14644_v15 = vpop.f32.mrf.mxu0  ;;  %v5734_v63 = vmul.f32 %v14682_v21, %v14682_v21  ;;  %v5678_v18 = vsel %vm2599_vm10, %v14682_v21, 0.0 }
 0xa9c   :  { %v5350_v25 = vpop.f32.mrf.mxu0  ;;  %v5759_v61 = vsel %vm2599_vm10, %v5734_v63, 0.0  ;;  %v16164_v63 = vld [vmem:[#allocation23_spill] sm:$0xff] }
 0xa9d   :  { %v5504_v25 = vadd.f32 %v14526_v24, %v5314_v33  ;;  %v11719_v24 = vld [vmem:[#allocation5 + $0x8b8] sm:$0xff]  ;;  %v5733_v33 = vmul.f32 %v14680_v26, %v14680_v26 }
 0xa9e   :  { %v14686_v3 = vmul.f32 %v11719_v24, %v5629_v39  ;;  %v5679_v24 = vadd.f32 %v5678_v18, %v5677_v17 }
 0xa9f   :  { %v14654_v20 = vpop.f32.mrf.mxu0  ;;  %v5607_v56 = vadd.f32 %v5504_v25, %v16160_v37  ;;  %v16162_v25 = vld [vmem:[#allocation21_spill] sm:$0xff]  ;;  %v5758_v6 = vsel %vm2599_vm10, %v5733_v33, 0.0  ;;  %v16163_v37 = vld [vmem:[#allocation22_spill] sm:$0xff] }
 0xaa0   :  { %v5735_v5 = vmul.f32 %v14686_v3, %v14686_v3  ;;  %v5680_v4 = vsel %vm2599_vm10, %v14686_v3, 0.0 }
 0xaa1   :  { %v5355_v22 = vpop.f32.mrf.mxu0  ;;  %v5632_v49 = vmax.f32 %v5607_v56, 0.0  ;;  %v5344_v56 = vadd.f32 %v14639_v31, %v14652_v34  ;;  %v5681_v31 = vadd.f32 %v5680_v4, %v5679_v24  ;;  %v11725_v24 = vld [vmem:[#allocation5 + $0x8e8] sm:$0xff] }
 0xaa2   :  { %v5606_v22 = vadd.f32 %v5499_v8, %v16159_v36  ;;  %v5339_v36 = vadd.f32 %v14637_v48, %v14652_v34  ;;  %v5610_v48 = vadd.f32 %v5519_v55, %v16163_v37  ;;  %v5763_v55 = vsel %vm2599_vm10, %v5736_v51, 0.0 }
 0xaa4   :  { %v5631_v41 = vmax.f32 %v5606_v22, 0.0 }
 0xaa6   :  { %v14664_v45 = vpop.f32.mrf.mxu0 }
 0xaa8   :  { %v5360_v38 = vpop.f32.mrf.mxu0 }
 0xaa9   :  { %v5334_v38 = vadd.f32 %v14635_v59, %v14652_v34  ;;  %v11721_v59 = vld [vmem:[#allocation5 + $0x8c8] sm:$0xff] }
 0xaaa   :  { %v14705_v58 = vmul.f32 %v11721_v59, %v5631_v41  ;;  %v5761_v41 = vsel %vm2599_vm10, %v5735_v5, 0.0  ;;  %v5635_v59 = vmax.f32 %v5610_v48, 0.0 }
 0xaab   :  { %v14673_v16 = vpop.f32.mrf.mxu0  ;;  %v5524_v39 = vadd.f32 %v14553_v29, %v5334_v38  ;;  %v14721_v29 = vmul.f32 %v11722_v62, %v5632_v49  ;;  %v5760_v49 = vadd.f32 %v5759_v61, %v5758_v6  ;;  %v11724_v61 = vld [vmem:[#allocation5 + $0x8e0] sm:$0xff] }
 0xaac   :  { %v5737_v57 = vmul.f32 %v14705_v58, %v14705_v58  ;;  %v5684_v18 = vsel %vm2599_vm10, %v14705_v58, 0.0  ;;  %v16165_v62 = vld [vmem:[#allocation24_spill] sm:$0xff] }
 0xaad   :  { %v5365_v19 = vpop.f32.mrf.mxu0  ;;  %v5611_v2 = vadd.f32 %v5524_v39, %v16164_v63  ;;  %v5738_v5 = vmul.f32 %v14721_v29, %v14721_v29  ;;  %v5683_v39 = vadd.f32 %v5682_v35, %v5681_v31  ;;  %v16166_v35 = vld [vmem:[#allocation25_spill] sm:$0xff]  ;;  %v11726_v31 = vld [vmem:[#allocation5 + $0x8f0] sm:$0xff] }
 0xaae   :  { %v5609_v19 = vadd.f32 %v5514_v44, %v16162_v25  ;;  %v11723_v44 = vld [vmem:[#allocation5 + $0x8d8] sm:$0xff]  ;;  %v5534_v25 = vadd.f32 %v14566_v1, %v5344_v56  ;;  %v5359_v56 = vadd.f32 %v14664_v45, %v14652_v34 }
 0xaaf   :  { %v14731_v38 = vmul.f32 %v11723_v44, %v5633_v0  ;;  %v5349_v0 = vadd.f32 %v14644_v15, %v14652_v34  ;;  %v5636_v4 = vmax.f32 %v5611_v2, 0.0  ;;  %v5685_v48 = vadd.f32 %v5684_v18, %v5683_v39  ;;  %v16167_v39 = vld [vmem:[#allocation26_spill] sm:$0xff] }
 0xab0   :  { %v5634_v33 = vmax.f32 %v5609_v19, 0.0  ;;  %v5762_v19 = vadd.f32 %v5761_v41, %v5760_v49  ;;  %v5686_v15 = vsel %vm2599_vm10, %v14721_v29, 0.0  ;;  %v14756_v41 = vmul.f32 %v11725_v24, %v5635_v59 }
 0xab1   :  { %v5739_v6 = vmul.f32 %v14731_v38, %v14731_v38  ;;  %v5539_v44 = vadd.f32 %v14573_v12, %v5349_v0  ;;  %v5688_v63 = vsel %vm2599_vm10, %v14731_v38, 0.0  ;;  %v5687_v12 = vadd.f32 %v5686_v15, %v5685_v48 }
 0xab2   :  { %v14688_v11 = vpop.f32.mrf.mxu0  ;;  %v14748_v51 = vmul.f32 %v11724_v61, %v5634_v33  ;;  %v5764_v37 = vadd.f32 %v5763_v55, %v5762_v19  ;;  %v14768_v55 = vmul.f32 %v11726_v31, %v5636_v4  ;;  %v5741_v0 = vmul.f32 %v14756_v41, %v14756_v41  ;;  %v16168_v4 = vld [vmem:[#allocation27_spill] sm:$0xff] }
 0xab3   :  { %v5769_v45 = vsel %vm2599_vm10, %v5739_v6, 0.0  ;;  %v5689_v6 = vadd.f32 %v5688_v63, %v5687_v12 }
 0xab4   :  { %v5370_v8 = vpop.f32.mrf.mxu0  ;;  %v5740_v49 = vmul.f32 %v14748_v51, %v14748_v51 }
 0xab5   :  { %v5529_v8 = vadd.f32 %v14559_v28, %v5339_v36  ;;  %v5765_v28 = vsel %vm2599_vm10, %v5737_v57, 0.0  ;;  %v5354_v36 = vadd.f32 %v14654_v20, %v14652_v34  ;;  %v5767_v20 = vsel %vm2599_vm10, %v5738_v5, 0.0 }
 0xab6   :  { %v5613_v57 = vadd.f32 %v5534_v25, %v16166_v35  ;;  %v5766_v33 = vadd.f32 %v5765_v28, %v5764_v37  ;;  %v5549_v25 = vadd.f32 %v14586_v60, %v5359_v56  ;;  %v5614_v28 = vadd.f32 %v5539_v44, %v16167_v39  ;;  %v11727_v37 = vld [vmem:[#allocation5 + $0x8f8] sm:$0xff] }
 0xab7   :  { %v14711_v22 = vpop.f32.mrf.mxu0  ;;  %v5612_v1 = vadd.f32 %v5529_v8, %v16165_v62  ;;  %v5544_v2 = vadd.f32 %v14579_v14, %v5354_v36  ;;  %v5364_v8 = vadd.f32 %v14673_v16, %v14652_v34  ;;  %v5369_v14 = vadd.f32 %v14688_v11, %v14652_v34 }
 0xab8   :  { %v5768_v59 = vadd.f32 %v5767_v20, %v5766_v33  ;;  %v5690_v16 = vsel %vm2599_vm10, %v14748_v51, 0.0  ;;  %v5638_v19 = vmax.f32 %v5613_v57, 0.0  ;;  %v5771_v60 = vsel %vm2599_vm10, %v5740_v49, 0.0  ;;  %v16169_v20 = vld [vmem:[#allocation28_spill] sm:$0xff] }
 0xab9   :  { %v5375_v13 = vpop.f32.mrf.mxu0  ;;  %v5637_v18 = vmax.f32 %v5612_v1, 0.0  ;;  %v5615_v62 = vadd.f32 %v5544_v2, %v16168_v4  ;;  %v5554_v1 = vadd.f32 %v14593_v47, %v5364_v8  ;;  %v5742_v11 = vmul.f32 %v14768_v55, %v14768_v55  ;;  %v11728_v57 = vld [vmem:[#allocation5 + $0x900] sm:$0xff] }
 0xaba   :  { %v5770_v61 = vadd.f32 %v5769_v45, %v5768_v59  ;;  %v5374_v15 = vadd.f32 %v14711_v22, %v14652_v34  ;;  %v5691_v56 = vadd.f32 %v5690_v16, %v5689_v6  ;;  %v5616_v24 = vadd.f32 %v5549_v25, %v16169_v20  ;;  %v16170_v45 = vld [vmem:[#allocation29_spill] sm:$0xff]  ;;  %v16171_v16 = vld [vmem:[#allocation30_spill] sm:$0xff]  ;;  %v11731_v20 = vld [vmem:[#allocation5 + $0x918] sm:$0xff] }
 0xabb   :  { %v14783_v48 = vmul.f32 %v11727_v37, %v5637_v18  ;;  %v5559_v35 = vadd.f32 %v14599_v53, %v5369_v14  ;;  %v5773_v47 = vsel %vm2599_vm10, %v5741_v0, 0.0  ;;  %v14792_v44 = vmul.f32 %v11728_v57, %v5638_v19  ;;  %v16172_v37 = vld [vmem:[#allocation31_spill] sm:$0xff] }
 0xabc   :  { %v5639_v33 = vmax.f32 %v5614_v28, 0.0  ;;  %v5772_v2 = vadd.f32 %v5771_v60, %v5770_v61  ;;  %v5694_v22 = vsel %vm2599_vm10, %v14768_v55, 0.0  ;;  %v5640_v8 = vmax.f32 %v5615_v62, 0.0  ;;  %v11729_v28 = vld [vmem:[#allocation5 + $0x908] sm:$0xff]  ;;  %v11730_v62 = vld [vmem:[#allocation5 + $0x910] sm:$0xff] }
 0xabd   :  { %v5617_v49 = vadd.f32 %v5554_v1, %v16170_v45  ;;  %v5775_v18 = vsel %vm2599_vm10, %v5742_v11, 0.0  ;;  %v5743_v53 = vmul.f32 %v14783_v48, %v14783_v48  ;;  %v5564_v12 = vadd.f32 %v14606_v9, %v5374_v15 }
 0xabe   :  { %v5378_v17 = vpop.f32.mrf.mxu0  ;;  %v5774_v14 = vadd.f32 %v5773_v47, %v5772_v2  ;;  %v5618_v0 = vadd.f32 %v5559_v35, %v16171_v16  ;;  %v5744_v39 = vmul.f32 %v14792_v44, %v14792_v44  ;;  %v5696_v60 = vsel %vm2599_vm10, %v14783_v48, 0.0 }
 0xabf   :  { %v5379_v63 = vadd.f32 %v5378_v17, %v14652_v34  ;;  %v5641_v17 = vmax.f32 %v5616_v24, 0.0  ;;  %v5642_v1 = vmax.f32 %v5617_v49, 0.0  ;;  %v5777_v11 = vsel %vm2599_vm10, %v5743_v53, 0.0 }
 0xac0   :  { %v5380_v13 = vpop.f32.mrf.mxu0  ;;  %v5776_v9 = vadd.f32 %v5775_v18, %v5774_v14  ;;  %v5619_v15 = vadd.f32 %v5564_v12, %v16172_v37  ;;  %v5643_v35 = vmax.f32 %v5618_v0, 0.0  ;;  %v5779_v57 = vsel %vm2599_vm10, %v5744_v39, 0.0  ;;  %v11733_v0 = vld [vmem:[#allocation5 + $0x928] sm:$0xff] }
 0xac1   :  { %v5692_v13 = vsel %vm2599_vm10, %v14756_v41, 0.0  ;;  %v5569_v6 = vadd.f32 %v14613_v50, %v5379_v63  ;;  %v5698_v50 = vsel %vm2599_vm10, %v14792_v44, 0.0  ;;  %v14819_v24 = vmul.f32 %v11731_v20, %v5641_v17  ;;  %v16173_v63 = vld [vmem:[#allocation32_spill] sm:$0xff] }
 0xac2   :  { %v5693_v25 = vadd.f32 %v5692_v13, %v5691_v56  ;;  %v5778_v45 = vadd.f32 %v5777_v11, %v5776_v9  ;;  %v5644_v12 = vmax.f32 %v5619_v15, 0.0  ;;  %v11734_v11 = vld [vmem:[#allocation5 + $0x930] sm:$0xff] }
 0xac3   :  { %v5383_v5 = vpop.f32.mrf.mxu0  ;;  %v5620_v2 = vadd.f32 %v5569_v6, %v16173_v63 }
 0xac4   :  { %v5384_v59 = vadd.f32 %v5383_v5, %v14652_v34  ;;  %v5695_v4 = vadd.f32 %v5694_v22, %v5693_v25  ;;  %v14810_v5 = vmul.f32 %v11730_v62, %v5640_v8  ;;  %v5780_v16 = vadd.f32 %v5779_v57, %v5778_v45 }
 0xac5   :  { %v5385_v36 = vpop.f32.mrf.mxu0  ;;  %v5645_v6 = vmax.f32 %v5620_v2, 0.0  ;;  %v14848_v37 = vmul.f32 %v11734_v11, %v5644_v12  ;;  %v11735_v2 = vld [vmem:[#allocation5 + $0x938] sm:$0xff] }
 0xac6   :  { %v14806_v36 = vmul.f32 %v11729_v28, %v5639_v33  ;;  %v5574_v56 = vadd.f32 %v14619_v27, %v5384_v59  ;;  %v5697_v8 = vadd.f32 %v5696_v60, %v5695_v4  ;;  %v5746_v49 = vmul.f32 %v14810_v5, %v14810_v5  ;;  %v16174_v59 = vld [vmem:[#allocation33_spill] sm:$0xff] }
 0xac7   :  { %v5702_v28 = vsel %vm2599_vm10, %v14810_v5, 0.0  ;;  %v5750_v12 = vmul.f32 %v14848_v37, %v14848_v37 }
 0xac8   :  { %v5745_v33 = vmul.f32 %v14806_v36, %v14806_v36  ;;  %v5700_v53 = vsel %vm2599_vm10, %v14806_v36, 0.0  ;;  %v5621_v25 = vadd.f32 %v5574_v56, %v16174_v59  ;;  %v5699_v17 = vadd.f32 %v5698_v50, %v5697_v8  ;;  %v16176_v56 = vld [vmem:[#allocation35_spill] sm:$0xff]  ;;  %v11736_v59 = vld [vmem:[#allocation5 + $0x940] sm:$0xff] }
 0xac9   :  { %v5783_v62 = vsel %vm2599_vm10, %v5746_v49, 0.0 }
 0xaca   :  { %v5388_v31 = vpop.f32.mrf.mxu0  ;;  %v5781_v39 = vsel %vm2599_vm10, %v5745_v33, 0.0  ;;  %v5701_v9 = vadd.f32 %v5700_v53, %v5699_v17  ;;  %v5646_v15 = vmax.f32 %v5621_v25, 0.0  ;;  %v16177_v17 = vld [vmem:[#allocation36_spill] sm:$0xff] }
 0xacb   :  { %v5389_v61 = vadd.f32 %v5388_v31, %v14652_v34  ;;  %v11732_v31 = vld [vmem:[#allocation5 + $0x920] sm:$0xff]  ;;  %v5782_v20 = vadd.f32 %v5781_v39, %v5780_v16 }
 0xacc   :  { %v5390_v19 = vpop.f32.mrf.mxu0  ;;  %v14829_v18 = vmul.f32 %v11732_v31, %v5642_v1  ;;  %v14865_v25 = vmul.f32 %v11736_v59, %v5646_v15  ;;  %v5791_v15 = vsel %vm2599_vm10, %v5750_v12, 0.0 }
 0xacd   :  { %v5579_v22 = vadd.f32 %v14625_v10, %v5389_v61  ;;  %v5747_v10 = vmul.f32 %v14819_v24, %v14819_v24  ;;  %v14837_v19 = vmul.f32 %v11733_v0, %v5643_v35  ;;  %v16175_v61 = vld [vmem:[#allocation34_spill] sm:$0xff]  ;;  %v5703_v35 = vadd.f32 %v5702_v28, %v5701_v9 }
 0xace   :  { %v5748_v1 = vmul.f32 %v14829_v18, %v14829_v18  ;;  %v5706_v63 = vsel %vm2599_vm10, %v14829_v18, 0.0  ;;  %v5784_v45 = vadd.f32 %v5783_v62, %v5782_v20 }
 0xacf   :  { %v5393_v13 = vpop.f32.mrf.mxu0  ;;  %v5622_v4 = vadd.f32 %v5579_v22, %v16175_v61  ;;  %v5749_v57 = vmul.f32 %v14837_v19, %v14837_v19  ;;  %v14857_v22 = vmul.f32 %v11735_v2, %v5645_v6  ;;  %v5708_v53 = vsel %vm2599_vm10, %v14837_v19, 0.0 }
 0xad0   :  { %v5394_v47 = vadd.f32 %v5393_v13, %v14652_v34  ;;  %v5787_v31 = vsel %vm2599_vm10, %v5748_v1, 0.0  ;;  %v5710_v6 = vsel %vm2599_vm10, %v14848_v37, 0.0 }
 0xad1   :  { %v5395_v27 = vpop.f32.mrf.mxu0  ;;  %v5751_v61 = vmul.f32 %v14857_v22, %v14857_v22 }
 0xad2   :  { %v5584_v14 = vadd.f32 %v14627_v52, %v5394_v47  ;;  %v5704_v52 = vsel %vm2599_vm10, %v14819_v24, 0.0  ;;  %v5785_v47 = vsel %vm2599_vm10, %v5747_v10, 0.0  ;;  %v5647_v27 = vmax.f32 %v5622_v4, 0.0  ;;  %v11737_v4 = vld [vmem:[#allocation5 + $0x948] sm:$0xff] }
 0xad3   :  { %v5705_v49 = vadd.f32 %v5704_v52, %v5703_v35  ;;  %v5786_v0 = vadd.f32 %v5785_v47, %v5784_v45 }
 0xad4   :  { %v5623_v13 = vadd.f32 %v5584_v14, %v16176_v56  ;;  %v14874_v9 = vmul.f32 %v11737_v4, %v5647_v27  ;;  %v5712_v56 = vsel %vm2599_vm10, %v14857_v22, 0.0  ;;  %v11739_v27 = vld [vmem:[#allocation5 + $0x958] sm:$0xff] }
 0xad5   :  { %v5707_v39 = vadd.f32 %v5706_v63, %v5705_v49  ;;  %v5788_v1 = vadd.f32 %v5787_v31, %v5786_v0  ;;  %v5793_v63 = vsel %vm2599_vm10, %v5751_v61, 0.0  ;;  %v11740_v0 = vld [vmem:[#allocation5 + $0x960] sm:$0xff] }
 0xad6   :  { %v5398_v60 = vpop.f32.mrf.mxu0  ;;  %v5648_v14 = vmax.f32 %v5623_v13, 0.0  ;;  %v5752_v13 = vmul.f32 %v14865_v25, %v14865_v25  ;;  %v5753_v2 = vmul.f32 %v14874_v9, %v14874_v9  ;;  %v5716_v59 = vsel %vm2599_vm10, %v14874_v9, 0.0 }
 0xad7   :  { %v5399_v50 = vadd.f32 %v5398_v60, %v14652_v34  ;;  %v5709_v60 = vadd.f32 %v5708_v53, %v5707_v39 }
 0xad8   :  { %v5400_v33 = vpop.f32.mrf.mxu0  ;;  %v5795_v12 = vsel %vm2599_vm10, %v5752_v13, 0.0 }
 0xad9   :  { %v5589_v8 = vadd.f32 %v14629_v30, %v5399_v50  ;;  %v5789_v30 = vsel %vm2599_vm10, %v5749_v57, 0.0  ;;  %v11738_v50 = vld [vmem:[#allocation5 + $0x950] sm:$0xff]  ;;  %v5711_v47 = vadd.f32 %v5710_v6, %v5709_v60  ;;  %v16178_v57 = vld [vmem:[#allocation37_spill] sm:$0xff] }
 0xada   :  { %v14882_v20 = vmul.f32 %v11738_v50, %v5648_v14  ;;  %v5790_v35 = vadd.f32 %v5789_v30, %v5788_v1 }
 0xadb   :  { %v5624_v16 = vadd.f32 %v5589_v8, %v16177_v17  ;;  %v5403_v10 = vpop.f32.mrf.mxu0  ;;  %v5713_v49 = vadd.f32 %v5712_v56, %v5711_v47 }
 0xadc   :  { %v5404_v28 = vadd.f32 %v5403_v10, %v14652_v34  ;;  %v5792_v45 = vadd.f32 %v5791_v15, %v5790_v35  ;;  %v5754_v14 = vmul.f32 %v14882_v20, %v14882_v20  ;;  %v5718_v6 = vsel %vm2599_vm10, %v14882_v20, 0.0 }
 0xadd   :  { %v5649_v62 = vmax.f32 %v5624_v16, 0.0  ;;  %v5405_v52 = vpop.f32.mrf.mxu0 }
 0xade   :  { %v5594_v11 = vadd.f32 %v14631_v54, %v5404_v28  ;;  %v5714_v54 = vsel %vm2599_vm10, %v14865_v25, 0.0  ;;  %v5794_v16 = vadd.f32 %v5793_v63, %v5792_v45  ;;  %v5797_v28 = vsel %vm2599_vm10, %v5753_v2, 0.0  ;;  %v11741_v63 = vld [vmem:[#allocation5 + $0x968] sm:$0xff] }
 0xadf   :  { %v14890_v8 = vmul.f32 %v11739_v27, %v5649_v62  ;;  %v5715_v10 = vadd.f32 %v5714_v54, %v5713_v49 }
 0xae0   :  { %v5625_v33 = vadd.f32 %v5594_v11, %v16178_v57  ;;  %v5796_v62 = vadd.f32 %v5795_v12, %v5794_v16  ;;  %v16179_v11 = vld [vmem:[#allocation38_spill] sm:$0xff] }
 0xae1   :  { %v5755_v61 = vmul.f32 %v14890_v8, %v14890_v8  ;;  %v5717_v52 = vadd.f32 %v5716_v59, %v5715_v10  ;;  %v5720_v1 = vsel %vm2599_vm10, %v14890_v8, 0.0 }
 0xae2   :  { %v5650_v31 = vmax.f32 %v5625_v33, 0.0  ;;  %v5408_v53 = vpop.f32.mrf.mxu0  ;;  %v5798_v56 = vadd.f32 %v5797_v28, %v5796_v62 }
 0xae3   :  { %v5409_v17 = vadd.f32 %v5408_v53, %v14652_v34  ;;  %v5799_v34 = vsel %vm2599_vm10, %v5754_v14, 0.0  ;;  %v5719_v13 = vadd.f32 %v5718_v6, %v5717_v52  ;;  %v5801_v50 = vsel %vm2599_vm10, %v5755_v61, 0.0 }
 0xae4   :  { %v14898_v39 = vmul.f32 %v11740_v0, %v5650_v31  ;;  %v5410_v30 = vpop.f32.mrf.mxu0  ;;  %v5800_v47 = vadd.f32 %v5799_v34, %v5798_v56 }
 0xae5   :  { %v5599_v4 = vadd.f32 %v14633_v43, %v5409_v17  ;;  %v5721_v57 = vadd.f32 %v5720_v1, %v5719_v13 }
 0xae6   :  { %v5756_v60 = vmul.f32 %v14898_v39, %v14898_v39  ;;  %v5722_v35 = vsel %vm2599_vm10, %v14898_v39, 0.0  ;;  %v5802_v2 = vadd.f32 %v5801_v50, %v5800_v47 }
 0xae7   :  { %v5626_v15 = vadd.f32 %v5599_v4, %v16179_v11  ;;  %v5723_v27 = vadd.f32 %v5722_v35, %v5721_v57 }
 0xae8   :  { %v5803_v33 = vsel %vm2599_vm10, %v5756_v60, 0.0 }
 0xae9   :  { %v5651_v43 = vmax.f32 %v5626_v15, 0.0  ;;  %v5804_v53 = vadd.f32 %v5803_v33, %v5802_v2  ;;  %v5870_v33 = vsub.s32 4, %v13580_v23 }
 0xaeb   :  { %v5676_v54 = vmul.f32 %v11741_v63, %v5651_v43 }
 0xaed   :  { %v5724_v45 = vsel %vm2599_vm10, %v5676_v54, 0.0  ;;  %v5757_v49 = vmul.f32 %v5676_v54, %v5676_v54 }
 0xaee   :  { %v5725_v31 = vadd.f32 %v5724_v45, %v5723_v27 }
 0xaef   :  { %v5805_v12 = vsel %vm2599_vm10, %v5757_v49, 0.0 }
 0xaf0   :  { %v5726_v59 = vrot.slane %v5725_v31, 4  ;;  %v5806_v14 = vadd.f32 %v5805_v12, %v5804_v53 }
 0xaf2   :  { %v5727_v17 = vadd.f32 %v5726_v59, %v5725_v31  ;;  %v5807_v16 = vrot.slane %v5806_v14, 4 }
 0xaf4   :  { %v5728_v10 = vrot.slane %v5727_v17, 2  ;;  %v5808_v0 = vadd.f32 %v5807_v16, %v5806_v14 }
 0xaf6   :  { %v5729_v30 = vadd.f32 %v5728_v10, %v5727_v17  ;;  %v5809_v28 = vrot.slane %v5808_v0, 2 }
 0xaf8   :  { %v5730_v6 = vrot.slane %v5729_v30, 1  ;;  %v5810_v61 = vadd.f32 %v5809_v28, %v5808_v0 }
 0xafa   :  { %v5731_v4 = vadd.f32 %v5730_v6, %v5729_v30  ;;  %v5811_v62 = vrot.slane %v5810_v61, 1 }
 0xafc   :  { %v14918_v52 = vmul.f32 0.0078125, %v5731_v4  ;;  %v5812_v34 = vadd.f32 %v5811_v62, %v5810_v61 }
 0xafe   :  { %v5813_v1 = vmul.f32 0.0078125, %v5812_v34  ;;  %v5814_v60 = vmul.f32 %v14918_v52, %v14918_v52  ;;  %v5840_v11 = vsub.f32 %v5676_v54, %v14918_v52  ;;  %v5834_v13 = vsub.f32 %v14857_v22, %v14918_v52 }
 0xaff   :  { %v5835_v50 = vsub.f32 %v14865_v25, %v14918_v52  ;;  %v5836_v35 = vsub.f32 %v14874_v9, %v14918_v52  ;;  %v5837_v43 = vsub.f32 %v14882_v20, %v14918_v52  ;;  %v5838_v47 = vsub.f32 %v14890_v8, %v14918_v52 }
 0xb00   :  { %v5815_v15 = vsub.f32 %v5813_v1, %v5814_v60  ;;  %v5839_v57 = vsub.f32 %v14898_v39, %v14918_v52  ;;  %v5899_v22 = vsub.s32 5, %v13580_v23  ;;  %v14940_v25 = vrot.slane %v14647_v7, %v5870_v33 }
 0xb01   :  { %v5816_v9 = vsub.f32 %v14680_v26, %v14918_v52  ;;  %v5817_v20 = vsub.f32 %v14682_v21, %v14918_v52  ;;  %v5818_v21 = vsub.f32 %v14686_v3, %v14918_v52  ;;  %v5819_v31 = vsub.f32 %v14698_v32, %v14918_v52 }
 0xb02   :  { %v5841_v56 = vadd.f32 1e-05, %v5815_v15  ;;  %v14951_v8 = vrot.slane %v14647_v7, %v5899_v22  ;;  %v5820_v53 = vsub.f32 %v14705_v58, %v14918_v52  ;;  %v5829_v12 = vsub.f32 %v14810_v5, %v14918_v52 }
 0xb03   :  { %v5830_v59 = vsub.f32 %v14819_v24, %v14918_v52  ;;  %v5831_v24 = vsub.f32 %v14829_v18, %v14918_v52  ;;  %v5821_v16 = vsub.f32 %v14721_v29, %v14918_v52  ;;  %v5832_v30 = vsub.f32 %v14837_v19, %v14918_v52 }
 0xb04   :  { %11673 = vrsqrt.f32 %v5841_v56  ;;  %v5833_v28 = vsub.f32 %v14848_v37, %v14918_v52 }
 0xb11   :  { %v14946_v63 = vpop.eup %11673 }
 0xb12   :  { %v5867_v39 = vmul.f32 %v14946_v63, %v5840_v11  ;;  %v5843_v54 = vmul.f32 %v14946_v63, %v5816_v9  ;;  %v5844_v2 = vmul.f32 %v14946_v63, %v5817_v20  ;;  %v5845_v7 = vmul.f32 %v14946_v63, %v5818_v21 }
 0xb13   :  { %v5846_v3 = vmul.f32 %v14946_v63, %v5819_v31  ;;  %v5847_v14 = vmul.f32 %v14946_v63, %v5820_v53  ;;  %v14977_v32 = vmul.f32 %v14946_v63, %v5829_v12  ;;  %v14980_v58 = vmul.f32 %v14946_v63, %v5830_v59 }
 0xb14   :  { %v5896_v27 = vmul.f32 %v14940_v25, %v5867_v39  ;;  %v5872_v26 = vmul.f32 %v14940_v25, %v5843_v54  ;;  %v5873_v49 = vmul.f32 %v14940_v25, %v5844_v2  ;;  %v5874_v17 = vmul.f32 %v14940_v25, %v5845_v7 }
 0xb15   :  { %v5875_v10 = vmul.f32 %v14940_v25, %v5846_v3  ;;  %v14991_v0 = vmul.f32 %v14946_v63, %v5831_v24  ;;  %v5876_v18 = vmul.f32 %v14940_v25, %v5847_v14  ;;  %v5848_v29 = vmul.f32 %v14946_v63, %v5821_v16 }
 0xb16   :  { %v5901_v45 = vadd.f32 %v14951_v8, %v5872_v26  ;;  %v5902_v5 = vadd.f32 %v14951_v8, %v5873_v49  ;;  %v5903_v6 = vadd.f32 %v14951_v8, %v5874_v17  ;;  %v5859_v61 = vmul.f32 %v14946_v63, %v5832_v30 }
 0xb17   :  { %v5860_v4 = vmul.f32 %v14946_v63, %v5833_v28  ;;  %v5861_v62 = vmul.f32 %v14946_v63, %v5834_v13  ;;  %v5862_v19 = vmul.f32 %v14946_v63, %v5835_v50  ;;  %v5863_v34 = vmul.f32 %v14946_v63, %v5836_v35 }
 0xb18   :  { %10377 = vmatmul.mubr.msk.f32.vlgmr.msra.gmra.mxu0 %vm2599_vm10, %v5901_v45  ;;  %v5864_v37 = vmul.f32 %v14946_v63, %v5837_v43  ;;  %v5865_v1 = vmul.f32 %v14946_v63, %v5838_v47  ;;  %v5904_v60 = vadd.f32 %v14951_v8, %v5875_v10  ;;  %v5888_v11 = vmul.f32 %v14940_v25, %v5859_v61 }
 0xb19   :  { %10379 = vmatprep.mubr.msk.f32.mxu0 %vm11829_vm1, %v14621_v42  ;;  %v5889_v15 = vmul.f32 %v14940_v25, %v5860_v4  ;;  %v5890_v56 = vmul.f32 %v14940_v25, %v5861_v62  ;;  %v5891_v13 = vmul.f32 %v14940_v25, %v5862_v19  ;;  %v5892_v50 = vmul.f32 %v14940_v25, %v5863_v34 }
 0xb1a   :  { %v5893_v35 = vmul.f32 %v14940_v25, %v5864_v37  ;;  %v5894_v43 = vmul.f32 %v14940_v25, %v5865_v1  ;;  %v15021_v47 = vadd.f32 %v14951_v8, %v5888_v11  ;;  %v5866_v39 = vmul.f32 %v14946_v63, %v5839_v57 }
 0xb1b   :  { %v15024_v9 = vadd.f32 %v14951_v8, %v5889_v15  ;;  %v15027_v20 = vadd.f32 %v14951_v8, %v5890_v56  ;;  %v15031_v54 = vadd.f32 %v14951_v8, %v5891_v13  ;;  %v15034_v2 = vadd.f32 %v14951_v8, %v5892_v50 }
 0xb1c   :  { %10380 = vmatmul.mubr.msk.f32.gmra.mxu0 %vm2599_vm10, %v5902_v5  ;;  %v15037_v26 = vadd.f32 %v14951_v8, %v5893_v35  ;;  %v15040_v21 = vadd.f32 %v14951_v8, %v5894_v43  ;;  %v5822_v45 = vsub.f32 %v14731_v38, %v14918_v52  ;;  %v5895_v49 = vmul.f32 %v14940_v25, %v5866_v39 }
 0xb1d   :  { %10382 = vmatprep.mubr.msk.f32.mxu0 %vm11829_vm1, %v14621_v42  ;;  %v15047_v57 = vadd.f32 %v14951_v8, %v5896_v27  ;;  %v5905_v7 = vadd.f32 %v14951_v8, %v5876_v18  ;;  %v5877_v31 = vmul.f32 %v14940_v25, %v5848_v29  ;;  %v5823_v38 = vsub.f32 %v14748_v51, %v14918_v52 }
 0xb1e   :  { %v5849_v53 = vmul.f32 %v14946_v63, %v5822_v45  ;;  %v15055_v12 = vadd.f32 %v14951_v8, %v5895_v49  ;;  %v5824_v14 = vsub.f32 %v14756_v41, %v14918_v52  ;;  %v5825_v24 = vsub.f32 %v14768_v55, %v14918_v52 }
 0xb1f   :  { %v5906_v27 = vadd.f32 %v14951_v8, %v5877_v31  ;;  %v5850_v3 = vmul.f32 %v14946_v63, %v5823_v38  ;;  %v5826_v30 = vsub.f32 %v14783_v48, %v14918_v52  ;;  %v5827_v29 = vsub.f32 %v14792_v44, %v14918_v52 }
 0xb20   :  { %10383 = vmatmul.mubr.msk.f32.gmra.mxu0 %vm2599_vm10, %v5903_v6  ;;  %v5878_v59 = vmul.f32 %v14940_v25, %v5849_v53  ;;  %v5851_v17 = vmul.f32 %v14946_v63, %v5824_v14  ;;  %v5852_v10 = vmul.f32 %v14946_v63, %v5825_v24  ;;  %v5828_v4 = vsub.f32 %v14806_v36, %v14918_v52 }
 0xb21   :  { %10385 = vmatprep.mubr.msk.f32.mxu0 %vm11829_vm1, %v14621_v42  ;;  %v5879_v51 = vmul.f32 %v14940_v25, %v5850_v3  ;;  %v5853_v18 = vmul.f32 %v14946_v63, %v5826_v30  ;;  %v5854_v61 = vmul.f32 %v14946_v63, %v5827_v29  ;;  %v5885_v52 = vmul.f32 %v14940_v25, %v14977_v32 }
 0xb22   :  { %v5907_v5 = vadd.f32 %v14951_v8, %v5878_v59  ;;  %v5880_v41 = vmul.f32 %v14940_v25, %v5851_v17  ;;  %v5881_v55 = vmul.f32 %v14940_v25, %v5852_v10  ;;  %v5855_v19 = vmul.f32 %v14946_v63, %v5828_v4 }
 0xb23   :  { %v5908_v16 = vadd.f32 %v14951_v8, %v5879_v51  ;;  %v5882_v48 = vmul.f32 %v14940_v25, %v5853_v18  ;;  %v5883_v44 = vmul.f32 %v14940_v25, %v5854_v61  ;;  %v5914_v63 = vadd.f32 %v14951_v8, %v5885_v52 }
 0xb24   :  { %10386 = vmatmul.mubr.msk.f32.gmra.mxu0 %vm2599_vm10, %v5904_v60  ;;  %v5909_v28 = vadd.f32 %v14951_v8, %v5880_v41  ;;  %v5910_v6 = vadd.f32 %v14951_v8, %v5881_v55  ;;  %v5884_v37 = vmul.f32 %v14940_v25, %v5855_v19  ;;  %v5886_v1 = vmul.f32 %v14940_v25, %v14980_v58 }
 0xb25   :  { %10388 = vmatprep.mubr.msk.f32.mxu0 %vm11829_vm1, %v14621_v42  ;;  %v5911_v62 = vadd.f32 %v14951_v8, %v5882_v48  ;;  %v5912_v34 = vadd.f32 %v14951_v8, %v5883_v44  ;;  %v5887_v32 = vmul.f32 %v14940_v25, %v14991_v0  ;;  %v15169_v25 = vld [vmem:[#allocation5 + $0xb40] ss:$0 sm:$0xff] }
 0xb26   :  { %v5913_v36 = vadd.f32 %v14951_v8, %v5884_v37  ;;  %v5915_v60 = vadd.f32 %v14951_v8, %v5886_v1 }
 0xb27   :  { %v5916_v11 = vadd.f32 %v14951_v8, %v5887_v32 }
 0xb28   :  { %10389 = vmatmul.mubr.msk.f32.gmra.mxu0 %vm2599_vm10, %v5905_v7 }
 0xb29   :  { %10391 = vmatprep.mubr.msk.f32.mxu0 %vm11829_vm1, %v14621_v42 }
 0xb2c   :  { %10392 = vmatmul.mubr.msk.f32.gmra.mxu0 %vm2599_vm10, %v5906_v27 }
 0xb2d   :  { %10394 = vmatprep.mubr.msk.f32.mxu0 %vm11829_vm1, %v14621_v42 }
 0xb30   :  { %10395 = vmatmul.mubr.msk.f32.gmra.mxu0 %vm2599_vm10, %v5907_v5 }
 0xb31   :  { %10397 = vmatprep.mubr.msk.f32.mxu0 %vm11829_vm1, %v14621_v42 }
 0xb34   :  { %10398 = vmatmul.mubr.msk.f32.gmra.mxu0 %vm2599_vm10, %v5908_v16 }
 0xb35   :  { %10400 = vmatprep.mubr.msk.f32.mxu0 %vm11829_vm1, %v14621_v42 }
 0xb38   :  { %10401 = vmatmul.mubr.msk.f32.gmra.mxu0 %vm2599_vm10, %v5909_v28 }
 0xb39   :  { %10403 = vmatprep.mubr.msk.f32.mxu0 %vm11829_vm1, %v14621_v42 }
 0xb3c   :  { %10404 = vmatmul.mubr.msk.f32.gmra.mxu0 %vm2599_vm10, %v5910_v6 }
 0xb3d   :  { %10406 = vmatprep.mubr.msk.f32.mxu0 %vm11829_vm1, %v14621_v42 }
 0xb40   :  { %10407 = vmatmul.mubr.msk.f32.gmra.mxu0 %vm2599_vm10, %v5911_v62 }
 0xb41   :  { %10409 = vmatprep.mubr.msk.f32.mxu0 %vm11829_vm1, %v14621_v42 }
 0xb44   :  { %10410 = vmatmul.mubr.msk.f32.gmra.mxu0 %vm2599_vm10, %v5912_v34 }
 0xb45   :  { %10412 = vmatprep.mubr.msk.f32.mxu0 %vm11829_vm1, %v14621_v42 }
 0xb48   :  { %10413 = vmatmul.mubr.msk.f32.gmra.mxu0 %vm2599_vm10, %v5913_v36 }
 0xb49   :  { %10415 = vmatprep.mubr.msk.f32.mxu0 %vm11829_vm1, %v14621_v42 }
 0xb4c   :  { %10416 = vmatmul.mubr.msk.f32.gmra.mxu0 %vm2599_vm10, %v5914_v63 }
 0xb4d   :  { %10418 = vmatprep.mubr.msk.f32.mxu0 %vm11829_vm1, %v14621_v42 }
 0xb50   :  { %10419 = vmatmul.mubr.msk.f32.gmra.mxu0 %vm2599_vm10, %v5915_v60 }
 0xb51   :  { %10421 = vmatprep.mubr.msk.f32.mxu0 %vm11829_vm1, %v14621_v42 }
 0xb54   :  { %10422 = vmatmul.mubr.msk.f32.gmra.mxu0 %vm2599_vm10, %v5916_v11 }
 0xb55   :  { %10424 = vmatprep.mubr.msk.f32.mxu0 %vm11829_vm1, %v14621_v42 }
 0xb58   :  { %10425 = vmatmul.mubr.msk.f32.gmra.mxu0 %vm2599_vm10, %v15021_v47 }
 0xb59   :  { %10427 = vmatprep.mubr.msk.f32.mxu0 %vm11829_vm1, %v14621_v42 }
 0xb5c   :  { %10428 = vmatmul.mubr.msk.f32.gmra.mxu0 %vm2599_vm10, %v15024_v9 }
 0xb5d   :  { %10430 = vmatprep.mubr.msk.f32.mxu0 %vm11829_vm1, %v14621_v42 }
 0xb60   :  { %10431 = vmatmul.mubr.msk.f32.gmra.mxu0 %vm2599_vm10, %v15027_v20 }
 0xb61   :  { %10433 = vmatprep.mubr.msk.f32.mxu0 %vm11829_vm1, %v14621_v42 }
 0xb64   :  { %10434 = vmatmul.mubr.msk.f32.gmra.mxu0 %vm2599_vm10, %v15031_v54 }
 0xb65   :  { %10436 = vmatprep.mubr.msk.f32.mxu0 %vm11829_vm1, %v14621_v42 }
 0xb68   :  { %10437 = vmatmul.mubr.msk.f32.gmra.mxu0 %vm2599_vm10, %v15034_v2 }
 0xb69   :  { %10439 = vmatprep.mubr.msk.f32.mxu0 %vm11829_vm1, %v14621_v42 }
 0xb6c   :  { %10440 = vmatmul.mubr.msk.f32.gmra.mxu0 %vm2599_vm10, %v15037_v26 }
 0xb6d   :  { %10442 = vmatprep.mubr.msk.f32.mxu0 %vm11829_vm1, %v14621_v42 }
 0xb70   :  { %10443 = vmatmul.mubr.msk.f32.gmra.mxu0 %vm2599_vm10, %v15040_v21 }
 0xb71   :  { %10445 = vmatprep.mubr.msk.f32.mxu0 %vm11829_vm1, %v14621_v42 }
 0xb74   :  { %10446 = vmatmul.mubr.msk.f32.gmra.mxu0 %vm2599_vm10, %v15055_v12 }
 0xb75   :  { %10448 = vmatprep.mubr.msk.f32.mxu0 %vm11829_vm1, %v14621_v42 }
 0xb78   :  { %10449 = vmatmul.mubr.msk.f32.gmra.mxu0 %vm2599_vm10, %v15047_v57 }
 0xbd8   :  { %v6076_v8 = vpop.f32.mrf.mxu0 }
 0xbd9   :  { %v6077_v58 = vadd.f32 %v15169_v25, %v6076_v8 }
 0xbda   :  { %v10378_v0 = vpop.f32.mrf.mxu0 }
 0xbdb   :  { %6200 = vst.msk [vmem:[#allocation3 + $0x10] sm:$0xff] %vm50_vm9, %v6077_v58 }
 0xbdc   :  { %v6081_v15 = vpop.f32.mrf.mxu0 }
 0xbdd   :  { %v6082_v56 = vadd.f32 %v15169_v25, %v6081_v15 }
 0xbde   :  { %v10381_v13 = vpop.f32.mrf.mxu0 }
 0xbdf   :  { %6201 = vst.msk [vmem:[#allocation3 + $0x18] sm:$0xff] %vm50_vm9, %v6082_v56 }
 0xbe0   :  { %v6086_v50 = vpop.f32.mrf.mxu0 }
 0xbe1   :  { %v6087_v42 = vadd.f32 %v15169_v25, %v6086_v50 }
 0xbe2   :  { %v10384_v35 = vpop.f32.mrf.mxu0 }
 0xbe3   :  { %6202 = vst.msk [vmem:[#allocation3 + $0x20] sm:$0xff] %vm50_vm9, %v6087_v42 }
 0xbe4   :  { %v6091_v43 = vpop.f32.mrf.mxu0 }
 0xbe5   :  { %v6092_v47 = vadd.f32 %v15169_v25, %v6091_v43 }
 0xbe6   :  { %v10387_v9 = vpop.f32.mrf.mxu0 }
 0xbe7   :  { %6203 = vst.msk [vmem:[#allocation3 + $0x28] sm:$0xff] %vm50_vm9, %v6092_v47 }
 0xbe8   :  { %v6096_v20 = vpop.f32.mrf.mxu0 }
 0xbe9   :  { %v6097_v39 = vadd.f32 %v15169_v25, %v6096_v20 }
 0xbea   :  { %v10390_v54 = vpop.f32.mrf.mxu0 }
 0xbeb   :  { %6204 = vst.msk [vmem:[#allocation3 + $0x30] sm:$0xff] %vm50_vm9, %v6097_v39 }
 0xbec   :  { %v6101_v2 = vpop.f32.mrf.mxu0 }
 0xbed   :  { %v6102_v26 = vadd.f32 %v15169_v25, %v6101_v2 }
 0xbee   :  { %v10393_v21 = vpop.f32.mrf.mxu0 }
 0xbef   :  { %6205 = vst.msk [vmem:[#allocation3 + $0x38] sm:$0xff] %vm50_vm9, %v6102_v26  ;;  %v6324_v21 = vld [vmem:[#allocation3 + $0xda] sm:$0xff] }
 0xbf0   :  { %v6106_v45 = vpop.f32.mrf.mxu0 }
 0xbf1   :  { %v6107_v49 = vadd.f32 %v15169_v25, %v6106_v45  ;;  %v6349_v45 = vld [vmem:[#allocation3 + $0xdb] sm:$0xff] }
 0xbf2   :  { %v10396_v57 = vpop.f32.mrf.mxu0 }
 0xbf3   :  { %6206 = vst.msk [vmem:[#allocation3 + $0x40] sm:$0xff] %vm50_vm9, %v6107_v49  ;;  %v6374_v49 = vmax.f32 %v6324_v21, %v6349_v45 }
 0xbf4   :  { %v6111_v7 = vpop.f32.mrf.mxu0 }
 0xbf5   :  { %v6112_v31 = vadd.f32 %v15169_v25, %v6111_v7 }
 0xbf6   :  { %v10399_v53 = vpop.f32.mrf.mxu0 }
 0xbf7   :  { %6207 = vst.msk [vmem:[#allocation3 + $0x48] sm:$0xff] %vm50_vm9, %v6112_v31 }
 0xbf8   :  { %v6116_v12 = vpop.f32.mrf.mxu0 }
 0xbf9   :  { %v6117_v38 = vadd.f32 %v15169_v25, %v6116_v12 }
 0xbfa   :  { %v10402_v27 = vpop.f32.mrf.mxu0 }
 0xbfb   :  { %6208 = vst.msk [vmem:[#allocation3 + $0x50] sm:$0xff] %vm50_vm9, %v6117_v38 }
 0xbfc   :  { %v6121_v59 = vpop.f32.mrf.mxu0 }
 0xbfd   :  { %v6122_v3 = vadd.f32 %v15169_v25, %v6121_v59 }
 0xbfe   :  { %v10405_v14 = vpop.f32.mrf.mxu0 }
 0xbff   :  { %6209 = vst.msk [vmem:[#allocation3 + $0x58] sm:$0xff] %vm50_vm9, %v6122_v3 }
 0xc00   :  { %v6126_v5 = vpop.f32.mrf.mxu0 }
 0xc01   :  { %v6127_v51 = vadd.f32 %v15169_v25, %v6126_v5 }
 0xc02   :  { %v10408_v17 = vpop.f32.mrf.mxu0 }
 0xc03   :  { %6210 = vst.msk [vmem:[#allocation3 + $0x60] sm:$0xff] %vm50_vm9, %v6127_v51 }
 0xc04   :  { %v6131_v24 = vpop.f32.mrf.mxu0 }
 0xc05   :  { %v6132_v16 = vadd.f32 %v15169_v25, %v6131_v24 }
 0xc06   :  { %v10411_v41 = vpop.f32.mrf.mxu0 }
 0xc07   :  { %6211 = vst.msk [vmem:[#allocation3 + $0x68] sm:$0xff] %vm50_vm9, %v6132_v16 }
 0xc08   :  { %v6136_v10 = vpop.f32.mrf.mxu0 }
 0xc09   :  { %v6137_v30 = vadd.f32 %v15169_v25, %v6136_v10 }
 0xc0a   :  { %v10414_v28 = vpop.f32.mrf.mxu0 }
 0xc0b   :  { %6212 = vst.msk [vmem:[#allocation3 + $0x70] sm:$0xff] %vm50_vm9, %v6137_v30 }
 0xc0c   :  { %v6141_v55 = vpop.f32.mrf.mxu0 }
 0xc0d   :  { %v6142_v18 = vadd.f32 %v15169_v25, %v6141_v55 }
 0xc0e   :  { %v10417_v29 = vpop.f32.mrf.mxu0 }
 0xc0f   :  { %6213 = vst.msk [vmem:[#allocation3 + $0x78] sm:$0xff] %vm50_vm9, %v6142_v18 }
 0xc10   :  { %v6146_v6 = vpop.f32.mrf.mxu0 }
 0xc11   :  { %v6147_v48 = vadd.f32 %v15169_v25, %v6146_v6 }
 0xc12   :  { %v10420_v61 = vpop.f32.mrf.mxu0 }
 0xc13   :  { %6214 = vst.msk [vmem:[#allocation3 + $0x80] sm:$0xff] %vm50_vm9, %v6147_v48  ;;  %v15221_v48 = vld [vmem:[#allocation4] sm:$0xff] }
 0xc14   :  { %v6151_v4 = vpop.f32.mrf.mxu0 }
 0xc15   :  { %v6152_v62 = vadd.f32 %v15169_v25, %v6151_v4 }
 0xc16   :  { %v10423_v44 = vpop.f32.mrf.mxu0 }
 0xc17   :  { %6215 = vst.msk [vmem:[#allocation3 + $0x88] sm:$0xff] %vm50_vm9, %v6152_v62 }
 0xc18   :  { %v6156_v19 = vpop.f32.mrf.mxu0 }
 0xc19   :  { %v6157_v34 = vadd.f32 %v15169_v25, %v6156_v19 }
 0xc1a   :  { %v10426_v37 = vpop.f32.mrf.mxu0 }
 0xc1b   :  { %6216 = vst.msk [vmem:[#allocation3 + $0x90] sm:$0xff] %vm50_vm9, %v6157_v34 }
 0xc1c   :  { %v6161_v36 = vpop.f32.mrf.mxu0 }
 0xc1d   :  { %v6162_v52 = vadd.f32 %v15169_v25, %v6161_v36 }
 0xc1e   :  { %v10429_v63 = vpop.f32.mrf.mxu0 }
 0xc1f   :  { %6217 = vst.msk [vmem:[#allocation3 + $0x98] sm:$0xff] %vm50_vm9, %v6162_v52 }
 0xc20   :  { %v6166_v1 = vpop.f32.mrf.mxu0 }
 0xc21   :  { %v6167_v60 = vadd.f32 %v15169_v25, %v6166_v1 }
 0xc22   :  { %v10432_v32 = vpop.f32.mrf.mxu0 }
 0xc23   :  { %6218 = vst.msk [vmem:[#allocation3 + $0xa0] sm:$0xff] %vm50_vm9, %v6167_v60 }
 0xc24   :  { %v6171_v11 = vpop.f32.mrf.mxu0 }
 0xc25   :  { %v6172_v8 = vadd.f32 %v15169_v25, %v6171_v11 }
 0xc26   :  { %v10435_v58 = vpop.f32.mrf.mxu0 }
 0xc27   :  { %6219 = vst.msk [vmem:[#allocation3 + $0xa8] sm:$0xff] %vm50_vm9, %v6172_v8 }
 0xc28   :  { %v6176_v0 = vpop.f32.mrf.mxu0 }
 0xc29   :  { %v6177_v15 = vadd.f32 %v15169_v25, %v6176_v0 }
 0xc2a   :  { %v10438_v56 = vpop.f32.mrf.mxu0 }
 0xc2b   :  { %6220 = vst.msk [vmem:[#allocation3 + $0xb0] sm:$0xff] %vm50_vm9, %v6177_v15 }
 0xc2c   :  { %v6181_v13 = vpop.f32.mrf.mxu0 }
 0xc2d   :  { %v6182_v50 = vadd.f32 %v15169_v25, %v6181_v13  ;;  %v6243_v13 = vld [vmem:[#allocation3 + $0xa0] sm:$0xff] }
 0xc2e   :  { %v10441_v42 = vpop.f32.mrf.mxu0  ;;  %v6244_v32 = vld [vmem:[#allocation3 + $0xa8] sm:$0xff] }
 0xc2f   :  { %6221 = vst.msk [vmem:[#allocation3 + $0xb8] sm:$0xff] %vm50_vm9, %v6182_v50  ;;  %v6268_v8 = vld [vmem:[#allocation3 + $0xa1] sm:$0xff]  ;;  %v6267_v42 = vld [vmem:[#allocation3 + $0x99] sm:$0xff] }
 0xc30   :  { %v6186_v35 = vpop.f32.mrf.mxu0  ;;  %v6317_v58 = vld [vmem:[#allocation3 + $0xa2] sm:$0xff] }
 0xc31   :  { %v6187_v43 = vadd.f32 %v15169_v25, %v6186_v35  ;;  %v6342_v0 = vld [vmem:[#allocation3 + $0xa3] sm:$0xff]  ;;  %v6316_v35 = vld [vmem:[#allocation3 + $0x9a] sm:$0xff] }
 0xc32   :  { %v10444_v47 = vpop.f32.mrf.mxu0  ;;  %v6245_v34 = vld [vmem:[#allocation3 + $0xb0] sm:$0xff] }
 0xc33   :  { %6222 = vst.msk [vmem:[#allocation3 + $0xc0] sm:$0xff] %vm50_vm9, %v6187_v43  ;;  %v6269_v36 = vld [vmem:[#allocation3 + $0xa9] sm:$0xff]  ;;  %v6341_v43 = vld [vmem:[#allocation3 + $0x9b] sm:$0xff] }
 0xc34   :  { %v6191_v9 = vpop.f32.mrf.mxu0  ;;  %v6318_v52 = vld [vmem:[#allocation3 + $0xaa] sm:$0xff]  ;;  %v6294_v56 = vmax.f32 %v6244_v32, %v6269_v36 }
 0xc35   :  { %v6192_v20 = vadd.f32 %v15169_v25, %v6191_v9  ;;  %v6343_v63 = vld [vmem:[#allocation3 + $0xab] sm:$0xff]  ;;  %v6293_v9 = vmax.f32 %v6243_v13, %v6268_v8  ;;  %v6260_v8 = vld [vmem:[#allocation3 + $0x61] sm:$0xff] }
 0xc36   :  { %v10447_v39 = vpop.f32.mrf.mxu0  ;;  %v6246_v29 = vld [vmem:[#allocation3 + $0xb8] sm:$0xff]  ;;  %v6368_v50 = vmax.f32 %v6318_v52, %v6343_v63  ;;  %v6261_v36 = vld [vmem:[#allocation3 + $0x69] sm:$0xff] }
 0xc37   :  { %6223 = vst.msk [vmem:[#allocation3 + $0xc8] sm:$0xff] %vm50_vm9, %v6192_v20  ;;  %v6270_v61 = vld [vmem:[#allocation3 + $0xb1] sm:$0xff]  ;;  %v6367_v39 = vmax.f32 %v6317_v58, %v6342_v0  ;;  %v6236_v32 = vld [vmem:[#allocation3 + $0x68] sm:$0xff] }
 0xc38   :  { %v6196_v54 = vpop.f32.mrf.mxu0  ;;  %v6319_v4 = vld [vmem:[#allocation3 + $0xb2] sm:$0xff]  ;;  %v6295_v60 = vmax.f32 %v6245_v34, %v6270_v61  ;;  %v6393_v21 = vmax.f32 %v6293_v9, %v6368_v50  ;;  %v6310_v52 = vld [vmem:[#allocation3 + $0x6a] sm:$0xff]  ;;  %v6309_v58 = vld [vmem:[#allocation3 + $0x62] sm:$0xff]  ;;  %v6286_v13 = vmax.f32 %v6236_v32, %v6261_v36 }
 0xc39   :  { %v6197_v2 = vadd.f32 %v15169_v25, %v6196_v54  ;;  %v6344_v62 = vld [vmem:[#allocation3 + $0xb3] sm:$0xff]  ;;  %v6335_v63 = vld [vmem:[#allocation3 + $0x6b] sm:$0xff]  ;;  %v6334_v0 = vld [vmem:[#allocation3 + $0x63] sm:$0xff] }
 0xc3a   :  { %v10450_v26 = vpop.f32.mrf.mxu0  ;;  %v6247_v16 = vld [vmem:[#allocation3 + $0xc0] sm:$0xff]  ;;  %v6369_v11 = vmax.f32 %v6319_v4, %v6344_v62  ;;  %v6242_v20 = vld [vmem:[#allocation3 + $0x98] sm:$0xff]  ;;  %v6237_v34 = vld [vmem:[#allocation3 + $0x70] sm:$0xff] }
 0xc3b   :  { %6224 = vst.msk [vmem:[#allocation3 + $0xd0] sm:$0xff] %vm50_vm9, %v6197_v2  ;;  %v6271_v10 = vld [vmem:[#allocation3 + $0xb9] sm:$0xff]  ;;  %v6266_v54 = vld [vmem:[#allocation3 + $0x91] sm:$0xff]  ;;  %v6292_v45 = vmax.f32 %v6242_v20, %v6267_v42  ;;  %v6360_v42 = vmax.f32 %v6310_v52, %v6335_v63  ;;  %v6253_v63 = vld [vmem:[#allocation3 + $0x29] sm:$0xff] }
 0xc3c   :  { %v6320_v30 = vld [vmem:[#allocation3 + $0xba] sm:$0xff]  ;;  %v6296_v19 = vmax.f32 %v6246_v29, %v6271_v10  ;;  %v6394_v47 = vmax.f32 %v6294_v56, %v6369_v11  ;;  %v6315_v2 = vld [vmem:[#allocation3 + $0x92] sm:$0xff] }
 0xc3d   :  { %v6345_v28 = vld [vmem:[#allocation3 + $0xbb] sm:$0xff]  ;;  %v6340_v26 = vld [vmem:[#allocation3 + $0x93] sm:$0xff] }
 0xc3e   :  { %v6248_v57 = vld [vmem:[#allocation3 + $0xc8] sm:$0xff]  ;;  %v6370_v37 = vmax.f32 %v6320_v30, %v6345_v28  ;;  %v6312_v10 = vld [vmem:[#allocation3 + $0x7a] sm:$0xff]  ;;  %v6311_v61 = vld [vmem:[#allocation3 + $0x72] sm:$0xff] }
 0xc3f   :  { %v6272_v12 = vld [vmem:[#allocation3 + $0xc1] sm:$0xff]  ;;  %v6336_v4 = vld [vmem:[#allocation3 + $0x73] sm:$0xff] }
 0xc40   :  { %v6321_v17 = vld [vmem:[#allocation3 + $0xc2] sm:$0xff]  ;;  %v6297_v18 = vmax.f32 %v6247_v16, %v6272_v12  ;;  %v6395_v15 = vmax.f32 %v6295_v60, %v6370_v37  ;;  %v6392_v12 = vmax.f32 %v6292_v45, %v6367_v39  ;;  %v6361_v11 = vmax.f32 %v6311_v61, %v6336_v4  ;;  %v6411_v56 = vld [vmem:[#allocation5 + $0x840] sm:$0xff]  ;;  %v6234_v39 = vld [vmem:[#allocation3 + $0x58] sm:$0xff] }
 0xc41   :  { %v6346_v25 = vld [vmem:[#allocation3 + $0xc3] sm:$0xff]  ;;  %v6337_v30 = vld [vmem:[#allocation3 + $0x7b] sm:$0xff]  ;;  %v6254_v4 = vld [vmem:[#allocation3 + $0x31] sm:$0xff] }
 0xc42   :  { %v6249_v7 = vld [vmem:[#allocation3 + $0xd0] sm:$0xff]  ;;  %v6371_v6 = vmax.f32 %v6321_v17, %v6346_v25  ;;  %v6409_v17 = vld [vmem:[#allocation5 + $0x830] sm:$0xff]  ;;  %v6362_v37 = vmax.f32 %v6312_v10, %v6337_v30  ;;  %v6386_v9 = vmax.f32 %v6286_v13, %v6361_v11 }
 0xc43   :  { %v6274_v31 = vld [vmem:[#allocation3 + $0xd1] sm:$0xff]  ;;  %v6273_v53 = vld [vmem:[#allocation3 + $0xc9] sm:$0xff]  ;;  %v6235_v50 = vld [vmem:[#allocation3 + $0x60] sm:$0xff] }
 0xc44   :  { %v6299_v38 = vmax.f32 %v6249_v7, %v6274_v31  ;;  %v6298_v27 = vmax.f32 %v6248_v57, %v6273_v53  ;;  %v6323_v59 = vld [vmem:[#allocation3 + $0xd2] sm:$0xff]  ;;  %v6322_v14 = vld [vmem:[#allocation3 + $0xca] sm:$0xff]  ;;  %v6396_v1 = vmax.f32 %v6296_v19, %v6371_v6  ;;  %v6366_v57 = vmax.f32 %v6316_v35, %v6341_v43  ;;  %v6308_v43 = vld [vmem:[#allocation3 + $0x5a] sm:$0xff] }
 0xc45   :  { %v6348_v3 = vld [vmem:[#allocation3 + $0xd3] sm:$0xff]  ;;  %v6347_v51 = vld [vmem:[#allocation3 + $0xcb] sm:$0xff]  ;;  %v6285_v20 = vmax.f32 %v6235_v50, %v6260_v8 }
 0xc46   :  { %v6373_v5 = vmax.f32 %v6323_v59, %v6348_v3  ;;  %v6399_v24 = vmax.f32 %v6299_v38, %v6374_v49  ;;  %v6372_v41 = vmax.f32 %v6322_v14, %v6347_v51  ;;  %v6241_v49 = vld [vmem:[#allocation3 + $0x90] sm:$0xff]  ;;  %v6365_v59 = vmax.f32 %v6315_v2, %v6340_v26  ;;  %v6264_v3 = vld [vmem:[#allocation3 + $0x81] sm:$0xff]  ;;  %v6259_v35 = vld [vmem:[#allocation3 + $0x59] sm:$0xff] }
 0xc47   :  { %v6265_v7 = vld [vmem:[#allocation3 + $0x89] sm:$0xff]  ;;  %v6291_v38 = vmax.f32 %v6241_v49, %v6266_v54  ;;  %v6262_v6 = vld [vmem:[#allocation3 + $0x71] sm:$0xff]  ;;  %v6359_v54 = vmax.f32 %v6309_v58, %v6334_v0  ;;  %v6385_v45 = vmax.f32 %v6285_v20, %v6360_v42  ;;  %v6255_v30 = vld [vmem:[#allocation3 + $0x39] sm:$0xff] }
 0xc48   :  { %10452 = vmatpush3.msra.mxu1 %v6399_v24  ;;  %v6398_v55 = vmax.f32 %v6298_v27, %v6373_v5  ;;  %v6397_v44 = vmax.f32 %v6297_v18, %v6372_v41  ;;  %v6314_v31 = vld [vmem:[#allocation3 + $0x8a] sm:$0xff]  ;;  %v6313_v14 = vld [vmem:[#allocation3 + $0x82] sm:$0xff]  ;;  %v6263_v41 = vld [vmem:[#allocation3 + $0x79] sm:$0xff]  ;;  %v6287_v60 = vmax.f32 %v6237_v34, %v6262_v6 }
 0xc49   :  { %10453 = vmatprep.subr.mxu1 %v15221_v48  ;;  %v6339_v53 = vld [vmem:[#allocation3 + $0x8b] sm:$0xff]  ;;  %v6338_v5 = vld [vmem:[#allocation3 + $0x83] sm:$0xff]  ;;  %v6391_v51 = vmax.f32 %v6291_v38, %v6366_v57  ;;  %v6238_v18 = vld [vmem:[#allocation3 + $0x78] sm:$0xff]  ;;  %v6284_v57 = vmax.f32 %v6234_v39, %v6259_v35 }
 0xc4a   :  { %10454 = vmatpush3.msra.mxu1 %v6398_v55  ;;  %v6240_v27 = vld [vmem:[#allocation3 + $0x88] sm:$0xff]  ;;  %v6239_v24 = vld [vmem:[#allocation3 + $0x80] sm:$0xff]  ;;  %v6364_v16 = vmax.f32 %v6314_v31, %v6339_v53  ;;  %v6363_v29 = vmax.f32 %v6313_v14, %v6338_v5  ;;  %v6288_v19 = vmax.f32 %v6238_v18, %v6263_v41  ;;  %v6258_v2 = vld [vmem:[#allocation3 + $0x51] sm:$0xff] }
 0xc4b   :  { %10455 = vmatprep.subr.mxu1 %v15221_v48  ;;  %v6290_v25 = vmax.f32 %v6240_v27, %v6265_v7  ;;  %v6289_v55 = vmax.f32 %v6239_v24, %v6264_v3  ;;  %v6307_v26 = vld [vmem:[#allocation3 + $0x52] sm:$0xff]  ;;  %v6257_v53 = vld [vmem:[#allocation3 + $0x49] sm:$0xff]  ;;  %v6384_v27 = vmax.f32 %v6284_v57, %v6359_v54  ;;  %v6256_v5 = vld [vmem:[#allocation3 + $0x41] sm:$0xff] }
 0xc4c   :  { %10456 = vmatpush3.msra.mxu1 %v6397_v44  ;;  %v6410_v44 = vld [vmem:[#allocation5 + $0x838] sm:$0xff]  ;;  %v6412_v49 = vld [vmem:[#allocation5 + $0x848] sm:$0xff]  ;;  %v6233_v7 = vld [vmem:[#allocation3 + $0x50] sm:$0xff] }
 0xc4d   :  { %10457 = vmatprep.subr.mxu1 %v15221_v48  ;;  %v6390_v28 = vmax.f32 %v6290_v25, %v6365_v59  ;;  %v6389_v62 = vmax.f32 %v6289_v55, %v6364_v16  ;;  %v6331_v38 = vld [vmem:[#allocation3 + $0x4b] sm:$0xff]  ;;  %v6283_v59 = vmax.f32 %v6233_v7, %v6258_v2  ;;  %v6413_v24 = vld [vmem:[#allocation5 + $0x850] sm:$0xff]  ;;  %v6230_v6 = vld [vmem:[#allocation3 + $0x38] sm:$0xff] }
 0xc4e   :  { %10458 = vmatpush3.msra.mxu1 %v6396_v1  ;;  %v6388_v1 = vmax.f32 %v6288_v19, %v6363_v29  ;;  %v6232_v3 = vld [vmem:[#allocation3 + $0x48] sm:$0xff]  ;;  %v6231_v41 = vld [vmem:[#allocation3 + $0x40] sm:$0xff]  ;;  %v6229_v36 = vld [vmem:[#allocation3 + $0x30] sm:$0xff] }
 0xc4f   :  { %10459 = vmatprep.subr.mxu1 %v15221_v48  ;;  %v6282_v16 = vmax.f32 %v6232_v3, %v6257_v53  ;;  %v6329_v55 = vld [vmem:[#allocation3 + $0x3b] sm:$0xff]  ;;  %v6281_v29 = vmax.f32 %v6231_v41, %v6256_v5  ;;  %v6414_v34 = vld [vmem:[#allocation5 + $0x858] sm:$0xff]  ;;  %v6279_v11 = vmax.f32 %v6229_v36, %v6254_v4  ;;  %v6415_v50 = vld [vmem:[#allocation5 + $0x860] sm:$0xff] }
 0xc50   :  { %10460 = vmatpush3.msra.mxu1 %v6395_v15  ;;  %v6387_v15 = vmax.f32 %v6287_v60, %v6362_v37  ;;  %v6280_v37 = vmax.f32 %v6230_v6, %v6255_v30  ;;  %v6327_v60 = vld [vmem:[#allocation3 + $0x2b] sm:$0xff]  ;;  %v6252_v0 = vld [vmem:[#allocation3 + $0x21] sm:$0xff] }
 0xc51   :  { %10461 = vmatprep.subr.mxu1 %v15221_v48  ;;  %v6228_v8 = vld [vmem:[#allocation3 + $0x28] sm:$0xff]  ;;  %v6227_v35 = vld [vmem:[#allocation3 + $0x20] sm:$0xff]  ;;  %v6403_v5 = vld [vmem:[#allocation5 + $0x800] sm:$0xff] }
 0xc52   :  { %10462 = vmatpush3.msra.mxu1 %v6394_v47  ;;  %v6333_v47 = vld [vmem:[#allocation3 + $0x5b] sm:$0xff]  ;;  %v6278_v42 = vmax.f32 %v6228_v8, %v6253_v63  ;;  %v6277_v54 = vmax.f32 %v6227_v35, %v6252_v0  ;;  %v6706_v41 = vld [vmem:[#allocation5 + $0x338] sm:$0xff]  ;;  %v6687_v6 = vld [vmem:[#allocation5 + $0x2a0] sm:$0xff] }
 0xc53   :  { %10463 = vmatprep.subr.mxu1 %v15221_v48  ;;  %v6358_v31 = vmax.f32 %v6308_v43, %v6333_v47  ;;  %v6251_v47 = vld [vmem:[#allocation3 + $0x19] sm:$0xff]  ;;  %v6686_v4 = vld [vmem:[#allocation5 + $0x298] sm:$0xff]  ;;  %v6683_v36 = vld [vmem:[#allocation5 + $0x280] sm:$0xff] }
 0xc54   :  { %10464 = vmatpush3.msra.mxu1 %v6393_v21  ;;  %v6332_v21 = vld [vmem:[#allocation3 + $0x53] sm:$0xff]  ;;  %v6325_v20 = vld [vmem:[#allocation3 + $0x1b] sm:$0xff]  ;;  %v6682_v63 = vld [vmem:[#allocation5 + $0x278] sm:$0xff] }
 0xc55   :  { %10465 = vmatprep.subr.mxu1 %v15221_v48  ;;  %v6357_v14 = vmax.f32 %v6307_v26, %v6332_v21  ;;  %v6383_v25 = vmax.f32 %v6283_v59, %v6358_v31  ;;  %v6226_v26 = vld [vmem:[#allocation3 + $0x18] sm:$0xff]  ;;  %v6225_v31 = vld [vmem:[#allocation3 + $0x10] sm:$0xff]  ;;  %v6401_v3 = vld [vmem:[#allocation5 + $0x7f0] sm:$0xff] }
 0xc56   :  { %10466 = vmatpush3.msra.mxu1 %v6392_v12  ;;  %v6306_v12 = vld [vmem:[#allocation3 + $0x4a] sm:$0xff]  ;;  %v6276_v57 = vmax.f32 %v6226_v26, %v6251_v47  ;;  %v6400_v59 = vld [vmem:[#allocation5 + $0x7e8] sm:$0xff]  ;;  %v6705_v30 = vld [vmem:[#allocation5 + $0x330] sm:$0xff] }
 0xc57   :  { %10467 = vmatprep.subr.mxu1 %v15221_v48  ;;  %v6356_v10 = vmax.f32 %v6306_v12, %v6331_v38  ;;  %v6382_v18 = vmax.f32 %v6282_v16, %v6357_v14  ;;  %v6250_v21 = vld [vmem:[#allocation3 + $0x11] sm:$0xff]  ;;  %v6402_v14 = vld [vmem:[#allocation5 + $0x7f8] sm:$0xff] }
 0xc58   :  { %10468 = vmatpush3.msra.mxu1 %v6391_v51  ;;  %v6305_v51 = vld [vmem:[#allocation3 + $0x42] sm:$0xff]  ;;  %v6275_v12 = vmax.f32 %v6225_v31, %v6250_v21  ;;  %v6408_v16 = vld [vmem:[#allocation5 + $0x828] sm:$0xff]  ;;  %v6695_v8 = vld [vmem:[#allocation5 + $0x2e0] sm:$0xff] }
 0xc59   :  { %10470 = vmatmul.mubr.msk.f32.vlgmr.msra.gmra.mxu1 %vm6418_vm12, %v6409_v17  ;;  %10496 = vmatprep.subr.mxu1 %v15221_v48  ;;  %v6330_v17 = vld [vmem:[#allocation3 + $0x43] sm:$0xff]  ;;  %v6381_v19 = vmax.f32 %v6281_v29, %v6356_v10  ;;  %v6703_v29 = vld [vmem:[#allocation5 + $0x320] sm:$0xff] }
 0xc5a   :  { %10497 = vmatpush3.msra.mxu1 %v6390_v28  ;;  %10472 = vmatprep.mubr.msk.f32.mxu1 %vm11829_vm1, %v15221_v48  ;;  %v6304_v28 = vld [vmem:[#allocation3 + $0x3a] sm:$0xff]  ;;  %v6355_v61 = vmax.f32 %v6305_v51, %v6330_v17  ;;  %v6690_v10 = vld [vmem:[#allocation5 + $0x2b8] sm:$0xff] }
 0xc5b   :  { %10498 = vmatprep.subr.mxu1 %v15221_v48  ;;  %v6354_v52 = vmax.f32 %v6304_v28, %v6329_v55  ;;  %v6404_v51 = vld [vmem:[#allocation5 + $0x808] sm:$0xff]  ;;  %v6405_v17 = vld [vmem:[#allocation5 + $0x810] sm:$0xff]  ;;  %v6694_v0 = vld [vmem:[#allocation5 + $0x2d8] sm:$0xff] }
 0xc5c   :  { %10499 = vmatpush3.msra.mxu1 %v6389_v62  ;;  %v6303_v62 = vld [vmem:[#allocation3 + $0x32] sm:$0xff]  ;;  %v6380_v32 = vmax.f32 %v6280_v37, %v6355_v61  ;;  %v6689_v28 = vld [vmem:[#allocation5 + $0x2b0] sm:$0xff]  ;;  %v6702_v61 = vld [vmem:[#allocation5 + $0x318] sm:$0xff] }
 0xc5d   :  { %10473 = vmatmul.mubr.msk.f32.gmra.mxu1 %vm6418_vm12, %v6410_v44  ;;  %10500 = vmatprep.subr.mxu1 %v15221_v48  ;;  %v6328_v44 = vld [vmem:[#allocation3 + $0x33] sm:$0xff]  ;;  %v6379_v13 = vmax.f32 %v6279_v11, %v6354_v52  ;;  %v6698_v52 = vld [vmem:[#allocation5 + $0x2f8] sm:$0xff] }
 0xc5e   :  { %10501 = vmatpush3.msra.mxu1 %v6388_v1  ;;  %10475 = vmatprep.mubr.msk.f32.mxu1 %vm11829_vm1, %v15221_v48  ;;  %v6302_v1 = vld [vmem:[#allocation3 + $0x2a] sm:$0xff]  ;;  %v6353_v58 = vmax.f32 %v6303_v62, %v6328_v44  ;;  %v6704_v55 = vld [vmem:[#allocation5 + $0x328] sm:$0xff]  ;;  %v6701_v62 = vld [vmem:[#allocation5 + $0x310] sm:$0xff] }
 0xc5f   :  { %10502 = vmatprep.subr.mxu1 %v15221_v48  ;;  %v6352_v43 = vmax.f32 %v6302_v1, %v6327_v60  ;;  %v6685_v44 = vld [vmem:[#allocation5 + $0x290] sm:$0xff]  ;;  %v6699_v37 = vld [vmem:[#allocation5 + $0x300] sm:$0xff]  ;;  %v6680_v11 = vld [vmem:[#allocation5 + $0x268] sm:$0xff] }
 0xc60   :  { %10503 = vmatpush3.msra.mxu1 %v6387_v15  ;;  %v6301_v15 = vld [vmem:[#allocation3 + $0x22] sm:$0xff]  ;;  %v6378_v39 = vmax.f32 %v6278_v42, %v6353_v58  ;;  %v6679_v58 = vld [vmem:[#allocation5 + $0x260] sm:$0xff] }
 0xc61   :  { %10476 = vmatmul.mubr.msk.f32.gmra.mxu1 %vm6418_vm12, %v6411_v56  ;;  %10504 = vmatprep.subr.mxu1 %v15221_v48  ;;  %v6326_v56 = vld [vmem:[#allocation3 + $0x23] sm:$0xff] }
 0xc62   :  { %10505 = vmatpush3.msra.mxu1 %v6386_v9  ;;  %10478 = vmatprep.mubr.msk.f32.mxu1 %vm11829_vm1, %v15221_v48  ;;  %v6300_v9 = vld [vmem:[#allocation3 + $0x1a] sm:$0xff]  ;;  %v6351_v2 = vmax.f32 %v6301_v15, %v6326_v56  ;;  %v6678_v15 = vld [vmem:[#allocation5 + $0x258] sm:$0xff] }
 0xc63   :  { %10506 = vmatprep.subr.mxu1 %v15221_v48  ;;  %v6350_v7 = vmax.f32 %v6300_v9, %v6325_v20  ;;  %v6697_v1 = vld [vmem:[#allocation5 + $0x2f0] sm:$0xff] }
 0xc64   :  { %10507 = vmatpush3.msra.mxu1 %v6385_v45  ;;  %v6377_v45 = vmax.f32 %v6277_v54, %v6352_v43  ;;  %v6376_v53 = vmax.f32 %v6276_v57, %v6351_v2  ;;  %v6681_v60 = vld [vmem:[#allocation5 + $0x270] sm:$0xff] }
 0xc65   :  { %10479 = vmatmul.mubr.msk.f32.gmra.mxu1 %vm6418_vm12, %v6412_v49  ;;  %10508 = vmatprep.subr.mxu1 %v15221_v48  ;;  %v6416_v49 = vld [vmem:[#allocation5 + $0x868] sm:$0xff]  ;;  %v6375_v38 = vmax.f32 %v6275_v12, %v6350_v7  ;;  %v6693_v56 = vld [vmem:[#allocation5 + $0x2d0] sm:$0xff] }
 0xc66   :  { %10509 = vmatpush3.msra.mxu1 %v6384_v27  ;;  %10481 = vmatprep.mubr.msk.f32.mxu1 %vm11829_vm1, %v15221_v48  ;;  %v6417_v27 = vld [vmem:[#allocation5 + $0x870] sm:$0xff] }
 0xc67   :  { %10510 = vmatprep.subr.mxu1 %v15221_v48 }
 0xc68   :  { %10511 = vmatpush3.msra.mxu1 %v6383_v25  ;;  %v6406_v25 = vld [vmem:[#allocation5 + $0x818] sm:$0xff] }
 0xc69   :  { %10482 = vmatmul.mubr.msk.f32.gmra.mxu1 %vm6418_vm12, %v6413_v24  ;;  %10512 = vmatprep.subr.mxu1 %v15221_v48  ;;  %v6407_v24 = vld [vmem:[#allocation5 + $0x820] sm:$0xff] }
 0xc6a   :  { %10513 = vmatpush3.msra.mxu1 %v6382_v18  ;;  %10484 = vmatprep.mubr.msk.f32.mxu1 %vm11829_vm1, %v15221_v48  ;;  %v6688_v18 = vld [vmem:[#allocation5 + $0x2a8] sm:$0xff] }
 0xc6b   :  { %10514 = vmatprep.subr.mxu1 %v15221_v48 }
 0xc6c   :  { %10515 = vmatpush3.msra.mxu1 %v6381_v19  ;;  %v6700_v19 = vld [vmem:[#allocation5 + $0x308] sm:$0xff] }
 0xc6d   :  { %10485 = vmatmul.mubr.msk.f32.gmra.mxu1 %vm6418_vm12, %v6414_v34  ;;  %10516 = vmatprep.subr.mxu1 %v15221_v48  ;;  %v6684_v34 = vld [vmem:[#allocation5 + $0x288] sm:$0xff] }
 0xc6e   :  { %10517 = vmatpush3.msra.mxu1 %v6380_v32  ;;  %10487 = vmatprep.mubr.msk.f32.mxu1 %vm11829_vm1, %v15221_v48  ;;  %v6696_v32 = vld [vmem:[#allocation5 + $0x2e8] sm:$0xff] }
 0xc6f   :  { %10518 = vmatprep.subr.mxu1 %v15221_v48 }
 0xc70   :  { %10519 = vmatpush3.msra.mxu1 %v6379_v13  ;;  %v6677_v13 = vld [vmem:[#allocation5 + $0x250] sm:$0xff] }
 0xc71   :  { %10488 = vmatmul.mubr.msk.f32.gmra.mxu1 %vm6418_vm12, %v6415_v50  ;;  %10520 = vmatprep.subr.mxu1 %v15221_v48 }
 0xc72   :  { %10521 = vmatpush3.msra.mxu1 %v6378_v39  ;;  %10490 = vmatprep.mubr.msk.f32.mxu1 %vm11829_vm1, %v15221_v48 }
 0xc73   :  { %10522 = vmatprep.subr.mxu1 %v15221_v48 }
 0xc74   :  { %10523 = vmatpush3.msra.mxu1 %v6377_v45 }
 0xc75   :  { %10491 = vmatmul.mubr.msk.f32.gmra.mxu1 %vm6418_vm12, %v6416_v49  ;;  %10524 = vmatprep.subr.mxu1 %v15221_v48 }
 0xc76   :  { %10525 = vmatpush3.msra.mxu1 %v6376_v53  ;;  %10493 = vmatprep.mubr.msk.f32.mxu1 %vm11829_vm1, %v15221_v48 }
 0xc77   :  { %10526 = vmatprep.subr.mxu1 %v15221_v48 }
 0xc78   :  { %10527 = vmatpush3.msra.mxu1 %v6375_v38 }
 0xc79   :  { %10494 = vmatmul.mubr.msk.f32.gmra.mxu1 %vm6418_vm12, %v6417_v27  ;;  %9353 = vmatprep.subr.mxu1 %v6706_v41  ;;  %v6736_v41 = vld [vmem:[#allocation5 + $0x428] sm:$0xff] }
 0xc7a   :  { %10528 = vmatprep.mubr.msk.f32.mxu1 %vm11829_vm1, %v15221_v48 }
 0xc7d   :  { %10529 = vmatmul.mubr.f32.vlgmr.msra.gmra.mxu1 %v6400_v59  ;;  %v6692_v59 = vld [vmem:[#allocation5 + $0x2c8] sm:$0xff] }
 0xc7e   :  { %10531 = vmatprep.mubr.msk.f32.mxu1 %vm11829_vm1, %v15221_v48  ;;  %9354 = vmatpush3.msra.mxu1 %v6690_v10 }
 0xc7f   :  { %9355 = vmatprep.subr.mxu1 %v6705_v30  ;;  %v6720_v30 = vld [vmem:[#allocation5 + $0x3a8] sm:$0xff] }
 0xc80   :  { %9356 = vmatpush3.msra.mxu1 %v6689_v28 }
 0xc81   :  { %10532 = vmatmul.mubr.f32.gmra.mxu1 %v6401_v3  ;;  %9357 = vmatprep.subr.mxu1 %v6704_v55  ;;  %v6738_v3 = vld [vmem:[#allocation5 + $0x438] sm:$0xff]  ;;  %v6735_v55 = vld [vmem:[#allocation5 + $0x420] sm:$0xff] }
 0xc82   :  { %10534 = vmatprep.mubr.msk.f32.mxu1 %vm11829_vm1, %v15221_v48  ;;  %9358 = vmatpush3.msra.mxu1 %v6688_v18  ;;  %v6719_v18 = vld [vmem:[#allocation5 + $0x3a0] sm:$0xff] }
 0xc83   :  { %9359 = vmatprep.subr.mxu1 %v6703_v29  ;;  %9412 = vmatprep.subr.mxu0 %v6738_v3 }
 0xc84   :  { %9360 = vmatpush3.msra.mxu1 %v6687_v6  ;;  %v6734_v6 = vld [vmem:[#allocation5 + $0x418] sm:$0xff] }
 0xc85   :  { %10535 = vmatmul.mubr.f32.gmra.mxu1 %v6402_v14  ;;  %9361 = vmatprep.subr.mxu1 %v6702_v61  ;;  %v6676_v14 = vld [vmem:[#allocation5 + $0x248] sm:$0xff] }
 0xc86   :  { %10537 = vmatprep.mubr.msk.f32.mxu1 %vm11829_vm1, %v15221_v48  ;;  %9362 = vmatpush3.msra.mxu1 %v6686_v4  ;;  %v6718_v4 = vld [vmem:[#allocation5 + $0x398] sm:$0xff] }
 0xc87   :  { %9363 = vmatprep.subr.mxu1 %v6701_v62 }
 0xc88   :  { %9364 = vmatpush3.msra.mxu1 %v6685_v44 }
 0xc89   :  { %10538 = vmatmul.mubr.f32.gmra.mxu1 %v6403_v5  ;;  %9365 = vmatprep.subr.mxu1 %v6700_v19  ;;  %v6722_v5 = vld [vmem:[#allocation5 + $0x3b8] sm:$0xff] }
 0xc8a   :  { %10540 = vmatprep.mubr.msk.f32.mxu1 %vm11829_vm1, %v15221_v48  ;;  %9366 = vmatpush3.msra.mxu1 %v6684_v34  ;;  %v6733_v34 = vld [vmem:[#allocation5 + $0x410] sm:$0xff] }
 0xc8b   :  { %9367 = vmatprep.subr.mxu1 %v6699_v37  ;;  %9413 = vmatpush3.msra.mxu0 %v6722_v5  ;;  %v6710_v5 = vld [vmem:[#allocation5 + $0x358] sm:$0xff] }
 0xc8c   :  { %9368 = vmatpush3.msra.mxu1 %v6683_v36  ;;  %v6717_v36 = vld [vmem:[#allocation5 + $0x390] sm:$0xff] }
 0xc8d   :  { %10541 = vmatmul.mubr.f32.gmra.mxu1 %v6404_v51  ;;  %9369 = vmatprep.subr.mxu1 %v6698_v52  ;;  %v6691_v51 = vld [vmem:[#allocation5 + $0x2c0] sm:$0xff] }
 0xc8e   :  { %10543 = vmatprep.mubr.msk.f32.mxu1 %vm11829_vm1, %v15221_v48  ;;  %9370 = vmatpush3.msra.mxu1 %v6682_v63 }
 0xc8f   :  { %9371 = vmatprep.subr.mxu1 %v6697_v1  ;;  %v6716_v1 = vld [vmem:[#allocation5 + $0x388] sm:$0xff] }
 0xc90   :  { %9372 = vmatpush3.msra.mxu1 %v6681_v60 }
 0xc91   :  { %10544 = vmatmul.mubr.f32.gmra.mxu1 %v6405_v17  ;;  %9373 = vmatprep.subr.mxu1 %v6696_v32  ;;  %v6737_v17 = vld [vmem:[#allocation5 + $0x430] sm:$0xff] }
 0xc92   :  { %10546 = vmatprep.mubr.msk.f32.mxu1 %vm11829_vm1, %v15221_v48  ;;  %9374 = vmatpush3.msra.mxu1 %v6680_v11 }
 0xc93   :  { %9375 = vmatprep.subr.mxu1 %v6695_v8  ;;  %9414 = vmatprep.subr.mxu0 %v6737_v17  ;;  %v6731_v8 = vld [vmem:[#allocation5 + $0x400] sm:$0xff] }
 0xc94   :  { %9376 = vmatpush3.msra.mxu1 %v6679_v58 }
 0xc95   :  { %10547 = vmatmul.mubr.f32.gmra.mxu1 %v6406_v25  ;;  %9377 = vmatprep.subr.mxu1 %v6694_v0  ;;  %v6715_v0 = vld [vmem:[#allocation5 + $0x380] sm:$0xff] }
 0xc96   :  { %10549 = vmatprep.mubr.msk.f32.mxu1 %vm11829_vm1, %v15221_v48  ;;  %9378 = vmatpush3.msra.mxu1 %v6678_v15 }
 0xc97   :  { %9379 = vmatprep.subr.mxu1 %v6693_v56  ;;  %v6730_v56 = vld [vmem:[#allocation5 + $0x3f8] sm:$0xff] }
 0xc98   :  { %9380 = vmatpush3.msra.mxu1 %v6677_v13 }
 0xc99   :  { %10550 = vmatmul.mubr.f32.gmra.mxu1 %v6407_v24  ;;  %9381 = vmatprep.subr.mxu1 %v6692_v59  ;;  %v6675_v24 = vld [vmem:[#allocation5 + $0x240] sm:$0xff] }
 0xc9a   :  { %10552 = vmatprep.mubr.msk.f32.mxu1 %vm11829_vm1, %v15221_v48  ;;  %9382 = vmatpush3.msra.mxu1 %v6676_v14  ;;  %v6711_v59 = vld [vmem:[#allocation5 + $0x360] sm:$0xff] }
 0xc9b   :  { %9383 = vmatprep.subr.mxu1 %v6691_v51 }
 0xc9c   :  { %9384 = vmatpush3.msra.mxu1 %v6675_v24  ;;  %v6725_v24 = vld [vmem:[#allocation5 + $0x3d0] sm:$0xff] }
 0xc9d   :  { %10553 = vmatmul.mubr.f32.gmra.mxu1 %v6408_v16  ;;  %v6721_v16 = vld [vmem:[#allocation5 + $0x3b0] sm:$0xff]  ;;  %10555 = vmatprep.subr.mxu1 %v15221_v48  ;;  %v6732_v48 = vld [vmem:[#allocation5 + $0x408] sm:$0xff] }
 0xc9e   :  { %9415 = vmatpush3.msra.mxu0 %v6721_v16 }
 0xc9f   :  { %9416 = vmatprep.subr.mxu0 %v6736_v41  ;;  %v6709_v41 = vld [vmem:[#allocation5 + $0x350] sm:$0xff] }
 0xca0   :  { %9417 = vmatpush3.msra.mxu0 %v6720_v30 }
 0xca1   :  { %9418 = vmatprep.subr.mxu0 %v6735_v55 }
 0xca2   :  { %9419 = vmatpush3.msra.mxu0 %v6719_v18 }
 0xca3   :  { %9420 = vmatprep.subr.mxu0 %v6734_v6  ;;  %v6724_v6 = vld [vmem:[#allocation5 + $0x3c8] sm:$0xff] }
 0xca4   :  { %9421 = vmatpush3.msra.mxu0 %v6718_v4 }
 0xca5   :  { %9422 = vmatprep.subr.mxu0 %v6733_v34 }
 0xca6   :  { %9423 = vmatpush3.msra.mxu0 %v6717_v36 }
 0xca7   :  { %9424 = vmatprep.subr.mxu0 %v6732_v48 }
 0xca8   :  { %9425 = vmatpush3.msra.mxu0 %v6716_v1 }
 0xca9   :  { %9426 = vmatprep.subr.mxu0 %v6731_v8 }
 0xcaa   :  { %9427 = vmatpush3.msra.mxu0 %v6715_v0 }
 0xcab   :  { %9428 = vmatprep.subr.mxu0 %v6730_v56 }
 0xd19   :  { %v6512_v50 = vpop.f32.mrf.mxu1 }
 0xd1b   :  { %v10471_v42 = vpop.f32.mrf.mxu1 }
 0xd1d   :  { %v6517_v35 = vpop.f32.mrf.mxu1 }
 0xd1f   :  { %v10474_v43 = vpop.f32.mrf.mxu1 }
 0xd21   :  { %v6522_v47 = vpop.f32.mrf.mxu1 }
 0xd23   :  { %v10477_v9 = vpop.f32.mrf.mxu1 }
 0xd25   :  { %v6527_v20 = vpop.f32.mrf.mxu1 }
 0xd27   :  { %v10480_v39 = vpop.f32.mrf.mxu1 }
 0xd29   :  { %v15290_v54 = vpop.f32.mrf.mxu1 }
 0xd2b   :  { %v10483_v2 = vpop.f32.mrf.mxu1 }
 0xd2d   :  { %v15292_v26 = vpop.f32.mrf.mxu1 }
 0xd2f   :  { %v10486_v21 = vpop.f32.mrf.mxu1 }
 0xd30   :  { %v6712_v21 = vld [vmem:[#allocation5 + $0x368] sm:$0xff] }
 0xd31   :  { %v15294_v45 = vpop.f32.mrf.mxu1 }
 0xd33   :  { %v10489_v49 = vpop.f32.mrf.mxu1 }
 0xd35   :  { %v15296_v57 = vpop.f32.mrf.mxu1 }
 0xd37   :  { %v10492_v7 = vpop.f32.mrf.mxu1 }
 0xd39   :  { %v15298_v31 = vpop.f32.mrf.mxu1 }
 0xd3b   :  { %v10495_v53 = vpop.f32.mrf.mxu1 }
 0xd3d   :  { %v6622_v12 = vpop.f32.mrf.mxu1 }
 0xd3e   :  { %v15300_v38 = vadd.f32 %v6622_v12, %v6512_v50  ;;  %v6714_v50 = vld [vmem:[#allocation5 + $0x378] sm:$0xff]  ;;  %v6727_v12 = vld [vmem:[#allocation5 + $0x3e0] sm:$0xff] }
 0xd3f   :  { %v10530_v27 = vpop.f32.mrf.mxu1  ;;  %9429 = vmatpush3.msra.mxu0 %v6714_v50 }
 0xd40   :  { %6820 = vst.msk [vmem:[#allocation4 + $0x10] sm:$0xff] %vm50_vm9, %v15300_v38 }
 0xd41   :  { %v6627_v25 = vpop.f32.mrf.mxu1 }
 0xd42   :  { %v15304_v10 = vadd.f32 %v6627_v25, %v6517_v35 }
 0xd43   :  { %v10533_v28 = vpop.f32.mrf.mxu1 }
 0xd44   :  { %6821 = vst.msk [vmem:[#allocation4 + $0x18] sm:$0xff] %vm50_vm9, %v15304_v10 }
 0xd45   :  { %v6632_v29 = vpop.f32.mrf.mxu1 }
 0xd46   :  { %v15309_v61 = vadd.f32 %v6632_v29, %v6522_v47  ;;  %v6729_v47 = vld [vmem:[#allocation5 + $0x3f0] sm:$0xff] }
 0xd47   :  { %v10536_v62 = vpop.f32.mrf.mxu1  ;;  %v6838_v44 = vld [vmem:[#allocation4 + $0xa] sm:$0xff]  ;;  %9430 = vmatprep.subr.mxu0 %v6729_v47 }
 0xd48   :  { %v6856_v19 = vld [vmem:[#allocation4 + $0xf] sm:$0xff]  ;;  %6822 = vst.msk [vmem:[#allocation4 + $0x20] sm:$0xff] %vm50_vm9, %v15309_v61 }
 0xd49   :  { %v11487_v37 = vpack.i.bf16 %v6838_v44, %v6856_v19  ;;  %v6637_v52 = vpop.f32.mrf.mxu1  ;;  %v6708_v62 = vld [vmem:[#allocation5 + $0x348] sm:$0xff]  ;;  %v6723_v44 = vld [vmem:[#allocation5 + $0x3c0] sm:$0xff] }
 0xd4a   :  { %v15313_v63 = vadd.f32 %v6637_v52, %v6527_v20  ;;  %v6713_v20 = vld [vmem:[#allocation5 + $0x370] sm:$0xff]  ;;  %v6707_v19 = vld [vmem:[#allocation5 + $0x340] sm:$0xff] }
 0xd4b   :  { %11488 = vrot.lane.b32.xlu1 %v11487_v37, %s11838_s20  ;;  %v10539_v60 = vpop.f32.mrf.mxu1  ;;  %v6839_v32 = vld [vmem:[#allocation4 + $0x12] sm:$0xff]  ;;  %9431 = vmatpush3.msra.mxu0 %v6713_v20 }
 0xd4c   :  { %v15316_v11 = vld [vmem:[#allocation4 + $0x17] sm:$0xff]  ;;  %6823 = vst.msk [vmem:[#allocation4 + $0x28] sm:$0xff] %vm50_vm9, %v15313_v63 }
 0xd4d   :  { %v11492_v58 = vpack.i.bf16 %v6839_v32, %v15316_v11  ;;  %v6642_v15 = vpop.f32.mrf.mxu1  ;;  %v15366_v48 = vld [vmem:[#allocation4 + $0x11] sm:$0xff] }
 0xd4e   :  { %v15322_v13 = vadd.f32 %v6642_v15, %v15290_v54  ;;  %v6728_v54 = vld [vmem:[#allocation5 + $0x3e8] sm:$0xff] }
 0xd4f   :  { %11493 = vrot.lane.b32.xlu0 %v11492_v58, %s11838_s20  ;;  %v10542_v42 = vpop.f32.mrf.mxu1  ;;  %v6840_v35 = vld [vmem:[#allocation4 + $0x1a] sm:$0xff]  ;;  %9432 = vmatprep.subr.mxu0 %v6728_v54 }
 0xd50   :  { %v15325_v43 = vld [vmem:[#allocation4 + $0x1f] sm:$0xff]  ;;  %6824 = vst.msk [vmem:[#allocation4 + $0x30] sm:$0xff] %vm50_vm9, %v15322_v13  ;;  %9433 = vmatpush3.msra.mxu0 %v6712_v21  ;;  %v6875_v1 = vld [vmem:[#allocation4 + $0x16] sm:$0xff] }
 0xd51   :  { %v11497_v9 = vpack.i.bf16 %v6840_v35, %v15325_v43  ;;  %v6647_v39 = vpop.f32.mrf.mxu1  ;;  %9434 = vmatprep.subr.mxu0 %v6727_v12  ;;  %v11522_v32 = vpack.i.bf16 %v15366_v48, %v6875_v1  ;;  %v15373_v58 = vld [vmem:[#allocation4 + $0x19] sm:$0xff] }
 0xd52   :  { %v15331_v2 = vadd.f32 %v6647_v39, %v15292_v26  ;;  %v6726_v26 = vld [vmem:[#allocation5 + $0x3d8] sm:$0xff]  ;;  %9435 = vmatpush3.msra.mxu0 %v6711_v59  ;;  %v6745_v1 = vld [vmem:[#allocation5 + $0x470] sm:$0xff] }
 0xd53   :  { %11498 = vrot.lane.b32.xlu1 %v11497_v9, %s11838_s20  ;;  %v10545_v49 = vpop.f32.mrf.mxu1  ;;  %v6841_v7 = vld [vmem:[#allocation4 + $0x22] sm:$0xff]  ;;  %9436 = vmatprep.subr.mxu0 %v6726_v26 }
 0xd54   :  { %v15334_v53 = vld [vmem:[#allocation4 + $0x27] sm:$0xff]  ;;  %6825 = vst.msk [vmem:[#allocation4 + $0x38] sm:$0xff] %vm50_vm9, %v15331_v2  ;;  %9437 = vmatpush3.msra.mxu0 %v6710_v5  ;;  %v6876_v0 = vld [vmem:[#allocation4 + $0x1e] sm:$0xff] }
 0xd55   :  { %v11502_v27 = vpack.i.bf16 %v6841_v7, %v15334_v53  ;;  %v6652_v3 = vpop.f32.mrf.mxu1  ;;  %9438 = vmatprep.subr.mxu0 %v6725_v24  ;;  %v11537_v50 = vpack.i.bf16 %v15373_v58, %v6876_v0  ;;  %v15381_v35 = vld [vmem:[#allocation4 + $0x21] sm:$0xff] }
 0xd56   :  { %v15340_v14 = vadd.f32 %v6652_v3, %v15294_v45  ;;  %9439 = vmatpush3.msra.mxu0 %v6709_v41  ;;  %v6877_v20 = vld [vmem:[#allocation4 + $0x26] sm:$0xff] }
 0xd57   :  { %11503 = vrot.lane.b32.xlu0 %v11502_v27, %s11838_s20  ;;  %v10548_v51 = vpop.f32.mrf.mxu1  ;;  %v6842_v17 = vld [vmem:[#allocation4 + $0x2a] sm:$0xff]  ;;  %9440 = vmatprep.subr.mxu0 %v6724_v6  ;;  %v11542_v54 = vpack.i.bf16 %v15381_v35, %v6877_v20  ;;  %v15413_v0 = vld [vmem:[#allocation4] sm:$0xff] }
 0xd58   :  { %v15343_v25 = vld [vmem:[#allocation4 + $0x2f] sm:$0xff]  ;;  %6826 = vst.msk [vmem:[#allocation4 + $0x40] sm:$0xff] %vm50_vm9, %v15340_v14  ;;  %9441 = vmatpush3.msra.mxu0 %v6708_v62 }
 0xd59   :  { %v11507_v16 = vpack.i.bf16 %v6842_v17, %v15343_v25  ;;  %v6657_v30 = vpop.f32.mrf.mxu1  ;;  %9442 = vmatprep.subr.mxu0 %v6723_v44  ;;  %v15383_v47 = vld [vmem:[#allocation4 + $0x29] sm:$0xff] }
 0xd5a   :  { %v15349_v45 = vadd.f32 %v6657_v30, %v15296_v57  ;;  %9443 = vmatpush3.msra.mxu0 %v6707_v19  ;;  %v6878_v9 = vld [vmem:[#allocation4 + $0x2e] sm:$0xff]  ;;  %v6746_v19 = vld [vmem:[#allocation5 + $0x478] sm:$0xff] }
 0xd5b   :  { %11508 = vrot.lane.b32.xlu1 %v11507_v16, %s11838_s20  ;;  %v10551_v28 = vpop.f32.mrf.mxu1  ;;  %v6843_v55 = vld [vmem:[#allocation4 + $0x32] sm:$0xff]  ;;  %v11547_v39 = vpack.i.bf16 %v15383_v47, %v6878_v9  ;;  %v6829_v6 = vld [vmem:[#allocation4 + $0x9] sm:$0xff] }
 0xd5c   :  { %v15352_v18 = vld [vmem:[#allocation4 + $0x37] sm:$0xff]  ;;  %6827 = vst.msk [vmem:[#allocation4 + $0x48] sm:$0xff] %vm50_vm9, %v15349_v45  ;;  %v6743_v20 = vld [vmem:[#allocation5 + $0x460] sm:$0xff] }
 0xd5d   :  { %v11512_v29 = vpack.i.bf16 %v6843_v55, %v15352_v18  ;;  %v6662_v4 = vpop.f32.mrf.mxu1  ;;  %v15389_v21 = vld [vmem:[#allocation4 + $0x31] sm:$0xff] }
 0xd5e   :  { %v15358_v57 = vadd.f32 %v6662_v4, %v15298_v31  ;;  %v6879_v12 = vld [vmem:[#allocation4 + $0x36] sm:$0xff]  ;;  %v6847_v4 = vld [vmem:[#allocation4 + $0xb] sm:$0xff] }
 0xd5f   :  { %11513 = vrot.lane.b32.xlu0 %v11512_v29, %s11838_s20  ;;  %v6844_v34 = vld [vmem:[#allocation4 + $0x3a] sm:$0xff]  ;;  %v10554_v36 = vpop.f32.mrf.mxu1  ;;  %v11552_v59 = vpack.i.bf16 %v15389_v21, %v6879_v12 }
 0xd60   :  { %v15361_v37 = vld [vmem:[#allocation4 + $0x3f] sm:$0xff]  ;;  %6828 = vst.msk [vmem:[#allocation4 + $0x50] sm:$0xff] %vm50_vm9, %v15358_v57 }
 0xd61   :  { %v11517_v52 = vpack.i.bf16 %v6844_v34, %v15361_v37  ;;  %v15391_v49 = vld [vmem:[#allocation4 + $0x39] sm:$0xff] }
 0xd62   :  { %v6880_v7 = vld [vmem:[#allocation4 + $0x3e] sm:$0xff] }
 0xd63   :  { %11518 = vrot.lane.b32.xlu1 %v11517_v52, %s11838_s20  ;;  %v6845_v31 = vld [vmem:[#allocation4 + $0x42] sm:$0xff]  ;;  %v11557_v27 = vpack.i.bf16 %v15391_v49, %v6880_v7 }
 0xd64   :  { %v15369_v60 = vld [vmem:[#allocation4 + $0x47] sm:$0xff] }
 0xd65   :  { %v11527_v8 = vpack.i.bf16 %v6845_v31, %v15369_v60  ;;  %v15397_v3 = vld [vmem:[#allocation4 + $0x41] sm:$0xff]  ;;  %v6848_v31 = vld [vmem:[#allocation4 + $0x13] sm:$0xff] }
 0xd66   :  { %v6881_v26 = vld [vmem:[#allocation4 + $0x46] sm:$0xff] }
 0xd67   :  { %11523 = vrot.lane.b32.xlu1 %v11522_v32, %s11838_s20  ;;  %11528 = vrot.lane.b32.xlu0 %v11527_v8, %s11838_s20  ;;  %v6846_v15 = vld [vmem:[#allocation4 + $0x4a] sm:$0xff]  ;;  %v11562_v17 = vpack.i.bf16 %v15397_v3, %v6881_v26  ;;  %v6883_v41 = vld [vmem:[#allocation4 + $0x56] sm:$0xff]  ;;  %v6742_v7 = vld [vmem:[#allocation5 + $0x458] sm:$0xff] }
 0xd68   :  { %v15377_v56 = vld [vmem:[#allocation4 + $0x4f] sm:$0xff]  ;;  %v6741_v26 = vld [vmem:[#allocation5 + $0x450] sm:$0xff] }
 0xd69   :  { %v11532_v42 = vpack.i.bf16 %v6846_v15, %v15377_v56  ;;  %v15399_v5 = vld [vmem:[#allocation4 + $0x49] sm:$0xff]  ;;  %v6865_v16 = vld [vmem:[#allocation4 + $0x51] sm:$0xff] }
 0xd6a   :  { %v6882_v51 = vld [vmem:[#allocation4 + $0x4e] sm:$0xff]  ;;  %v11572_v30 = vpack.i.bf16 %v6865_v16, %v6883_v41 }
 0xd6b   :  { %11538 = vrot.lane.b32.xlu1 %v11537_v50, %s11838_s20  ;;  %11533 = vrot.lane.b32.xlu0 %v11532_v42, %s11838_s20  ;;  %v11567_v24 = vpack.i.bf16 %v15399_v5, %v6882_v51  ;;  %v6744_v15 = vld [vmem:[#allocation5 + $0x468] sm:$0xff]  ;;  %v6850_v51 = vld [vmem:[#allocation4 + $0x23] sm:$0xff] }
 0xd6f   :  { %11548 = vrot.lane.b32.xlu1 %v11547_v39, %s11838_s20  ;;  %11543 = vrot.lane.b32.xlu0 %v11542_v54, %s11838_s20  ;;  %v6849_v39 = vld [vmem:[#allocation4 + $0x1b] sm:$0xff] }
 0xd73   :  { %11558 = vrot.lane.b32.xlu1 %v11557_v27, %s11838_s20  ;;  %11553 = vrot.lane.b32.xlu0 %v11552_v59, %s11838_s20 }
 0xd77   :  { %11563 = vrot.lane.b32.xlu0 %v11562_v17, %s11838_s20  ;;  %11568 = vrot.lane.b32.xlu1 %v11567_v24, %s11838_s20 }
 0xd7b   :  { %11573 = vrot.lane.b32.xlu0 %v11572_v30, %s11838_s20 }
 0xdbd   :  { %v11489_v28 = vpop.permute.xlu1 %11488 }
 0xdbe   :  { %v11491_v55 = vunpack.i.h.bf16 %v11489_v28  ;;  %v11490_v29 = vunpack.i.l.bf16 %v11489_v28  ;;  %v6739_v28 = vld [vmem:[#allocation5 + $0x440] sm:$0xff] }
 0xdc0   :  { %v7029_v62 = vsel %vm50_vm9, %v6829_v6, %v11491_v55  ;;  %v7038_v44 = vsel %vm50_vm9, %v6847_v4, %v11490_v29  ;;  %v6851_v55 = vld [vmem:[#allocation4 + $0x2b] sm:$0xff] }
 0xdc1   :  { %7152 = vmatprep.mubr.f32.mxu1 %v7038_v44  ;;  %v11494_v34 = vpop.permute.xlu0 %11493  ;;  %v6852_v44 = vld [vmem:[#allocation4 + $0x33] sm:$0xff] }
 0xdc2   :  { %v11496_v36 = vunpack.i.h.bf16 %v11494_v34  ;;  %v11495_v52 = vunpack.i.l.bf16 %v11494_v34  ;;  %7153 = vmatmul.mubr.f32.vlgmr.msra.gmra.mxu1 %v7029_v62 }
 0xdc3   :  { %10556 = vmatpush3.msra.mxu1 %v6746_v19 }
 0xdc4   :  { %v7039_v32 = vsel %vm50_vm9, %v6848_v31, %v11495_v52  ;;  %v7030_v8 = vsel %vm50_vm9, %v15366_v48, %v11496_v36  ;;  %10557 = vmatprep.subr.mxu1 %v15413_v0 }
 0xdc5   :  { %7157 = vmatprep.mubr.f32.mxu1 %v7039_v32  ;;  %v11499_v50 = vpop.permute.xlu1 %11498  ;;  %10558 = vmatpush3.msra.mxu1 %v6745_v1 }
 0xdc6   :  { %v11501_v42 = vunpack.i.h.bf16 %v11499_v50  ;;  %v11500_v9 = vunpack.i.l.bf16 %v11499_v50  ;;  %7158 = vmatmul.mubr.f32.gmra.mxu1 %v7030_v8  ;;  %10559 = vmatprep.subr.mxu1 %v15413_v0 }
 0xdc7   :  { %10560 = vmatpush3.msra.mxu1 %v6744_v15 }
 0xdc8   :  { %v7040_v54 = vsel %vm50_vm9, %v6849_v39, %v11500_v9  ;;  %v7031_v48 = vsel %vm50_vm9, %v15373_v58, %v11501_v42  ;;  %10561 = vmatprep.subr.mxu1 %v15413_v0  ;;  %v6740_v58 = vld [vmem:[#allocation5 + $0x448] sm:$0xff] }
 0xdc9   :  { %7162 = vmatprep.mubr.f32.mxu1 %v7040_v54  ;;  %v11504_v12 = vpop.permute.xlu0 %11503  ;;  %10562 = vmatpush3.msra.mxu1 %v6743_v20  ;;  %v6866_v39 = vld [vmem:[#allocation4 + $0x15] sm:$0xff] }
 0xdca   :  { %v11506_v27 = vunpack.i.h.bf16 %v11504_v12  ;;  %v11505_v59 = vunpack.i.l.bf16 %v11504_v12  ;;  %7163 = vmatmul.mubr.f32.gmra.mxu1 %v7031_v48  ;;  %10563 = vmatprep.subr.mxu1 %v15413_v0 }
 0xdcb   :  { %10564 = vmatpush3.msra.mxu1 %v6742_v7 }
 0xdcc   :  { %v7041_v17 = vsel %vm50_vm9, %v6850_v51, %v11505_v59  ;;  %v7032_v24 = vsel %vm50_vm9, %v15381_v35, %v11506_v27  ;;  %10565 = vmatprep.subr.mxu1 %v15413_v0 }
 0xdcd   :  { %7167 = vmatprep.mubr.f32.mxu1 %v7041_v17  ;;  %v11509_v16 = vpop.permute.xlu1 %11508  ;;  %10566 = vmatpush3.msra.mxu1 %v6741_v26 }
 0xdce   :  { %v11511_v41 = vunpack.i.h.bf16 %v11509_v16  ;;  %v11510_v30 = vunpack.i.l.bf16 %v11509_v16  ;;  %7168 = vmatmul.mubr.f32.gmra.mxu1 %v7032_v24  ;;  %10567 = vmatprep.subr.mxu1 %v15413_v0  ;;  %v6867_v24 = vld [vmem:[#allocation4 + $0x1d] sm:$0xff] }
 0xdcf   :  { %10568 = vmatpush3.msra.mxu1 %v6740_v58  ;;  %v6855_v58 = vld [vmem:[#allocation4 + $0x4b] sm:$0xff] }
 0xdd0   :  { %v7042_v29 = vsel %vm50_vm9, %v6851_v55, %v11510_v30  ;;  %v7033_v6 = vsel %vm50_vm9, %v15383_v47, %v11511_v41  ;;  %10569 = vmatprep.subr.mxu1 %v15413_v0  ;;  %v6853_v47 = vld [vmem:[#allocation4 + $0x3b] sm:$0xff] }
 0xdd1   :  { %7172 = vmatprep.mubr.f32.mxu1 %v7042_v29  ;;  %v11514_v35 = vpop.permute.xlu0 %11513  ;;  %10570 = vmatpush3.msra.mxu1 %v6739_v28 }
 0xdd2   :  { %v11516_v4 = vunpack.i.h.bf16 %v11514_v35  ;;  %v11515_v62 = vunpack.i.l.bf16 %v11514_v35  ;;  %7173 = vmatmul.mubr.f32.gmra.mxu1 %v7033_v6 }
 0xdd4   :  { %v7043_v19 = vsel %vm50_vm9, %v6852_v44, %v11515_v62  ;;  %v7034_v34 = vsel %vm50_vm9, %v15389_v21, %v11516_v4  ;;  %v6854_v21 = vld [vmem:[#allocation4 + $0x43] sm:$0xff] }
 0xdd5   :  { %7177 = vmatprep.mubr.f32.mxu1 %v7043_v19  ;;  %v11519_v36 = vpop.permute.xlu1 %11518  ;;  %v6868_v4 = vld [vmem:[#allocation4 + $0x25] sm:$0xff] }
 0xdd6   :  { %v11521_v52 = vunpack.i.h.bf16 %v11519_v36  ;;  %v11520_v1 = vunpack.i.l.bf16 %v11519_v36  ;;  %7178 = vmatmul.mubr.f32.gmra.mxu1 %v7034_v34  ;;  %v6869_v34 = vld [vmem:[#allocation4 + $0x2d] sm:$0xff] }
 0xdd8   :  { %v7044_v31 = vsel %vm50_vm9, %v6853_v47, %v11520_v1  ;;  %v7035_v32 = vsel %vm50_vm9, %v15391_v49, %v11521_v52 }
 0xdd9   :  { %v11524_v8 = vpop.permute.xlu1 %11523  ;;  %7182 = vmatprep.mubr.f32.mxu1 %v7044_v31  ;;  %v11529_v15 = vpop.permute.xlu0 %11528 }
 0xdda   :  { %v11526_v50 = vunpack.i.h.bf16 %v11524_v8  ;;  %v11525_v42 = vunpack.i.l.bf16 %v11524_v8  ;;  %v11531_v9 = vunpack.i.h.bf16 %v11529_v15  ;;  %v11530_v20 = vunpack.i.l.bf16 %v11529_v15  ;;  %7183 = vmatmul.mubr.f32.gmra.mxu1 %v7035_v32  ;;  %v6870_v32 = vld [vmem:[#allocation4 + $0x35] sm:$0xff] }
 0xddc   :  { %v7047_v54 = vsel %vm50_vm9, %v15300_v38, %v11526_v50  ;;  %v7045_v48 = vsel %vm50_vm9, %v6854_v21, %v11530_v20  ;;  %v7056_v7 = vsel %vm50_vm9, %v6866_v39, %v11525_v42  ;;  %v7036_v49 = vsel %vm50_vm9, %v15397_v3, %v11531_v9  ;;  %v6871_v9 = vld [vmem:[#allocation4 + $0x3d] sm:$0xff] }
 0xddd   :  { %v11539_v12 = vpop.permute.xlu1 %11538  ;;  %7187 = vmatprep.mubr.f32.mxu1 %v7045_v48  ;;  %7262 = vmatprep.mubr.f32.mxu0 %v7056_v7  ;;  %v11534_v27 = vpop.permute.xlu0 %11533  ;;  %v6872_v48 = vld [vmem:[#allocation4 + $0x45] sm:$0xff] }
 0xdde   :  { %v11541_v59 = vunpack.i.h.bf16 %v11539_v12  ;;  %v11540_v26 = vunpack.i.l.bf16 %v11539_v12  ;;  %v11536_v51 = vunpack.i.h.bf16 %v11534_v27  ;;  %v11535_v17 = vunpack.i.l.bf16 %v11534_v27  ;;  %7188 = vmatmul.mubr.f32.gmra.mxu1 %v7036_v49  ;;  %7263 = vmatmul.mubr.f32.vlgmr.msra.gmra.mxu0 %v7047_v54 }
 0xde0   :  { %v7057_v16 = vsel %vm50_vm9, %v6867_v24, %v11540_v26  ;;  %v7046_v41 = vsel %vm50_vm9, %v6855_v58, %v11535_v17  ;;  %v7037_v30 = vsel %vm50_vm9, %v15399_v5, %v11536_v51  ;;  %v7048_v3 = vsel %vm50_vm9, %v15304_v10, %v11541_v59  ;;  %v6873_v59 = vld [vmem:[#allocation4 + $0x4d] sm:$0xff]  ;;  %v6874_v24 = vld [vmem:[#allocation4 + $0x55] sm:$0xff] }
 0xde1   :  { %v11549_v28 = vpop.permute.xlu1 %11548  ;;  %7267 = vmatprep.mubr.f32.mxu0 %v7057_v16  ;;  %v11544_v55 = vpop.permute.xlu0 %11543  ;;  %7192 = vmatprep.mubr.f32.mxu1 %v7046_v41 }
 0xde2   :  { %v11550_v29 = vunpack.i.l.bf16 %v11549_v28  ;;  %v11546_v6 = vunpack.i.h.bf16 %v11544_v55  ;;  %v11545_v35 = vunpack.i.l.bf16 %v11544_v55  ;;  %7193 = vmatmul.mubr.f32.gmra.mxu1 %v7037_v30  ;;  %7268 = vmatmul.mubr.f32.gmra.mxu0 %v7048_v3  ;;  %v11551_v44 = vunpack.i.h.bf16 %v11549_v28 }
 0xde3   :  { %10571 = vmatprep.mubr.msk.f32.mxu1 %vm11829_vm1, %v15413_v0 }
 0xde4   :  { %v7058_v62 = vsel %vm50_vm9, %v6868_v4, %v11545_v35  ;;  %v7049_v5 = vsel %vm50_vm9, %v15309_v61, %v11546_v6  ;;  %v7059_v52 = vsel %vm50_vm9, %v6869_v34, %v11550_v29  ;;  %v7050_v31 = vsel %vm50_vm9, %v15313_v63, %v11551_v44 }
 0xde5   :  { %v11554_v19 = vpop.permute.xlu0 %11553  ;;  %7272 = vmatprep.mubr.f32.mxu0 %v7058_v62  ;;  %v11559_v1 = vpop.permute.xlu1 %11558 }
 0xde6   :  { %v11555_v36 = vunpack.i.l.bf16 %v11554_v19  ;;  %7273 = vmatmul.mubr.f32.gmra.mxu0 %v7049_v5  ;;  %10572 = vmatmul.mubr.msk.f32.vlgmr.msra.gmra.mxu1 %vm50_vm9, %v15316_v11  ;;  %v11556_v47 = vunpack.i.h.bf16 %v11554_v19  ;;  %v11560_v8 = vunpack.i.l.bf16 %v11559_v1  ;;  %v11561_v50 = vunpack.i.h.bf16 %v11559_v1  ;;  %v15523_v1 = vld [vmem:[#allocation5 + $0xb48] sm:$0x3f] }
 0xde7   :  { %7277 = vmatprep.mubr.f32.mxu0 %v7059_v52  ;;  %10574 = vmatprep.mubr.msk.f32.mxu1 %vm11829_vm1, %v15413_v0 }
 0xde8   :  { %v7060_v15 = vsel %vm50_vm9, %v6870_v32, %v11555_v36  ;;  %v7051_v42 = vsel %vm50_vm9, %v15322_v13, %v11556_v47  ;;  %v7061_v21 = vsel %vm50_vm9, %v6871_v9, %v11560_v8  ;;  %v7052_v54 = vsel %vm50_vm9, %v15331_v2, %v11561_v50  ;;  %v6778_v32 = vld [vmem:[#allocation5 + $0x578] sm:$0xff] }
 0xde9   :  { %v11564_v11 = vpop.permute.xlu0 %11563  ;;  %v6762_v8 = vld [vmem:[#allocation5 + $0x4f8] sm:$0xff]  ;;  %9488 = vmatprep.subr.mxu0 %v6778_v32 }
 0xdea   :  { %7278 = vmatmul.mubr.f32.gmra.mxu0 %v7050_v31  ;;  %10575 = vmatmul.mubr.msk.f32.gmra.mxu1 %vm50_vm9, %v15325_v43  ;;  %v11565_v20 = vunpack.i.l.bf16 %v11564_v11  ;;  %v11569_v43 = vpop.permute.xlu1 %11568  ;;  %v11566_v39 = vunpack.i.h.bf16 %v11564_v11 }
 0xdeb   :  { %7282 = vmatprep.mubr.f32.mxu0 %v7060_v15  ;;  %10577 = vmatprep.mubr.msk.f32.mxu1 %vm11829_vm1, %v15413_v0  ;;  %v11570_v7 = vunpack.i.l.bf16 %v11569_v43  ;;  %v11571_v12 = vunpack.i.h.bf16 %v11569_v43  ;;  %v6777_v15 = vld [vmem:[#allocation5 + $0x570] sm:$0xff] }
 0xdec   :  { %v7062_v49 = vsel %vm50_vm9, %v6872_v48, %v11565_v20  ;;  %v7053_v27 = vsel %vm50_vm9, %v15340_v14, %v11566_v39  ;;  %9489 = vmatpush3.msra.mxu0 %v6762_v8  ;;  %v6776_v20 = vld [vmem:[#allocation5 + $0x568] sm:$0xff] }
 0xded   :  { %v7063_v51 = vsel %vm50_vm9, %v6873_v59, %v11570_v7  ;;  %v7054_v17 = vsel %vm50_vm9, %v15349_v45, %v11571_v12  ;;  %9490 = vmatprep.subr.mxu0 %v6777_v15  ;;  %v6775_v12 = vld [vmem:[#allocation5 + $0x560] sm:$0xff] }
 0xdee   :  { %7283 = vmatmul.mubr.f32.gmra.mxu0 %v7051_v42  ;;  %10578 = vmatmul.mubr.msk.f32.gmra.mxu1 %vm50_vm9, %v15334_v53  ;;  %v11574_v53 = vpop.permute.xlu0 %11573  ;;  %v6761_v42 = vld [vmem:[#allocation5 + $0x4f0] sm:$0xff] }
 0xdef   :  { %7287 = vmatprep.mubr.f32.mxu0 %v7061_v21  ;;  %10580 = vmatprep.mubr.msk.f32.mxu1 %vm11829_vm1, %v15413_v0  ;;  %v11575_v26 = vunpack.i.l.bf16 %v11574_v53  ;;  %v16180_v21 = vld [vmem:[#allocation39_spill] sm:$0xff] }
 0xdf0   :  { %v15529_v43 = vrot.slane %v15523_v1, %v16180_v21  ;;  %9491 = vmatpush3.msra.mxu0 %v6761_v42  ;;  %v6792_v42 = vld [vmem:[#allocation5 + $0x5e8] sm:$0xff] }
 0xdf1   :  { %v7064_v58 = vsel %vm50_vm9, %v6874_v24, %v11575_v26  ;;  %9492 = vmatprep.subr.mxu0 %v6776_v20 }
 0xdf2   :  { %7288 = vmatmul.mubr.f32.gmra.mxu0 %v7052_v54  ;;  %10581 = vmatmul.mubr.msk.f32.gmra.mxu1 %vm50_vm9, %v15343_v25  ;;  %v11576_v25 = vunpack.i.h.bf16 %v11574_v53 }
 0xdf3   :  { %7292 = vmatprep.mubr.f32.mxu0 %v7062_v49  ;;  %10583 = vmatprep.mubr.msk.f32.mxu1 %vm11829_vm1, %v15413_v0  ;;  %v6760_v49 = vld [vmem:[#allocation5 + $0x4e8] sm:$0xff] }
 0xdf4   :  { %9493 = vmatpush3.msra.mxu0 %v6760_v49 }
 0xdf5   :  { %9494 = vmatprep.subr.mxu0 %v6775_v12 }
 0xdf6   :  { %7293 = vmatmul.mubr.f32.gmra.mxu0 %v7053_v27  ;;  %10584 = vmatmul.mubr.msk.f32.gmra.mxu1 %vm50_vm9, %v15352_v18  ;;  %v7055_v18 = vsel %vm50_vm9, %v15358_v57, %v11576_v25  ;;  %v6759_v25 = vld [vmem:[#allocation5 + $0x4e0] sm:$0xff] }
 0xdf7   :  { %7297 = vmatprep.mubr.f32.mxu0 %v7063_v51  ;;  %10586 = vmatprep.mubr.msk.f32.mxu1 %vm11829_vm1, %v15413_v0 }
 0xdf8   :  { %9495 = vmatpush3.msra.mxu0 %v6759_v25 }
 0xdfa   :  { %7298 = vmatmul.mubr.f32.gmra.mxu0 %v7054_v17  ;;  %10587 = vmatmul.mubr.msk.f32.gmra.mxu1 %vm50_vm9, %v15361_v37  ;;  %v6884_v37 = vld [vmem:[#allocation4 + $0x57] sm:$0xff]  ;;  %v6810_v17 = vld [vmem:[#allocation5 + $0x678] sm:$0xff] }
 0xdfb   :  { %7302 = vmatprep.mubr.f32.mxu0 %v7064_v58  ;;  %10589 = vmatprep.mubr.msk.f32.mxu1 %vm11829_vm1, %v15413_v0 }
 0xdfc   :  { %9547 = vmatprep.subr.mxu1 %v6810_v17 }
 0xdfe   :  { %7303 = vmatmul.mubr.f32.gmra.mxu0 %v7055_v18  ;;  %10590 = vmatmul.mubr.msk.f32.gmra.mxu1 %vm50_vm9, %v15369_v60  ;;  %v6774_v18 = vld [vmem:[#allocation5 + $0x558] sm:$0xff] }
 0xdff   :  { %10592 = vmatprep.mubr.msk.f32.mxu1 %vm11829_vm1, %v15413_v0  ;;  %9496 = vmatprep.subr.mxu0 %v6774_v18  ;;  %v6805_v18 = vld [vmem:[#allocation5 + $0x650] sm:$0xff] }
 0xe02   :  { %10593 = vmatmul.mubr.msk.f32.gmra.mxu1 %vm50_vm9, %v15377_v56 }
 0xe03   :  { %10595 = vmatprep.mubr.msk.f32.mxu1 %vm11829_vm1, %v15413_v0 }
 0xe06   :  { %10596 = vmatmul.mubr.msk.f32.gmra.mxu1 %vm50_vm9, %v6884_v37  ;;  %v6794_v37 = vld [vmem:[#allocation5 + $0x5f8] sm:$0xff] }
 0xe07   :  { %9548 = vmatpush3.msra.mxu1 %v6794_v37 }
 0xe82   :  { %v9385_v16 = vpop.f32.mrf.mxu1 }
 0xe84   :  { %v9386_v41 = vpop.f32.mrf.mxu1 }
 0xe85   :  { %v9387_v39 = vadd.f32 %v9386_v41, %v9385_v16 }
 0xe86   :  { %v9388_v30 = vpop.f32.mrf.mxu1 }
 0xe87   :  { %v7155_v16 = vadd.f32 %v9387_v39, %v15529_v43 }
 0xe88   :  { %v9389_v3 = vpop.f32.mrf.mxu1 }
 0xe89   :  { %v9390_v9 = vadd.f32 %v9389_v3, %v9388_v30 }
 0xe8a   :  { %v9391_v28 = vpop.f32.mrf.mxu1 }
 0xe8b   :  { %v7160_v24 = vadd.f32 %v9390_v9, %v15529_v43  ;;  %v6807_v9 = vld [vmem:[#allocation5 + $0x660] sm:$0xff] }
 0xe8c   :  { %v9392_v55 = vpop.f32.mrf.mxu1 }
 0xe8d   :  { %v9393_v54 = vadd.f32 %v9392_v55, %v9391_v28  ;;  %v6758_v28 = vld [vmem:[#allocation5 + $0x4d8] sm:$0xff]  ;;  %v6809_v55 = vld [vmem:[#allocation5 + $0x670] sm:$0xff] }
 0xe8e   :  { %v9394_v29 = vpop.f32.mrf.mxu1  ;;  %9549 = vmatprep.subr.mxu1 %v6809_v55  ;;  %9497 = vmatpush3.msra.mxu0 %v6758_v28  ;;  %v15540_v55 = vld [vmem:[#allocation5 + $0x978] sm:$0xff] }
 0xe8f   :  { %v7165_v41 = vadd.f32 %v9393_v54, %v15529_v43 }
 0xe90   :  { %v9395_v60 = vpop.f32.mrf.mxu1 }
 0xe91   :  { %v9396_v58 = vadd.f32 %v9395_v60, %v9394_v29  ;;  %v6808_v29 = vld [vmem:[#allocation5 + $0x668] sm:$0xff] }
 0xe92   :  { %v15505_v6 = vpop.f32.mrf.mxu1 }
 0xe93   :  { %v7170_v20 = vadd.f32 %v9396_v58, %v15529_v43  ;;  %v6790_v58 = vld [vmem:[#allocation5 + $0x5d8] sm:$0xff] }
 0xe94   :  { %v15507_v35 = vpop.f32.mrf.mxu1 }
 0xe95   :  { %v9399_v39 = vadd.f32 %v15507_v35, %v15505_v6 }
 0xe96   :  { %v15509_v4 = vpop.f32.mrf.mxu1 }
 0xe98   :  { %v15511_v56 = vpop.f32.mrf.mxu1 }
 0xe99   :  { %v9402_v37 = vadd.f32 %v15511_v56, %v15509_v4 }
 0xe9a   :  { %v15513_v0 = vpop.f32.mrf.mxu1 }
 0xe9c   :  { %v15515_v62 = vpop.f32.mrf.mxu1 }
 0xe9e   :  { %v15517_v5 = vpop.f32.mrf.mxu1  ;;  %v9444_v44 = vpop.f32.mrf.mxu0 }
 0xea0   :  { %v15519_v19 = vpop.f32.mrf.mxu1  ;;  %v9445_v34 = vpop.f32.mrf.mxu0 }
 0xea1   :  { %v9446_v27 = vadd.f32 %v9445_v34, %v9444_v44  ;;  %v6793_v44 = vld [vmem:[#allocation5 + $0x5f0] sm:$0xff] }
 0xea2   :  { %v15521_v36 = vpop.f32.mrf.mxu1  ;;  %v9447_v52 = vpop.f32.mrf.mxu0  ;;  %9550 = vmatpush3.msra.mxu1 %v6793_v44 }
 0xea3   :  { %v7265_v60 = vadd.f32 %v9446_v27, %v7155_v16  ;;  %9551 = vmatprep.subr.mxu1 %v6808_v29  ;;  %v15542_v29 = vld [vmem:[#allocation5 + $0x970] sm:$0xff] }
 0xea4   :  { %v15525_v47 = vpop.f32.mrf.mxu1  ;;  %v9448_v31 = vpop.f32.mrf.mxu0  ;;  %9552 = vmatpush3.msra.mxu1 %v6792_v42  ;;  %v6753_v42 = vld [vmem:[#allocation5 + $0x4b0] sm:$0xff] }
 0xea5   :  { %v9449_v53 = vadd.f32 %v9448_v31, %v9447_v52  ;;  %v6773_v31 = vld [vmem:[#allocation5 + $0x550] sm:$0xff]  ;;  %9553 = vmatprep.subr.mxu1 %v6807_v9  ;;  %v7180_v9 = vadd.f32 %v9402_v37, %v15529_v43 }
 0xea6   :  { %v9450_v11 = vpop.f32.mrf.mxu0  ;;  %v7374_v50 = vpop.f32.mrf.mxu1  ;;  %9498 = vmatprep.subr.mxu0 %v6773_v31  ;;  %v6754_v31 = vld [vmem:[#allocation5 + $0x4b8] sm:$0xff] }
 0xea7   :  { %v7270_v34 = vadd.f32 %v9449_v53, %v7160_v24  ;;  %v7375_v49 = vadd.f32 %v7374_v50, %v7265_v60  ;;  %v6771_v24 = vld [vmem:[#allocation5 + $0x540] sm:$0xff]  ;;  %v7175_v50 = vadd.f32 %v9399_v39, %v15529_v43 }
 0xea8   :  { %v9451_v48 = vpop.f32.mrf.mxu0  ;;  %v10573_v7 = vpop.f32.mrf.mxu1  ;;  %v15544_v60 = vld [vmem:[#allocation5 + $0x980] sm:$0xff] }
 0xea9   :  { %v9452_v59 = vadd.f32 %v9451_v48, %v9450_v11  ;;  %v6757_v11 = vld [vmem:[#allocation5 + $0x4d0] sm:$0xff]  ;;  %v6772_v48 = vld [vmem:[#allocation5 + $0x548] sm:$0xff]  ;;  %v6791_v7 = vld [vmem:[#allocation5 + $0x5e0] sm:$0xff]  ;;  %v7418_v28 = vmax.f32 %v7375_v49, 0.0 }
 0xeaa   :  { %v9453_v26 = vpop.f32.mrf.mxu0  ;;  %v7379_v51 = vpop.f32.mrf.mxu1  ;;  %9499 = vmatpush3.msra.mxu0 %v6757_v11  ;;  %9554 = vmatpush3.msra.mxu1 %v6791_v7  ;;  %v6768_v7 = vld [vmem:[#allocation5 + $0x528] sm:$0xff] }
 0xeab   :  { %v7275_v8 = vadd.f32 %v9452_v59, %v7165_v41  ;;  %v7380_v54 = vadd.f32 %v7379_v51, %v7270_v34  ;;  %v6756_v59 = vld [vmem:[#allocation5 + $0x4c8] sm:$0xff]  ;;  %9500 = vmatprep.subr.mxu0 %v6772_v48  ;;  %v6755_v51 = vld [vmem:[#allocation5 + $0x4c0] sm:$0xff]  ;;  %v15555_v49 = vmul.f32 %v7418_v28, %v15542_v29 }
 0xeac   :  { %v9454_v30 = vpop.f32.mrf.mxu0  ;;  %v10576_v3 = vpop.f32.mrf.mxu1  ;;  %9501 = vmatpush3.msra.mxu0 %v6756_v59  ;;  %v6752_v59 = vld [vmem:[#allocation5 + $0x4a8] sm:$0xff] }
 0xead   :  { %v9455_v52 = vadd.f32 %v9454_v30, %v9453_v26  ;;  %v6806_v26 = vld [vmem:[#allocation5 + $0x658] sm:$0xff]  ;;  %v7419_v16 = vmax.f32 %v7380_v54, 0.0  ;;  %v6789_v3 = vld [vmem:[#allocation5 + $0x5d0] sm:$0xff]  ;;  %9502 = vmatprep.subr.mxu0 %v6771_v24  ;;  %v15552_v54 = vld [vmem:[#allocation5 + $0x988] sm:$0xff]  ;;  %v9408_v24 = vadd.f32 %v15519_v19, %v15517_v5 }
 0xeae   :  { %v9456_v32 = vpop.f32.mrf.mxu0  ;;  %v7384_v15 = vpop.f32.mrf.mxu1  ;;  %v6770_v30 = vld [vmem:[#allocation5 + $0x538] sm:$0xff]  ;;  %9555 = vmatprep.subr.mxu1 %v6806_v26  ;;  %9503 = vmatpush3.msra.mxu0 %v6755_v51  ;;  %v15560_v26 = vld [vmem:[#allocation5 + $0x990] sm:$0xff]  ;;  %v6751_v51 = vld [vmem:[#allocation5 + $0x4a0] sm:$0xff] }
 0xeaf   :  { %v7385_v53 = vadd.f32 %v7384_v15, %v7275_v8  ;;  %v7280_v17 = vadd.f32 %v9455_v52, %v7170_v20  ;;  %9556 = vmatpush3.msra.mxu1 %v6790_v58  ;;  %9504 = vmatprep.subr.mxu0 %v6770_v30  ;;  %v9405_v20 = vadd.f32 %v15515_v62, %v15513_v0  ;;  %v15577_v30 = vld [vmem:[#allocation5 + $0x998] sm:$0xff] }
 0xeb0   :  { %v9457_v12 = vpop.f32.mrf.mxu0  ;;  %v10579_v27 = vpop.f32.mrf.mxu1  ;;  %9557 = vmatprep.subr.mxu1 %v6805_v18  ;;  %v15550_v39 = vmul.f32 %v7419_v16, %v15540_v55  ;;  %9505 = vmatpush3.msra.mxu0 %v6754_v31  ;;  %v6766_v16 = vld [vmem:[#allocation5 + $0x518] sm:$0xff] }
 0xeb1   :  { %v9458_v25 = vadd.f32 %v9457_v12, %v9456_v32  ;;  %v7420_v44 = vmax.f32 %v7385_v53, 0.0  ;;  %v6769_v32 = vld [vmem:[#allocation5 + $0x530] sm:$0xff]  ;;  %9558 = vmatpush3.msra.mxu1 %v6789_v3  ;;  %v7185_v18 = vadd.f32 %v9405_v20, %v15529_v43 }
 0xeb2   :  { %v9459_v6 = vpop.f32.mrf.mxu0  ;;  %v7389_v35 = vpop.f32.mrf.mxu1  ;;  %9506 = vmatprep.subr.mxu0 %v6769_v32  ;;  %v7190_v32 = vadd.f32 %v9408_v24, %v15529_v43  ;;  %v6749_v20 = vld [vmem:[#allocation5 + $0x490] sm:$0xff] }
 0xeb3   :  { %v7390_v41 = vadd.f32 %v7389_v35, %v7280_v17  ;;  %v7285_v56 = vadd.f32 %v9458_v25, %v7175_v50  ;;  %v15558_v53 = vmul.f32 %v7420_v44, %v15544_v60  ;;  %9507 = vmatpush3.msra.mxu0 %v6753_v42  ;;  %v6767_v17 = vld [vmem:[#allocation5 + $0x520] sm:$0xff]  ;;  %v7462_v50 = vmul.f32 %v15550_v39, %v15550_v39  ;;  %v6750_v44 = vld [vmem:[#allocation5 + $0x498] sm:$0xff] }
 0xeb4   :  { %v9460_v34 = vpop.f32.mrf.mxu0  ;;  %v10582_v52 = vpop.f32.mrf.mxu1  ;;  %9508 = vmatprep.subr.mxu0 %v6768_v7 }
 0xeb5   :  { %v9461_v4 = vadd.f32 %v9460_v34, %v9459_v6  ;;  %v7421_v8 = vmax.f32 %v7390_v41, 0.0  ;;  %9509 = vmatpush3.msra.mxu0 %v6752_v59  ;;  %v7461_v41 = vmul.f32 %v15555_v49, %v15555_v49  ;;  %v7463_v5 = vmul.f32 %v15558_v53, %v15558_v53 }
 0xeb6   :  { %v9462_v15 = vpop.f32.mrf.mxu0  ;;  %v7394_v11 = vpop.f32.mrf.mxu1  ;;  %9510 = vmatprep.subr.mxu0 %v6767_v17  ;;  %v7437_v34 = vsel %vm50_vm9, %v15550_v39, 0.0  ;;  %v7439_v7 = vsel %vm50_vm9, %v15558_v53, 0.0 }
 0xeb7   :  { %v7395_v48 = vadd.f32 %v7394_v11, %v7285_v56  ;;  %v7290_v25 = vadd.f32 %v9461_v4, %v7180_v9  ;;  %v15565_v58 = vmul.f32 %v7421_v8, %v15552_v54  ;;  %9511 = vmatpush3.msra.mxu0 %v6751_v51  ;;  %v6765_v56 = vld [vmem:[#allocation5 + $0x510] sm:$0xff]  ;;  %v9411_v8 = vadd.f32 %v15525_v47, %v15521_v36 }
 0xeb8   :  { %v9463_v12 = vpop.f32.mrf.mxu0  ;;  %v10585_v27 = vpop.f32.mrf.mxu1  ;;  %9512 = vmatprep.subr.mxu0 %v6766_v16  ;;  %v7470_v36 = vsel %vm50_vm9, %v7461_v41, 0.0  ;;  %v7473_v59 = vsel %vm50_vm9, %v7463_v5, 0.0 }
 0xeb9   :  { %v7422_v0 = vmax.f32 %v7395_v48, 0.0  ;;  %v9464_v62 = vadd.f32 %v9463_v12, %v9462_v15  ;;  %v7436_v15 = vsel %vm50_vm9, %v15555_v49, 0.0  ;;  %v7464_v11 = vmul.f32 %v15565_v58, %v15565_v58  ;;  %9513 = vmatpush3.msra.mxu0 %v6750_v44 }
 0xeba   :  { %v9465_v6 = vpop.f32.mrf.mxu0  ;;  %v7399_v35 = vpop.f32.mrf.mxu1  ;;  %v7471_v48 = vsel %vm50_vm9, %v7462_v50, 0.0  ;;  %v7438_v47 = vadd.f32 %v7437_v34, %v7436_v15  ;;  %9514 = vmatprep.subr.mxu0 %v6765_v56  ;;  %v7441_v24 = vsel %vm50_vm9, %v15565_v58, 0.0 }
 0xebb   :  { %v7400_v37 = vadd.f32 %v7399_v35, %v7290_v25  ;;  %v15575_v19 = vmul.f32 %v7422_v0, %v15560_v26  ;;  %v7295_v4 = vadd.f32 %v9464_v62, %v7185_v18  ;;  %v15598_v62 = vld [vmem:[#allocation5 + $0x9a0] sm:$0xff]  ;;  %9515 = vmatpush3.msra.mxu0 %v6749_v20  ;;  %v7195_v18 = vadd.f32 %v9411_v8, %v15529_v43  ;;  %v15612_v43 = vld [vmem:[#allocation5 + $0x9a8] sm:$0xff] }
 0xebc   :  { %v9466_v3 = vpop.f32.mrf.mxu0  ;;  %v10588_v28 = vpop.f32.mrf.mxu1  ;;  %v7472_v50 = vadd.f32 %v7471_v48, %v7470_v36  ;;  %v7475_v16 = vsel %vm50_vm9, %v7464_v11, 0.0 }
 0xebd   :  { %v7423_v52 = vmax.f32 %v7400_v37, 0.0  ;;  %v9467_v31 = vadd.f32 %v9466_v3, %v9465_v6  ;;  %v7465_v0 = vmul.f32 %v15575_v19, %v15575_v19  ;;  %v7440_v37 = vadd.f32 %v7439_v7, %v7438_v47 }
 0xebe   :  { %v9468_v42 = vpop.f32.mrf.mxu0  ;;  %v7404_v9 = vpop.f32.mrf.mxu1  ;;  %v7443_v5 = vsel %vm50_vm9, %v15575_v19, 0.0  ;;  %v7474_v34 = vadd.f32 %v7473_v59, %v7472_v50  ;;  %v15622_v59 = vld [vmem:[#allocation5 + $0x9b0] sm:$0xff] }
 0xebf   :  { %v15592_v12 = vmul.f32 %v7423_v52, %v15577_v30  ;;  %v7405_v27 = vadd.f32 %v7404_v9, %v7295_v4  ;;  %v7300_v51 = vadd.f32 %v9467_v31, %v7190_v32  ;;  %v7442_v52 = vadd.f32 %v7441_v24, %v7440_v37 }
 0xec0   :  { %v9469_v25 = vpop.f32.mrf.mxu0  ;;  %v10591_v17 = vpop.f32.mrf.mxu1  ;;  %v7477_v31 = vsel %vm50_vm9, %v7465_v0, 0.0  ;;  %v7476_v11 = vadd.f32 %v7475_v16, %v7474_v34 }
 0xec1   :  { %v7424_v6 = vmax.f32 %v7405_v27, 0.0  ;;  %v9470_v35 = vadd.f32 %v9469_v25, %v9468_v42  ;;  %v7466_v3 = vmul.f32 %v15592_v12, %v15592_v12  ;;  %v7445_v56 = vsel %vm50_vm9, %v15592_v12, 0.0 }
 0xec2   :  { %v7409_v41 = vpop.f32.mrf.mxu1  ;;  %v7444_v42 = vadd.f32 %v7443_v5, %v7442_v52  ;;  %v7478_v36 = vadd.f32 %v7477_v31, %v7476_v11 }
 0xec3   :  { %v15609_v28 = vmul.f32 %v7424_v6, %v15598_v62  ;;  %v7410_v44 = vadd.f32 %v7409_v41, %v7300_v51  ;;  %v7305_v15 = vadd.f32 %v9470_v35, %v7195_v18  ;;  %v7479_v20 = vsel %vm50_vm9, %v7466_v3, 0.0 }
 0xec4   :  { %v10594_v4 = vpop.f32.mrf.mxu1  ;;  %v7446_v47 = vadd.f32 %v7445_v56, %v7444_v42  ;;  %v7480_v35 = vadd.f32 %v7479_v20, %v7478_v36 }
 0xec5   :  { %v7467_v32 = vmul.f32 %v15609_v28, %v15609_v28  ;;  %v7425_v8 = vmax.f32 %v7410_v44, 0.0  ;;  %v7447_v48 = vsel %vm50_vm9, %v15609_v28, 0.0 }
 0xec6   :  { %v7414_v9 = vpop.f32.mrf.mxu1  ;;  %v7448_v51 = vadd.f32 %v7447_v48, %v7446_v47 }
 0xec7   :  { %v7434_v7 = vmul.f32 %v7425_v8, %v15612_v43  ;;  %v7415_v27 = vadd.f32 %v7414_v9, %v7305_v15  ;;  %v7481_v25 = vsel %vm50_vm9, %v7467_v32, 0.0 }
 0xec8   :  { %v10597_v0 = vpop.f32.mrf.mxu1  ;;  %v7482_v37 = vadd.f32 %v7481_v25, %v7480_v35  ;;  %v16181_v35 = vsub.s32 2, %v13580_v23 }
 0xec9   :  { %v7449_v17 = vsel %vm50_vm9, %v7434_v7, 0.0  ;;  %v7468_v24 = vmul.f32 %v7434_v7, %v7434_v7  ;;  %v7426_v6 = vmax.f32 %v7415_v27, 0.0 }
 0xeca   :  { %v7450_v16 = vadd.f32 %v7449_v17, %v7448_v51  ;;  %v7532_v51 = vrot.slane %v15523_v1, %v16181_v35 }
 0xecb   :  { %v7483_v18 = vsel %vm50_vm9, %v7468_v24, 0.0  ;;  %v7435_v50 = vmul.f32 %v7426_v6, %v15622_v59  ;;  %v7519_v6 = vrot.slane %v15523_v1, %v13939_v46 }
 0xecc   :  { %v7484_v3 = vadd.f32 %v7483_v18, %v7482_v37 }
 0xecd   :  { %v7451_v41 = vsel %vm50_vm9, %v7435_v50, 0.0  ;;  %v7469_v5 = vmul.f32 %v7435_v50, %v7435_v50 }
 0xece   :  { %v7452_v44 = vadd.f32 %v7451_v41, %v7450_v16 }
 0xecf   :  { %v7485_v34 = vsel %vm50_vm9, %v7469_v5, 0.0 }
 0xed0   :  { %v7453_v52 = vrot.slane %v7452_v44, 4  ;;  %v7486_v31 = vadd.f32 %v7485_v34, %v7484_v3 }
 0xed2   :  { %v7454_v4 = vadd.f32 %v7453_v52, %v7452_v44  ;;  %v7487_v56 = vrot.slane %v7486_v31, 4 }
 0xed4   :  { %v7455_v32 = vrot.slane %v7454_v4, 2  ;;  %v7488_v8 = vadd.f32 %v7487_v56, %v7486_v31 }
 0xed6   :  { %v7456_v15 = vadd.f32 %v7455_v32, %v7454_v4  ;;  %v7489_v11 = vrot.slane %v7488_v8, 2 }
 0xed8   :  { %v7457_v42 = vrot.slane %v7456_v15, 1  ;;  %v7490_v9 = vadd.f32 %v7489_v11, %v7488_v8 }
 0xeda   :  { %v7458_v20 = vadd.f32 %v7457_v42, %v7456_v15  ;;  %v7491_v48 = vrot.slane %v7490_v9, 1 }
 0xedc   :  { %v7460_v27 = vmul.f32 0.03125, %v7458_v20  ;;  %v7492_v36 = vadd.f32 %v7491_v48, %v7490_v9 }
 0xede   :  { %v7493_v47 = vmul.f32 0.03125, %v7492_v36  ;;  %v7494_v0 = vmul.f32 %v7460_v27, %v7460_v27  ;;  %v7496_v24 = vsub.f32 %v15555_v49, %v7460_v27  ;;  %v7497_v18 = vsub.f32 %v15550_v39, %v7460_v27 }
 0xedf   :  { %v7498_v37 = vsub.f32 %v15558_v53, %v7460_v27  ;;  %v7499_v16 = vsub.f32 %v15565_v58, %v7460_v27  ;;  %v7500_v41 = vsub.f32 %v15575_v19, %v7460_v27  ;;  %v7501_v3 = vsub.f32 %v15592_v12, %v7460_v27 }
 0xee0   :  { %v7495_v25 = vsub.f32 %v7493_v47, %v7494_v0  ;;  %v7502_v49 = vsub.f32 %v15609_v28, %v7460_v27  ;;  %v7503_v44 = vsub.f32 %v7434_v7, %v7460_v27  ;;  %v7504_v34 = vsub.f32 %v7435_v50, %v7460_v27 }
 0xee2   :  { %v7505_v17 = vadd.f32 1e-05, %v7495_v25 }
 0xee4   :  { %11675 = vrsqrt.f32 %v7505_v17 }
 0xef1   :  { %v11676_v5 = vpop.eup %11675 }
 0xef2   :  { %v7507_v52 = vmul.f32 %v11676_v5, %v7496_v24  ;;  %v7508_v31 = vmul.f32 %v11676_v5, %v7497_v18  ;;  %v7509_v4 = vmul.f32 %v11676_v5, %v7498_v37  ;;  %v7510_v56 = vmul.f32 %v11676_v5, %v7499_v16  ;;  %v6764_v16 = vld [vmem:[#allocation5 + $0x508] sm:$0xff] }
 0xef3   :  { %v7511_v1 = vmul.f32 %v11676_v5, %v7500_v41  ;;  %v7512_v32 = vmul.f32 %v11676_v5, %v7501_v3  ;;  %v7513_v39 = vmul.f32 %v11676_v5, %v7502_v49  ;;  %v7514_v8 = vmul.f32 %v11676_v5, %v7503_v44  ;;  %v6804_v41 = vld [vmem:[#allocation5 + $0x648] sm:$0xff]  ;;  %9516 = vmatprep.subr.mxu0 %v6764_v16  ;;  %v6803_v3 = vld [vmem:[#allocation5 + $0x640] sm:$0xff]  ;;  %v6801_v49 = vld [vmem:[#allocation5 + $0x630] sm:$0xff] }
 0xef4   :  { %v7515_v53 = vmul.f32 %v11676_v5, %v7504_v34  ;;  %v7520_v15 = vmul.f32 %v7519_v6, %v7507_v52  ;;  %v7521_v58 = vmul.f32 %v7519_v6, %v7508_v31  ;;  %v7522_v11 = vmul.f32 %v7519_v6, %v7509_v4  ;;  %v6748_v5 = vld [vmem:[#allocation5 + $0x488] sm:$0xff]  ;;  %9559 = vmatprep.subr.mxu1 %v6804_v41  ;;  %v15687_v44 = vld [vmem:[#allocation4] sm:$0xff]  ;;  %v6785_v34 = vld [vmem:[#allocation5 + $0x5b0] sm:$0xff] }
 0xef5   :  { %v7523_v19 = vmul.f32 %v7519_v6, %v7510_v56  ;;  %v7524_v42 = vmul.f32 %v7519_v6, %v7511_v1  ;;  %v7525_v9 = vmul.f32 %v7519_v6, %v7512_v32  ;;  %v7526_v12 = vmul.f32 %v7519_v6, %v7513_v39  ;;  %9517 = vmatpush3.msra.mxu0 %v6748_v5  ;;  %v6800_v52 = vld [vmem:[#allocation5 + $0x628] sm:$0xff]  ;;  %v6783_v16 = vld [vmem:[#allocation5 + $0x5a0] sm:$0xff]  ;;  %v6798_v41 = vld [vmem:[#allocation5 + $0x618] sm:$0xff] }
 0xef6   :  { %v7527_v20 = vmul.f32 %v7519_v6, %v7514_v8  ;;  %v7528_v28 = vmul.f32 %v7519_v6, %v7515_v53  ;;  %v7533_v7 = vadd.f32 %v7532_v51, %v7520_v15  ;;  %v7534_v50 = vadd.f32 %v7532_v51, %v7521_v58  ;;  %v6784_v56 = vld [vmem:[#allocation5 + $0x5a8] sm:$0xff]  ;;  %v6799_v8 = vld [vmem:[#allocation5 + $0x620] sm:$0xff] }
 0xef7   :  { %v7535_v48 = vadd.f32 %v7532_v51, %v7522_v11  ;;  %v7536_v27 = vadd.f32 %v7532_v51, %v7523_v19  ;;  %v7537_v36 = vadd.f32 %v7532_v51, %v7524_v42  ;;  %v7538_v47 = vadd.f32 %v7532_v51, %v7525_v9 }
 0xef8   :  { %v7539_v0 = vadd.f32 %v7532_v51, %v7526_v12  ;;  %v7540_v25 = vadd.f32 %v7532_v51, %v7527_v20  ;;  %v7541_v17 = vadd.f32 %v7532_v51, %v7528_v28  ;;  %v15643_v24 = vmul.f32 %v7533_v7, %v15542_v29 }
 0xef9   :  { %v15646_v35 = vmul.f32 %v7534_v50, %v15540_v55  ;;  %v15649_v18 = vmul.f32 %v7535_v48, %v15544_v60  ;;  %v15652_v6 = vmul.f32 %v7536_v27, %v15552_v54  ;;  %v15655_v37 = vmul.f32 %v7537_v36, %v15560_v26  ;;  %v6788_v54 = vld [vmem:[#allocation5 + $0x5c8] sm:$0xff]  ;;  %v6763_v26 = vld [vmem:[#allocation5 + $0x500] sm:$0xff] }
 0xefa   :  { %v15658_v51 = vmul.f32 %v7538_v47, %v15577_v30  ;;  %v15661_v29 = vmul.f32 %v7539_v0, %v15598_v62  ;;  %v15664_v55 = vmul.f32 %v7540_v25, %v15612_v43  ;;  %v15667_v60 = vmul.f32 %v7541_v17, %v15622_v59  ;;  %7551 = vst.msk [vmem:[#allocation4 + $0x10] sm:$0xff] %vm50_vm9, %v15643_v24  ;;  %v6747_v30 = vld [vmem:[#allocation5 + $0x480] sm:$0xff]  ;;  %v6802_v43 = vld [vmem:[#allocation5 + $0x638] sm:$0xff] }
 0xefb   :  { %7552 = vst.msk [vmem:[#allocation4 + $0x18] sm:$0xff] %vm50_vm9, %v15646_v35  ;;  %7553 = vst.msk [vmem:[#allocation4 + $0x20] sm:$0xff] %vm50_vm9, %v15649_v18  ;;  %v6787_v62 = vld [vmem:[#allocation5 + $0x5c0] sm:$0xff]  ;;  %9560 = vmatpush3.msra.mxu1 %v6788_v54  ;;  %9518 = vmatprep.subr.mxu0 %v6763_v26  ;;  %v6786_v59 = vld [vmem:[#allocation5 + $0x5b8] sm:$0xff] }
 0xefc   :  { %7554 = vst.msk [vmem:[#allocation4 + $0x28] sm:$0xff] %vm50_vm9, %v15652_v6  ;;  %7555 = vst.msk [vmem:[#allocation4 + $0x30] sm:$0xff] %vm50_vm9, %v15655_v37  ;;  %9561 = vmatprep.subr.mxu1 %v6803_v3  ;;  %9519 = vmatpush3.msra.mxu0 %v6747_v30  ;;  %v6782_v26 = vld [vmem:[#allocation5 + $0x598] sm:$0xff]  ;;  %v6797_v3 = vld [vmem:[#allocation5 + $0x610] sm:$0xff] }
 0xefd   :  { %7556 = vst.msk [vmem:[#allocation4 + $0x38] sm:$0xff] %vm50_vm9, %v15658_v51  ;;  %7557 = vst.msk [vmem:[#allocation4 + $0x40] sm:$0xff] %vm50_vm9, %v15661_v29  ;;  %9562 = vmatpush3.msra.mxu1 %v6787_v62  ;;  %10598 = vmatprep.subr.mxu0 %v15687_v44 }
 0xefe   :  { %7558 = vst.msk [vmem:[#allocation4 + $0x48] sm:$0xff] %vm50_vm9, %v15664_v55  ;;  %7559 = vst.msk [vmem:[#allocation4 + $0x50] sm:$0xff] %vm50_vm9, %v15667_v60  ;;  %9563 = vmatprep.subr.mxu1 %v6802_v43  ;;  %v6781_v43 = vld [vmem:[#allocation5 + $0x590] sm:$0xff] }
 0xeff   :  { %9564 = vmatpush3.msra.mxu1 %v6786_v59  ;;  %v6796_v59 = vld [vmem:[#allocation5 + $0x608] sm:$0xff] }
 0xf00   :  { %9565 = vmatprep.subr.mxu1 %v6801_v49 }
 0xf01   :  { %v7569_v31 = vld [vmem:[#allocation4 + $0xa] sm:$0xff]  ;;  %9566 = vmatpush3.msra.mxu1 %v6785_v34 }
 0xf02   :  { %v7587_v4 = vld [vmem:[#allocation4 + $0xf] sm:$0xff]  ;;  %v15690_v32 = vld [vmem:[#allocation4 + $0x17] sm:$0xff]  ;;  %v15693_v58 = vld [vmem:[#allocation4 + $0x1f] sm:$0xff]  ;;  %9567 = vmatprep.subr.mxu1 %v6800_v52 }
 0xf03   :  { %v7570_v1 = vld [vmem:[#allocation4 + $0x12] sm:$0xff]  ;;  %v11577_v39 = vpack.i.bf16 %v7569_v31, %v7587_v4  ;;  %v7571_v15 = vld [vmem:[#allocation4 + $0x1a] sm:$0xff]  ;;  %v7572_v11 = vld [vmem:[#allocation4 + $0x22] sm:$0xff]  ;;  %9568 = vmatpush3.msra.mxu1 %v6784_v56 }
 0xf04   :  { %v11582_v53 = vpack.i.bf16 %v7570_v1, %v15690_v32  ;;  %v15696_v19 = vld [vmem:[#allocation4 + $0x27] sm:$0xff]  ;;  %9569 = vmatprep.subr.mxu1 %v6799_v8  ;;  %v11587_v42 = vpack.i.bf16 %v7571_v15, %v15693_v58  ;;  %v15701_v20 = vld [vmem:[#allocation4 + $0x2f] sm:$0xff]  ;;  %v15704_v7 = vld [vmem:[#allocation4 + $0x37] sm:$0xff] }
 0xf05   :  { %11578 = vrot.lane.b32.xlu1 %v11577_v39, %s11838_s20  ;;  %v11592_v9 = vpack.i.bf16 %v7572_v11, %v15696_v19  ;;  %v7573_v12 = vld [vmem:[#allocation4 + $0x2a] sm:$0xff]  ;;  %v7574_v28 = vld [vmem:[#allocation4 + $0x32] sm:$0xff]  ;;  %v7575_v27 = vld [vmem:[#allocation4 + $0x3a] sm:$0xff]  ;;  %9570 = vmatpush3.msra.mxu1 %v6783_v16 }
 0xf06   :  { %11583 = vrot.lane.b32.xlu0 %v11582_v53, %s11838_s20  ;;  %v11597_v50 = vpack.i.bf16 %v7573_v12, %v15701_v20  ;;  %v11602_v48 = vpack.i.bf16 %v7574_v28, %v15704_v7  ;;  %v15709_v36 = vld [vmem:[#allocation4 + $0x3f] sm:$0xff]  ;;  %v15712_v0 = vld [vmem:[#allocation4 + $0x47] sm:$0xff]  ;;  %v15716_v17 = vld [vmem:[#allocation4 + $0x11] sm:$0xff]  ;;  %9571 = vmatprep.subr.mxu1 %v6798_v41 }
 0xf07   :  { %v7576_v47 = vld [vmem:[#allocation4 + $0x42] sm:$0xff]  ;;  %v11607_v25 = vpack.i.bf16 %v7575_v27, %v15709_v36  ;;  %v7606_v54 = vld [vmem:[#allocation4 + $0x16] sm:$0xff]  ;;  %v7577_v30 = vld [vmem:[#allocation4 + $0x4a] sm:$0xff]  ;;  %9572 = vmatpush3.msra.mxu1 %v6782_v26 }
 0xf08   :  { %v11612_v5 = vpack.i.bf16 %v7576_v47, %v15712_v0  ;;  %v15720_v62 = vld [vmem:[#allocation4 + $0x4f] sm:$0xff]  ;;  %v11617_v49 = vpack.i.bf16 %v15716_v17, %v7606_v54  ;;  %9573 = vmatprep.subr.mxu1 %v6797_v3  ;;  %v15725_v31 = vld [vmem:[#allocation4 + $0x19] sm:$0xff]  ;;  %v15728_v1 = vld [vmem:[#allocation4 + $0x21] sm:$0xff] }
 0xf09   :  { %11588 = vrot.lane.b32.xlu1 %v11587_v42, %s11838_s20  ;;  %v6780_v34 = vld [vmem:[#allocation5 + $0x588] sm:$0xff]  ;;  %v11622_v52 = vpack.i.bf16 %v7577_v30, %v15720_v62  ;;  %v7607_v4 = vld [vmem:[#allocation4 + $0x1e] sm:$0xff]  ;;  %9574 = vmatpush3.msra.mxu1 %v6781_v43  ;;  %v6795_v56 = vld [vmem:[#allocation5 + $0x600] sm:$0xff] }
 0xf0a   :  { %11593 = vrot.lane.b32.xlu0 %v11592_v9, %s11838_s20  ;;  %v7608_v39 = vld [vmem:[#allocation4 + $0x26] sm:$0xff]  ;;  %9575 = vmatprep.subr.mxu1 %v6796_v59  ;;  %v11627_v53 = vpack.i.bf16 %v15725_v31, %v7607_v4  ;;  %v7609_v42 = vld [vmem:[#allocation4 + $0x2e] sm:$0xff]  ;;  %v7610_v12 = vld [vmem:[#allocation4 + $0x36] sm:$0xff] }
 0xf0b   :  { %v6779_v8 = vld [vmem:[#allocation5 + $0x580] sm:$0xff]  ;;  %9576 = vmatpush3.msra.mxu1 %v6780_v34  ;;  %v11632_v15 = vpack.i.bf16 %v15728_v1, %v7608_v39  ;;  %v15736_v9 = vld [vmem:[#allocation4 + $0x31] sm:$0xff]  ;;  %v7611_v27 = vld [vmem:[#allocation4 + $0x3e] sm:$0xff] }
 0xf0c   :  { %9577 = vmatprep.subr.mxu1 %v6795_v56  ;;  %v15733_v11 = vld [vmem:[#allocation4 + $0x29] sm:$0xff]  ;;  %v15745_v47 = vld [vmem:[#allocation4 + $0x41] sm:$0xff]  ;;  %v7596_v26 = vld [vmem:[#allocation4 + $0x51] sm:$0xff] }
 0xf0d   :  { %11598 = vrot.lane.b32.xlu1 %v11597_v50, %s11838_s20  ;;  %9578 = vmatpush3.msra.mxu1 %v6779_v8  ;;  %v11637_v28 = vpack.i.bf16 %v15733_v11, %v7609_v42  ;;  %v11642_v50 = vpack.i.bf16 %v15736_v9, %v7610_v12  ;;  %v7613_v54 = vld [vmem:[#allocation4 + $0x4e] sm:$0xff]  ;;  %v7614_v3 = vld [vmem:[#allocation4 + $0x56] sm:$0xff] }
 0xf0e   :  { %11603 = vrot.lane.b32.xlu0 %v11602_v48, %s11838_s20  ;;  %10641 = vmatprep.subr.mxu1 %v15687_v44  ;;  %v15742_v48 = vld [vmem:[#allocation4 + $0x39] sm:$0xff]  ;;  %v11662_v43 = vpack.i.bf16 %v7596_v26, %v7614_v3  ;;  %v7560_v56 = vld [vmem:[#allocation4 + $0x9] sm:$0xff] }
 0xf0f   :  { %v11647_v16 = vpack.i.bf16 %v15742_v48, %v7611_v27  ;;  %v7578_v39 = vld [vmem:[#allocation4 + $0xb] sm:$0xff] }
 0xf11   :  { %11608 = vrot.lane.b32.xlu1 %v11607_v25, %s11838_s20  ;;  %v7612_v25 = vld [vmem:[#allocation4 + $0x46] sm:$0xff] }
 0xf12   :  { %11613 = vrot.lane.b32.xlu0 %v11612_v5, %s11838_s20  ;;  %v11652_v41 = vpack.i.bf16 %v15745_v47, %v7612_v25  ;;  %v15750_v5 = vld [vmem:[#allocation4 + $0x49] sm:$0xff] }
 0xf13   :  { %v11657_v30 = vpack.i.bf16 %v15750_v5, %v7613_v54 }
 0xf15   :  { %11618 = vrot.lane.b32.xlu1 %v11617_v49, %s11838_s20 }
 0xf16   :  { %11623 = vrot.lane.b32.xlu0 %v11622_v52, %s11838_s20 }
 0xf19   :  { %11628 = vrot.lane.b32.xlu1 %v11627_v53, %s11838_s20 }
 0xf1a   :  { %11633 = vrot.lane.b32.xlu0 %v11632_v15, %s11838_s20  ;;  %v6818_v15 = vld [vmem:[#allocation5 + $0x6b8] sm:$0xff] }
 0xf1d   :  { %11638 = vrot.lane.b32.xlu1 %v11637_v28, %s11838_s20  ;;  %v7579_v28 = vld [vmem:[#allocation4 + $0x13] sm:$0xff] }
 0xf1e   :  { %11643 = vrot.lane.b32.xlu0 %v11642_v50, %s11838_s20 }
 0xf21   :  { %11648 = vrot.lane.b32.xlu1 %v11647_v16, %s11838_s20  ;;  %v6817_v16 = vld [vmem:[#allocation5 + $0x6b0] sm:$0xff] }
 0xf22   :  { %11653 = vrot.lane.b32.xlu0 %v11652_v41, %s11838_s20  ;;  %v6816_v41 = vld [vmem:[#allocation5 + $0x6a8] sm:$0xff] }
 0xf25   :  { %11658 = vrot.lane.b32.xlu1 %v11657_v30, %s11838_s20  ;;  %v7580_v30 = vld [vmem:[#allocation4 + $0x1b] sm:$0xff] }
 0xf26   :  { %11663 = vrot.lane.b32.xlu0 %v11662_v43, %s11838_s20 }
 0xf77   :  { %v11579_v59 = vpop.permute.xlu1 %11578 }
 0xf78   :  { %v11584_v49 = vpop.permute.xlu0 %11583  ;;  %v11581_v34 = vunpack.i.h.bf16 %v11579_v59  ;;  %v11580_v52 = vunpack.i.l.bf16 %v11579_v59 }
 0xf79   :  { %v11585_v4 = vunpack.i.l.bf16 %v11584_v49  ;;  %v11586_v42 = vunpack.i.h.bf16 %v11584_v49 }
 0xf7a   :  { %v7760_v8 = vsel %vm50_vm9, %v7560_v56, %v11581_v34  ;;  %v7769_v53 = vsel %vm50_vm9, %v7578_v39, %v11580_v52  ;;  %v6815_v34 = vld [vmem:[#allocation5 + $0x6a0] sm:$0xff]  ;;  %v6814_v52 = vld [vmem:[#allocation5 + $0x698] sm:$0xff] }
 0xf7b   :  { %v11589_v12 = vpop.permute.xlu1 %11588  ;;  %7883 = vmatprep.mubr.f32.mxu0 %v7769_v53  ;;  %v7770_v25 = vsel %vm50_vm9, %v7579_v28, %v11585_v4  ;;  %v7761_v3 = vsel %vm50_vm9, %v15716_v17, %v11586_v42  ;;  %v7581_v39 = vld [vmem:[#allocation4 + $0x23] sm:$0xff]  ;;  %v6813_v42 = vld [vmem:[#allocation5 + $0x690] sm:$0xff] }
 0xf7c   :  { %v11594_v50 = vpop.permute.xlu0 %11593  ;;  %v11590_v27 = vunpack.i.l.bf16 %v11589_v12  ;;  %7884 = vmatmul.mubr.f32.vlgmr.msra.gmra.mxu0 %v7760_v8  ;;  %v11591_v54 = vunpack.i.h.bf16 %v11589_v12  ;;  %v6812_v12 = vld [vmem:[#allocation5 + $0x688] sm:$0xff] }
 0xf7d   :  { %7888 = vmatprep.mubr.f32.mxu0 %v7770_v25  ;;  %10599 = vmatpush3.msra.mxu0 %v6818_v15  ;;  %v11595_v43 = vunpack.i.l.bf16 %v11594_v50  ;;  %v11596_v4 = vunpack.i.h.bf16 %v11594_v50 }
 0xf7e   :  { %10600 = vmatprep.subr.mxu0 %v15687_v44  ;;  %v7771_v49 = vsel %vm50_vm9, %v7580_v30, %v11590_v27  ;;  %v7762_v17 = vsel %vm50_vm9, %v15725_v31, %v11591_v54  ;;  %v7582_v27 = vld [vmem:[#allocation4 + $0x2b] sm:$0xff] }
 0xf7f   :  { %v11599_v26 = vpop.permute.xlu1 %11598  ;;  %10601 = vmatpush3.msra.mxu0 %v6817_v16  ;;  %v7772_v15 = vsel %vm50_vm9, %v7581_v39, %v11595_v43  ;;  %v7763_v31 = vsel %vm50_vm9, %v15728_v1, %v11596_v4  ;;  %v6811_v30 = vld [vmem:[#allocation5 + $0x680] sm:$0xff]  ;;  %v7583_v4 = vld [vmem:[#allocation4 + $0x33] sm:$0xff] }
 0xf80   :  { %v15763_v59 = vpop.permute.xlu0 %11603  ;;  %7889 = vmatmul.mubr.f32.gmra.mxu0 %v7761_v3  ;;  %10602 = vmatprep.subr.mxu0 %v15687_v44  ;;  %v11600_v8 = vunpack.i.l.bf16 %v11599_v26  ;;  %v11601_v28 = vunpack.i.h.bf16 %v11599_v26  ;;  %v7597_v26 = vld [vmem:[#allocation4 + $0x15] sm:$0xff] }
 0xf81   :  { %7893 = vmatprep.mubr.f32.mxu0 %v7771_v49  ;;  %10603 = vmatpush3.msra.mxu0 %v6816_v41  ;;  %v11605_v25 = vunpack.i.l.bf16 %v15763_v59  ;;  %v11606_v49 = vunpack.i.h.bf16 %v15763_v59 }
 0xf82   :  { %10604 = vmatprep.subr.mxu0 %v15687_v44  ;;  %v7773_v3 = vsel %vm50_vm9, %v7582_v27, %v11600_v8 }
 0xf83   :  { %v15768_v56 = vpop.permute.xlu1 %11608  ;;  %10605 = vmatpush3.msra.mxu0 %v6815_v34  ;;  %v7765_v27 = vsel %vm50_vm9, %v15736_v9, %v11606_v49  ;;  %v7585_v49 = vld [vmem:[#allocation4 + $0x43] sm:$0xff] }
 0xf84   :  { %v15772_v53 = vpop.permute.xlu0 %11613  ;;  %7894 = vmatmul.mubr.f32.gmra.mxu0 %v7762_v17  ;;  %10606 = vmatprep.subr.mxu0 %v15687_v44  ;;  %v11610_v17 = vunpack.i.l.bf16 %v15768_v56 }
 0xf85   :  { %7898 = vmatprep.mubr.f32.mxu0 %v7772_v15  ;;  %10607 = vmatpush3.msra.mxu0 %v6814_v52  ;;  %v7764_v52 = vsel %vm50_vm9, %v15733_v11, %v11601_v28  ;;  %v11611_v28 = vunpack.i.h.bf16 %v15768_v56  ;;  %v11616_v56 = vunpack.i.h.bf16 %v15772_v53 }
 0xf86   :  { %10608 = vmatprep.subr.mxu0 %v15687_v44 }
 0xf87   :  { %v11619_v50 = vpop.permute.xlu1 %11618  ;;  %10609 = vmatpush3.msra.mxu0 %v6813_v42  ;;  %v7766_v9 = vsel %vm50_vm9, %v15742_v48, %v11611_v28 }
 0xf88   :  { %v15780_v16 = vpop.permute.xlu0 %11623  ;;  %v11621_v41 = vunpack.i.h.bf16 %v11619_v50  ;;  %v11620_v54 = vunpack.i.l.bf16 %v11619_v50  ;;  %7899 = vmatmul.mubr.f32.gmra.mxu0 %v7763_v31  ;;  %10610 = vmatprep.subr.mxu0 %v15687_v44 }
 0xf89   :  { %7903 = vmatprep.mubr.f32.mxu0 %v7773_v3  ;;  %10611 = vmatpush3.msra.mxu0 %v6812_v12  ;;  %v7598_v12 = vld [vmem:[#allocation4 + $0x1d] sm:$0xff] }
 0xf8a   :  { %v7778_v1 = vsel %vm50_vm9, %v15643_v24, %v11621_v41  ;;  %v7787_v43 = vsel %vm50_vm9, %v7597_v26, %v11620_v54  ;;  %10612 = vmatprep.subr.mxu0 %v15687_v44  ;;  %v7774_v24 = vsel %vm50_vm9, %v7583_v4, %v11605_v25  ;;  %v7584_v41 = vld [vmem:[#allocation4 + $0x3b] sm:$0xff]  ;;  %v7599_v25 = vld [vmem:[#allocation4 + $0x25] sm:$0xff]  ;;  %v11615_v54 = vunpack.i.l.bf16 %v15772_v53 }
 0xf8b   :  { %v11629_v34 = vpop.permute.xlu1 %11628  ;;  %7993 = vmatprep.mubr.f32.mxu1 %v7787_v43  ;;  %10613 = vmatpush3.msra.mxu0 %v6811_v30  ;;  %v7775_v30 = vsel %vm50_vm9, %v7584_v41, %v11610_v17  ;;  %v11626_v53 = vunpack.i.h.bf16 %v15780_v16 }
 0xf8c   :  { %v11634_v39 = vpop.permute.xlu0 %11633  ;;  %v11631_v8 = vunpack.i.h.bf16 %v11629_v34  ;;  %v11630_v15 = vunpack.i.l.bf16 %v11629_v34  ;;  %7904 = vmatmul.mubr.f32.gmra.mxu0 %v7764_v52  ;;  %7994 = vmatmul.mubr.f32.vlgmr.msra.gmra.mxu1 %v7778_v1  ;;  %v7600_v34 = vld [vmem:[#allocation4 + $0x2d] sm:$0xff]  ;;  %v11625_v52 = vunpack.i.l.bf16 %v15780_v16  ;;  %v7776_v17 = vsel %vm50_vm9, %v7585_v49, %v11615_v54 }
 0xf8d   :  { %v11635_v42 = vunpack.i.l.bf16 %v11634_v39  ;;  %7908 = vmatprep.mubr.f32.mxu0 %v7774_v24  ;;  %10684 = vmatprep.subr.mxu0 %v15687_v44  ;;  %v11636_v50 = vunpack.i.h.bf16 %v11634_v39  ;;  %v7586_v24 = vld [vmem:[#allocation4 + $0x4b] sm:$0xff] }
 0xf8e   :  { %v7788_v59 = vsel %vm50_vm9, %v7598_v12, %v11630_v15  ;;  %v7779_v11 = vsel %vm50_vm9, %v15646_v35, %v11631_v8 }
 0xf8f   :  { %v11639_v31 = vpop.permute.xlu1 %11638  ;;  %7998 = vmatprep.mubr.f32.mxu1 %v7788_v59  ;;  %v7789_v26 = vsel %vm50_vm9, %v7599_v25, %v11635_v42  ;;  %v7780_v43 = vsel %vm50_vm9, %v15649_v18, %v11636_v50  ;;  %v7767_v18 = vsel %vm50_vm9, %v15745_v47, %v11616_v56  ;;  %v7601_v42 = vld [vmem:[#allocation4 + $0x35] sm:$0xff]  ;;  %v7777_v59 = vsel %vm50_vm9, %v7586_v24, %v11625_v52  ;;  %v7604_v56 = vld [vmem:[#allocation4 + $0x4d] sm:$0xff] }
 0xf90   :  { %v11640_v3 = vunpack.i.l.bf16 %v11639_v31  ;;  %7909 = vmatmul.mubr.f32.gmra.mxu0 %v7765_v27  ;;  %7999 = vmatmul.mubr.f32.gmra.mxu1 %v7779_v11  ;;  %v11644_v35 = vpop.permute.xlu0 %11643  ;;  %v11641_v1 = vunpack.i.h.bf16 %v11639_v31  ;;  %v7768_v50 = vsel %vm50_vm9, %v15750_v5, %v11626_v53 }
 0xf91   :  { %7913 = vmatprep.mubr.f32.mxu0 %v7775_v30  ;;  %8003 = vmatprep.mubr.f32.mxu1 %v7789_v26  ;;  %v11645_v4 = vunpack.i.l.bf16 %v11644_v35  ;;  %v11646_v48 = vunpack.i.h.bf16 %v11644_v35 }
 0xf92   :  { %v7790_v39 = vsel %vm50_vm9, %v7600_v34, %v11640_v3  ;;  %v7781_v15 = vsel %vm50_vm9, %v15652_v6, %v11641_v1  ;;  %v7602_v6 = vld [vmem:[#allocation4 + $0x3d] sm:$0xff]  ;;  %v7603_v3 = vld [vmem:[#allocation4 + $0x45] sm:$0xff] }
 0xf93   :  { %v11649_v8 = vpop.permute.xlu1 %11648  ;;  %v7791_v11 = vsel %vm50_vm9, %v7601_v42, %v11645_v4  ;;  %v7782_v47 = vsel %vm50_vm9, %v15655_v37, %v11646_v48  ;;  %v8281_v34 = vld [vmem:[#allocation5 + $0x6e0] sm:$0xff] }
 0xf94   :  { %7914 = vmatmul.mubr.f32.gmra.mxu0 %v7766_v9  ;;  %8004 = vmatmul.mubr.f32.gmra.mxu1 %v7780_v43  ;;  %v11650_v12 = vunpack.i.l.bf16 %v11649_v8  ;;  %v11654_v28 = vpop.permute.xlu0 %11653  ;;  %v11651_v16 = vunpack.i.h.bf16 %v11649_v8  ;;  %v7605_v43 = vld [vmem:[#allocation4 + $0x55] sm:$0xff] }
 0xf95   :  { %7918 = vmatprep.mubr.f32.mxu0 %v7776_v17  ;;  %8008 = vmatprep.mubr.f32.mxu1 %v7790_v39  ;;  %v11655_v31 = vunpack.i.l.bf16 %v11654_v28  ;;  %v11656_v25 = vunpack.i.h.bf16 %v11654_v28 }
 0xf96   :  { %v7792_v27 = vsel %vm50_vm9, %v7602_v6, %v11650_v12  ;;  %v7783_v54 = vsel %vm50_vm9, %v15658_v51, %v11651_v16 }
 0xf97   :  { %v11659_v41 = vpop.permute.xlu1 %11658  ;;  %v7793_v37 = vsel %vm50_vm9, %v7603_v3, %v11655_v31  ;;  %v7784_v35 = vsel %vm50_vm9, %v15661_v29, %v11656_v25 }
 0xf98   :  { %7919 = vmatmul.mubr.f32.gmra.mxu0 %v7767_v18  ;;  %8009 = vmatmul.mubr.f32.gmra.mxu1 %v7781_v15  ;;  %v11660_v5 = vunpack.i.l.bf16 %v11659_v41  ;;  %v11664_v30 = vpop.permute.xlu0 %11663  ;;  %v11661_v26 = vunpack.i.h.bf16 %v11659_v41 }
 0xf99   :  { %7923 = vmatprep.mubr.f32.mxu0 %v7777_v59  ;;  %8013 = vmatprep.mubr.f32.mxu1 %v7791_v11  ;;  %v11665_v1 = vunpack.i.l.bf16 %v11664_v30 }
 0xf9a   :  { %v7794_v51 = vsel %vm50_vm9, %v7604_v56, %v11660_v5  ;;  %v7785_v9 = vsel %vm50_vm9, %v15664_v55, %v11661_v26  ;;  %v7615_v55 = vld [vmem:[#allocation4 + $0x57] sm:$0xff] }
 0xf9b   :  { %v7795_v29 = vsel %vm50_vm9, %v7605_v43, %v11665_v1 }
 0xf9c   :  { %7924 = vmatmul.mubr.f32.gmra.mxu0 %v7768_v50  ;;  %8014 = vmatmul.mubr.f32.gmra.mxu1 %v7782_v47 }
 0xf9d   :  { %8018 = vmatprep.mubr.f32.mxu1 %v7792_v27  ;;  %10614 = vmatprep.mubr.msk.f32.mxu0 %vm11829_vm1, %v15687_v44 }
 0xfa0   :  { %8019 = vmatmul.mubr.f32.gmra.mxu1 %v7783_v54  ;;  %10615 = vmatmul.mubr.msk.f32.vlgmr.msra.gmra.mxu0 %vm50_vm9, %v15690_v32  ;;  %v11666_v32 = vunpack.i.h.bf16 %v11664_v30  ;;  %v15888_v30 = vld [vmem:[#allocation5 + $0xb48] sm:$0x3f] }
 0xfa1   :  { %8023 = vmatprep.mubr.f32.mxu1 %v7793_v37  ;;  %10617 = vmatprep.mubr.msk.f32.mxu0 %vm11829_vm1, %v15687_v44  ;;  %v15893_v26 = vrot.slane %v15888_v30, %v5145_v40 }
 0xfa4   :  { %8024 = vmatmul.mubr.f32.gmra.mxu1 %v7784_v35  ;;  %10618 = vmatmul.mubr.msk.f32.gmra.mxu0 %vm50_vm9, %v15693_v58  ;;  %v7786_v58 = vsel %vm50_vm9, %v15667_v60, %v11666_v32  ;;  %v8288_v60 = vld [vmem:[#allocation5 + $0x718] sm:$0xff] }
 0xfa5   :  { %8028 = vmatprep.mubr.f32.mxu1 %v7794_v51  ;;  %10620 = vmatprep.mubr.msk.f32.mxu0 %vm11829_vm1, %v15687_v44 }
 0xfa6   :  { %10642 = vmatpush3.msra.mxu1 %v8288_v60 }
 0xfa7   :  { %10643 = vmatprep.subr.mxu1 %v15687_v44 }
 0xfa8   :  { %8029 = vmatmul.mubr.f32.gmra.mxu1 %v7785_v9  ;;  %10621 = vmatmul.mubr.msk.f32.gmra.mxu0 %vm50_vm9, %v15696_v19  ;;  %v8287_v19 = vld [vmem:[#allocation5 + $0x710] sm:$0xff] }
 0xfa9   :  { %8033 = vmatprep.mubr.f32.mxu1 %v7795_v29  ;;  %10623 = vmatprep.mubr.msk.f32.mxu0 %vm11829_vm1, %v15687_v44 }
 0xfaa   :  { %10644 = vmatpush3.msra.mxu1 %v8287_v19 }
 0xfab   :  { %10645 = vmatprep.subr.mxu1 %v15687_v44 }
 0xfac   :  { %8034 = vmatmul.mubr.f32.gmra.mxu1 %v7786_v58  ;;  %10624 = vmatmul.mubr.msk.f32.gmra.mxu0 %vm50_vm9, %v15701_v20  ;;  %v8286_v20 = vld [vmem:[#allocation5 + $0x708] sm:$0xff] }
 0xfad   :  { %10626 = vmatprep.mubr.msk.f32.mxu0 %vm11829_vm1, %v15687_v44  ;;  %10657 = vmatprep.mubr.msk.f32.mxu1 %vm11829_vm1, %v15687_v44 }
 0xfae   :  { %10646 = vmatpush3.msra.mxu1 %v8286_v20 }
 0xfaf   :  { %10647 = vmatprep.subr.mxu1 %v15687_v44 }
 0xfb0   :  { %10627 = vmatmul.mubr.msk.f32.gmra.mxu0 %vm50_vm9, %v15704_v7  ;;  %v8285_v7 = vld [vmem:[#allocation5 + $0x700] sm:$0xff] }
 0xfb1   :  { %10629 = vmatprep.mubr.msk.f32.mxu0 %vm11829_vm1, %v15687_v44  ;;  %10648 = vmatpush3.msra.mxu1 %v8285_v7 }
 0xfb2   :  { %10649 = vmatprep.subr.mxu1 %v15687_v44 }
 0xfb4   :  { %10630 = vmatmul.mubr.msk.f32.gmra.mxu0 %vm50_vm9, %v15709_v36  ;;  %v8284_v36 = vld [vmem:[#allocation5 + $0x6f8] sm:$0xff] }
 0xfb5   :  { %10632 = vmatprep.mubr.msk.f32.mxu0 %vm11829_vm1, %v15687_v44  ;;  %10650 = vmatpush3.msra.mxu1 %v8284_v36 }
 0xfb6   :  { %10651 = vmatprep.subr.mxu1 %v15687_v44 }
 0xfb8   :  { %10633 = vmatmul.mubr.msk.f32.gmra.mxu0 %vm50_vm9, %v15712_v0  ;;  %v8283_v0 = vld [vmem:[#allocation5 + $0x6f0] sm:$0xff] }
 0xfb9   :  { %10635 = vmatprep.mubr.msk.f32.mxu0 %vm11829_vm1, %v15687_v44  ;;  %10652 = vmatpush3.msra.mxu1 %v8283_v0 }
 0xfba   :  { %10653 = vmatprep.subr.mxu1 %v15687_v44 }
 0xfbc   :  { %10636 = vmatmul.mubr.msk.f32.gmra.mxu0 %vm50_vm9, %v15720_v62  ;;  %v8282_v62 = vld [vmem:[#allocation5 + $0x6e8] sm:$0xff] }
 0xfbd   :  { %10638 = vmatprep.mubr.msk.f32.mxu0 %vm11829_vm1, %v15687_v44  ;;  %10654 = vmatpush3.msra.mxu1 %v8282_v62 }
 0xfbe   :  { %10655 = vmatprep.subr.mxu1 %v15687_v44 }
 0xfbf   :  { %10656 = vmatpush3.msra.mxu1 %v8281_v34 }
 0xfc0   :  { %10639 = vmatmul.mubr.msk.f32.gmra.mxu0 %vm50_vm9, %v7615_v55 }
 0xfc1   :  { %10702 = vmatprep.mubr.msk.f32.mxu0 %vm11829_vm1, %v15687_v44 }
0x103c   :  { %v9520_v49 = vpop.f32.mrf.mxu0 }
0x103e   :  { %v9521_v52 = vpop.f32.mrf.mxu0 }
0x103f   :  { %v9522_v35 = vadd.f32 %v9521_v52, %v9520_v49 }
0x1040   :  { %v9523_v4 = vpop.f32.mrf.mxu0 }
0x1041   :  { %v7886_v60 = vadd.f32 %v9522_v35, %v15893_v26 }
0x1042   :  { %v9524_v17 = vpop.f32.mrf.mxu0 }
0x1043   :  { %v9525_v37 = vadd.f32 %v9524_v17, %v9523_v4 }
0x1044   :  { %v9526_v39 = vpop.f32.mrf.mxu0 }
0x1045   :  { %v7891_v58 = vadd.f32 %v9525_v37, %v15893_v26 }
0x1046   :  { %v9527_v8 = vpop.f32.mrf.mxu0 }
0x1047   :  { %v9528_v51 = vadd.f32 %v9527_v8, %v9526_v39 }
0x1048   :  { %v9529_v53 = vpop.f32.mrf.mxu0 }
0x1049   :  { %v7896_v7 = vadd.f32 %v9528_v51, %v15893_v26 }
0x104a   :  { %v9530_v48 = vpop.f32.mrf.mxu0 }
0x104b   :  { %v9531_v36 = vadd.f32 %v9530_v48, %v9529_v53 }
0x104c   :  { %v9532_v18 = vpop.f32.mrf.mxu0  ;;  %v9579_v15 = vpop.f32.mrf.mxu1 }
0x104d   :  { %v7901_v8 = vadd.f32 %v9531_v36, %v15893_v26  ;;  %v11747_v36 = vld [vmem:[#allocation5 + $0x970] sm:$0xff] }
0x104e   :  { %v9533_v24 = vpop.f32.mrf.mxu0  ;;  %v9580_v42 = vpop.f32.mrf.mxu1 }
0x104f   :  { %v9581_v9 = vadd.f32 %v9580_v42, %v9579_v15  ;;  %v9534_v15 = vadd.f32 %v9533_v24, %v9532_v18 }
0x1050   :  { %v9535_v12 = vpop.f32.mrf.mxu0  ;;  %v9582_v59 = vpop.f32.mrf.mxu1 }
0x1051   :  { %v7996_v0 = vadd.f32 %v9581_v9, %v7886_v60 }
0x1052   :  { %v9536_v11 = vpop.f32.mrf.mxu0  ;;  %v9583_v28 = vpop.f32.mrf.mxu1 }
0x1053   :  { %v9584_v32 = vadd.f32 %v9583_v28, %v9582_v59 }
0x1054   :  { %v9538_v16 = vpop.f32.mrf.mxu0  ;;  %v9585_v50 = vpop.f32.mrf.mxu1 }
0x1055   :  { %v8001_v40 = vadd.f32 %v9584_v32, %v7891_v58 }
0x1056   :  { %v9539_v47 = vpop.f32.mrf.mxu0  ;;  %v9586_v6 = vpop.f32.mrf.mxu1 }
0x1057   :  { %v9587_v55 = vadd.f32 %v9586_v6, %v9585_v50  ;;  %v9540_v58 = vadd.f32 %v9539_v47, %v9538_v16  ;;  %v11748_v47 = vld [vmem:[#allocation5 + $0x980] sm:$0xff] }
0x1058   :  { %v15880_v44 = vpop.f32.mrf.mxu0  ;;  %v9588_v31 = vpop.f32.mrf.mxu1 }
0x1059   :  { %v8006_v4 = vadd.f32 %v9587_v55, %v7896_v7  ;;  %v7916_v16 = vadd.f32 %v9540_v58, %v15893_v26 }
0x105a   :  { %v15882_v27 = vpop.f32.mrf.mxu0  ;;  %v9589_v41 = vpop.f32.mrf.mxu1 }
0x105b   :  { %v9590_v49 = vadd.f32 %v9589_v41, %v9588_v31  ;;  %v7906_v31 = vadd.f32 %v9534_v15, %v15893_v26  ;;  %v9537_v41 = vadd.f32 %v9536_v11, %v9535_v12  ;;  %v11746_v12 = vld [vmem:[#allocation5 + $0x978] sm:$0xff] }
0x105c   :  { %v15884_v25 = vpop.f32.mrf.mxu0  ;;  %v9591_v54 = vpop.f32.mrf.mxu1 }
0x105d   :  { %v8011_v37 = vadd.f32 %v9590_v49, %v7901_v8 }
0x105e   :  { %v15886_v3 = vpop.f32.mrf.mxu0  ;;  %v9592_v5 = vpop.f32.mrf.mxu1 }
0x105f   :  { %v9593_v28 = vadd.f32 %v9592_v5, %v9591_v54  ;;  %v9546_v15 = vadd.f32 %v15886_v3, %v15884_v25 }
0x1060   :  { %v9594_v56 = vpop.f32.mrf.mxu1  ;;  %v8105_v1 = vpop.f32.mrf.mxu0 }
0x1061   :  { %v8106_v17 = vadd.f32 %v8105_v1, %v7996_v0  ;;  %v8016_v54 = vadd.f32 %v9593_v28, %v7906_v31 }
0x1062   :  { %v9595_v43 = vpop.f32.mrf.mxu1  ;;  %v10616_v29 = vpop.f32.mrf.mxu0 }
0x1063   :  { %v8149_v53 = vadd.f32 %v8106_v17, %v15300_v38  ;;  %v9596_v32 = vadd.f32 %v9595_v43, %v9594_v56  ;;  %v7911_v29 = vadd.f32 %v9537_v41, %v15893_v26 }
0x1064   :  { %v9597_v19 = vpop.f32.mrf.mxu1  ;;  %v8110_v20 = vpop.f32.mrf.mxu0 }
0x1065   :  { %v8111_v34 = vadd.f32 %v8110_v20, %v8001_v40  ;;  %v8158_v5 = vmax.f32 %v8149_v53, 0.0  ;;  %v8021_v43 = vadd.f32 %v9596_v32, %v7911_v29 }
0x1066   :  { %v10619_v62 = vpop.f32.mrf.mxu0  ;;  %v9598_v52 = vpop.f32.mrf.mxu1 }
0x1067   :  { %v8150_v50 = vadd.f32 %v8111_v34, %v15304_v10  ;;  %v15910_v40 = vmul.f32 %v11747_v36, %v8158_v5 }
0x1068   :  { %v8115_v39 = vpop.f32.mrf.mxu0  ;;  %v9600_v6 = vpop.f32.mrf.mxu1 }
0x1069   :  { %v8116_v42 = vadd.f32 %v8115_v39, %v8006_v4  ;;  %v8159_v9 = vmax.f32 %v8150_v50, 0.0 }
0x106a   :  { %v10622_v59 = vpop.f32.mrf.mxu0  ;;  %v9601_v18 = vpop.f32.mrf.mxu1 }
0x106b   :  { %v8151_v35 = vadd.f32 %v8116_v42, %v15309_v61  ;;  %v15905_v11 = vmul.f32 %v11746_v12, %v8159_v9  ;;  %v9599_v61 = vadd.f32 %v9598_v52, %v9597_v19  ;;  %v9602_v4 = vadd.f32 %v9601_v18, %v9600_v6  ;;  %v11749_v19 = vld [vmem:[#allocation5 + $0x988] sm:$0xff]  ;;  %v11750_v59 = vld [vmem:[#allocation5 + $0x990] sm:$0xff] }
0x106c   :  { %v8120_v48 = vpop.f32.mrf.mxu0  ;;  %v9603_v7 = vpop.f32.mrf.mxu1  ;;  %v8200_v42 = vmul.f32 %v15910_v40, %v15910_v40  ;;  %v7926_v18 = vadd.f32 %v9546_v15, %v15893_v26 }
0x106d   :  { %v8121_v1 = vadd.f32 %v8120_v48, %v8011_v37  ;;  %v8160_v38 = vmax.f32 %v8151_v35, 0.0  ;;  %v8201_v17 = vmul.f32 %v15905_v11, %v15905_v11  ;;  %v8026_v39 = vadd.f32 %v9599_v61, %v7916_v16 }
0x106e   :  { %v10625_v51 = vpop.f32.mrf.mxu0  ;;  %v8177_v6 = vsel %vm50_vm9, %v15905_v11, 0.0  ;;  %v8176_v48 = vsel %vm50_vm9, %v15910_v40, 0.0 }
0x106f   :  { %v8152_v24 = vadd.f32 %v8121_v1, %v15313_v63  ;;  %v9543_v63 = vadd.f32 %v15882_v27, %v15880_v44  ;;  %v15913_v62 = vmul.f32 %v11748_v47, %v8160_v38  ;;  %v9604_v44 = vpop.f32.mrf.mxu1  ;;  %v8210_v35 = vsel %vm50_vm9, %v8201_v17, 0.0  ;;  %v11751_v51 = vld [vmem:[#allocation5 + $0x998] sm:$0xff] }
0x1070   :  { %v8125_v10 = vpop.f32.mrf.mxu0  ;;  %v9605_v3 = vadd.f32 %v9604_v44, %v9603_v7 }
0x1071   :  { %v8126_v55 = vadd.f32 %v8125_v10, %v8016_v54  ;;  %v8161_v60 = vmax.f32 %v8152_v24, 0.0  ;;  %v7921_v8 = vadd.f32 %v9543_v63, %v15893_v26  ;;  %v8202_v37 = vmul.f32 %v15913_v62, %v15913_v62 }
0x1072   :  { %v10628_v20 = vpop.f32.mrf.mxu0  ;;  %v8179_v1 = vsel %vm50_vm9, %v15913_v62, 0.0  ;;  %v8209_v24 = vsel %vm50_vm9, %v8200_v42, 0.0  ;;  %v8178_v54 = vadd.f32 %v8177_v6, %v8176_v48  ;;  %v8036_v26 = vadd.f32 %v9605_v3, %v7926_v18  ;;  %v11754_v3 = vld [vmem:[#allocation5 + $0x9b0] sm:$0xff] }
0x1073   :  { %v8153_v56 = vadd.f32 %v8126_v55, %v15322_v13  ;;  %v15915_v52 = vmul.f32 %v11749_v19, %v8161_v60  ;;  %v8031_v41 = vadd.f32 %v9602_v4, %v7921_v8  ;;  %v8212_v29 = vsel %vm50_vm9, %v8202_v37, 0.0 }
0x1074   :  { %v8130_v0 = vpop.f32.mrf.mxu0  ;;  %v8211_v60 = vadd.f32 %v8210_v35, %v8209_v24  ;;  %v8180_v20 = vadd.f32 %v8179_v1, %v8178_v54 }
0x1075   :  { %v8162_v49 = vmax.f32 %v8153_v56, 0.0  ;;  %v8131_v34 = vadd.f32 %v8130_v0, %v8021_v43  ;;  %v8203_v25 = vmul.f32 %v15915_v52, %v15915_v52  ;;  %v8181_v58 = vsel %vm50_vm9, %v15915_v52, 0.0  ;;  %v11752_v56 = vld [vmem:[#allocation5 + $0x9a0] sm:$0xff] }
0x1076   :  { %v10631_v13 = vpop.f32.mrf.mxu0  ;;  %v8213_v36 = vadd.f32 %v8212_v29, %v8211_v60  ;;  %v8182_v0 = vadd.f32 %v8181_v58, %v8180_v20 }
0x1077   :  { %v8154_v27 = vadd.f32 %v8131_v34, %v15331_v2  ;;  %v15925_v28 = vmul.f32 %v11750_v59, %v8162_v49 }
0x1078   :  { %v8135_v50 = vpop.f32.mrf.mxu0 }
0x1079   :  { %v8163_v2 = vmax.f32 %v8154_v27, 0.0  ;;  %v8136_v53 = vadd.f32 %v8135_v50, %v8026_v39  ;;  %v8204_v5 = vmul.f32 %v15925_v28, %v15925_v28  ;;  %v8183_v61 = vsel %vm50_vm9, %v15925_v28, 0.0  ;;  %v11753_v39 = vld [vmem:[#allocation5 + $0x9a8] sm:$0xff] }
0x107a   :  { %v10634_v31 = vpop.f32.mrf.mxu0  ;;  %v8184_v17 = vadd.f32 %v8183_v61, %v8182_v0  ;;  %v8258_v0 = vrot.slane %v15888_v30, %v5870_v33 }
0x107b   :  { %v15938_v32 = vmul.f32 %v11751_v51, %v8163_v2  ;;  %v8155_v9 = vadd.f32 %v8136_v53, %v15340_v14  ;;  %v8214_v14 = vsel %vm50_vm9, %v8203_v25, 0.0  ;;  %v8216_v16 = vsel %vm50_vm9, %v8204_v5, 0.0 }
0x107c   :  { %v8140_v10 = vpop.f32.mrf.mxu0  ;;  %v8215_v13 = vadd.f32 %v8214_v14, %v8213_v36 }
0x107d   :  { %v8164_v38 = vmax.f32 %v8155_v9, 0.0  ;;  %v8141_v55 = vadd.f32 %v8140_v10, %v8031_v41  ;;  %v8205_v7 = vmul.f32 %v15938_v32, %v15938_v32  ;;  %v8185_v49 = vsel %vm50_vm9, %v15938_v32, 0.0 }
0x107e   :  { %v10637_v12 = vpop.f32.mrf.mxu0  ;;  %v8217_v42 = vadd.f32 %v8216_v16, %v8215_v13  ;;  %v8186_v59 = vadd.f32 %v8185_v49, %v8184_v17 }
0x107f   :  { %v15953_v43 = vmul.f32 %v11752_v56, %v8164_v38  ;;  %v8156_v63 = vadd.f32 %v8141_v55, %v15349_v45  ;;  %v8218_v27 = vsel %vm50_vm9, %v8205_v7, 0.0 }
0x1080   :  { %v8145_v47 = vpop.f32.mrf.mxu0  ;;  %v8219_v53 = vadd.f32 %v8218_v27, %v8217_v42 }
0x1081   :  { %v8206_v34 = vmul.f32 %v15953_v43, %v15953_v43  ;;  %v8165_v4 = vmax.f32 %v8156_v63, 0.0  ;;  %v8146_v19 = vadd.f32 %v8145_v47, %v8036_v26  ;;  %v8187_v45 = vsel %vm50_vm9, %v15953_v43, 0.0 }
0x1082   :  { %v10640_v44 = vpop.f32.mrf.mxu0  ;;  %v8188_v48 = vadd.f32 %v8187_v45, %v8186_v59 }
0x1083   :  { %v15964_v8 = vmul.f32 %v11753_v39, %v8165_v4  ;;  %v8157_v15 = vadd.f32 %v8146_v19, %v15358_v57  ;;  %v8220_v50 = vsel %vm50_vm9, %v8206_v34, 0.0  ;;  %v8271_v4 = vrot.slane %v15888_v30, %v5899_v22 }
0x1084   :  { %v8221_v41 = vadd.f32 %v8220_v50, %v8219_v53 }
0x1085   :  { %v8189_v6 = vsel %vm50_vm9, %v15964_v8, 0.0  ;;  %v8207_v37 = vmul.f32 %v15964_v8, %v15964_v8  ;;  %v8166_v2 = vmax.f32 %v8157_v15, 0.0 }
0x1086   :  { %v8190_v57 = vadd.f32 %v8189_v6, %v8188_v48 }
0x1087   :  { %v8222_v25 = vsel %vm50_vm9, %v8207_v37, 0.0  ;;  %v15973_v31 = vmul.f32 %v11754_v3, %v8166_v2 }
0x1088   :  { %v8223_v51 = vadd.f32 %v8222_v25, %v8221_v41 }
0x1089   :  { %v8191_v35 = vsel %vm50_vm9, %v15973_v31, 0.0  ;;  %v8208_v1 = vmul.f32 %v15973_v31, %v15973_v31 }
0x108a   :  { %v8192_v9 = vadd.f32 %v8191_v35, %v8190_v57 }
0x108b   :  { %v8224_v18 = vsel %vm50_vm9, %v8208_v1, 0.0 }
0x108c   :  { %v8193_v24 = vrot.slane %v8192_v9, 4  ;;  %v8225_v54 = vadd.f32 %v8224_v18, %v8223_v51  ;;  %v8608_v51 = vld [vmem:[#allocation8 + $0xf8] sm:$0xff]  ;;  %v8606_v18 = vld [vmem:[#allocation8 + $0xe8] sm:$0xff] }
0x108d   :  { %8622 = vmatprep.subr.mxu1 %v8608_v51 }
0x108e   :  { %v8194_v5 = vadd.f32 %v8193_v24, %v8192_v9  ;;  %v8226_v10 = vrot.slane %v8225_v54, 4  ;;  %v8607_v9 = vld [vmem:[#allocation8 + $0xf0] sm:$0xff]  ;;  %v8605_v24 = vld [vmem:[#allocation8 + $0xe0] sm:$0xff] }
0x1090   :  { %v8195_v29 = vrot.slane %v8194_v5, 2  ;;  %v8227_v58 = vadd.f32 %v8226_v10, %v8225_v54  ;;  %v8604_v54 = vld [vmem:[#allocation8 + $0xd8] sm:$0xff]  ;;  %v8602_v10 = vld [vmem:[#allocation8 + $0xc8] sm:$0xff] }
0x1092   :  { %v8196_v38 = vadd.f32 %v8195_v29, %v8194_v5  ;;  %v8228_v55 = vrot.slane %v8227_v58, 2  ;;  %v8603_v5 = vld [vmem:[#allocation8 + $0xd0] sm:$0xff]  ;;  %v8601_v29 = vld [vmem:[#allocation8 + $0xc0] sm:$0xff] }
0x1094   :  { %v8197_v60 = vrot.slane %v8196_v38, 1  ;;  %v8229_v20 = vadd.f32 %v8228_v55, %v8227_v58  ;;  %v8600_v58 = vld [vmem:[#allocation8 + $0xb8] sm:$0xff]  ;;  %v8598_v55 = vld [vmem:[#allocation8 + $0xa8] sm:$0xff] }
0x1096   :  { %v8198_v14 = vadd.f32 %v8197_v60, %v8196_v38  ;;  %v8230_v12 = vrot.slane %v8229_v20, 1  ;;  %v8599_v38 = vld [vmem:[#allocation8 + $0xb0] sm:$0xff]  ;;  %v8597_v60 = vld [vmem:[#allocation8 + $0xa0] sm:$0xff] }
0x1098   :  { %v8199_v26 = vmul.f32 0.03125, %v8198_v14  ;;  %v8231_v61 = vadd.f32 %v8230_v12, %v8229_v20  ;;  %v8596_v20 = vld [vmem:[#allocation8 + $0x98] sm:$0xff]  ;;  %v8595_v14 = vld [vmem:[#allocation8 + $0x90] sm:$0xff]  ;;  %v8594_v12 = vld [vmem:[#allocation8 + $0x88] sm:$0xff] }
0x109a   :  { %v8232_v7 = vmul.f32 0.03125, %v8231_v61  ;;  %v8233_v56 = vmul.f32 %v8199_v26, %v8199_v26  ;;  %v8235_v16 = vsub.f32 %v15910_v40, %v8199_v26  ;;  %v8236_v47 = vsub.f32 %v15905_v11, %v8199_v26  ;;  %v15991_v40 = vld [vmem:[#allocation4] sm:$0xff]  ;;  %v8592_v61 = vld [vmem:[#allocation8 + $0x78] sm:$0xff] }
0x109b   :  { %v8237_v17 = vsub.f32 %v15913_v62, %v8199_v26  ;;  %v8238_v33 = vsub.f32 %v15915_v52, %v8199_v26  ;;  %v8239_v22 = vsub.f32 %v15925_v28, %v8199_v26  ;;  %v8240_v52 = vsub.f32 %v15938_v32, %v8199_v26 }
0x109c   :  { %v8234_v63 = vsub.f32 %v8232_v7, %v8233_v56  ;;  %v8241_v28 = vsub.f32 %v15953_v43, %v8199_v26  ;;  %v8242_v32 = vsub.f32 %v15964_v8, %v8199_v26  ;;  %v8243_v41 = vsub.f32 %v15973_v31, %v8199_v26  ;;  %v8593_v26 = vld [vmem:[#allocation8 + $0x80] sm:$0xff]  ;;  %v8591_v7 = vld [vmem:[#allocation8 + $0x70] sm:$0xff]  ;;  %v8590_v56 = vld [vmem:[#allocation8 + $0x68] sm:$0xff] }
0x109e   :  { %v8244_v36 = vadd.f32 1e-05, %v8234_v63  ;;  %v8589_v63 = vld [vmem:[#allocation8 + $0x60] sm:$0xff] }
0x10a0   :  { %11677 = vrsqrt.f32 %v8244_v36  ;;  %v8588_v36 = vld [vmem:[#allocation8 + $0x58] sm:$0xff] }
0x10ad   :  { %v11678_v49 = vpop.eup %11677 }
0x10ae   :  { %v8246_v34 = vmul.f32 %v11678_v49, %v8235_v16  ;;  %v8247_v19 = vmul.f32 %v11678_v49, %v8236_v47  ;;  %v8248_v45 = vmul.f32 %v11678_v49, %v8237_v17  ;;  %v8249_v15 = vmul.f32 %v11678_v49, %v8238_v33  ;;  %v8586_v16 = vld [vmem:[#allocation8 + $0x48] sm:$0xff]  ;;  %v8585_v47 = vld [vmem:[#allocation8 + $0x40] sm:$0xff]  ;;  %v8579_v17 = vld [vmem:[#allocation8 + $0x10] sm:$0xff] }
0x10af   :  { %v8250_v42 = vmul.f32 %v11678_v49, %v8239_v22  ;;  %v8251_v6 = vmul.f32 %v11678_v49, %v8240_v52  ;;  %v8252_v53 = vmul.f32 %v11678_v49, %v8241_v28  ;;  %v8253_v3 = vmul.f32 %v11678_v49, %v8242_v32 }
0x10b0   :  { %v8259_v13 = vmul.f32 %v8258_v0, %v8246_v34  ;;  %v8260_v27 = vmul.f32 %v8258_v0, %v8247_v19  ;;  %v8261_v39 = vmul.f32 %v8258_v0, %v8248_v45  ;;  %v8262_v62 = vmul.f32 %v8258_v0, %v8249_v15  ;;  %v8583_v34 = vld [vmem:[#allocation8 + $0x30] sm:$0xff]  ;;  %v8581_v19 = vld [vmem:[#allocation8 + $0x20] sm:$0xff] }
0x10b1   :  { %v8263_v50 = vmul.f32 %v8258_v0, %v8250_v42  ;;  %v8264_v2 = vmul.f32 %v8258_v0, %v8251_v6  ;;  %v8265_v25 = vmul.f32 %v8258_v0, %v8252_v53  ;;  %v8254_v43 = vmul.f32 %v11678_v49, %v8243_v41  ;;  %v8584_v49 = vld [vmem:[#allocation8 + $0x38] sm:$0xff] }
0x10b2   :  { %v8272_v44 = vadd.f32 %v8271_v4, %v8259_v13  ;;  %v8273_v11 = vadd.f32 %v8271_v4, %v8260_v27  ;;  %v8274_v30 = vadd.f32 %v8271_v4, %v8261_v39  ;;  %v8275_v59 = vadd.f32 %v8271_v4, %v8262_v62  ;;  %v8580_v13 = vld [vmem:[#allocation8 + $0x18] sm:$0xff] }
0x10b3   :  { %v8276_v37 = vadd.f32 %v8271_v4, %v8263_v50  ;;  %v8277_v48 = vadd.f32 %v8271_v4, %v8264_v2  ;;  %v8278_v57 = vadd.f32 %v8271_v4, %v8265_v25  ;;  %v8266_v35 = vmul.f32 %v8258_v0, %v8253_v3  ;;  %v9016_v27 = vld [vmem:[#allocation5 + $0xb50] ss:$0 sm:$0xff] }
0x10b4   :  { %10658 = vmatmul.mubr.msk.f32.vlgmr.msra.gmra.mxu1 %vm50_vm9, %v8272_v44  ;;  %v8267_v8 = vmul.f32 %v8258_v0, %v8254_v43  ;;  %v8587_v0 = vld [vmem:[#allocation8 + $0x50] sm:$0xff]  ;;  %v8578_v44 = vld [vmem:[#allocation8 + $0x8] sm:$0xff] }
0x10b5   :  { %10660 = vmatprep.mubr.msk.f32.mxu1 %vm11829_vm1, %v15991_v40  ;;  %v8279_v1 = vadd.f32 %v8271_v4, %v8266_v35  ;;  %8623 = vmatpush1.msra.mxu1 %v8607_v9 }
0x10b6   :  { %v8280_v31 = vadd.f32 %v8271_v4, %v8267_v8  ;;  %8624 = vmatprep.subr.mxu1 %v8606_v18  ;;  %v8582_v4 = vld [vmem:[#allocation8 + $0x28] sm:$0xff] }
0x10b7   :  { %8625 = vmatpush1.msra.mxu1 %v8605_v24 }
0x10b8   :  { %10661 = vmatmul.mubr.msk.f32.gmra.mxu1 %vm50_vm9, %v8273_v11  ;;  %8626 = vmatprep.subr.mxu1 %v8604_v54 }
0x10b9   :  { %10663 = vmatprep.mubr.msk.f32.mxu1 %vm11829_vm1, %v15991_v40  ;;  %8627 = vmatpush1.msra.mxu1 %v8603_v5 }
0x10ba   :  { %8628 = vmatprep.subr.mxu1 %v8602_v10 }
0x10bb   :  { %8629 = vmatpush1.msra.mxu1 %v8601_v29 }
0x10bc   :  { %10664 = vmatmul.mubr.msk.f32.gmra.mxu1 %vm50_vm9, %v8274_v30  ;;  %8630 = vmatprep.subr.mxu1 %v8600_v58 }
0x10bd   :  { %10666 = vmatprep.mubr.msk.f32.mxu1 %vm11829_vm1, %v15991_v40  ;;  %8631 = vmatpush1.msra.mxu1 %v8599_v38 }
0x10be   :  { %8632 = vmatprep.subr.mxu1 %v8598_v55 }
0x10bf   :  { %8633 = vmatpush1.msra.mxu1 %v8597_v60 }
0x10c0   :  { %10667 = vmatmul.mubr.msk.f32.gmra.mxu1 %vm50_vm9, %v8275_v59  ;;  %8634 = vmatprep.subr.mxu1 %v8596_v20 }
0x10c1   :  { %10669 = vmatprep.mubr.msk.f32.mxu1 %vm11829_vm1, %v15991_v40  ;;  %8635 = vmatpush1.msra.mxu1 %v8595_v14 }
0x10c2   :  { %8636 = vmatprep.subr.mxu1 %v8594_v12 }
0x10c3   :  { %8637 = vmatpush1.msra.mxu1 %v8593_v26 }
0x10c4   :  { %10670 = vmatmul.mubr.msk.f32.gmra.mxu1 %vm50_vm9, %v8276_v37  ;;  %8638 = vmatprep.subr.mxu1 %v8592_v61 }
0x10c5   :  { %10672 = vmatprep.mubr.msk.f32.mxu1 %vm11829_vm1, %v15991_v40  ;;  %8639 = vmatpush1.msra.mxu1 %v8591_v7 }
0x10c6   :  { %8640 = vmatprep.subr.mxu1 %v8590_v56 }
0x10c7   :  { %8641 = vmatpush1.msra.mxu1 %v8589_v63 }
0x10c8   :  { %10673 = vmatmul.mubr.msk.f32.gmra.mxu1 %vm50_vm9, %v8277_v48  ;;  %8642 = vmatprep.subr.mxu1 %v8588_v36 }
0x10c9   :  { %10675 = vmatprep.mubr.msk.f32.mxu1 %vm11829_vm1, %v15991_v40  ;;  %8643 = vmatpush1.msra.mxu1 %v8587_v0 }
0x10ca   :  { %8644 = vmatprep.subr.mxu1 %v8586_v16 }
0x10cb   :  { %8645 = vmatpush1.msra.mxu1 %v8585_v47 }
0x10cc   :  { %10676 = vmatmul.mubr.msk.f32.gmra.mxu1 %vm50_vm9, %v8278_v57  ;;  %8646 = vmatprep.subr.mxu1 %v8584_v49 }
0x10cd   :  { %10678 = vmatprep.mubr.msk.f32.mxu1 %vm11829_vm1, %v15991_v40  ;;  %8647 = vmatpush1.msra.mxu1 %v8583_v34 }
0x10ce   :  { %8648 = vmatprep.subr.mxu1 %v8582_v4 }
0x10cf   :  { %8649 = vmatpush1.msra.mxu1 %v8581_v19 }
0x10d0   :  { %10679 = vmatmul.mubr.msk.f32.gmra.mxu1 %vm50_vm9, %v8279_v1  ;;  %8650 = vmatprep.subr.mxu1 %v8580_v13 }
0x10d1   :  { %10681 = vmatprep.mubr.msk.f32.mxu1 %vm11829_vm1, %v15991_v40  ;;  %8651 = vmatpush1.msra.mxu1 %v8579_v17 }
0x10d2   :  { %8652 = vmatprep.subr.mxu1 %v8578_v44 }
0x10d4   :  { %10682 = vmatmul.mubr.msk.f32.gmra.mxu1 %vm50_vm9, %v8280_v31 }
0x10d5   :  { %8686 = vmatprep.mubr.f32.mxu1 %v15991_v40 }
0x1174   :  { %v8387_v45 = vpop.f32.mrf.mxu1 }
0x1175   :  { %v16023_v33 = vadd.f32 %v9016_v27, %v8387_v45 }
0x1176   :  { %v10659_v11 = vpop.f32.mrf.mxu1 }
0x1177   :  { %8431 = vst [vmem:[#allocation4 + $0x10] sm:$0xff] %v16023_v33 }
0x1178   :  { %v8392_v39 = vpop.f32.mrf.mxu1 }
0x1179   :  { %v16026_v15 = vadd.f32 %v9016_v27, %v8392_v39 }
0x117a   :  { %v10662_v22 = vpop.f32.mrf.mxu1 }
0x117b   :  { %8432 = vst [vmem:[#allocation4 + $0x18] sm:$0xff] %v16026_v15 }
0x117c   :  { %v8397_v30 = vpop.f32.mrf.mxu1 }
0x117d   :  { %v16029_v62 = vadd.f32 %v9016_v27, %v8397_v30 }
0x117e   :  { %v10665_v42 = vpop.f32.mrf.mxu1 }
0x117f   :  { %8433 = vst [vmem:[#allocation4 + $0x20] sm:$0xff] %v16029_v62 }
0x1180   :  { %v8402_v52 = vpop.f32.mrf.mxu1 }
0x1181   :  { %v16032_v59 = vadd.f32 %v9016_v27, %v8402_v52 }
0x1182   :  { %v10668_v50 = vpop.f32.mrf.mxu1 }
0x1183   :  { %8434 = vst [vmem:[#allocation4 + $0x28] sm:$0xff] %v16032_v59 }
0x1184   :  { %v8407_v6 = vpop.f32.mrf.mxu1 }
0x1185   :  { %v16035_v28 = vadd.f32 %v9016_v27, %v8407_v6 }
0x1186   :  { %v10671_v37 = vpop.f32.mrf.mxu1  ;;  %v8450_v30 = vld [vmem:[#allocation4 + $0x19] sm:$0xff] }
0x1187   :  { %8435 = vst [vmem:[#allocation4 + $0x30] sm:$0xff] %v16035_v28  ;;  %v8468_v42 = vld [vmem:[#allocation4 + $0x1e] sm:$0xff]  ;;  %v8449_v37 = vld [vmem:[#allocation4 + $0x11] sm:$0xff] }
0x1188   :  { %v8412_v2 = vpop.f32.mrf.mxu1  ;;  %v8477_v52 = vld [vmem:[#allocation4 + $0x1f] sm:$0xff] }
0x1189   :  { %v8413_v53 = vadd.f32 %v9016_v27, %v8412_v2  ;;  %v8467_v2 = vld [vmem:[#allocation4 + $0x16] sm:$0xff] }
0x118a   :  { %v10674_v32 = vpop.f32.mrf.mxu1  ;;  %v8451_v44 = vld [vmem:[#allocation4 + $0x21] sm:$0xff] }
0x118b   :  { %8436 = vst [vmem:[#allocation4 + $0x38] sm:$0xff] %v8413_v53  ;;  %v8478_v45 = vld [vmem:[#allocation4 + $0x27] sm:$0xff]  ;;  %v8460_v6 = vmax.f32 %v16029_v62, %v8451_v44 }
0x118c   :  { %v8417_v48 = vpop.f32.mrf.mxu1 }
0x118d   :  { %v8418_v25 = vadd.f32 %v9016_v27, %v8417_v48  ;;  %v8486_v48 = vmax.f32 %v8468_v42, %v8477_v52 }
0x118e   :  { %v10677_v3 = vpop.f32.mrf.mxu1  ;;  %v8452_v49 = vld [vmem:[#allocation4 + $0x29] sm:$0xff] }
0x118f   :  { %8437 = vst [vmem:[#allocation4 + $0x40] sm:$0xff] %v8418_v25  ;;  %v8470_v34 = vld [vmem:[#allocation4 + $0x2e] sm:$0xff]  ;;  %v8461_v39 = vmax.f32 %v16032_v59, %v8452_v49  ;;  %v8459_v59 = vmax.f32 %v16026_v15, %v8450_v30  ;;  %v8458_v3 = vmax.f32 %v16023_v33, %v8449_v37  ;;  %v8577_v15 = vld [vmem:[#allocation8] sm:$0xff] }
0x1190   :  { %v8422_v41 = vpop.f32.mrf.mxu1  ;;  %v8479_v4 = vld [vmem:[#allocation4 + $0x2f] sm:$0xff]  ;;  %8653 = vmatpush1.msra.mxu1 %v8577_v15 }
0x1191   :  { %v8423_v43 = vadd.f32 %v9016_v27, %v8422_v41  ;;  %v8488_v22 = vmax.f32 %v8470_v34, %v8479_v4  ;;  %v8495_v62 = vmax.f32 %v8459_v59, %v8486_v48 }
0x1192   :  { %v10680_v57 = vpop.f32.mrf.mxu1  ;;  %v8453_v56 = vld [vmem:[#allocation4 + $0x31] sm:$0xff] }
0x1193   :  { %8438 = vst [vmem:[#allocation4 + $0x48] sm:$0xff] %v8423_v43  ;;  %v8471_v63 = vld [vmem:[#allocation4 + $0x36] sm:$0xff]  ;;  %v8462_v13 = vmax.f32 %v16035_v28, %v8453_v56  ;;  %v8497_v32 = vmax.f32 %v8461_v39, %v8488_v22  ;;  %v8503_v57 = vld [vmem:[#allocation5 + $0x878] sm:$0x3] }
0x1194   :  { %v8427_v35 = vpop.f32.mrf.mxu1  ;;  %v8480_v36 = vld [vmem:[#allocation4 + $0x37] sm:$0xff] }
0x1195   :  { %v8428_v8 = vadd.f32 %v9016_v27, %v8427_v35  ;;  %v8489_v17 = vmax.f32 %v8471_v63, %v8480_v36  ;;  %v8469_v27 = vld [vmem:[#allocation4 + $0x26] sm:$0xff] }
0x1196   :  { %v10683_v1 = vpop.f32.mrf.mxu1  ;;  %v8454_v20 = vld [vmem:[#allocation4 + $0x39] sm:$0xff]  ;;  %v8487_v28 = vmax.f32 %v8469_v27, %v8478_v45 }
0x1197   :  { %8439 = vst [vmem:[#allocation4 + $0x50] sm:$0xff] %v8428_v8  ;;  %v8472_v14 = vld [vmem:[#allocation4 + $0x3e] sm:$0xff]  ;;  %v8463_v16 = vmax.f32 %v8413_v53, %v8454_v20  ;;  %v8498_v50 = vmax.f32 %v8462_v13, %v8489_v17 }
0x1198   :  { %v8481_v12 = vld [vmem:[#allocation4 + $0x3f] sm:$0xff]  ;;  %v8476_v53 = vld [vmem:[#allocation4 + $0x17] sm:$0xff] }
0x1199   :  { %v8490_v47 = vmax.f32 %v8472_v14, %v8481_v12  ;;  %v8485_v41 = vmax.f32 %v8467_v2, %v8476_v53 }
0x119a   :  { %v8455_v31 = vld [vmem:[#allocation4 + $0x41] sm:$0xff] }
0x119b   :  { %v8473_v51 = vld [vmem:[#allocation4 + $0x46] sm:$0xff]  ;;  %v8464_v61 = vmax.f32 %v8418_v25, %v8455_v31  ;;  %v8499_v11 = vmax.f32 %v8463_v16, %v8490_v47  ;;  %v8496_v25 = vmax.f32 %v8460_v6, %v8487_v28 }
0x119c   :  { %v8482_v9 = vld [vmem:[#allocation4 + $0x47] sm:$0xff] }
0x119d   :  { %v8491_v7 = vmax.f32 %v8473_v51, %v8482_v9 }
0x119e   :  { %v8457_v18 = vld [vmem:[#allocation4 + $0x51] sm:$0xff]  ;;  %v8456_v29 = vld [vmem:[#allocation4 + $0x49] sm:$0xff] }
0x119f   :  { %v8475_v24 = vld [vmem:[#allocation4 + $0x56] sm:$0xff]  ;;  %v8466_v5 = vmax.f32 %v8428_v8, %v8457_v18  ;;  %v8474_v58 = vld [vmem:[#allocation4 + $0x4e] sm:$0xff]  ;;  %v8465_v55 = vmax.f32 %v8423_v43, %v8456_v29  ;;  %v8500_v19 = vmax.f32 %v8464_v61, %v8491_v7  ;;  %v8494_v43 = vmax.f32 %v8458_v3, %v8485_v41  ;;  %v8610_v8 = vld [vmem:[#allocation8 + $0x100] ss:$8 sm:$0x3] }
0x11a0   :  { %v8484_v54 = vld [vmem:[#allocation4 + $0x57] sm:$0xff]  ;;  %v8483_v38 = vld [vmem:[#allocation4 + $0x4f] sm:$0xff]  ;;  %v8615_v1 = vrot.slane %v8610_v8, %v16180_v21  ;;  %v8619_v31 = vrot.slane %v8610_v8, %v13939_v46 }
0x11a1   :  { %v8493_v10 = vmax.f32 %v8475_v24, %v8484_v54  ;;  %v8492_v60 = vmax.f32 %v8474_v58, %v8483_v38 }
0x11a3   :  { %v8502_v26 = vmax.f32 %v8466_v5, %v8493_v10  ;;  %v8501_v0 = vmax.f32 %v8465_v55, %v8492_v60 }
0x11a5   :  { %10685 = vmatpush3.msra.mxu0 %v8502_v26  ;;  %v11840_v26 = vmov 1983009808  }
0x11a6   :  { %10686 = vmatprep.subr.mxu0 %v15991_v40  ;;  %v8717_v61 = vunpack.c.l.s4 %v11840_v26 }
0x11a7   :  { %10687 = vmatpush3.msra.mxu0 %v8501_v0 }
0x11a8   :  { %10688 = vmatprep.subr.mxu0 %v15991_v40  ;;  %v8718_v7 = vunpack.c.0.s8 %v8717_v61 }
0x11a9   :  { %10689 = vmatpush3.msra.mxu0 %v8500_v19 }
0x11aa   :  { %10690 = vmatprep.subr.mxu0 %v15991_v40  ;;  %v8721_v0 = vsub.s32 %v8718_v7, %v13580_v23 }
0x11ab   :  { %10691 = vmatpush3.msra.mxu0 %v8499_v11 }
0x11ac   :  { %10692 = vmatprep.subr.mxu0 %v15991_v40 }
0x11ad   :  { %10693 = vmatpush3.msra.mxu0 %v8498_v50 }
0x11ae   :  { %10694 = vmatprep.subr.mxu0 %v15991_v40 }
0x11af   :  { %10695 = vmatpush3.msra.mxu0 %v8497_v32 }
0x11b0   :  { %10696 = vmatprep.subr.mxu0 %v15991_v40 }
0x11b1   :  { %10697 = vmatpush3.msra.mxu0 %v8496_v25 }
0x11b2   :  { %10698 = vmatprep.subr.mxu0 %v15991_v40 }
0x11b3   :  { %10699 = vmatpush3.msra.mxu0 %v8495_v62 }
0x11b4   :  { %10700 = vmatprep.subr.mxu0 %v15991_v40 }
0x11b5   :  { %10701 = vmatpush3.msra.mxu0 %v8494_v43 }
0x11b6   :  { %10703 = vmatmul.mubr.msk.f32.vlgmr.msra.gmra.mxu0 %vm6418_vm12, %v8503_v57 }
0x1276   :  { %v8573_v35 = vpop.f32.mrf.mxu0 }
0x1277   :  { %8687 = vmatmul.mubr.f32.vlgmr.msra.gmra.mxu1 %v8573_v35 }
0x1278   :  { %v10704_v33 = vpop.f32.mrf.mxu0 }
0x1337   :  { %v8688_v51 = vpop.f32.mrf.mxu1 }
0x1338   :  { %v8689_v9 = vadd.f32 %v8688_v51, %v8615_v1 }
0x1339   :  { %v8690_v18 = vpop.f32.mrf.mxu1 }
0x133a   :  { %v8691_v24 = vadd.f32 %v8690_v18, %v8619_v31  ;;  %v8693_v40 = vsel %vm1273_vm7, %v8689_v9, -inf }
0x133c   :  { %v8695_v54 = vsel %vm8694_vm13, %v8691_v24, -inf }
0x133d   :  { %v8696_v5 = vmax.f32 %v8693_v40, %v8695_v54 }
0x133f   :  { %8697 = vmax.xlane.f32.xlu1 %v8696_v5 }
0x13c8   :  { %v8698_v10 = vpop.xlane.xlu1 %8697 }
0x13c9   :  { %v8699_v29 = vsub.f32 %v8689_v9, %v8698_v10  ;;  %v8700_v58 = vsub.f32 %v8691_v24, %v8698_v10 }
0x13cb   :  { %v8701_v38 = vmul.f32 1.442695, %v8699_v29  ;;  %v8703_v55 = vmul.f32 1.442695, %v8700_v58 }
0x13cd   :  { %11679 = vpow2.f32 %v8701_v38 }
0x13ce   :  { %11681 = vpow2.f32 %v8703_v55 }
0x13da   :  { %v11680_v21 = vpop.eup %11679 }
0x13db   :  { %v11682_v46 = vpop.eup %11681  ;;  %v8705_v60 = vsel %vm1273_vm7, %v11680_v21, 0.0 }
0x13dc   :  { %v8706_v20 = vsel %vm8694_vm13, %v11682_v46, 0.0 }
0x13dd   :  { %v8707_v14 = vadd.f32 %v8706_v20, %v8705_v60 }
0x13df   :  { %8708 = vadd.xlane.f32.xlu0 %v8707_v14 }
0x1468   :  { %v8709_v12 = vpop.xlane.xlu0 %8708 }
0x1469   :  { %11683 = vrcp.f32 %v8709_v12 }
0x1476   :  { %v11684_v56 = vpop.eup %11683 }
0x1477   :  { %v8711_v63 = vmul.f32 %v11684_v56, %v11680_v21  ;;  %v8712_v36 = vmul.f32 %v11684_v56, %v11682_v46 }
0x1479   :  { %v8715_v16 = vcombine.low %v8711_v63, %v8712_v36 }
0x147b   :  { %v8722_v47 = vrot.slane %v8715_v16, %v8721_v0 }
0x147d   :  { %8726 = vst.msk [vmem:[#allocation10] sm:$0xf] %vm8725_vm15, %v8722_v47 }
0x147e   :  { %11807 = shalt.err (!%p11804_p0)
}
0x147f   :  { %8736 = dma.vmem_to_hbm [thread:$0]  %s8734_s23, 64, %s16066_s3, [#allocation7]  }
0x1480   :  { %11820 = dma.done.wait [#allocation7], 64  }
0x1481   :  { %11821 = vsyncadd [#allocation7], 4294967232 }
0x1482   :  { %8740 = vsyncpa [#allocation6], 1 }
0x1483   :  { %8741 = vsyncpa [#allocation9], 1 }
0x1484   :  { %8742 = vsyncpa [#allocation7], 1 }

</bundles_post_ra>
